<compile_context>
chip_gen: v5e
topology: v5e:2x2
jax: 0.10.0
libtpu: 0.0.40
codegen_flags: <defaults>
</compile_context>

<pallas_src>
import jax
import jax.numpy as jnp
from jax.experimental import pallas as pl
from jax.experimental.pallas import tpu as pltpu

CPAD = 128  # lane-padded channel width used for every layer


def _make_fused_kernel(H, W):
    """Fused conv1+pool -> conv2+pool -> conv3 kernel for one batch element.

    Refs per grid step:
      x_ref : (1, H+2, W+2, CPAD)  zero-halo padded NHWC input slab (lane = C)
      wK_ref: (9, CPAD, CPAD)      3x3 taps as (tap, Cin, Cout), VMEM-resident
      bK_ref: (1, CPAD)            bias, VMEM-resident
      o_ref : (1, H//4, W//4, CPAD) lane-dense output slab
      h1_ref: (H//2+2, W//2+2, CPAD) VMEM scratch (stage-1 pooled act + halo)
      h2_ref: (H//4+2, W//4+2, CPAD) VMEM scratch (stage-2 pooled act + halo)
    """
    assert H % 4 == 0 and W % 4 == 0, "spatial dims must be divisible by 4"
    H1, W1 = H // 2, W // 2
    H2, W2 = H1 // 2, W1 // 2

    def conv3x3_relu(read_tap, HH, WW, w_ref, b_ref):
        # conv3x3 (SAME) as 9 shifted-view MXU matmuls, f32 accumulation.
        acc = jnp.zeros((HH * WW, CPAD), jnp.float32)
        for tap in range(9):
            dy, dx = tap // 3, tap % 3
            xs = read_tap(dy, dx).reshape(HH * WW, CPAD)
            acc = acc + jnp.dot(xs, w_ref[tap],
                                preferred_element_type=jnp.float32)
        acc = jnp.maximum(acc + b_ref[...], 0.0)   # fused bias + ReLU
        return acc.reshape(HH, WW, CPAD)

    def pool2x2(a, HH, WW):
        # 2x2 max-pool, stride 2 (HH, WW are even here).
        Ho, Wo = HH // 2, WW // 2
        a = a.reshape(HH, Wo, 2, CPAD)
        a = jnp.max(a, axis=2)                     # pool along W
        a = a.reshape(Ho, 2, Wo, CPAD)
        a = jnp.max(a, axis=1)                     # pool along H
        return a

    def kernel(x_ref, w1_ref, b1_ref, w2_ref, b2_ref, w3_ref, b3_ref,
               o_ref, h1_ref, h2_ref):
        # Zero the halo scratch slabs (interiors are fully overwritten below).
        h1_ref[...] = jnp.zeros_like(h1_ref)
        h2_ref[...] = jnp.zeros_like(h2_ref)

        # Stage 1: conv(3->16) + ReLU + pool, result stays in VMEM scratch.
        a1 = conv3x3_relu(lambda dy, dx: x_ref[0, dy:dy + H, dx:dx + W, :],
                          H, W, w1_ref, b1_ref)
        h1_ref[1:1 + H1, 1:1 + W1, :] = pool2x2(a1, H, W)

        # Stage 2: conv(16->32) + ReLU + pool, result stays in VMEM scratch.
        a2 = conv3x3_relu(lambda dy, dx: h1_ref[dy:dy + H1, dx:dx + W1, :],
                          H1, W1, w2_ref, b2_ref)
        h2_ref[1:1 + H2, 1:1 + W2, :] = pool2x2(a2, H1, W1)

        # Stage 3: conv(32->64) + ReLU, lane-dense store to the output slab.
        a3 = conv3x3_relu(lambda dy, dx: h2_ref[dy:dy + H2, dx:dx + W2, :],
                          H2, W2, w3_ref, b3_ref)
        o_ref[0] = a3.astype(o_ref.dtype)

    return kernel, H2, W2


def _prep_weights(w, b, cin, cout):
    """PyTorch (Cout, Cin, 3, 3)/(Cout,) -> (9, CPAD, CPAD)/(1, CPAD), zero-padded."""
    w9 = jnp.transpose(w, (2, 3, 1, 0)).reshape(9, cin, cout)     # (tap, Cin, Cout)
    w9 = jnp.pad(w9, ((0, 0), (0, CPAD - cin), (0, CPAD - cout)))
    bp = jnp.pad(b, (0, CPAD - cout)).reshape(1, CPAD)
    return w9.astype(jnp.float32), bp.astype(jnp.float32)


@jax.jit
def feature_extractor_forward(x, w1, b1, w2, b2, w3, b3):
    """Pallas forward of FeatureExtractorCNN.  x: (N, 3, H, W) NCHW float32."""
    N, C, H, W = x.shape
    # NCHW -> NHWC exactly once; pad channels to the 128-lane axis and apply
    # the SAME (padding=1) zero halo for stage 1 once in HBM.
    xh = jnp.transpose(x, (0, 2, 3, 1)).astype(jnp.float32)
    xh = jnp.pad(xh, ((0, 0), (1, 1), (1, 1), (0, CPAD - C)))

    w1p, b1p = _prep_weights(w1, b1, 3, 16)
    w2p, b2p = _prep_weights(w2, b2, 16, 32)
    w3p, b3p = _prep_weights(w3, b3, 32, 64)

    kernel, Hout, Wout = _make_fused_kernel(H, W)
    H1, W1 = H // 2, W // 2

    y = pl.pallas_call(
        kernel,
        out_shape=jax.ShapeDtypeStruct((N, Hout, Wout, CPAD), jnp.float32),
        grid_spec=pltpu.PrefetchScalarGridSpec(
            num_scalar_prefetch=0,
            grid=(N,),
            in_specs=[
                pl.BlockSpec((1, H + 2, W + 2, CPAD), lambda n: (n, 0, 0, 0)),
                pl.BlockSpec((9, CPAD, CPAD), lambda n: (0, 0, 0)),   # resident W1
                pl.BlockSpec((1, CPAD), lambda n: (0, 0)),            # resident b1
                pl.BlockSpec((9, CPAD, CPAD), lambda n: (0, 0, 0)),   # resident W2
                pl.BlockSpec((1, CPAD), lambda n: (0, 0)),            # resident b2
                pl.BlockSpec((9, CPAD, CPAD), lambda n: (0, 0, 0)),   # resident W3
                pl.BlockSpec((1, CPAD), lambda n: (0, 0)),            # resident b3
            ],
            out_specs=pl.BlockSpec((1, Hout, Wout, CPAD),
                                   lambda n: (n, 0, 0, 0)),
            scratch_shapes=[
                pltpu.VMEM((H1 + 2, W1 + 2, CPAD), jnp.float32),
                pltpu.VMEM((Hout + 2, Wout + 2, CPAD), jnp.float32),
            ],
        ),
        compiler_params=pltpu.CompilerParams(
            dimension_semantics=("parallel",)),
    )(xh, w1p, b1p, w2p, b2p, w3p, b3p)

    # Strip channel padding, NHWC -> NCHW exactly once.
    return jnp.transpose(y[..., :64], (0, 3, 1, 2))


def _reference(x, w1, b1, w2, b2, w3, b3):
    """Pure-JAX (XLA) reference matching the PyTorch module."""
    def conv_relu(x, w, b):
        y = jax.lax.conv_general_dilated(
            x, w, window_strides=(1, 1), padding="SAME",
            dimension_numbers=("NCHW", "OIHW", "NCHW"))
        return jax.nn.relu(y + b[None, :, None, None])

    def pool(x):
        return jax.lax.reduce_window(
            x, -jnp.inf, jax.lax.max,
            window_dimensions=(1, 1, 2, 2),
            window_strides=(1, 1, 2, 2), padding="VALID")

    y = pool(conv_relu(x, w1, b1))
    y = pool(conv_relu(y, w2, b2))
    return conv_relu(y, w3, b3)


if __name__ == "__main__":
    key = jax.random.PRNGKey(0)
    ks = jax.random.split(key, 7)
    N, H, W = 2, 16, 16
    x = jax.random.normal(ks[0], (N, 3, H, W), jnp.float32)
    w1 = jax.random.normal(ks[1], (16, 3, 3, 3), jnp.float32) * 0.1
    b1 = jax.random.normal(ks[2], (16,), jnp.float32) * 0.1
    w2 = jax.random.normal(ks[3], (32, 16, 3, 3), jnp.float32) * 0.1
    b2 = jax.random.normal(ks[4], (32,), jnp.float32) * 0.1
    w3 = jax.random.normal(ks[5], (64, 32, 3, 3), jnp.float32) * 0.1
    b3 = jax.random.normal(ks[6], (64,), jnp.float32) * 0.1

    out = feature_extractor_forward(x, w1, b1, w2, b2, w3, b3)
    out = jax.block_until_ready(out)
    assert out.shape == (N, 64, H // 4, W // 4), out.shape

    ref = jax.block_until_ready(_reference(x, w1, b1, w2, b2, w3, b3))
    max_err = float(jnp.max(jnp.abs(out - ref)))
    assert jnp.allclose(out, ref, atol=1e-3, rtol=1e-3), max_err

    print("KERNEL_OK")
</pallas_src>

<mosaic_0001>
module attributes {stable_mosaic.version = 11 : i64} {
  func.func @kernel(%arg0: i32, %arg1: memref<1x18x18x128xf32, #tpu.memory_space<vmem>>, %arg2: memref<9x128x128xf32, #tpu.memory_space<vmem>>, %arg3: memref<1x128xf32, #tpu.memory_space<vmem>>, %arg4: memref<9x128x128xf32, #tpu.memory_space<vmem>>, %arg5: memref<1x128xf32, #tpu.memory_space<vmem>>, %arg6: memref<9x128x128xf32, #tpu.memory_space<vmem>>, %arg7: memref<1x128xf32, #tpu.memory_space<vmem>>, %arg8: memref<1x4x4x128xf32, #tpu.memory_space<vmem>>, %arg9: memref<10x10x128xf32, #tpu.memory_space<vmem>>, %arg10: memref<6x6x128xf32, #tpu.memory_space<vmem>>) attributes {dimension_semantics = [#tpu.dimension_semantics<parallel>], iteration_bounds = array<i64: 2>, scalar_prefetch = 0 : i64, scratch_operands = 2 : i64, tpu.core_type = #tpu.core_type<tc>, window_params = [{transform_indices = @transform_0, window_bounds = array<i64: 1, 18, 18, 128>}, {pipeline_mode = #tpu.pipeline_mode<synchronous>, transform_indices = @transform_1, window_bounds = array<i64: 9, 128, 128>}, {pipeline_mode = #tpu.pipeline_mode<synchronous>, transform_indices = @transform_2, window_bounds = array<i64: 1, 128>}, {pipeline_mode = #tpu.pipeline_mode<synchronous>, transform_indices = @transform_3, window_bounds = array<i64: 9, 128, 128>}, {pipeline_mode = #tpu.pipeline_mode<synchronous>, transform_indices = @transform_4, window_bounds = array<i64: 1, 128>}, {pipeline_mode = #tpu.pipeline_mode<synchronous>, transform_indices = @transform_5, window_bounds = array<i64: 9, 128, 128>}, {pipeline_mode = #tpu.pipeline_mode<synchronous>, transform_indices = @transform_6, window_bounds = array<i64: 1, 128>}, {transform_indices = @transform_7, window_bounds = array<i64: 1, 4, 4, 128>}]} {
    %cst = arith.constant 0.000000e+00 : f32
    %0 = vector.broadcast %cst : f32 to vector<10x10x128xf32>
    %c0 = arith.constant 0 : index
    %c0_0 = arith.constant 0 : index
    %c0_1 = arith.constant 0 : index
    %1 = vector.load %arg9[%c0, %c0_0, %c0_1] : memref<10x10x128xf32, #tpu.memory_space<vmem>>, vector<10x10x128xf32>
    tpu.vector_store %arg9[%c0, %c0_0, %c0_1], %0 {strides = array<i32>} : memref<10x10x128xf32, #tpu.memory_space<vmem>>, vector<10x10x128xf32>,
    %cst_2 = arith.constant 0.000000e+00 : f32
    %2 = vector.broadcast %cst_2 : f32 to vector<6x6x128xf32>
    %c0_3 = arith.constant 0 : index
    %c0_4 = arith.constant 0 : index
    %c0_5 = arith.constant 0 : index
    %3 = vector.load %arg10[%c0_3, %c0_4, %c0_5] : memref<6x6x128xf32, #tpu.memory_space<vmem>>, vector<6x6x128xf32>
    tpu.vector_store %arg10[%c0_3, %c0_4, %c0_5], %2 {strides = array<i32>} : memref<6x6x128xf32, #tpu.memory_space<vmem>>, vector<6x6x128xf32>,
    %cst_6 = arith.constant 0.000000e+00 : f32
    %4 = vector.broadcast %cst_6 : f32 to vector<256x128xf32>
    %c0_7 = arith.constant 0 : index
    %c0_8 = arith.constant 0 : index
    %c0_9 = arith.constant 0 : index
    %c0_10 = arith.constant 0 : index
    %5 = vector.load %arg1[%c0_7, %c0_8, %c0_9, %c0_10] : memref<1x18x18x128xf32, #tpu.memory_space<vmem>>, vector<1x16x16x128xf32>
    %6 = vector.shape_cast %5 : vector<1x16x16x128xf32> to vector<16x16x128xf32>
    %7 = vector.shape_cast %6 : vector<16x16x128xf32> to vector<256x128xf32>
    %c0_11 = arith.constant 0 : index
    %c0_12 = arith.constant 0 : index
    %c0_13 = arith.constant 0 : index
    %8 = vector.load %arg2[%c0_11, %c0_12, %c0_13] : memref<9x128x128xf32, #tpu.memory_space<vmem>>, vector<1x128x128xf32>
    %9 = vector.shape_cast %8 : vector<1x128x128xf32> to vector<128x128xf32>
    %cst_14 = arith.constant dense<0.000000e+00> : vector<256x128xf32>
    %10 = tpu.matmul %7, %9, %cst_14 {dimension_numbers = #tpu.dot_dimension_numbers<[1], [0], [0], [1], [0, 0, 1, 1], [], []>} : vector<256x128xf32>, vector<128x128xf32>, vector<256x128xf32> -> vector<256x128xf32>
    %11 = arith.addf %4, %10 : vector<256x128xf32>
    %c0_15 = arith.constant 0 : index
    %c0_16 = arith.constant 0 : index
    %c1 = arith.constant 1 : index
    %c0_17 = arith.constant 0 : index
    %12 = vector.load %arg1[%c0_15, %c0_16, %c1, %c0_17] : memref<1x18x18x128xf32, #tpu.memory_space<vmem>>, vector<1x16x16x128xf32>
    %13 = vector.shape_cast %12 : vector<1x16x16x128xf32> to vector<16x16x128xf32>
    %14 = vector.shape_cast %13 : vector<16x16x128xf32> to vector<256x128xf32>
    %c1_18 = arith.constant 1 : index
    %c0_19 = arith.constant 0 : index
    %c0_20 = arith.constant 0 : index
    %15 = vector.load %arg2[%c1_18, %c0_19, %c0_20] : memref<9x128x128xf32, #tpu.memory_space<vmem>>, vector<1x128x128xf32>
    %16 = vector.shape_cast %15 : vector<1x128x128xf32> to vector<128x128xf32>
    %cst_21 = arith.constant dense<0.000000e+00> : vector<256x128xf32>
    %17 = tpu.matmul %14, %16, %cst_21 {dimension_numbers = #tpu.dot_dimension_numbers<[1], [0], [0], [1], [0, 0, 1, 1], [], []>} : vector<256x128xf32>, vector<128x128xf32>, vector<256x128xf32> -> vector<256x128xf32>
    %18 = arith.addf %11, %17 : vector<256x128xf32>
    %c0_22 = arith.constant 0 : index
    %c0_23 = arith.constant 0 : index
    %c2 = arith.constant 2 : index
    %c0_24 = arith.constant 0 : index
    %19 = vector.load %arg1[%c0_22, %c0_23, %c2, %c0_24] : memref<1x18x18x128xf32, #tpu.memory_space<vmem>>, vector<1x16x16x128xf32>
    %20 = vector.shape_cast %19 : vector<1x16x16x128xf32> to vector<16x16x128xf32>
    %21 = vector.shape_cast %20 : vector<16x16x128xf32> to vector<256x128xf32>
    %c2_25 = arith.constant 2 : index
    %c0_26 = arith.constant 0 : index
    %c0_27 = arith.constant 0 : index
    %22 = vector.load %arg2[%c2_25, %c0_26, %c0_27] : memref<9x128x128xf32, #tpu.memory_space<vmem>>, vector<1x128x128xf32>
    %23 = vector.shape_cast %22 : vector<1x128x128xf32> to vector<128x128xf32>
    %cst_28 = arith.constant dense<0.000000e+00> : vector<256x128xf32>
    %24 = tpu.matmul %21, %23, %cst_28 {dimension_numbers = #tpu.dot_dimension_numbers<[1], [0], [0], [1], [0, 0, 1, 1], [], []>} : vector<256x128xf32>, vector<128x128xf32>, vector<256x128xf32> -> vector<256x128xf32>
    %25 = arith.addf %18, %24 : vector<256x128xf32>
    %c0_29 = arith.constant 0 : index
    %c1_30 = arith.constant 1 : index
    %c0_31 = arith.constant 0 : index
    %c0_32 = arith.constant 0 : index
    %26 = vector.load %arg1[%c0_29, %c1_30, %c0_31, %c0_32] : memref<1x18x18x128xf32, #tpu.memory_space<vmem>>, vector<1x16x16x128xf32>
    %27 = vector.shape_cast %26 : vector<1x16x16x128xf32> to vector<16x16x128xf32>
    %28 = vector.shape_cast %27 : vector<16x16x128xf32> to vector<256x128xf32>
    %c3 = arith.constant 3 : index
    %c0_33 = arith.constant 0 : index
    %c0_34 = arith.constant 0 : index
    %29 = vector.load %arg2[%c3, %c0_33, %c0_34] : memref<9x128x128xf32, #tpu.memory_space<vmem>>, vector<1x128x128xf32>
    %30 = vector.shape_cast %29 : vector<1x128x128xf32> to vector<128x128xf32>
    %cst_35 = arith.constant dense<0.000000e+00> : vector<256x128xf32>
    %31 = tpu.matmul %28, %30, %cst_35 {dimension_numbers = #tpu.dot_dimension_numbers<[1], [0], [0], [1], [0, 0, 1, 1], [], []>} : vector<256x128xf32>, vector<128x128xf32>, vector<256x128xf32> -> vector<256x128xf32>
    %32 = arith.addf %25, %31 : vector<256x128xf32>
    %c0_36 = arith.constant 0 : index
    %c1_37 = arith.constant 1 : index
    %c1_38 = arith.constant 1 : index
    %c0_39 = arith.constant 0 : index
    %33 = vector.load %arg1[%c0_36, %c1_37, %c1_38, %c0_39] : memref<1x18x18x128xf32, #tpu.memory_space<vmem>>, vector<1x16x16x128xf32>
    %34 = vector.shape_cast %33 : vector<1x16x16x128xf32> to vector<16x16x128xf32>
    %35 = vector.shape_cast %34 : vector<16x16x128xf32> to vector<256x128xf32>
    %c4 = arith.constant 4 : index
    %c0_40 = arith.constant 0 : index
    %c0_41 = arith.constant 0 : index
    %36 = vector.load %arg2[%c4, %c0_40, %c0_41] : memref<9x128x128xf32, #tpu.memory_space<vmem>>, vector<1x128x128xf32>
    %37 = vector.shape_cast %36 : vector<1x128x128xf32> to vector<128x128xf32>
    %cst_42 = arith.constant dense<0.000000e+00> : vector<256x128xf32>
    %38 = tpu.matmul %35, %37, %cst_42 {dimension_numbers = #tpu.dot_dimension_numbers<[1], [0], [0], [1], [0, 0, 1, 1], [], []>} : vector<256x128xf32>, vector<128x128xf32>, vector<256x128xf32> -> vector<256x128xf32>
    %39 = arith.addf %32, %38 : vector<256x128xf32>
    %c0_43 = arith.constant 0 : index
    %c1_44 = arith.constant 1 : index
    %c2_45 = arith.constant 2 : index
    %c0_46 = arith.constant 0 : index
    %40 = vector.load %arg1[%c0_43, %c1_44, %c2_45, %c0_46] : memref<1x18x18x128xf32, #tpu.memory_space<vmem>>, vector<1x16x16x128xf32>
    %41 = vector.shape_cast %40 : vector<1x16x16x128xf32> to vector<16x16x128xf32>
    %42 = vector.shape_cast %41 : vector<16x16x128xf32> to vector<256x128xf32>
    %c5 = arith.constant 5 : index
    %c0_47 = arith.constant 0 : index
    %c0_48 = arith.constant 0 : index
    %43 = vector.load %arg2[%c5, %c0_47, %c0_48] : memref<9x128x128xf32, #tpu.memory_space<vmem>>, vector<1x128x128xf32>
    %44 = vector.shape_cast %43 : vector<1x128x128xf32> to vector<128x128xf32>
    %cst_49 = arith.constant dense<0.000000e+00> : vector<256x128xf32>
    %45 = tpu.matmul %42, %44, %cst_49 {dimension_numbers = #tpu.dot_dimension_numbers<[1], [0], [0], [1], [0, 0, 1, 1], [], []>} : vector<256x128xf32>, vector<128x128xf32>, vector<256x128xf32> -> vector<256x128xf32>
    %46 = arith.addf %39, %45 : vector<256x128xf32>
    %c0_50 = arith.constant 0 : index
    %c2_51 = arith.constant 2 : index
    %c0_52 = arith.constant 0 : index
    %c0_53 = arith.constant 0 : index
    %47 = vector.load %arg1[%c0_50, %c2_51, %c0_52, %c0_53] : memref<1x18x18x128xf32, #tpu.memory_space<vmem>>, vector<1x16x16x128xf32>
    %48 = vector.shape_cast %47 : vector<1x16x16x128xf32> to vector<16x16x128xf32>
    %49 = vector.shape_cast %48 : vector<16x16x128xf32> to vector<256x128xf32>
    %c6 = arith.constant 6 : index
    %c0_54 = arith.constant 0 : index
    %c0_55 = arith.constant 0 : index
    %50 = vector.load %arg2[%c6, %c0_54, %c0_55] : memref<9x128x128xf32, #tpu.memory_space<vmem>>, vector<1x128x128xf32>
    %51 = vector.shape_cast %50 : vector<1x128x128xf32> to vector<128x128xf32>
    %cst_56 = arith.constant dense<0.000000e+00> : vector<256x128xf32>
    %52 = tpu.matmul %49, %51, %cst_56 {dimension_numbers = #tpu.dot_dimension_numbers<[1], [0], [0], [1], [0, 0, 1, 1], [], []>} : vector<256x128xf32>, vector<128x128xf32>, vector<256x128xf32> -> vector<256x128xf32>
    %53 = arith.addf %46, %52 : vector<256x128xf32>
    %c0_57 = arith.constant 0 : index
    %c2_58 = arith.constant 2 : index
    %c1_59 = arith.constant 1 : index
    %c0_60 = arith.constant 0 : index
    %54 = vector.load %arg1[%c0_57, %c2_58, %c1_59, %c0_60] : memref<1x18x18x128xf32, #tpu.memory_space<vmem>>, vector<1x16x16x128xf32>
    %55 = vector.shape_cast %54 : vector<1x16x16x128xf32> to vector<16x16x128xf32>
    %56 = vector.shape_cast %55 : vector<16x16x128xf32> to vector<256x128xf32>
    %c7 = arith.constant 7 : index
    %c0_61 = arith.constant 0 : index
    %c0_62 = arith.constant 0 : index
    %57 = vector.load %arg2[%c7, %c0_61, %c0_62] : memref<9x128x128xf32, #tpu.memory_space<vmem>>, vector<1x128x128xf32>
    %58 = vector.shape_cast %57 : vector<1x128x128xf32> to vector<128x128xf32>
    %cst_63 = arith.constant dense<0.000000e+00> : vector<256x128xf32>
    %59 = tpu.matmul %56, %58, %cst_63 {dimension_numbers = #tpu.dot_dimension_numbers<[1], [0], [0], [1], [0, 0, 1, 1], [], []>} : vector<256x128xf32>, vector<128x128xf32>, vector<256x128xf32> -> vector<256x128xf32>
    %60 = arith.addf %53, %59 : vector<256x128xf32>
    %c0_64 = arith.constant 0 : index
    %c2_65 = arith.constant 2 : index
    %c2_66 = arith.constant 2 : index
    %c0_67 = arith.constant 0 : index
    %61 = vector.load %arg1[%c0_64, %c2_65, %c2_66, %c0_67] : memref<1x18x18x128xf32, #tpu.memory_space<vmem>>, vector<1x16x16x128xf32>
    %62 = vector.shape_cast %61 : vector<1x16x16x128xf32> to vector<16x16x128xf32>
    %63 = vector.shape_cast %62 : vector<16x16x128xf32> to vector<256x128xf32>
    %c8 = arith.constant 8 : index
    %c0_68 = arith.constant 0 : index
    %c0_69 = arith.constant 0 : index
    %64 = vector.load %arg2[%c8, %c0_68, %c0_69] : memref<9x128x128xf32, #tpu.memory_space<vmem>>, vector<1x128x128xf32>
    %65 = vector.shape_cast %64 : vector<1x128x128xf32> to vector<128x128xf32>
    %cst_70 = arith.constant dense<0.000000e+00> : vector<256x128xf32>
    %66 = tpu.matmul %63, %65, %cst_70 {dimension_numbers = #tpu.dot_dimension_numbers<[1], [0], [0], [1], [0, 0, 1, 1], [], []>} : vector<256x128xf32>, vector<128x128xf32>, vector<256x128xf32> -> vector<256x128xf32>
    %67 = arith.addf %60, %66 : vector<256x128xf32>
    %c0_71 = arith.constant 0 : index
    %c0_72 = arith.constant 0 : index
    %68 = vector.load %arg3[%c0_71, %c0_72] : memref<1x128xf32, #tpu.memory_space<vmem>>, vector<1x128xf32>
    %69 = vector.broadcast %68 : vector<1x128xf32> to vector<256x128xf32>
    %70 = arith.addf %67, %69 : vector<256x128xf32>
    %cst_73 = arith.constant 0.000000e+00 : f32
    %71 = vector.broadcast %cst_73 : f32 to vector<256x128xf32>
    %72 = arith.maximumf %70, %71 : vector<256x128xf32>
    %73 = vector.shape_cast %72 : vector<256x128xf32> to vector<16x16x128xf32>
    %74 = vector.shape_cast %73 : vector<16x16x128xf32> to vector<16x8x2x128xf32>
    %cst_74 = arith.constant dense<0xFF800000> : vector<16x8x128xf32>
    %75 = vector.multi_reduction <maximumf>, %74, %cst_74 [2] : vector<16x8x2x128xf32> to vector<16x8x128xf32>
    %76 = vector.shape_cast %75 : vector<16x8x128xf32> to vector<8x2x8x128xf32>
    %cst_75 = arith.constant dense<0xFF800000> : vector<8x8x128xf32>
    %77 = vector.multi_reduction <maximumf>, %76, %cst_75 [1] : vector<8x2x8x128xf32> to vector<8x8x128xf32>
    %c1_76 = arith.constant 1 : index
    %c1_77 = arith.constant 1 : index
    %c0_78 = arith.constant 0 : index
    %78 = vector.load %arg9[%c1_76, %c1_77, %c0_78] : memref<10x10x128xf32, #tpu.memory_space<vmem>>, vector<8x8x128xf32>
    tpu.vector_store %arg9[%c1_76, %c1_77, %c0_78], %77 {strides = array<i32>} : memref<10x10x128xf32, #tpu.memory_space<vmem>>, vector<8x8x128xf32>,
    %cst_79 = arith.constant 0.000000e+00 : f32
    %79 = vector.broadcast %cst_79 : f32 to vector<64x128xf32>
    %c0_80 = arith.constant 0 : index
    %c0_81 = arith.constant 0 : index
    %c0_82 = arith.constant 0 : index
    %80 = vector.load %arg9[%c0_80, %c0_81, %c0_82] : memref<10x10x128xf32, #tpu.memory_space<vmem>>, vector<8x8x128xf32>
    %81 = vector.shape_cast %80 : vector<8x8x128xf32> to vector<64x128xf32>
    %c0_83 = arith.constant 0 : index
    %c0_84 = arith.constant 0 : index
    %c0_85 = arith.constant 0 : index
    %82 = vector.load %arg4[%c0_83, %c0_84, %c0_85] : memref<9x128x128xf32, #tpu.memory_space<vmem>>, vector<1x128x128xf32>
    %83 = vector.shape_cast %82 : vector<1x128x128xf32> to vector<128x128xf32>
    %cst_86 = arith.constant dense<0.000000e+00> : vector<64x128xf32>
    %84 = tpu.matmul %81, %83, %cst_86 {dimension_numbers = #tpu.dot_dimension_numbers<[1], [0], [0], [1], [0, 0, 1, 1], [], []>} : vector<64x128xf32>, vector<128x128xf32>, vector<64x128xf32> -> vector<64x128xf32>
    %85 = arith.addf %79, %84 : vector<64x128xf32>
    %c0_87 = arith.constant 0 : index
    %c1_88 = arith.constant 1 : index
    %c0_89 = arith.constant 0 : index
    %86 = vector.load %arg9[%c0_87, %c1_88, %c0_89] : memref<10x10x128xf32, #tpu.memory_space<vmem>>, vector<8x8x128xf32>
    %87 = vector.shape_cast %86 : vector<8x8x128xf32> to vector<64x128xf32>
    %c1_90 = arith.constant 1 : index
    %c0_91 = arith.constant 0 : index
    %c0_92 = arith.constant 0 : index
    %88 = vector.load %arg4[%c1_90, %c0_91, %c0_92] : memref<9x128x128xf32, #tpu.memory_space<vmem>>, vector<1x128x128xf32>
    %89 = vector.shape_cast %88 : vector<1x128x128xf32> to vector<128x128xf32>
    %cst_93 = arith.constant dense<0.000000e+00> : vector<64x128xf32>
    %90 = tpu.matmul %87, %89, %cst_93 {dimension_numbers = #tpu.dot_dimension_numbers<[1], [0], [0], [1], [0, 0, 1, 1], [], []>} : vector<64x128xf32>, vector<128x128xf32>, vector<64x128xf32> -> vector<64x128xf32>
    %91 = arith.addf %85, %90 : vector<64x128xf32>
    %c0_94 = arith.constant 0 : index
    %c2_95 = arith.constant 2 : index
    %c0_96 = arith.constant 0 : index
    %92 = vector.load %arg9[%c0_94, %c2_95, %c0_96] : memref<10x10x128xf32, #tpu.memory_space<vmem>>, vector<8x8x128xf32>
    %93 = vector.shape_cast %92 : vector<8x8x128xf32> to vector<64x128xf32>
    %c2_97 = arith.constant 2 : index
    %c0_98 = arith.constant 0 : index
    %c0_99 = arith.constant 0 : index
    %94 = vector.load %arg4[%c2_97, %c0_98, %c0_99] : memref<9x128x128xf32, #tpu.memory_space<vmem>>, vector<1x128x128xf32>
    %95 = vector.shape_cast %94 : vector<1x128x128xf32> to vector<128x128xf32>
    %cst_100 = arith.constant dense<0.000000e+00> : vector<64x128xf32>
    %96 = tpu.matmul %93, %95, %cst_100 {dimension_numbers = #tpu.dot_dimension_numbers<[1], [0], [0], [1], [0, 0, 1, 1], [], []>} : vector<64x128xf32>, vector<128x128xf32>, vector<64x128xf32> -> vector<64x128xf32>
    %97 = arith.addf %91, %96 : vector<64x128xf32>
    %c1_101 = arith.constant 1 : index
    %c0_102 = arith.constant 0 : index
    %c0_103 = arith.constant 0 : index
    %98 = vector.load %arg9[%c1_101, %c0_102, %c0_103] : memref<10x10x128xf32, #tpu.memory_space<vmem>>, vector<8x8x128xf32>
    %99 = vector.shape_cast %98 : vector<8x8x128xf32> to vector<64x128xf32>
    %c3_104 = arith.constant 3 : index
    %c0_105 = arith.constant 0 : index
    %c0_106 = arith.constant 0 : index
    %100 = vector.load %arg4[%c3_104, %c0_105, %c0_106] : memref<9x128x128xf32, #tpu.memory_space<vmem>>, vector<1x128x128xf32>
    %101 = vector.shape_cast %100 : vector<1x128x128xf32> to vector<128x128xf32>
    %cst_107 = arith.constant dense<0.000000e+00> : vector<64x128xf32>
    %102 = tpu.matmul %99, %101, %cst_107 {dimension_numbers = #tpu.dot_dimension_numbers<[1], [0], [0], [1], [0, 0, 1, 1], [], []>} : vector<64x128xf32>, vector<128x128xf32>, vector<64x128xf32> -> vector<64x128xf32>
    %103 = arith.addf %97, %102 : vector<64x128xf32>
    %c1_108 = arith.constant 1 : index
    %c1_109 = arith.constant 1 : index
    %c0_110 = arith.constant 0 : index
    %104 = vector.load %arg9[%c1_108, %c1_109, %c0_110] : memref<10x10x128xf32, #tpu.memory_space<vmem>>, vector<8x8x128xf32>
    %105 = vector.shape_cast %104 : vector<8x8x128xf32> to vector<64x128xf32>
    %c4_111 = arith.constant 4 : index
    %c0_112 = arith.constant 0 : index
    %c0_113 = arith.constant 0 : index
    %106 = vector.load %arg4[%c4_111, %c0_112, %c0_113] : memref<9x128x128xf32, #tpu.memory_space<vmem>>, vector<1x128x128xf32>
    %107 = vector.shape_cast %106 : vector<1x128x128xf32> to vector<128x128xf32>
    %cst_114 = arith.constant dense<0.000000e+00> : vector<64x128xf32>
    %108 = tpu.matmul %105, %107, %cst_114 {dimension_numbers = #tpu.dot_dimension_numbers<[1], [0], [0], [1], [0, 0, 1, 1], [], []>} : vector<64x128xf32>, vector<128x128xf32>, vector<64x128xf32> -> vector<64x128xf32>
    %109 = arith.addf %103, %108 : vector<64x128xf32>
    %c1_115 = arith.constant 1 : index
    %c2_116 = arith.constant 2 : index
    %c0_117 = arith.constant 0 : index
    %110 = vector.load %arg9[%c1_115, %c2_116, %c0_117] : memref<10x10x128xf32, #tpu.memory_space<vmem>>, vector<8x8x128xf32>
    %111 = vector.shape_cast %110 : vector<8x8x128xf32> to vector<64x128xf32>
    %c5_118 = arith.constant 5 : index
    %c0_119 = arith.constant 0 : index
    %c0_120 = arith.constant 0 : index
    %112 = vector.load %arg4[%c5_118, %c0_119, %c0_120] : memref<9x128x128xf32, #tpu.memory_space<vmem>>, vector<1x128x128xf32>
    %113 = vector.shape_cast %112 : vector<1x128x128xf32> to vector<128x128xf32>
    %cst_121 = arith.constant dense<0.000000e+00> : vector<64x128xf32>
    %114 = tpu.matmul %111, %113, %cst_121 {dimension_numbers = #tpu.dot_dimension_numbers<[1], [0], [0], [1], [0, 0, 1, 1], [], []>} : vector<64x128xf32>, vector<128x128xf32>, vector<64x128xf32> -> vector<64x128xf32>
    %115 = arith.addf %109, %114 : vector<64x128xf32>
    %c2_122 = arith.constant 2 : index
    %c0_123 = arith.constant 0 : index
    %c0_124 = arith.constant 0 : index
    %116 = vector.load %arg9[%c2_122, %c0_123, %c0_124] : memref<10x10x128xf32, #tpu.memory_space<vmem>>, vector<8x8x128xf32>
    %117 = vector.shape_cast %116 : vector<8x8x128xf32> to vector<64x128xf32>
    %c6_125 = arith.constant 6 : index
    %c0_126 = arith.constant 0 : index
    %c0_127 = arith.constant 0 : index
    %118 = vector.load %arg4[%c6_125, %c0_126, %c0_127] : memref<9x128x128xf32, #tpu.memory_space<vmem>>, vector<1x128x128xf32>
    %119 = vector.shape_cast %118 : vector<1x128x128xf32> to vector<128x128xf32>
    %cst_128 = arith.constant dense<0.000000e+00> : vector<64x128xf32>
    %120 = tpu.matmul %117, %119, %cst_128 {dimension_numbers = #tpu.dot_dimension_numbers<[1], [0], [0], [1], [0, 0, 1, 1], [], []>} : vector<64x128xf32>, vector<128x128xf32>, vector<64x128xf32> -> vector<64x128xf32>
    %121 = arith.addf %115, %120 : vector<64x128xf32>
    %c2_129 = arith.constant 2 : index
    %c1_130 = arith.constant 1 : index
    %c0_131 = arith.constant 0 : index
    %122 = vector.load %arg9[%c2_129, %c1_130, %c0_131] : memref<10x10x128xf32, #tpu.memory_space<vmem>>, vector<8x8x128xf32>
    %123 = vector.shape_cast %122 : vector<8x8x128xf32> to vector<64x128xf32>
    %c7_132 = arith.constant 7 : index
    %c0_133 = arith.constant 0 : index
    %c0_134 = arith.constant 0 : index
    %124 = vector.load %arg4[%c7_132, %c0_133, %c0_134] : memref<9x128x128xf32, #tpu.memory_space<vmem>>, vector<1x128x128xf32>
    %125 = vector.shape_cast %124 : vector<1x128x128xf32> to vector<128x128xf32>
    %cst_135 = arith.constant dense<0.000000e+00> : vector<64x128xf32>
    %126 = tpu.matmul %123, %125, %cst_135 {dimension_numbers = #tpu.dot_dimension_numbers<[1], [0], [0], [1], [0, 0, 1, 1], [], []>} : vector<64x128xf32>, vector<128x128xf32>, vector<64x128xf32> -> vector<64x128xf32>
    %127 = arith.addf %121, %126 : vector<64x128xf32>
    %c2_136 = arith.constant 2 : index
    %c2_137 = arith.constant 2 : index
    %c0_138 = arith.constant 0 : index
    %128 = vector.load %arg9[%c2_136, %c2_137, %c0_138] : memref<10x10x128xf32, #tpu.memory_space<vmem>>, vector<8x8x128xf32>
    %129 = vector.shape_cast %128 : vector<8x8x128xf32> to vector<64x128xf32>
    %c8_139 = arith.constant 8 : index
    %c0_140 = arith.constant 0 : index
    %c0_141 = arith.constant 0 : index
    %130 = vector.load %arg4[%c8_139, %c0_140, %c0_141] : memref<9x128x128xf32, #tpu.memory_space<vmem>>, vector<1x128x128xf32>
    %131 = vector.shape_cast %130 : vector<1x128x128xf32> to vector<128x128xf32>
    %cst_142 = arith.constant dense<0.000000e+00> : vector<64x128xf32>
    %132 = tpu.matmul %129, %131, %cst_142 {dimension_numbers = #tpu.dot_dimension_numbers<[1], [0], [0], [1], [0, 0, 1, 1], [], []>} : vector<64x128xf32>, vector<128x128xf32>, vector<64x128xf32> -> vector<64x128xf32>
    %133 = arith.addf %127, %132 : vector<64x128xf32>
    %c0_143 = arith.constant 0 : index
    %c0_144 = arith.constant 0 : index
    %134 = vector.load %arg5[%c0_143, %c0_144] : memref<1x128xf32, #tpu.memory_space<vmem>>, vector<1x128xf32>
    %135 = vector.broadcast %134 : vector<1x128xf32> to vector<64x128xf32>
    %136 = arith.addf %133, %135 : vector<64x128xf32>
    %cst_145 = arith.constant 0.000000e+00 : f32
    %137 = vector.broadcast %cst_145 : f32 to vector<64x128xf32>
    %138 = arith.maximumf %136, %137 : vector<64x128xf32>
    %139 = vector.shape_cast %138 : vector<64x128xf32> to vector<8x8x128xf32>
    %140 = vector.shape_cast %139 : vector<8x8x128xf32> to vector<8x4x2x128xf32>
    %cst_146 = arith.constant dense<0xFF800000> : vector<8x4x128xf32>
    %141 = vector.multi_reduction <maximumf>, %140, %cst_146 [2] : vector<8x4x2x128xf32> to vector<8x4x128xf32>
    %142 = vector.shape_cast %141 : vector<8x4x128xf32> to vector<4x2x4x128xf32>
    %cst_147 = arith.constant dense<0xFF800000> : vector<4x4x128xf32>
    %143 = vector.multi_reduction <maximumf>, %142, %cst_147 [1] : vector<4x2x4x128xf32> to vector<4x4x128xf32>
    %c1_148 = arith.constant 1 : index
    %c1_149 = arith.constant 1 : index
    %c0_150 = arith.constant 0 : index
    %144 = vector.load %arg10[%c1_148, %c1_149, %c0_150] : memref<6x6x128xf32, #tpu.memory_space<vmem>>, vector<4x4x128xf32>
    tpu.vector_store %arg10[%c1_148, %c1_149, %c0_150], %143 {strides = array<i32>} : memref<6x6x128xf32, #tpu.memory_space<vmem>>, vector<4x4x128xf32>,
    %cst_151 = arith.constant 0.000000e+00 : f32
    %145 = vector.broadcast %cst_151 : f32 to vector<16x128xf32>
    %c0_152 = arith.constant 0 : index
    %c0_153 = arith.constant 0 : index
    %c0_154 = arith.constant 0 : index
    %146 = vector.load %arg10[%c0_152, %c0_153, %c0_154] : memref<6x6x128xf32, #tpu.memory_space<vmem>>, vector<4x4x128xf32>
    %147 = vector.shape_cast %146 : vector<4x4x128xf32> to vector<16x128xf32>
    %c0_155 = arith.constant 0 : index
    %c0_156 = arith.constant 0 : index
    %c0_157 = arith.constant 0 : index
    %148 = vector.load %arg6[%c0_155, %c0_156, %c0_157] : memref<9x128x128xf32, #tpu.memory_space<vmem>>, vector<1x128x128xf32>
    %149 = vector.shape_cast %148 : vector<1x128x128xf32> to vector<128x128xf32>
    %cst_158 = arith.constant dense<0.000000e+00> : vector<16x128xf32>
    %150 = tpu.matmul %147, %149, %cst_158 {dimension_numbers = #tpu.dot_dimension_numbers<[1], [0], [0], [1], [0, 0, 1, 1], [], []>} : vector<16x128xf32>, vector<128x128xf32>, vector<16x128xf32> -> vector<16x128xf32>
    %151 = arith.addf %145, %150 : vector<16x128xf32>
    %c0_159 = arith.constant 0 : index
    %c1_160 = arith.constant 1 : index
    %c0_161 = arith.constant 0 : index
    %152 = vector.load %arg10[%c0_159, %c1_160, %c0_161] : memref<6x6x128xf32, #tpu.memory_space<vmem>>, vector<4x4x128xf32>
    %153 = vector.shape_cast %152 : vector<4x4x128xf32> to vector<16x128xf32>
    %c1_162 = arith.constant 1 : index
    %c0_163 = arith.constant 0 : index
    %c0_164 = arith.constant 0 : index
    %154 = vector.load %arg6[%c1_162, %c0_163, %c0_164] : memref<9x128x128xf32, #tpu.memory_space<vmem>>, vector<1x128x128xf32>
    %155 = vector.shape_cast %154 : vector<1x128x128xf32> to vector<128x128xf32>
    %cst_165 = arith.constant dense<0.000000e+00> : vector<16x128xf32>
    %156 = tpu.matmul %153, %155, %cst_165 {dimension_numbers = #tpu.dot_dimension_numbers<[1], [0], [0], [1], [0, 0, 1, 1], [], []>} : vector<16x128xf32>, vector<128x128xf32>, vector<16x128xf32> -> vector<16x128xf32>
    %157 = arith.addf %151, %156 : vector<16x128xf32>
    %c0_166 = arith.constant 0 : index
    %c2_167 = arith.constant 2 : index
    %c0_168 = arith.constant 0 : index
    %158 = vector.load %arg10[%c0_166, %c2_167, %c0_168] : memref<6x6x128xf32, #tpu.memory_space<vmem>>, vector<4x4x128xf32>
    %159 = vector.shape_cast %158 : vector<4x4x128xf32> to vector<16x128xf32>
    %c2_169 = arith.constant 2 : index
    %c0_170 = arith.constant 0 : index
    %c0_171 = arith.constant 0 : index
    %160 = vector.load %arg6[%c2_169, %c0_170, %c0_171] : memref<9x128x128xf32, #tpu.memory_space<vmem>>, vector<1x128x128xf32>
    %161 = vector.shape_cast %160 : vector<1x128x128xf32> to vector<128x128xf32>
    %cst_172 = arith.constant dense<0.000000e+00> : vector<16x128xf32>
    %162 = tpu.matmul %159, %161, %cst_172 {dimension_numbers = #tpu.dot_dimension_numbers<[1], [0], [0], [1], [0, 0, 1, 1], [], []>} : vector<16x128xf32>, vector<128x128xf32>, vector<16x128xf32> -> vector<16x128xf32>
    %163 = arith.addf %157, %162 : vector<16x128xf32>
    %c1_173 = arith.constant 1 : index
    %c0_174 = arith.constant 0 : index
    %c0_175 = arith.constant 0 : index
    %164 = vector.load %arg10[%c1_173, %c0_174, %c0_175] : memref<6x6x128xf32, #tpu.memory_space<vmem>>, vector<4x4x128xf32>
    %165 = vector.shape_cast %164 : vector<4x4x128xf32> to vector<16x128xf32>
    %c3_176 = arith.constant 3 : index
    %c0_177 = arith.constant 0 : index
    %c0_178 = arith.constant 0 : index
    %166 = vector.load %arg6[%c3_176, %c0_177, %c0_178] : memref<9x128x128xf32, #tpu.memory_space<vmem>>, vector<1x128x128xf32>
    %167 = vector.shape_cast %166 : vector<1x128x128xf32> to vector<128x128xf32>
    %cst_179 = arith.constant dense<0.000000e+00> : vector<16x128xf32>
    %168 = tpu.matmul %165, %167, %cst_179 {dimension_numbers = #tpu.dot_dimension_numbers<[1], [0], [0], [1], [0, 0, 1, 1], [], []>} : vector<16x128xf32>, vector<128x128xf32>, vector<16x128xf32> -> vector<16x128xf32>
    %169 = arith.addf %163, %168 : vector<16x128xf32>
    %c1_180 = arith.constant 1 : index
    %c1_181 = arith.constant 1 : index
    %c0_182 = arith.constant 0 : index
    %170 = vector.load %arg10[%c1_180, %c1_181, %c0_182] : memref<6x6x128xf32, #tpu.memory_space<vmem>>, vector<4x4x128xf32>
    %171 = vector.shape_cast %170 : vector<4x4x128xf32> to vector<16x128xf32>
    %c4_183 = arith.constant 4 : index
    %c0_184 = arith.constant 0 : index
    %c0_185 = arith.constant 0 : index
    %172 = vector.load %arg6[%c4_183, %c0_184, %c0_185] : memref<9x128x128xf32, #tpu.memory_space<vmem>>, vector<1x128x128xf32>
    %173 = vector.shape_cast %172 : vector<1x128x128xf32> to vector<128x128xf32>
    %cst_186 = arith.constant dense<0.000000e+00> : vector<16x128xf32>
    %174 = tpu.matmul %171, %173, %cst_186 {dimension_numbers = #tpu.dot_dimension_numbers<[1], [0], [0], [1], [0, 0, 1, 1], [], []>} : vector<16x128xf32>, vector<128x128xf32>, vector<16x128xf32> -> vector<16x128xf32>
    %175 = arith.addf %169, %174 : vector<16x128xf32>
    %c1_187 = arith.constant 1 : index
    %c2_188 = arith.constant 2 : index
    %c0_189 = arith.constant 0 : index
    %176 = vector.load %arg10[%c1_187, %c2_188, %c0_189] : memref<6x6x128xf32, #tpu.memory_space<vmem>>, vector<4x4x128xf32>
    %177 = vector.shape_cast %176 : vector<4x4x128xf32> to vector<16x128xf32>
    %c5_190 = arith.constant 5 : index
    %c0_191 = arith.constant 0 : index
    %c0_192 = arith.constant 0 : index
    %178 = vector.load %arg6[%c5_190, %c0_191, %c0_192] : memref<9x128x128xf32, #tpu.memory_space<vmem>>, vector<1x128x128xf32>
    %179 = vector.shape_cast %178 : vector<1x128x128xf32> to vector<128x128xf32>
    %cst_193 = arith.constant dense<0.000000e+00> : vector<16x128xf32>
    %180 = tpu.matmul %177, %179, %cst_193 {dimension_numbers = #tpu.dot_dimension_numbers<[1], [0], [0], [1], [0, 0, 1, 1], [], []>} : vector<16x128xf32>, vector<128x128xf32>, vector<16x128xf32> -> vector<16x128xf32>
    %181 = arith.addf %175, %180 : vector<16x128xf32>
    %c2_194 = arith.constant 2 : index
    %c0_195 = arith.constant 0 : index
    %c0_196 = arith.constant 0 : index
    %182 = vector.load %arg10[%c2_194, %c0_195, %c0_196] : memref<6x6x128xf32, #tpu.memory_space<vmem>>, vector<4x4x128xf32>
    %183 = vector.shape_cast %182 : vector<4x4x128xf32> to vector<16x128xf32>
    %c6_197 = arith.constant 6 : index
    %c0_198 = arith.constant 0 : index
    %c0_199 = arith.constant 0 : index
    %184 = vector.load %arg6[%c6_197, %c0_198, %c0_199] : memref<9x128x128xf32, #tpu.memory_space<vmem>>, vector<1x128x128xf32>
    %185 = vector.shape_cast %184 : vector<1x128x128xf32> to vector<128x128xf32>
    %cst_200 = arith.constant dense<0.000000e+00> : vector<16x128xf32>
    %186 = tpu.matmul %183, %185, %cst_200 {dimension_numbers = #tpu.dot_dimension_numbers<[1], [0], [0], [1], [0, 0, 1, 1], [], []>} : vector<16x128xf32>, vector<128x128xf32>, vector<16x128xf32> -> vector<16x128xf32>
    %187 = arith.addf %181, %186 : vector<16x128xf32>
    %c2_201 = arith.constant 2 : index
    %c1_202 = arith.constant 1 : index
    %c0_203 = arith.constant 0 : index
    %188 = vector.load %arg10[%c2_201, %c1_202, %c0_203] : memref<6x6x128xf32, #tpu.memory_space<vmem>>, vector<4x4x128xf32>
    %189 = vector.shape_cast %188 : vector<4x4x128xf32> to vector<16x128xf32>
    %c7_204 = arith.constant 7 : index
    %c0_205 = arith.constant 0 : index
    %c0_206 = arith.constant 0 : index
    %190 = vector.load %arg6[%c7_204, %c0_205, %c0_206] : memref<9x128x128xf32, #tpu.memory_space<vmem>>, vector<1x128x128xf32>
    %191 = vector.shape_cast %190 : vector<1x128x128xf32> to vector<128x128xf32>
    %cst_207 = arith.constant dense<0.000000e+00> : vector<16x128xf32>
    %192 = tpu.matmul %189, %191, %cst_207 {dimension_numbers = #tpu.dot_dimension_numbers<[1], [0], [0], [1], [0, 0, 1, 1], [], []>} : vector<16x128xf32>, vector<128x128xf32>, vector<16x128xf32> -> vector<16x128xf32>
    %193 = arith.addf %187, %192 : vector<16x128xf32>
    %c2_208 = arith.constant 2 : index
    %c2_209 = arith.constant 2 : index
    %c0_210 = arith.constant 0 : index
    %194 = vector.load %arg10[%c2_208, %c2_209, %c0_210] : memref<6x6x128xf32, #tpu.memory_space<vmem>>, vector<4x4x128xf32>
    %195 = vector.shape_cast %194 : vector<4x4x128xf32> to vector<16x128xf32>
    %c8_211 = arith.constant 8 : index
    %c0_212 = arith.constant 0 : index
    %c0_213 = arith.constant 0 : index
    %196 = vector.load %arg6[%c8_211, %c0_212, %c0_213] : memref<9x128x128xf32, #tpu.memory_space<vmem>>, vector<1x128x128xf32>
    %197 = vector.shape_cast %196 : vector<1x128x128xf32> to vector<128x128xf32>
    %cst_214 = arith.constant dense<0.000000e+00> : vector<16x128xf32>
    %198 = tpu.matmul %195, %197, %cst_214 {dimension_numbers = #tpu.dot_dimension_numbers<[1], [0], [0], [1], [0, 0, 1, 1], [], []>} : vector<16x128xf32>, vector<128x128xf32>, vector<16x128xf32> -> vector<16x128xf32>
    %199 = arith.addf %193, %198 : vector<16x128xf32>
    %c0_215 = arith.constant 0 : index
    %c0_216 = arith.constant 0 : index
    %200 = vector.load %arg7[%c0_215, %c0_216] : memref<1x128xf32, #tpu.memory_space<vmem>>, vector<1x128xf32>
    %201 = vector.broadcast %200 : vector<1x128xf32> to vector<16x128xf32>
    %202 = arith.addf %199, %201 : vector<16x128xf32>
    %cst_217 = arith.constant 0.000000e+00 : f32
    %203 = vector.broadcast %cst_217 : f32 to vector<16x128xf32>
    %204 = arith.maximumf %202, %203 : vector<16x128xf32>
    %205 = vector.shape_cast %204 : vector<16x128xf32> to vector<4x4x128xf32>
    %c0_218 = arith.constant 0 : index
    %c0_219 = arith.constant 0 : index
    %c0_220 = arith.constant 0 : index
    %c0_221 = arith.constant 0 : index
    %206 = vector.load %arg8[%c0_218, %c0_219, %c0_220, %c0_221] : memref<1x4x4x128xf32, #tpu.memory_space<vmem>>, vector<1x4x4x128xf32>
    %207 = vector.shape_cast %206 : vector<1x4x4x128xf32> to vector<4x4x128xf32>
    %208 = vector.shape_cast %205 : vector<4x4x128xf32> to vector<1x4x4x128xf32>
    tpu.vector_store %arg8[%c0_218, %c0_219, %c0_220, %c0_221], %208 {strides = array<i32>} : memref<1x4x4x128xf32, #tpu.memory_space<vmem>>, vector<1x4x4x128xf32>,
    return
  }
  func.func @transform_0(%arg0: i32) -> (i32, i32, i32, i32) {
    %c0_i32 = arith.constant 0 : i32
    %c0_i32_0 = arith.constant 0 : i32
    %c0_i32_1 = arith.constant 0 : i32
    %c0_i32_2 = arith.constant 0 : i32
    return %arg0, %c0_i32, %c0_i32_0, %c0_i32_1 : i32, i32, i32, i32
  }
  func.func @transform_1(%arg0: i32) -> (i32, i32, i32) {
    %c0_i32 = arith.constant 0 : i32
    %c0_i32_0 = arith.constant 0 : i32
    %c0_i32_1 = arith.constant 0 : i32
    %c0_i32_2 = arith.constant 0 : i32
    return %c0_i32, %c0_i32_0, %c0_i32_1 : i32, i32, i32
  }
  func.func @transform_2(%arg0: i32) -> (i32, i32) {
    %c0_i32 = arith.constant 0 : i32
    %c0_i32_0 = arith.constant 0 : i32
    %c0_i32_1 = arith.constant 0 : i32
    return %c0_i32, %c0_i32_0 : i32, i32
  }
  func.func @transform_3(%arg0: i32) -> (i32, i32, i32) {
    %c0_i32 = arith.constant 0 : i32
    %c0_i32_0 = arith.constant 0 : i32
    %c0_i32_1 = arith.constant 0 : i32
    %c0_i32_2 = arith.constant 0 : i32
    return %c0_i32, %c0_i32_0, %c0_i32_1 : i32, i32, i32
  }
  func.func @transform_4(%arg0: i32) -> (i32, i32) {
    %c0_i32 = arith.constant 0 : i32
    %c0_i32_0 = arith.constant 0 : i32
    %c0_i32_1 = arith.constant 0 : i32
    return %c0_i32, %c0_i32_0 : i32, i32
  }
  func.func @transform_5(%arg0: i32) -> (i32, i32, i32) {
    %c0_i32 = arith.constant 0 : i32
    %c0_i32_0 = arith.constant 0 : i32
    %c0_i32_1 = arith.constant 0 : i32
    %c0_i32_2 = arith.constant 0 : i32
    return %c0_i32, %c0_i32_0, %c0_i32_1 : i32, i32, i32
  }
  func.func @transform_6(%arg0: i32) -> (i32, i32) {
    %c0_i32 = arith.constant 0 : i32
    %c0_i32_0 = arith.constant 0 : i32
    %c0_i32_1 = arith.constant 0 : i32
    return %c0_i32, %c0_i32_0 : i32, i32
  }
  func.func @transform_7(%arg0: i32) -> (i32, i32, i32, i32) {
    %c0_i32 = arith.constant 0 : i32
    %c0_i32_0 = arith.constant 0 : i32
    %c0_i32_1 = arith.constant 0 : i32
    %c0_i32_2 = arith.constant 0 : i32
    return %arg0, %c0_i32, %c0_i32_0, %c0_i32_1 : i32, i32, i32, i32
  }
}

</mosaic_0001>

<bundles_post_ra>
// kernel: feature_extractor_forward.1
= control target key start
LH: loop header
LB: loop body
LE: loop exit
PB: predicated region body
PF: predicated region fallthrough
CT: control target
= control target key end

     0   :  { %s5683_s24 = smov 0   ;;  %s8721_s0 = inlined_call_operand.vmem [shape: f32[2,18,18,128], index: 0, kind: input, shape index: {}]   ;;  %s8722_s1 = inlined_call_operand.vmem [shape: f32[9,128,128], index: 1, kind: input, shape index: {}]   ;;  %s8723_s2 = inlined_call_operand.vmem [shape: f32[1,128], index: 2, kind: input, shape index: {}]   ;;  %s8724_s3 = inlined_call_operand.vmem [shape: f32[9,128,128], index: 3, kind: input, shape index: {}]   ;;  %s8725_s4 = inlined_call_operand.vmem [shape: f32[1,128], index: 4, kind: input, shape index: {}]   ;;  %s8726_s5 = inlined_call_operand.vmem [shape: f32[9,128,128], index: 5, kind: input, shape index: {}]   ;;  %s8727_s6 = inlined_call_operand.vmem [shape: f32[1,128], index: 6, kind: input, shape index: {}]   ;;  %s8728_s7 = inlined_call_operand.vmem [shape: f32[2,4,4,128], index: 7, kind: output, shape index: {}]  }
   0x1 LB: > { %s5006_s25 = sadd.s32 4294967295, %s5640_s24   ;;  %p5010_p0 = scmp.ge.s32.totalorder %s5640_s24, 1  ;;  %s5640_s24 = sphi %s5683_s24, %s17_s24  }
   0x2   : > { %p237_p1 = scmp.lt.s32.totalorder %s5640_s24, 3 }
   0x4   : > { %p238_p2 = pnand %p5010_p0, %p237_p1 }
   0x6   : > { %241 = sbr.rel (%p238_p2) target bundleno = 1484 (0x5cc), region = 48 }
   0xb   : > { %v5029_v0 = vld [vmem:[%s8722_s1 + $0xf8] sm:$0xff]  ;;  %v5028_v3 = vld [vmem:[%s8722_s1 + $0xf0] sm:$0xff]  ;;  %v5027_v7 = vld [vmem:[%s8722_s1 + $0xe8] sm:$0xff]  ;;  %p5798_p3 = scmp.lt.s32.totalorder %s5006_s25, 1  ;;  %vm2280_vm0 = vcmask 1041408   ;;  %vm3305_vm1 = vcmask 1041409  }
   0xc   : > { %v352_v1 = vld [vmem:[%s8722_s1 + $0x78] sm:$0xff]  ;;  %402 = vmatpush.msra.mxu0 %v5029_v0  ;;  %v351_v4 = vld [vmem:[%s8722_s1 + $0x70] sm:$0xff]  ;;  %v350_v8 = vld [vmem:[%s8722_s1 + $0x68] sm:$0xff]  ;;  %vm3307_vm2 = vcmask 1042434   ;;  %vm3309_vm3 = vcmask 1043459   ;;  %vm3311_vm4 = vcmask 1044484  }
   0xd   : > { %v5045_v2 = vld [vmem:[%s8722_s1 + $0x178] sm:$0xff]  ;;  %515 = vmatpush.msra.mxu1 %v352_v1  ;;  %v5044_v5 = vld [vmem:[%s8722_s1 + $0x170] sm:$0xff]  ;;  %v5043_v9 = vld [vmem:[%s8722_s1 + $0x168] sm:$0xff]  ;;  %s8838_s25 = smov (!%p5798_p3, %s5006_s25), 1  ;;  %vm3313_vm5 = vcmask 1045509   ;;  %vm3315_vm6 = vcmask 1046534  }
   0xe   : > { %677 = vmatpush.msra.mxu2 %v5045_v2  ;;  %v5093_v6 = vld [vmem:[%s8722_s1 + $0x1f8] sm:$0xff]  ;;  %403 = vmatpush.msra.mxu0 %v5028_v3  ;;  %v5092_v10 = vld [vmem:[%s8722_s1 + $0x1f0] sm:$0xff]  ;;  %v5026_v11 = vld [vmem:[%s8722_s1 + $0xe0] sm:$0xff]  ;;  %s5609_s22 = smul.u32 432, %s8838_s25  ;;  %vm3317_vm7 = vcmask 1047559  }
   0xf   : > { %516 = vmatpush.msra.mxu1 %v351_v4  ;;  %872 = vmatpush.msra.mxu3 %v5093_v6  ;;  %v349_v12 = vld [vmem:[%s8722_s1 + $0x60] sm:$0xff]  ;;  %v5091_v14 = vld [vmem:[%s8722_s1 + $0x1e8] sm:$0xff]  ;;  %v5025_v15 = vld [vmem:[%s8722_s1 + $0xd8] sm:$0xff] }
  0x10   : > { %678 = vmatpush.msra.mxu2 %v5044_v5  ;;  %404 = vmatpush.msra.mxu0 %v5027_v7  ;;  %v5042_v13 = vld [vmem:[%s8722_s1 + $0x160] sm:$0xff]  ;;  %v348_v16 = vld [vmem:[%s8722_s1 + $0x58] sm:$0xff]  ;;  %v5024_v19 = vld [vmem:[%s8722_s1 + $0xd0] sm:$0xff]  ;;  %s5884_s20 = scalar_lea.vmem %s8721_s0, %s5609_s22 }
  0x11   : > { %517 = vmatpush.msra.mxu1 %v350_v8  ;;  %873 = vmatpush.msra.mxu3 %v5092_v10  ;;  %v5041_v17 = vld [vmem:[%s8722_s1 + $0x158] sm:$0xff]  ;;  %v5090_v18 = vld [vmem:[%s8722_s1 + $0x1e0] sm:$0xff]  ;;  %v347_v20 = vld [vmem:[%s8722_s1 + $0x50] sm:$0xff] }
  0x12   : > { %679 = vmatpush.msra.mxu2 %v5043_v9  ;;  %405 = vmatpush.msra.mxu0 %v5026_v11  ;;  %v5040_v21 = vld [vmem:[%s8722_s1 + $0x150] sm:$0xff]  ;;  %v5089_v22 = vld [vmem:[%s8722_s1 + $0x1d8] sm:$0xff]  ;;  %v5023_v23 = vld [vmem:[%s8722_s1 + $0xc8] sm:$0xff] }
  0x13   : > { %518 = vmatpush.msra.mxu1 %v349_v12  ;;  %874 = vmatpush.msra.mxu3 %v5091_v14  ;;  %v346_v24 = vld [vmem:[%s8722_s1 + $0x48] sm:$0xff]  ;;  %v5088_v26 = vld [vmem:[%s8722_s1 + $0x1d0] sm:$0xff]  ;;  %v5022_v27 = vld [vmem:[%s8722_s1 + $0xc0] sm:$0xff] }
  0x14   : > { %680 = vmatpush.msra.mxu2 %v5042_v13  ;;  %406 = vmatpush.msra.mxu0 %v5025_v15  ;;  %v5039_v25 = vld [vmem:[%s8722_s1 + $0x148] sm:$0xff]  ;;  %v345_v28 = vld [vmem:[%s8722_s1 + $0x40] sm:$0xff]  ;;  %v5021_v31 = vld [vmem:[%s8722_s1 + $0xb8] sm:$0xff] }
  0x15   : > { %519 = vmatpush.msra.mxu1 %v348_v16  ;;  %875 = vmatpush.msra.mxu3 %v5090_v18  ;;  %v5038_v29 = vld [vmem:[%s8722_s1 + $0x140] sm:$0xff]  ;;  %v5087_v30 = vld [vmem:[%s8722_s1 + $0x1c8] sm:$0xff]  ;;  %v344_v32 = vld [vmem:[%s8722_s1 + $0x38] sm:$0xff] }
  0x16   : > { %681 = vmatpush.msra.mxu2 %v5041_v17  ;;  %407 = vmatpush.msra.mxu0 %v5024_v19  ;;  %v5037_v33 = vld [vmem:[%s8722_s1 + $0x138] sm:$0xff]  ;;  %v5086_v34 = vld [vmem:[%s8722_s1 + $0x1c0] sm:$0xff]  ;;  %v5020_v35 = vld [vmem:[%s8722_s1 + $0xb0] sm:$0xff] }
  0x17   : > { %520 = vmatpush.msra.mxu1 %v347_v20  ;;  %876 = vmatpush.msra.mxu3 %v5089_v22  ;;  %v343_v36 = vld [vmem:[%s8722_s1 + $0x30] sm:$0xff]  ;;  %v5085_v38 = vld [vmem:[%s8722_s1 + $0x1b8] sm:$0xff]  ;;  %v5019_v39 = vld [vmem:[%s8722_s1 + $0xa8] sm:$0xff] }
  0x18   : > { %682 = vmatpush.msra.mxu2 %v5040_v21  ;;  %408 = vmatpush.msra.mxu0 %v5023_v23  ;;  %v5036_v37 = vld [vmem:[%s8722_s1 + $0x130] sm:$0xff]  ;;  %v342_v40 = vld [vmem:[%s8722_s1 + $0x28] sm:$0xff]  ;;  %v5018_v43 = vld [vmem:[%s8722_s1 + $0xa0] sm:$0xff] }
  0x19   : > { %521 = vmatpush.msra.mxu1 %v346_v24  ;;  %877 = vmatpush.msra.mxu3 %v5088_v26  ;;  %v5035_v41 = vld [vmem:[%s8722_s1 + $0x128] sm:$0xff]  ;;  %v5084_v42 = vld [vmem:[%s8722_s1 + $0x1b0] sm:$0xff]  ;;  %v341_v44 = vld [vmem:[%s8722_s1 + $0x20] sm:$0xff] }
  0x1a   : > { %683 = vmatpush.msra.mxu2 %v5039_v25  ;;  %409 = vmatpush.msra.mxu0 %v5022_v27  ;;  %v5034_v45 = vld [vmem:[%s8722_s1 + $0x120] sm:$0xff]  ;;  %v5083_v46 = vld [vmem:[%s8722_s1 + $0x1a8] sm:$0xff]  ;;  %v5017_v47 = vld [vmem:[%s8722_s1 + $0x98] sm:$0xff] }
  0x1b   : > { %522 = vmatpush.msra.mxu1 %v345_v28  ;;  %878 = vmatpush.msra.mxu3 %v5087_v30  ;;  %v340_v48 = vld [vmem:[%s8722_s1 + $0x18] sm:$0xff]  ;;  %v5082_v50 = vld [vmem:[%s8722_s1 + $0x1a0] sm:$0xff]  ;;  %v5016_v51 = vld [vmem:[%s8722_s1 + $0x90] sm:$0xff] }
  0x1c   : > { %684 = vmatpush.msra.mxu2 %v5038_v29  ;;  %410 = vmatpush.msra.mxu0 %v5021_v31  ;;  %v5033_v49 = vld [vmem:[%s8722_s1 + $0x118] sm:$0xff]  ;;  %v339_v52 = vld [vmem:[%s8722_s1 + $0x10] sm:$0xff]  ;;  %v5015_v55 = vld [vmem:[%s8722_s1 + $0x88] sm:$0xff] }
  0x1d   : > { %523 = vmatpush.msra.mxu1 %v344_v32  ;;  %879 = vmatpush.msra.mxu3 %v5086_v34  ;;  %v5032_v53 = vld [vmem:[%s8722_s1 + $0x110] sm:$0xff]  ;;  %v5081_v54 = vld [vmem:[%s8722_s1 + $0x198] sm:$0xff]  ;;  %v338_v56 = vld [vmem:[%s8722_s1 + $0x8] sm:$0xff] }
  0x1e   : > { %685 = vmatpush.msra.mxu2 %v5037_v33  ;;  %411 = vmatpush.msra.mxu0 %v5020_v35  ;;  %v5031_v57 = vld [vmem:[%s8722_s1 + $0x108] sm:$0xff]  ;;  %v5080_v58 = vld [vmem:[%s8722_s1 + $0x190] sm:$0xff]  ;;  %v5014_v59 = vld [vmem:[%s8722_s1 + $0x80] sm:$0xff] }
  0x1f   : > { %524 = vmatpush.msra.mxu1 %v343_v36  ;;  %880 = vmatpush.msra.mxu3 %v5085_v38  ;;  %v337_v60 = vld [vmem:[%s8722_s1] sm:$0xff]  ;;  %v5079_v62 = vld [vmem:[%s8722_s1 + $0x188] sm:$0xff]  ;;  %v5141_v2 = vld [vmem:[%s8722_s1 + $0x278] sm:$0xff] }
  0x20   : > { %686 = vmatpush.msra.mxu2 %v5036_v37  ;;  %412 = vmatpush.msra.mxu0 %v5019_v39  ;;  %v5030_v61 = vld [vmem:[%s8722_s1 + $0x100] sm:$0xff]  ;;  %v5046_v4 = vld [vmem:[%s5884_s20 + $0x18] sm:$0xff]  ;;  %v5140_v5 = vld [vmem:[%s8722_s1 + $0x270] sm:$0xff] }
  0x21   : > { %525 = vmatpush.msra.mxu1 %v342_v40  ;;  %881 = vmatpush.msra.mxu3 %v5084_v42  ;;  %v353_v63 = vld [vmem:[%s5884_s20 + $0x1] sm:$0xff]  ;;  %v354_v7 = vld [vmem:[%s5884_s20 + $0x9] sm:$0xff]  ;;  %v5919_v11 = vld [vmem:[%s5884_s20 + $0x19] sm:$0xff] }
  0x22   : > { %687 = vmatpush.msra.mxu2 %v5035_v41  ;;  %413 = vmatpush.msra.mxu0 %v5018_v43  ;;  %v305_v0 = vld [vmem:[%s5884_s20] sm:$0xff]  ;;  %v5139_v6 = vld [vmem:[%s8722_s1 + $0x268] sm:$0xff]  ;;  %v5926_v13 = vld [vmem:[%s5884_s20 + $0x30] sm:$0xff] }
  0x23   : > { %526 = vmatpush.msra.mxu1 %v341_v44  ;;  %882 = vmatpush.msra.mxu3 %v5083_v46  ;;  %v628_v1 = vld [vmem:[%s5884_s20 + $0x2] sm:$0xff]  ;;  %v629_v9 = vld [vmem:[%s5884_s20 + $0xa] sm:$0xff]  ;;  %v5922_v12 = vld [vmem:[%s5884_s20 + $0x1a] sm:$0xff] }
  0x24   : > { %688 = vmatpush.msra.mxu2 %v5034_v45  ;;  %414 = vmatpush.msra.mxu0 %v5017_v47  ;;  %v5078_v3 = vld [vmem:[%s8722_s1 + $0x180] sm:$0xff]  ;;  %v306_v8 = vld [vmem:[%s5884_s20 + $0x8] sm:$0xff]  ;;  %v5941_v17 = vld [vmem:[%s5884_s20 + $0x38] sm:$0xff] }
  0x25   : > { %527 = vmatpush.msra.mxu1 %v340_v48  ;;  %883 = vmatpush.msra.mxu3 %v5082_v50  ;;  %v5047_v10 = vld [vmem:[%s5884_s20 + $0x20] sm:$0xff]  ;;  %v5946_v18 = vld [vmem:[%s5884_s20 + $0x31] sm:$0xff]  ;;  %v5954_v20 = vld [vmem:[%s5884_s20 + $0x48] sm:$0xff] }
  0x26   : > { %689 = vmatpush.msra.mxu2 %v5033_v49  ;;  %415 = vmatpush.msra.mxu0 %v5016_v51  ;;  %v5138_v14 = vld [vmem:[%s8722_s1 + $0x260] sm:$0xff]  ;;  %v5949_v19 = vld [vmem:[%s5884_s20 + $0x32] sm:$0xff]  ;;  %v5975_v25 = vld [vmem:[%s5884_s20 + $0x49] sm:$0xff] }
  0x27   : > { %528 = vmatpush.msra.mxu1 %v339_v52  ;;  %884 = vmatpush.msra.mxu3 %v5081_v54  ;;  %v5934_v15 = vld [vmem:[%s5884_s20 + $0x21] sm:$0xff]  ;;  %v5137_v21 = vld [vmem:[%s8722_s1 + $0x258] sm:$0xff]  ;;  %v5970_v24 = vld [vmem:[%s5884_s20 + $0x50] sm:$0xff] }
  0x28   : > { %690 = vmatpush.msra.mxu2 %v5032_v53  ;;  %416 = vmatpush.msra.mxu0 %v5015_v55  ;;  %v5937_v16 = vld [vmem:[%s5884_s20 + $0x22] sm:$0xff]  ;;  %v5962_v22 = vld [vmem:[%s5884_s20 + $0x39] sm:$0xff]  ;;  %v5978_v26 = vld [vmem:[%s5884_s20 + $0x4a] sm:$0xff] }
  0x29   : > { %529 = vmatpush.msra.mxu1 %v338_v56  ;;  %885 = vmatpush.msra.mxu3 %v5080_v58  ;;  %v5965_v23 = vld [vmem:[%s5884_s20 + $0x3a] sm:$0xff]  ;;  %v5136_v28 = vld [vmem:[%s8722_s1 + $0x250] sm:$0xff]  ;;  %v5997_v31 = vld [vmem:[%s5884_s20 + $0x68] sm:$0xff] }
  0x2a   : > { %691 = vmatpush.msra.mxu2 %v5031_v57  ;;  %417 = vmatpush.msra.mxu0 %v5014_v59  ;;  %v5983_v27 = vld [vmem:[%s5884_s20 + $0x60] sm:$0xff]  ;;  %v5991_v29 = vld [vmem:[%s5884_s20 + $0x51] sm:$0xff]  ;;  %v5135_v35 = vld [vmem:[%s8722_s1 + $0x248] sm:$0xff] }
  0x2b   : > { %530 = vmatpush.msra.mxu1 %v337_v60  ;;  %886 = vmatpush.msra.mxu3 %v5079_v62  ;;  %v635_v30 = vld [vmem:[%s5884_s20 + $0x52] sm:$0xff]  ;;  %v6001_v32 = vld [vmem:[%s5884_s20 + $0x61] sm:$0xff]  ;;  %v6011_v36 = vld [vmem:[%s5884_s20 + $0x69] sm:$0xff] }
  0x2c   : > { %692 = vmatpush.msra.mxu2 %v5030_v61  ;;  %418 = vmatmul.f32.vlgmr.msra.gmra.mxu0 %v353_v63  ;;  %v636_v33 = vld [vmem:[%s5884_s20 + $0x62] sm:$0xff]  ;;  %v5054_v34 = vld [vmem:[%s5884_s20 + $0x78] sm:$0xff]  ;;  %v637_v37 = vld [vmem:[%s5884_s20 + $0x6a] sm:$0xff] }
  0x2d   : > { %531 = vmatmul.f32.vlgmr.msra.gmra.mxu1 %v305_v0  ;;  %693 = vmatmul.f32.vlgmr.msra.gmra.mxu2 %v628_v1  ;;  %v5055_v38 = vld [vmem:[%s5884_s20 + $0x80] sm:$0xff]  ;;  %v5056_v41 = vld [vmem:[%s5884_s20 + $0x90] sm:$0xff]  ;;  %v5057_v45 = vld [vmem:[%s5884_s20 + $0x98] sm:$0xff] }
  0x2e   : > { %1066 = vmatpush.msrb.mxu0 %v5141_v2  ;;  %887 = vmatpush.msra.mxu3 %v5078_v3  ;;  %v363_v39 = vld [vmem:[%s5884_s20 + $0x79] sm:$0xff]  ;;  %v364_v43 = vld [vmem:[%s5884_s20 + $0x81] sm:$0xff]  ;;  %v365_v46 = vld [vmem:[%s5884_s20 + $0x91] sm:$0xff] }
  0x2f   : > { %888 = vmatmul.f32.vlgmr.msra.gmra.mxu3 %v5046_v4  ;;  %v638_v40 = vld [vmem:[%s5884_s20 + $0x7a] sm:$0xff]  ;;  %v639_v44 = vld [vmem:[%s5884_s20 + $0x82] sm:$0xff]  ;;  %v640_v47 = vld [vmem:[%s5884_s20 + $0x92] sm:$0xff] }
  0x30   : > { %1067 = vmatpush.msrb.mxu0 %v5140_v5  ;;  %v5134_v42 = vld [vmem:[%s8722_s1 + $0x240] sm:$0xff]  ;;  %v5058_v48 = vld [vmem:[%s5884_s20 + $0xa8] sm:$0xff]  ;;  %v5133_v49 = vld [vmem:[%s8722_s1 + $0x238] sm:$0xff] }
  0x31   : > { %v366_v50 = vld [vmem:[%s5884_s20 + $0x99] sm:$0xff]  ;;  %v5059_v52 = vld [vmem:[%s5884_s20 + $0xb0] sm:$0xff]  ;;  %v5061_v59 = vld [vmem:[%s5884_s20 + $0xc8] sm:$0xff] }
  0x32   : > { %1068 = vmatpush.msrb.mxu0 %v5139_v6  ;;  %v641_v51 = vld [vmem:[%s5884_s20 + $0x9a] sm:$0xff]  ;;  %v367_v53 = vld [vmem:[%s5884_s20 + $0xa9] sm:$0xff]  ;;  %v368_v57 = vld [vmem:[%s5884_s20 + $0xb1] sm:$0xff] }
  0x33   : > { %v642_v54 = vld [vmem:[%s5884_s20 + $0xaa] sm:$0xff]  ;;  %v5060_v55 = vld [vmem:[%s5884_s20 + $0xc0] sm:$0xff]  ;;  %v643_v58 = vld [vmem:[%s5884_s20 + $0xb2] sm:$0xff] }
  0x34   : > { %421 = vmatmul.f32.gmra.mxu0 %v354_v7  ;;  %v5132_v56 = vld [vmem:[%s8722_s1 + $0x230] sm:$0xff]  ;;  %v369_v62 = vld [vmem:[%s5884_s20 + $0xc1] sm:$0xff]  ;;  %v5062_v0 = vld [vmem:[%s5884_s20 + $0xd8] sm:$0xff] }
  0x35   : > { %534 = vmatmul.f32.gmra.mxu1 %v306_v8  ;;  %696 = vmatmul.f32.gmra.mxu2 %v629_v9  ;;  %v644_v63 = vld [vmem:[%s5884_s20 + $0xc2] sm:$0xff]  ;;  %v645_v9 = vld [vmem:[%s5884_s20 + $0xca] sm:$0xff] }
  0x36   : > { %1069 = vmatpush.msrb.mxu0 %v5138_v14  ;;  %v5131_v1 = vld [vmem:[%s8722_s1 + $0x228] sm:$0xff]  ;;  %v5063_v14 = vld [vmem:[%s5884_s20 + $0xe0] sm:$0xff] }
  0x37   : > { %891 = vmatmul.f32.gmra.mxu3 %v5047_v10  ;;  %v370_v7 = vld [vmem:[%s5884_s20 + $0xc9] sm:$0xff] }
  0x38   : > { %1070 = vmatpush.msrb.mxu0 %v5137_v21 }
  0x3a   : > { %1071 = vmatpush.msrb.mxu0 %v5136_v28 }
  0x3c   : > { %424 = vmatmul.f32.gmra.mxu0 %v5919_v11 }
  0x3d   : > { %537 = vmatmul.f32.gmra.mxu1 %v5046_v4  ;;  %699 = vmatmul.f32.gmra.mxu2 %v5922_v12 }
  0x3e   : > { %1072 = vmatpush.msrb.mxu0 %v5135_v35  ;;  %v371_v35 = vld [vmem:[%s5884_s20 + $0xd9] sm:$0xff] }
  0x3f   : > { %894 = vmatmul.f32.gmra.mxu3 %v5926_v13 }
  0x40   : > { %1073 = vmatpush.msrb.mxu0 %v5134_v42 }
  0x42   : > { %1074 = vmatpush.msrb.mxu0 %v5133_v49  ;;  %v647_v49 = vld [vmem:[%s5884_s20 + $0xe2] sm:$0xff] }
  0x44   : > { %427 = vmatmul.f32.gmra.mxu0 %v5934_v15 }
  0x45   : > { %540 = vmatmul.f32.gmra.mxu1 %v5047_v10  ;;  %702 = vmatmul.f32.gmra.mxu2 %v5937_v16 }
  0x46   : > { %1075 = vmatpush.msrb.mxu0 %v5132_v56 }
  0x47   : > { %897 = vmatmul.f32.gmra.mxu3 %v5941_v17 }
  0x48   : > { %1076 = vmatpush.msrb.mxu0 %v5131_v1 }
  0x4c   : > { %430 = vmatmul.f32.gmra.mxu0 %v5946_v18 }
  0x4d   : > { %543 = vmatmul.f32.gmra.mxu1 %v5926_v13  ;;  %705 = vmatmul.f32.gmra.mxu2 %v5949_v19 }
  0x4f   : > { %900 = vmatmul.f32.gmra.mxu3 %v5954_v20 }
  0x54   : > { %433 = vmatmul.f32.gmra.mxu0 %v5962_v22 }
  0x55   : > { %546 = vmatmul.f32.gmra.mxu1 %v5941_v17  ;;  %708 = vmatmul.f32.gmra.mxu2 %v5965_v23 }
  0x57   : > { %903 = vmatmul.f32.gmra.mxu3 %v5970_v24 }
  0x5c   : > { %436 = vmatmul.f32.gmra.mxu0 %v5975_v25 }
  0x5d   : > { %549 = vmatmul.f32.gmra.mxu1 %v5954_v20  ;;  %711 = vmatmul.f32.gmra.mxu2 %v5978_v26 }
  0x5f   : > { %906 = vmatmul.f32.gmra.mxu3 %v5983_v27 }
  0x64   : > { %439 = vmatmul.f32.gmra.mxu0 %v5991_v29 }
  0x65   : > { %552 = vmatmul.f32.gmra.mxu1 %v5970_v24  ;;  %714 = vmatmul.f32.gmra.mxu2 %v635_v30 }
  0x67   : > { %909 = vmatmul.f32.gmra.mxu3 %v5997_v31 }
  0x6c   : > { %442 = vmatmul.f32.gmra.mxu0 %v6001_v32 }
  0x6d   : > { %555 = vmatmul.f32.gmra.mxu1 %v5983_v27  ;;  %717 = vmatmul.f32.gmra.mxu2 %v636_v33 }
  0x6f   : > { %912 = vmatmul.f32.gmra.mxu3 %v5054_v34 }
  0x74   : > { %445 = vmatmul.f32.gmra.mxu0 %v6011_v36 }
  0x75   : > { %558 = vmatmul.f32.gmra.mxu1 %v5997_v31  ;;  %720 = vmatmul.f32.gmra.mxu2 %v637_v37 }
  0x77   : > { %915 = vmatmul.f32.gmra.mxu3 %v5055_v38 }
  0x7c   : > { %448 = vmatmul.f32.gmra.mxu0 %v363_v39 }
  0x7d   : > { %561 = vmatmul.f32.gmra.mxu1 %v5054_v34  ;;  %723 = vmatmul.f32.gmra.mxu2 %v638_v40  ;;  %v5064_v40 = vld [vmem:[%s5884_s20 + $0xf0] sm:$0xff] }
  0x7f   : > { %918 = vmatmul.f32.gmra.mxu3 %v5056_v41 }
  0x84   : > { %451 = vmatmul.f32.gmra.mxu0 %v364_v43 }
  0x85   : > { %564 = vmatmul.f32.gmra.mxu1 %v5055_v38  ;;  %726 = vmatmul.f32.gmra.mxu2 %v639_v44  ;;  %v646_v38 = vld [vmem:[%s5884_s20 + $0xda] sm:$0xff] }
  0x87   : > { %921 = vmatmul.f32.gmra.mxu3 %v5057_v45 }
  0x8c   : > { %454 = vmatmul.f32.gmra.mxu0 %v365_v46 }
  0x8d   : > { %567 = vmatmul.f32.gmra.mxu1 %v5056_v41  ;;  %729 = vmatmul.f32.gmra.mxu2 %v640_v47  ;;  %v5130_v41 = vld [vmem:[%s8722_s1 + $0x220] sm:$0xff] }
  0x8e   : > { %1077 = vmatpush.msrb.mxu0 %v5130_v41  ;;  %v372_v47 = vld [vmem:[%s5884_s20 + $0xe1] sm:$0xff] }
  0x8f   : > { %924 = vmatmul.f32.gmra.mxu3 %v5058_v48 }
  0x94   : > { %457 = vmatmul.f32.gmra.mxu0 %v366_v50 }
  0x95   : > { %570 = vmatmul.f32.gmra.mxu1 %v5057_v45  ;;  %732 = vmatmul.f32.gmra.mxu2 %v641_v51  ;;  %v5065_v51 = vld [vmem:[%s5884_s20 + $0xf8] sm:$0xff] }
  0x97   : > { %927 = vmatmul.f32.gmra.mxu3 %v5059_v52 }
  0x9c   : > { %460 = vmatmul.f32.gmra.mxu0 %v367_v53 }
  0x9d   : > { %573 = vmatmul.f32.gmra.mxu1 %v5058_v48  ;;  %735 = vmatmul.f32.gmra.mxu2 %v642_v54 }
  0x9f   : > { %930 = vmatmul.f32.gmra.mxu3 %v5060_v55 }
  0xa4   : > { %463 = vmatmul.f32.gmra.mxu0 %v368_v57  ;;  %v373_v57 = vld [vmem:[%s5884_s20 + $0xf1] sm:$0xff] }
  0xa5   : > { %576 = vmatmul.f32.gmra.mxu1 %v5059_v52  ;;  %738 = vmatmul.f32.gmra.mxu2 %v643_v58 }
  0xa7   : > { %933 = vmatmul.f32.gmra.mxu3 %v5061_v59 }
  0xa9   : > { %v419_v60 = vpop.f32.mrf.mxu0 }
  0xaa   : > { %v532_v61 = vpop.f32.mrf.mxu1 }
  0xab   : > { %v533_v2 = vadd.f32 %v532_v61, %v419_v60  ;;  %v5066_v61 = vld [vmem:[%s5884_s20 + $0x108] sm:$0xff] }
  0xac   : > { %466 = vmatmul.f32.gmra.mxu0 %v369_v62  ;;  %v5129_v62 = vld [vmem:[%s8722_s1 + $0x218] sm:$0xff] }
  0xad   : > { %579 = vmatmul.f32.gmra.mxu1 %v5060_v55  ;;  %741 = vmatmul.f32.gmra.mxu2 %v644_v63 }
  0xae   : > { %1078 = vmatpush.msrb.mxu0 %v5129_v62  ;;  %v6099_v62 = vld [vmem:[%s5884_s20 + $0x138] sm:$0xff] }
  0xaf   : > { %936 = vmatmul.f32.gmra.mxu3 %v5062_v0 }
  0xb0   : > { %v694_v3 = vpop.f32.mrf.mxu2 }
  0xb1   : > { %v790_v4 = vadd.f32 %v694_v3, %v533_v2  ;;  %v422_v5 = vpop.f32.mrf.mxu0 }
  0xb2   : > { %v535_v6 = vpop.f32.mrf.mxu1  ;;  %v889_v8 = vpop.f32.mrf.mxu3 }
  0xb3   : > { %v6052_v10 = vadd.f32 %v889_v8, %v790_v4  ;;  %v536_v21 = vadd.f32 %v535_v6, %v422_v5  ;;  %v374_v4 = vld [vmem:[%s5884_s20 + $0xf9] sm:$0xff]  ;;  %v5067_v8 = vld [vmem:[%s5884_s20 + $0x110] sm:$0xff] }
  0xb4   : > { %469 = vmatmul.f32.gmra.mxu0 %v370_v7  ;;  %v649_v6 = vld [vmem:[%s5884_s20 + $0xfa] sm:$0xff] }
  0xb5   : > { %582 = vmatmul.f32.gmra.mxu1 %v5061_v59  ;;  %744 = vmatmul.f32.gmra.mxu2 %v645_v9  ;;  %v648_v59 = vld [vmem:[%s5884_s20 + $0xf2] sm:$0xff] }
  0xb7   : > { %939 = vmatmul.f32.gmra.mxu3 %v5063_v14 }
  0xb8   : > { %v697_v28 = vpop.f32.mrf.mxu2 }
  0xb9   : > { %v791_v30 = vadd.f32 %v697_v28, %v536_v21  ;;  %v425_v33 = vpop.f32.mrf.mxu0 }
  0xba   : > { %v538_v34 = vpop.f32.mrf.mxu1  ;;  %v892_v37 = vpop.f32.mrf.mxu3 }
  0xbb   : > { %v6057_v39 = vadd.f32 %v892_v37, %v791_v30  ;;  %v539_v42 = vadd.f32 %v538_v34, %v425_v33  ;;  %v375_v33 = vld [vmem:[%s5884_s20 + $0x109] sm:$0xff] }
  0xbc   : > { %472 = vmatmul.f32.gmra.mxu0 %v371_v35  ;;  %v650_v35 = vld [vmem:[%s5884_s20 + $0x10a] sm:$0xff] }
  0xbd   : > { %585 = vmatmul.f32.gmra.mxu1 %v5062_v0  ;;  %747 = vmatmul.f32.gmra.mxu2 %v646_v38  ;;  %v5068_v38 = vld [vmem:[%s5884_s20 + $0x120] sm:$0xff] }
  0xbf   : > { %942 = vmatmul.f32.gmra.mxu3 %v5064_v40 }
  0xc0   : > { %v700_v43 = vpop.f32.mrf.mxu2 }
  0xc1   : > { %v792_v44 = vadd.f32 %v700_v43, %v539_v42  ;;  %v428_v45 = vpop.f32.mrf.mxu0 }
  0xc2   : > { %v541_v46 = vpop.f32.mrf.mxu1  ;;  %v895_v48 = vpop.f32.mrf.mxu3 }
  0xc3   : > { %v6065_v50 = vadd.f32 %v895_v48, %v792_v44  ;;  %v542_v52 = vadd.f32 %v541_v46, %v428_v45  ;;  %v376_v46 = vld [vmem:[%s5884_s20 + $0x111] sm:$0xff] }
  0xc4   : > { %475 = vmatmul.f32.gmra.mxu0 %v372_v47  ;;  %v651_v48 = vld [vmem:[%s5884_s20 + $0x112] sm:$0xff] }
  0xc5   : > { %588 = vmatmul.f32.gmra.mxu1 %v5063_v14  ;;  %750 = vmatmul.f32.gmra.mxu2 %v647_v49 }
  0xc7   : > { %945 = vmatmul.f32.gmra.mxu3 %v5065_v51 }
  0xc8   : > { %v703_v53 = vpop.f32.mrf.mxu2 }
  0xc9   : > { %v793_v54 = vadd.f32 %v703_v53, %v542_v52  ;;  %v431_v55 = vpop.f32.mrf.mxu0 }
  0xca   : > { %v544_v56 = vpop.f32.mrf.mxu1  ;;  %v898_v58 = vpop.f32.mrf.mxu3 }
  0xcb   : > { %v6070_v60 = vadd.f32 %v898_v58, %v793_v54  ;;  %v545_v63 = vadd.f32 %v544_v56, %v431_v55 }
  0xcc   : > { %478 = vmatmul.f32.gmra.mxu0 %v373_v57  ;;  %v377_v57 = vld [vmem:[%s5884_s20 + $0x121] sm:$0xff] }
  0xcd   : > { %591 = vmatmul.f32.gmra.mxu1 %v5064_v40  ;;  %753 = vmatmul.f32.gmra.mxu2 %v648_v59  ;;  %v5128_v40 = vld [vmem:[%s8722_s1 + $0x210] sm:$0xff]  ;;  %v652_v59 = vld [vmem:[%s5884_s20 + $0x122] sm:$0xff] }
  0xce   : > { %1079 = vmatpush.msrb.mxu0 %v5128_v40  ;;  %v5234_v40 = vld [vmem:[%s8722_s1 + $0x360] sm:$0xff] }
  0xcf   : > { %948 = vmatmul.f32.gmra.mxu3 %v5066_v61 }
  0xd0   : > { %v706_v0 = vpop.f32.mrf.mxu2 }
  0xd1   : > { %v794_v1 = vadd.f32 %v706_v0, %v545_v63  ;;  %v434_v2 = vpop.f32.mrf.mxu0  ;;  %v5127_v63 = vld [vmem:[%s8722_s1 + $0x208] sm:$0xff]  ;;  %v5237_v0 = vld [vmem:[%s8722_s1 + $0x378] sm:$0xff] }
  0xd2   : > { %v547_v3 = vpop.f32.mrf.mxu1  ;;  %v901_v5 = vpop.f32.mrf.mxu3  ;;  %1080 = vmatpush.msrb.mxu0 %v5127_v63  ;;  %1455 = vmatpush.msrb.mxu2 %v5237_v0  ;;  %v5280_v63 = vld [vmem:[%s8722_s1 + $0x3d0] sm:$0xff] }
  0xd3   : > { %v6078_v7 = vadd.f32 %v901_v5, %v794_v1  ;;  %v548_v9 = vadd.f32 %v547_v3, %v434_v2  ;;  %v5189_v2 = vld [vmem:[%s8722_s1 + $0x2f8] sm:$0xff]  ;;  %v5236_v3 = vld [vmem:[%s8722_s1 + $0x370] sm:$0xff] }
  0xd4   : > { %481 = vmatmul.f32.gmra.mxu0 %v374_v4  ;;  %v5285_v4 = vld [vmem:[%s8722_s1 + $0x3f8] sm:$0xff]  ;;  %1260 = vmatpush.msrb.mxu1 %v5189_v2  ;;  %v5183_v2 = vld [vmem:[%s8722_s1 + $0x2c8] sm:$0xff] }
  0xd5   : > { %594 = vmatmul.f32.gmra.mxu1 %v5065_v51  ;;  %756 = vmatmul.f32.gmra.mxu2 %v649_v6  ;;  %v5069_v51 = vld [vmem:[%s5884_s20 + $0x128] sm:$0xff] }
  0xd6   : > { %v378_v6 = vld [vmem:[%s5884_s20 + $0x129] sm:$0xff]  ;;  %1456 = vmatpush.msrb.mxu2 %v5236_v3  ;;  %1649 = vmatpush.msrb.mxu3 %v5285_v4  ;;  %v5230_v4 = vld [vmem:[%s8722_s1 + $0x340] sm:$0xff] }
  0xd7   : > { %951 = vmatmul.f32.gmra.mxu3 %v5067_v8  ;;  %v6179_v3 = vld [vmem:[%s5884_s20 + $0x150] sm:$0xff] }
  0xd8   : > { %v709_v14 = vpop.f32.mrf.mxu2 }
  0xd9   : > { %v795_v21 = vadd.f32 %v709_v14, %v548_v9  ;;  %v437_v28 = vpop.f32.mrf.mxu0 }
  0xda   : > { %v550_v30 = vpop.f32.mrf.mxu1  ;;  %v904_v34 = vpop.f32.mrf.mxu3 }
  0xdb   : > { %v6083_v37 = vadd.f32 %v904_v34, %v795_v21  ;;  %v551_v41 = vadd.f32 %v550_v30, %v437_v28  ;;  %v5188_v21 = vld [vmem:[%s8722_s1 + $0x2f0] sm:$0xff]  ;;  %v5235_v28 = vld [vmem:[%s8722_s1 + $0x368] sm:$0xff] }
  0xdc   : > { %484 = vmatmul.f32.gmra.mxu0 %v375_v33  ;;  %v5284_v30 = vld [vmem:[%s8722_s1 + $0x3f0] sm:$0xff]  ;;  %1261 = vmatpush.msrb.mxu1 %v5188_v21 }
  0xdd   : > { %597 = vmatmul.f32.gmra.mxu1 %v5066_v61  ;;  %759 = vmatmul.f32.gmra.mxu2 %v650_v35  ;;  %v653_v34 = vld [vmem:[%s5884_s20 + $0x12a] sm:$0xff] }
  0xde   : > { %1457 = vmatpush.msrb.mxu2 %v5235_v28  ;;  %1650 = vmatpush.msrb.mxu3 %v5284_v30  ;;  %v5181_v28 = vld [vmem:[%s8722_s1 + $0x2b8] sm:$0xff] }
  0xdf   : > { %954 = vmatmul.f32.gmra.mxu3 %v5068_v38 }
  0xe0   : > { %v712_v42 = vpop.f32.mrf.mxu2  ;;  %1458 = vmatpush.msrb.mxu2 %v5234_v40 }
  0xe1   : > { %v796_v43 = vadd.f32 %v712_v42, %v551_v41  ;;  %v440_v44 = vpop.f32.mrf.mxu0  ;;  %v5283_v41 = vld [vmem:[%s8722_s1 + $0x3e8] sm:$0xff]  ;;  %v6140_v42 = vld [vmem:[%s5884_s20 + $0x140] sm:$0xff] }
  0xe2   : > { %v553_v45 = vpop.f32.mrf.mxu1  ;;  %v907_v47 = vpop.f32.mrf.mxu3  ;;  %1651 = vmatpush.msrb.mxu3 %v5283_v41  ;;  %v655_v41 = vld [vmem:[%s5884_s20 + $0x142] sm:$0xff] }
  0xe3   : > { %v6091_v49 = vadd.f32 %v907_v47, %v796_v43  ;;  %v554_v52 = vadd.f32 %v553_v45, %v440_v44  ;;  %v5186_v43 = vld [vmem:[%s8722_s1 + $0x2e0] sm:$0xff]  ;;  %v5233_v44 = vld [vmem:[%s8722_s1 + $0x358] sm:$0xff] }
  0xe4   : > { %487 = vmatmul.f32.gmra.mxu0 %v376_v46  ;;  %v5282_v45 = vld [vmem:[%s8722_s1 + $0x3e0] sm:$0xff]  ;;  %v5185_v47 = vld [vmem:[%s8722_s1 + $0x2d8] sm:$0xff]  ;;  %1459 = vmatpush.msrb.mxu2 %v5233_v44 }
  0xe5   : > { %600 = vmatmul.f32.gmra.mxu1 %v5067_v8  ;;  %762 = vmatmul.f32.gmra.mxu2 %v651_v48  ;;  %v5232_v48 = vld [vmem:[%s8722_s1 + $0x350] sm:$0xff] }
  0xe6   : > { %1652 = vmatpush.msrb.mxu3 %v5282_v45  ;;  %1460 = vmatpush.msrb.mxu2 %v5232_v48  ;;  %v5228_v45 = vld [vmem:[%s8722_s1 + $0x330] sm:$0xff]  ;;  %v5227_v48 = vld [vmem:[%s8722_s1 + $0x328] sm:$0xff] }
  0xe7   : > { %957 = vmatmul.f32.gmra.mxu3 %v5069_v51 }
  0xe8   : > { %v715_v53 = vpop.f32.mrf.mxu2 }
  0xe9   : > { %v797_v54 = vadd.f32 %v715_v53, %v554_v52  ;;  %v443_v55 = vpop.f32.mrf.mxu0 }
  0xea   : > { %v556_v56 = vpop.f32.mrf.mxu1  ;;  %v910_v58 = vpop.f32.mrf.mxu3 }
  0xeb   : > { %v6096_v61 = vadd.f32 %v910_v58, %v797_v54  ;;  %v557_v1 = vadd.f32 %v556_v56, %v443_v55  ;;  %v379_v56 = vld [vmem:[%s5884_s20 + $0x139] sm:$0xff] }
  0xec   : > { %490 = vmatmul.f32.gmra.mxu0 %v377_v57  ;;  %v5184_v57 = vld [vmem:[%s8722_s1 + $0x2d0] sm:$0xff] }
  0xed   : > { %603 = vmatmul.f32.gmra.mxu1 %v5068_v38  ;;  %765 = vmatmul.f32.gmra.mxu2 %v652_v59  ;;  %v5187_v38 = vld [vmem:[%s8722_s1 + $0x2e8] sm:$0xff]  ;;  %v654_v59 = vld [vmem:[%s5884_s20 + $0x13a] sm:$0xff] }
  0xee   : > { %1262 = vmatpush.msrb.mxu1 %v5187_v38  ;;  %v380_v38 = vld [vmem:[%s5884_s20 + $0x141] sm:$0xff] }
  0xef   : > { %960 = vmatmul.f32.gmra.mxu3 %v6099_v62 }
  0xf0   : > { %v718_v5 = vpop.f32.mrf.mxu2  ;;  %1263 = vmatpush.msrb.mxu1 %v5186_v43  ;;  %v5277_v43 = vld [vmem:[%s8722_s1 + $0x3b8] sm:$0xff] }
  0xf1   : > { %v798_v8 = vadd.f32 %v718_v5, %v557_v1  ;;  %v446_v9 = vpop.f32.mrf.mxu0  ;;  %v5231_v1 = vld [vmem:[%s8722_s1 + $0x348] sm:$0xff] }
  0xf2   : > { %v559_v14 = vpop.f32.mrf.mxu1  ;;  %v913_v33 = vpop.f32.mrf.mxu3  ;;  %1264 = vmatpush.msrb.mxu1 %v5185_v47  ;;  %v5279_v5 = vld [vmem:[%s8722_s1 + $0x3c8] sm:$0xff]  ;;  %1461 = vmatpush.msrb.mxu2 %v5231_v1  ;;  %v6218_v47 = vld [vmem:[%s5884_s20 + $0x158] sm:$0xff] }
  0xf3   : > { %v6128_v35 = vadd.f32 %v913_v33, %v798_v8  ;;  %v560_v46 = vadd.f32 %v559_v14, %v446_v9  ;;  %v5229_v9 = vld [vmem:[%s8722_s1 + $0x338] sm:$0xff]  ;;  %v5278_v14 = vld [vmem:[%s8722_s1 + $0x3c0] sm:$0xff] }
  0xf4   : > { %493 = vmatmul.f32.gmra.mxu0 %v378_v6  ;;  %1265 = vmatpush.msrb.mxu1 %v5184_v57  ;;  %v5126_v6 = vld [vmem:[%s8722_s1 + $0x200] sm:$0xff] }
  0xf5   : > { %606 = vmatmul.f32.gmra.mxu1 %v5069_v51  ;;  %768 = vmatmul.f32.gmra.mxu2 %v653_v34  ;;  %v5281_v51 = vld [vmem:[%s8722_s1 + $0x3d8] sm:$0xff] }
  0xf6   : > { %1653 = vmatpush.msrb.mxu3 %v5281_v51  ;;  %1266 = vmatpush.msrb.mxu1 %v5183_v2  ;;  %v5276_v51 = vld [vmem:[%s8722_s1 + $0x3b0] sm:$0xff] }
  0xf7   : > { %963 = vmatmul.f32.gmra.mxu3 %v6140_v42  ;;  %1081 = vmatpush.msrb.mxu0 %v5126_v6  ;;  %v656_v2 = vld [vmem:[%s5884_s20 + $0x152] sm:$0xff] }
  0xf8   : > { %v721_v52 = vpop.f32.mrf.mxu2  ;;  %1654 = vmatpush.msrb.mxu3 %v5280_v63  ;;  %1462 = vmatpush.msrb.mxu2 %v5230_v4  ;;  %v381_v63 = vld [vmem:[%s5884_s20 + $0x151] sm:$0xff]  ;;  %v5274_v4 = vld [vmem:[%s8722_s1 + $0x3a0] sm:$0xff] }
  0xf9   : > { %v799_v53 = vadd.f32 %v721_v52, %v560_v46  ;;  %v449_v54 = vpop.f32.mrf.mxu0  ;;  %v5180_v46 = vld [vmem:[%s8722_s1 + $0x2b0] sm:$0xff]  ;;  %v5225_v6 = vld [vmem:[%s8722_s1 + $0x318] sm:$0xff] }
  0xfa   : > { %v562_v55 = vpop.f32.mrf.mxu1  ;;  %v916_v58 = vpop.f32.mrf.mxu3  ;;  %1655 = vmatpush.msrb.mxu3 %v5279_v5  ;;  %1463 = vmatpush.msrb.mxu2 %v5229_v9  ;;  %v5224_v9 = vld [vmem:[%s8722_s1 + $0x310] sm:$0xff] }
  0xfb   : > { %v6169_v0 = vadd.f32 %v916_v58, %v799_v53  ;;  %v563_v8 = vadd.f32 %v562_v55, %v449_v54  ;;  %v5226_v53 = vld [vmem:[%s8722_s1 + $0x320] sm:$0xff]  ;;  %v5275_v54 = vld [vmem:[%s8722_s1 + $0x3a8] sm:$0xff] }
  0xfc   : > { %496 = vmatmul.f32.gmra.mxu0 %v379_v56  ;;  %1656 = vmatpush.msrb.mxu3 %v5278_v14  ;;  %v5178_v56 = vld [vmem:[%s8722_s1 + $0x2a0] sm:$0xff]  ;;  %v5273_v14 = vld [vmem:[%s8722_s1 + $0x398] sm:$0xff] }
  0xfd   : > { %609 = vmatmul.f32.gmra.mxu1 %v6099_v62  ;;  %771 = vmatmul.f32.gmra.mxu2 %v654_v59  ;;  %v5182_v62 = vld [vmem:[%s8722_s1 + $0x2c0] sm:$0xff] }
  0xfe   : > { %1267 = vmatpush.msrb.mxu1 %v5182_v62  ;;  %1657 = vmatpush.msrb.mxu3 %v5277_v43  ;;  %v5177_v62 = vld [vmem:[%s8722_s1 + $0x298] sm:$0xff] }
  0xff   : > { %966 = vmatmul.f32.gmra.mxu3 %v6179_v3  ;;  %1464 = vmatpush.msrb.mxu2 %v5228_v45  ;;  %v382_v45 = vld [vmem:[%s5884_s20 + $0x159] sm:$0xff] }
 0x100   : > { %v724_v21 = vpop.f32.mrf.mxu2  ;;  %1268 = vmatpush.msrb.mxu1 %v5181_v28  ;;  %1658 = vmatpush.msrb.mxu3 %v5276_v51  ;;  %v5271_v51 = vld [vmem:[%s8722_s1 + $0x388] sm:$0xff] }
 0x101   : > { %v800_v30 = vadd.f32 %v724_v21, %v563_v8  ;;  %v452_v33 = vpop.f32.mrf.mxu0  ;;  %1465 = vmatpush.msrb.mxu2 %v5227_v48  ;;  %v5074_v8 = vld [vmem:[%s5884_s20 + $0x168] sm:$0xff]  ;;  %v5333_v21 = vld [vmem:[%s8722_s1 + $0x478] sm:$0xff] }
 0x102   : > { %v565_v34 = vpop.f32.mrf.mxu1  ;;  %v919_v40 = vpop.f32.mrf.mxu3  ;;  %1269 = vmatpush.msrb.mxu1 %v5180_v46  ;;  %1659 = vmatpush.msrb.mxu3 %v5275_v54  ;;  %v657_v48 = vld [vmem:[%s5884_s20 + $0x15a] sm:$0xff]  ;;  %v5075_v54 = vld [vmem:[%s5884_s20 + $0x170] sm:$0xff] }
 0x103   : > { %v6208_v44 = vadd.f32 %v919_v40, %v800_v30  ;;  %v566_v52 = vadd.f32 %v565_v34, %v452_v33  ;;  %1466 = vmatpush.msrb.mxu2 %v5226_v53  ;;  %v5223_v30 = vld [vmem:[%s8722_s1 + $0x308] sm:$0xff]  ;;  %v5272_v33 = vld [vmem:[%s8722_s1 + $0x390] sm:$0xff]  ;;  %1843 = vmatpush.msra.mxu0 %v5333_v21  ;;  %v5174_v53 = vld [vmem:[%s8722_s1 + $0x280] sm:$0xff] }
 0x104   : > { %499 = vmatmul.f32.gmra.mxu0 %v380_v38  ;;  %1660 = vmatpush.msrb.mxu3 %v5274_v4  ;;  %v5175_v38 = vld [vmem:[%s8722_s1 + $0x288] sm:$0xff] }
 0x105   : > { %612 = vmatmul.f32.gmra.mxu1 %v6140_v42  ;;  %774 = vmatmul.f32.gmra.mxu2 %v655_v41  ;;  %v5179_v42 = vld [vmem:[%s8722_s1 + $0x2a8] sm:$0xff] }
 0x106   : > { %1270 = vmatpush.msrb.mxu1 %v5179_v42  ;;  %1467 = vmatpush.msrb.mxu2 %v5225_v6  ;;  %v5076_v6 = vld [vmem:[%s5884_s20 + $0x180] sm:$0xff] }
 0x107   : > { %969 = vmatmul.f32.gmra.mxu3 %v6218_v47 }
 0x108   : > { %v727_v55 = vpop.f32.mrf.mxu2  ;;  %1271 = vmatpush.msrb.mxu1 %v5178_v56  ;;  %1468 = vmatpush.msrb.mxu2 %v5224_v9 }
 0x109   : > { %v801_v57 = vadd.f32 %v727_v55, %v566_v52  ;;  %v455_v58 = vpop.f32.mrf.mxu0  ;;  %1661 = vmatpush.msrb.mxu3 %v5273_v14  ;;  %v5222_v52 = vld [vmem:[%s8722_s1 + $0x300] sm:$0xff] }
 0x10a   : > { %v568_v59 = vpop.f32.mrf.mxu1  ;;  %v922_v1 = vpop.f32.mrf.mxu3  ;;  %1272 = vmatpush.msrb.mxu1 %v5177_v62  ;;  %1469 = vmatpush.msrb.mxu2 %v5223_v30  ;;  %v5270_v55 = vld [vmem:[%s8722_s1 + $0x380] sm:$0xff]  ;;  %v5332_v62 = vld [vmem:[%s8722_s1 + $0x470] sm:$0xff] }
 0x10b   : > { %v6244_v5 = vadd.f32 %v922_v1, %v801_v57  ;;  %v569_v28 = vadd.f32 %v568_v59, %v455_v58  ;;  %1662 = vmatpush.msrb.mxu3 %v5272_v33  ;;  %v383_v1 = vld [vmem:[%s5884_s20 + $0x169] sm:$0xff]  ;;  %1844 = vmatpush.msra.mxu0 %v5332_v62  ;;  %v6302_v30 = vld [vmem:[%s5884_s20 + $0x171] sm:$0xff] }
 0x10c   : > { %502 = vmatmul.f32.gmra.mxu0 %v381_v63  ;;  %1470 = vmatpush.msrb.mxu2 %v5222_v52  ;;  %v5331_v52 = vld [vmem:[%s8722_s1 + $0x468] sm:$0xff] }
 0x10d   : > { %615 = vmatmul.f32.gmra.mxu1 %v6179_v3  ;;  %777 = vmatmul.f32.gmra.mxu2 %v656_v2  ;;  %v5176_v3 = vld [vmem:[%s8722_s1 + $0x290] sm:$0xff] }
 0x10e   : > { %1273 = vmatpush.msrb.mxu1 %v5176_v3  ;;  %1663 = vmatpush.msrb.mxu3 %v5271_v51  ;;  %v658_v2 = vld [vmem:[%s5884_s20 + $0x16a] sm:$0xff] }
 0x10f   : > { %972 = vmatmul.f32.gmra.mxu3 %v5074_v8  ;;  %1845 = vmatpush.msra.mxu0 %v5331_v52 }
 0x110   : > { %v730_v34 = vpop.f32.mrf.mxu2  ;;  %1274 = vmatpush.msrb.mxu1 %v5175_v38  ;;  %1664 = vmatpush.msrb.mxu3 %v5270_v55 }
 0x111   : > { %v802_v40 = vadd.f32 %v730_v34, %v569_v28  ;;  %v458_v41 = vpop.f32.mrf.mxu0  ;;  %v659_v34 = vld [vmem:[%s5884_s20 + $0x172] sm:$0xff] }
 0x112   : > { %v571_v43 = vpop.f32.mrf.mxu1  ;;  %v925_v46 = vpop.f32.mrf.mxu3  ;;  %1275 = vmatpush.msrb.mxu1 %v5174_v53 }
 0x113   : > { %v6280_v42 = vadd.f32 %v925_v46, %v802_v40  ;;  %v572_v56 = vadd.f32 %v571_v43, %v458_v41 }
 0x114   : > { %505 = vmatmul.f32.gmra.mxu0 %v382_v45 }
 0x115   : > { %618 = vmatmul.f32.gmra.mxu1 %v6218_v47  ;;  %780 = vmatmul.f32.gmra.mxu2 %v657_v48 }
 0x117   : > { %975 = vmatmul.f32.gmra.mxu3 %v5075_v54 }
 0x118   : > { %v733_v57 = vpop.f32.mrf.mxu2 }
 0x119   : > { %v803_v58 = vadd.f32 %v733_v57, %v572_v56  ;;  %v461_v59 = vpop.f32.mrf.mxu0 }
 0x11a   : > { %v574_v63 = vpop.f32.mrf.mxu1  ;;  %v928_v47 = vpop.f32.mrf.mxu3 }
 0x11b   : > { %v6295_v4 = vadd.f32 %v928_v47, %v803_v58  ;;  %v575_v9 = vadd.f32 %v574_v63, %v461_v59 }
 0x11c   : > { %508 = vmatmul.f32.gmra.mxu0 %v383_v1 }
 0x11d   : > { %621 = vmatmul.f32.gmra.mxu1 %v5074_v8  ;;  %783 = vmatmul.f32.gmra.mxu2 %v658_v2  ;;  %v6309_v8 = vld [vmem:[%s5884_s20 + $0x188] sm:$0xff] }
 0x11f   : > { %978 = vmatmul.f32.gmra.mxu3 %v5076_v6 }
 0x120   : > { %v736_v14 = vpop.f32.mrf.mxu2 }
 0x121   : > { %v804_v21 = vadd.f32 %v736_v14, %v575_v9  ;;  %v464_v3 = vpop.f32.mrf.mxu0 }
 0x122   : > { %v577_v28 = vpop.f32.mrf.mxu1  ;;  %v931_v33 = vpop.f32.mrf.mxu3 }
 0x123   : > { %v6305_v38 = vadd.f32 %v931_v33, %v804_v21  ;;  %v578_v40 = vadd.f32 %v577_v28, %v464_v3 }
 0x124   : > { %511 = vmatmul.f32.gmra.mxu0 %v6302_v30 }
 0x125   : > { %624 = vmatmul.f32.gmra.mxu1 %v5075_v54  ;;  %786 = vmatmul.f32.gmra.mxu2 %v659_v34 }
 0x127   : > { %981 = vmatmul.f32.gmra.mxu3 %v6309_v8 }
 0x128   : > { %v739_v41 = vpop.f32.mrf.mxu2 }
 0x129   : > { %v805_v43 = vadd.f32 %v739_v41, %v578_v40  ;;  %v467_v45 = vpop.f32.mrf.mxu0 }
 0x12a   : > { %v580_v46 = vpop.f32.mrf.mxu1  ;;  %v934_v48 = vpop.f32.mrf.mxu3 }
 0x12b   : > { %v6312_v51 = vadd.f32 %v934_v48, %v805_v43  ;;  %v581_v53 = vadd.f32 %v580_v46, %v467_v45  ;;  %v5099_v43 = vld [vmem:[%s5884_s20 + $0x51] sm:$0xff] }
 0x12c   : > { %1082 = vmatmul.f32.vlgmr.msrb.gmra.mxu0 %v5919_v11 }
 0x12d   : > { %1276 = vmatmul.f32.vlgmr.msrb.gmra.mxu1 %v5922_v12  ;;  %1471 = vmatmul.f32.vlgmr.msrb.gmra.mxu2 %v5926_v13 }
 0x12f   : > { %1665 = vmatmul.f32.vlgmr.msrb.gmra.mxu3 %v5946_v18 }
 0x130   : > { %v742_v54 = vpop.f32.mrf.mxu2 }
 0x131   : > { %v806_v55 = vadd.f32 %v742_v54, %v581_v53  ;;  %v470_v56 = vpop.f32.mrf.mxu0  ;;  %v5100_v53 = vld [vmem:[%s5884_s20 + $0x61] sm:$0xff] }
 0x132   : > { %v583_v57 = vpop.f32.mrf.mxu1  ;;  %v937_v58 = vpop.f32.mrf.mxu3  ;;  %v6362_v54 = vld [vmem:[%s5884_s20 + $0x62] sm:$0xff] }
 0x133   : > { %v6321_v59 = vadd.f32 %v937_v58, %v806_v55  ;;  %v584_v11 = vadd.f32 %v583_v57, %v470_v56  ;;  %v5196_v56 = vld [vmem:[%s5884_s20 + $0x78] sm:$0xff] }
 0x134   : > { %1085 = vmatmul.f32.gmra.mxu0 %v5934_v15  ;;  %v5330_v15 = vld [vmem:[%s8722_s1 + $0x460] sm:$0xff] }
 0x135   : > { %1279 = vmatmul.f32.gmra.mxu1 %v5937_v16  ;;  %1474 = vmatmul.f32.gmra.mxu2 %v5941_v17 }
 0x136   : > { %1846 = vmatpush.msra.mxu0 %v5330_v15 }
 0x137   : > { %1668 = vmatmul.f32.gmra.mxu3 %v5962_v22 }
 0x138   : > { %v745_v12 = vpop.f32.mrf.mxu2 }
 0x139   : > { %v807_v13 = vadd.f32 %v745_v12, %v584_v11  ;;  %v473_v63 = vpop.f32.mrf.mxu0 }
 0x13a   : > { %v586_v1 = vpop.f32.mrf.mxu1  ;;  %v940_v47 = vpop.f32.mrf.mxu3 }
 0x13b   : > { %v6327_v2 = vadd.f32 %v940_v47, %v807_v13  ;;  %v587_v16 = vadd.f32 %v586_v1, %v473_v63  ;;  %v5101_v1 = vld [vmem:[%s5884_s20 + $0x69] sm:$0xff] }
 0x13c   : > { %1088 = vmatmul.f32.gmra.mxu0 %v5946_v18  ;;  %v6374_v47 = vld [vmem:[%s5884_s20 + $0x6a] sm:$0xff] }
 0x13d   : > { %1282 = vmatmul.f32.gmra.mxu1 %v5949_v19  ;;  %1477 = vmatmul.f32.gmra.mxu2 %v5954_v20 }
 0x13f   : > { %1671 = vmatmul.f32.gmra.mxu3 %v5975_v25 }
 0x140   : > { %v748_v17 = vpop.f32.mrf.mxu2 }
 0x141   : > { %v808_v6 = vadd.f32 %v748_v17, %v587_v16  ;;  %v476_v62 = vpop.f32.mrf.mxu0  ;;  %v5197_v16 = vld [vmem:[%s5884_s20 + $0x80] sm:$0xff] }
 0x142   : > { %v589_v9 = vpop.f32.mrf.mxu1  ;;  %v943_v14 = vpop.f32.mrf.mxu3 }
 0x143   : > { %v6336_v21 = vadd.f32 %v943_v14, %v808_v6  ;;  %v590_v18 = vadd.f32 %v589_v9, %v476_v62  ;;  %v5245_v6 = vld [vmem:[%s5884_s20 + $0x81] sm:$0xff] }
 0x144   : > { %1091 = vmatmul.f32.gmra.mxu0 %v5962_v22  ;;  %v5329_v22 = vld [vmem:[%s8722_s1 + $0x458] sm:$0xff] }
 0x145   : > { %1285 = vmatmul.f32.gmra.mxu1 %v5965_v23  ;;  %1480 = vmatmul.f32.gmra.mxu2 %v5970_v24 }
 0x146   : > { %1847 = vmatpush.msra.mxu0 %v5329_v22  ;;  %v5246_v22 = vld [vmem:[%s5884_s20 + $0x91] sm:$0xff] }
 0x147   : > { %1674 = vmatmul.f32.gmra.mxu3 %v5991_v29 }
 0x148   : > { %v751_v19 = vpop.f32.mrf.mxu2 }
 0x149   : > { %v809_v20 = vadd.f32 %v751_v19, %v590_v18  ;;  %v479_v3 = vpop.f32.mrf.mxu0 }
 0x14a   : > { %v592_v28 = vpop.f32.mrf.mxu1  ;;  %v946_v33 = vpop.f32.mrf.mxu3 }
 0x14b   : > { %v6342_v34 = vadd.f32 %v946_v33, %v809_v20  ;;  %v593_v23 = vadd.f32 %v592_v28, %v479_v3  ;;  %v6382_v20 = vld [vmem:[%s5884_s20 + $0x7a] sm:$0xff]  ;;  %v5198_v28 = vld [vmem:[%s5884_s20 + $0x90] sm:$0xff] }
 0x14c   : > { %1094 = vmatmul.f32.gmra.mxu0 %v5975_v25  ;;  %v6353_v25 = vld [vmem:[%s5884_s20 + $0x52] sm:$0xff] }
 0x14d   : > { %1288 = vmatmul.f32.gmra.mxu1 %v5978_v26  ;;  %1483 = vmatmul.f32.gmra.mxu2 %v5983_v27 }
 0x14f   : > { %1677 = vmatmul.f32.gmra.mxu3 %v6001_v32 }
 0x150   : > { %v754_v24 = vpop.f32.mrf.mxu2 }
 0x151   : > { %v810_v29 = vadd.f32 %v754_v24, %v593_v23  ;;  %v482_v40 = vpop.f32.mrf.mxu0  ;;  %v5327_v23 = vld [vmem:[%s8722_s1 + $0x448] sm:$0xff] }
 0x152   : > { %v595_v41 = vpop.f32.mrf.mxu1  ;;  %v949_v26 = vpop.f32.mrf.mxu3 }
 0x153   : > { %v6355_v27 = vadd.f32 %v949_v26, %v810_v29  ;;  %v596_v32 = vadd.f32 %v595_v41, %v482_v40  ;;  %v6393_v26 = vld [vmem:[%s5884_s20 + $0x82] sm:$0xff] }
 0x154   : > { %1097 = vmatmul.f32.gmra.mxu0 %v5099_v43 }
 0x155   : > { %1291 = vmatmul.f32.gmra.mxu1 %v6353_v25  ;;  %1486 = vmatmul.f32.gmra.mxu2 %v5997_v31  ;;  %v5244_v31 = vld [vmem:[%s5884_s20 + $0x79] sm:$0xff] }
 0x157   : > { %1680 = vmatmul.f32.gmra.mxu3 %v6011_v36  ;;  %v5328_v36 = vld [vmem:[%s8722_s1 + $0x450] sm:$0xff] }
 0x158   : > { %v757_v45 = vpop.f32.mrf.mxu2  ;;  %1848 = vmatpush.msra.mxu0 %v5328_v36  ;;  %v6401_v36 = vld [vmem:[%s5884_s20 + $0x92] sm:$0xff] }
 0x159   : > { %v811_v46 = vadd.f32 %v757_v45, %v596_v32  ;;  %v485_v48 = vpop.f32.mrf.mxu0  ;;  %v5199_v45 = vld [vmem:[%s5884_s20 + $0x98] sm:$0xff] }
 0x15a   : > { %v598_v52 = vpop.f32.mrf.mxu1  ;;  %v952_v55 = vpop.f32.mrf.mxu3  ;;  %1849 = vmatpush.msra.mxu0 %v5327_v23 }
 0x15b   : > { %v6365_v57 = vadd.f32 %v952_v55, %v811_v46  ;;  %v599_v58 = vadd.f32 %v598_v52, %v485_v48  ;;  %v5247_v48 = vld [vmem:[%s5884_s20 + $0x99] sm:$0xff] }
 0x15c   : > { %1100 = vmatmul.f32.gmra.mxu0 %v5100_v53 }
 0x15d   : > { %1294 = vmatmul.f32.gmra.mxu1 %v6362_v54  ;;  %1489 = vmatmul.f32.gmra.mxu2 %v5196_v56 }
 0x15f   : > { %1683 = vmatmul.f32.gmra.mxu3 %v5244_v31 }
 0x160   : > { %v760_v11 = vpop.f32.mrf.mxu2 }
 0x161   : > { %v812_v12 = vadd.f32 %v760_v11, %v599_v58  ;;  %v488_v13 = vpop.f32.mrf.mxu0  ;;  %v5200_v11 = vld [vmem:[%s5884_s20 + $0xa8] sm:$0xff] }
 0x162   : > { %v601_v63 = vpop.f32.mrf.mxu1  ;;  %v955_v15 = vpop.f32.mrf.mxu3 }
 0x163   : > { %v6377_v17 = vadd.f32 %v955_v15, %v812_v12  ;;  %v602_v62 = vadd.f32 %v601_v63, %v488_v13  ;;  %v5248_v13 = vld [vmem:[%s5884_s20 + $0xa9] sm:$0xff]  ;;  %v5326_v63 = vld [vmem:[%s8722_s1 + $0x440] sm:$0xff] }
 0x164   : > { %1103 = vmatmul.f32.gmra.mxu0 %v5101_v1 }
 0x165   : > { %8733 = vst [vmem:[#allocation4_spill] sm:$0xff] %v6377_v17  ;;  %1297 = vmatmul.f32.gmra.mxu1 %v6374_v47  ;;  %1492 = vmatmul.f32.gmra.mxu2 %v5197_v16 }
 0x166   : > { %1850 = vmatpush.msra.mxu0 %v5326_v63 }
 0x167   : > { %1686 = vmatmul.f32.gmra.mxu3 %v5245_v6 }
 0x168   : > { %v763_v9 = vpop.f32.mrf.mxu2 }
 0x169   : > { %v813_v14 = vadd.f32 %v763_v9, %v602_v62  ;;  %v491_v18 = vpop.f32.mrf.mxu0  ;;  %v6412_v9 = vld [vmem:[%s5884_s20 + $0x9a] sm:$0xff] }
 0x16a   : > { %v604_v19 = vpop.f32.mrf.mxu1  ;;  %v958_v3 = vpop.f32.mrf.mxu3 }
 0x16b   : > { %v6385_v33 = vadd.f32 %v958_v3, %v813_v14  ;;  %v605_v24 = vadd.f32 %v604_v19, %v491_v18  ;;  %v5201_v18 = vld [vmem:[%s5884_s20 + $0xb0] sm:$0xff] }
 0x16c   : > { %1106 = vmatmul.f32.gmra.mxu0 %v5244_v31  ;;  %v5249_v3 = vld [vmem:[%s5884_s20 + $0xb1] sm:$0xff] }
 0x16d   : > { %8734 = vst [vmem:[#allocation5_spill] sm:$0xff] %v6385_v33  ;;  %1300 = vmatmul.f32.gmra.mxu1 %v6382_v20  ;;  %1495 = vmatmul.f32.gmra.mxu2 %v5198_v28 }
 0x16f   : > { %1689 = vmatmul.f32.gmra.mxu3 %v5246_v22 }
 0x170   : > { %v766_v29 = vpop.f32.mrf.mxu2 }
 0x171   : > { %v814_v40 = vadd.f32 %v766_v29, %v605_v24  ;;  %v494_v41 = vpop.f32.mrf.mxu0 }
 0x172   : > { %v607_v43 = vpop.f32.mrf.mxu1  ;;  %v961_v32 = vpop.f32.mrf.mxu3 }
 0x173   : > { %v6396_v46 = vadd.f32 %v961_v32, %v814_v40  ;;  %v608_v52 = vadd.f32 %v607_v43, %v494_v41  ;;  %v6420_v40 = vld [vmem:[%s5884_s20 + $0xaa] sm:$0xff]  ;;  %v5202_v43 = vld [vmem:[%s5884_s20 + $0xc0] sm:$0xff] }
 0x174   : > { %1109 = vmatmul.f32.gmra.mxu0 %v5245_v6 }
 0x175   : > { %8735 = vst [vmem:[#allocation6_spill] sm:$0xff] %v6396_v46  ;;  %1303 = vmatmul.f32.gmra.mxu1 %v6393_v26  ;;  %1498 = vmatmul.f32.gmra.mxu2 %v5199_v45  ;;  %v5250_v45 = vld [vmem:[%s5884_s20 + $0xc1] sm:$0xff] }
 0x177   : > { %1692 = vmatmul.f32.gmra.mxu3 %v5247_v48 }
 0x178   : > { %v769_v53 = vpop.f32.mrf.mxu2 }
 0x179   : > { %v815_v55 = vadd.f32 %v769_v53, %v608_v52  ;;  %v497_v56 = vpop.f32.mrf.mxu0 }
 0x17a   : > { %v610_v31 = vpop.f32.mrf.mxu1  ;;  %v964_v58 = vpop.f32.mrf.mxu3 }
 0x17b   : > { %v6404_v12 = vadd.f32 %v964_v58, %v815_v55  ;;  %v611_v1 = vadd.f32 %v610_v31, %v497_v56  ;;  %v6431_v58 = vld [vmem:[%s5884_s20 + $0xb2] sm:$0xff] }
 0x17c   : > { %1112 = vmatmul.f32.gmra.mxu0 %v5246_v22 }
 0x17d   : > { %8736 = vst [vmem:[#allocation7_spill] sm:$0xff] %v6404_v12  ;;  %1306 = vmatmul.f32.gmra.mxu1 %v6401_v36  ;;  %1501 = vmatmul.f32.gmra.mxu2 %v5200_v11 }
 0x17f   : > { %1695 = vmatmul.f32.gmra.mxu3 %v5248_v13 }
 0x180   : > { %v772_v15 = vpop.f32.mrf.mxu2 }
 0x181   : > { %v816_v16 = vadd.f32 %v772_v15, %v611_v1  ;;  %v500_v6 = vpop.f32.mrf.mxu0  ;;  %v5251_v1 = vld [vmem:[%s5884_s20 + $0xc9] sm:$0xff] }
 0x182   : > { %v613_v62 = vpop.f32.mrf.mxu1  ;;  %v967_v14 = vpop.f32.mrf.mxu3 }
 0x183   : > { %v6415_v19 = vadd.f32 %v967_v14, %v816_v16  ;;  %v614_v28 = vadd.f32 %v613_v62, %v500_v6 }
 0x184   : > { %1115 = vmatmul.f32.gmra.mxu0 %v5247_v48  ;;  %v5325_v48 = vld [vmem:[%s8722_s1 + $0x438] sm:$0xff] }
 0x185   : > { %8737 = vst [vmem:[#allocation8_spill] sm:$0xff] %v6415_v19  ;;  %1309 = vmatmul.f32.gmra.mxu1 %v6412_v9  ;;  %1504 = vmatmul.f32.gmra.mxu2 %v5201_v18  ;;  %v6439_v18 = vld [vmem:[%s5884_s20 + $0xc2] sm:$0xff] }
 0x186   : > { %1851 = vmatpush.msra.mxu0 %v5325_v48  ;;  %v5269_v19 = vld [vmem:[%s5884_s20 + $0x1a1] sm:$0xff] }
 0x187   : > { %1698 = vmatmul.f32.gmra.mxu3 %v5249_v3 }
 0x188   : > { %v775_v22 = vpop.f32.mrf.mxu2 }
 0x189   : > { %v817_v23 = vadd.f32 %v775_v22, %v614_v28  ;;  %v503_v24 = vpop.f32.mrf.mxu0  ;;  %v5204_v22 = vld [vmem:[%s5884_s20 + $0xd8] sm:$0xff] }
 0x18a   : > { %v616_v29 = vpop.f32.mrf.mxu1  ;;  %v970_v41 = vpop.f32.mrf.mxu3 }
 0x18b   : > { %v6423_v32 = vadd.f32 %v970_v41, %v817_v23  ;;  %v617_v52 = vadd.f32 %v616_v29, %v503_v24  ;;  %v5324_v24 = vld [vmem:[%s8722_s1 + $0x430] sm:$0xff] }
 0x18c   : > { %1118 = vmatmul.f32.gmra.mxu0 %v5248_v13  ;;  %v5203_v13 = vld [vmem:[%s5884_s20 + $0xc8] sm:$0xff] }
 0x18d   : > { %8738 = vst [vmem:[#allocation9_spill] sm:$0xff] %v6423_v32  ;;  %1312 = vmatmul.f32.gmra.mxu1 %v6420_v40  ;;  %1507 = vmatmul.f32.gmra.mxu2 %v5202_v43  ;;  %v5173_v32 = vld [vmem:[%s5884_s20 + $0x18a] sm:$0xff] }
 0x18e   : > { %1852 = vmatpush.msra.mxu0 %v5324_v24 }
 0x18f   : > { %1701 = vmatmul.f32.gmra.mxu3 %v5250_v45 }
 0x190   : > { %v778_v53 = vpop.f32.mrf.mxu2 }
 0x191   : > { %v818_v55 = vadd.f32 %v778_v53, %v617_v52  ;;  %v506_v56 = vpop.f32.mrf.mxu0  ;;  %v6450_v53 = vld [vmem:[%s5884_s20 + $0xca] sm:$0xff] }
 0x192   : > { %v619_v31 = vpop.f32.mrf.mxu1  ;;  %v973_v11 = vpop.f32.mrf.mxu3 }
 0x193   : > { %v6434_v63 = vadd.f32 %v973_v11, %v818_v55  ;;  %v620_v15 = vadd.f32 %v619_v31, %v506_v56  ;;  %v5205_v55 = vld [vmem:[%s5884_s20 + $0xe0] sm:$0xff] }
 0x194   : > { %1121 = vmatmul.f32.gmra.mxu0 %v5249_v3  ;;  %v5252_v3 = vld [vmem:[%s5884_s20 + $0xd9] sm:$0xff]  ;;  %v5253_v31 = vld [vmem:[%s5884_s20 + $0xe1] sm:$0xff] }
 0x195   : > { %8739 = vst [vmem:[#allocation10_spill] sm:$0xff] %v6434_v63  ;;  %1315 = vmatmul.f32.gmra.mxu1 %v6431_v58  ;;  %1510 = vmatmul.f32.gmra.mxu2 %v5203_v13 }
 0x197   : > { %1704 = vmatmul.f32.gmra.mxu3 %v5251_v1 }
 0x198   : > { %v781_v16 = vpop.f32.mrf.mxu2 }
 0x199   : > { %v819_v6 = vadd.f32 %v781_v16, %v620_v15  ;;  %v509_v62 = vpop.f32.mrf.mxu0 }
 0x19a   : > { %v622_v14 = vpop.f32.mrf.mxu1  ;;  %v976_v28 = vpop.f32.mrf.mxu3 }
 0x19b   : > { %v6442_v23 = vadd.f32 %v976_v28, %v819_v6  ;;  %v623_v29 = vadd.f32 %v622_v14, %v509_v62  ;;  %v6458_v62 = vld [vmem:[%s5884_s20 + $0xda] sm:$0xff] }
 0x19c   : > { %1124 = vmatmul.f32.gmra.mxu0 %v5250_v45 }
 0x19d   : > { %8740 = vst [vmem:[#allocation11_spill] sm:$0xff] %v6442_v23  ;;  %1318 = vmatmul.f32.gmra.mxu1 %v6439_v18  ;;  %1513 = vmatmul.f32.gmra.mxu2 %v5204_v22  ;;  %v5206_v22 = vld [vmem:[%s5884_s20 + $0xf0] sm:$0xff] }
 0x19f   : > { %1707 = vmatmul.f32.gmra.mxu3 %v5252_v3 }
 0x1a0   : > { %v784_v41 = vpop.f32.mrf.mxu2 }
 0x1a1   : > { %v820_v43 = vadd.f32 %v784_v41, %v623_v29  ;;  %v512_v48 = vpop.f32.mrf.mxu0  ;;  %v5254_v29 = vld [vmem:[%s5884_s20 + $0xf1] sm:$0xff]  ;;  %v5323_v41 = vld [vmem:[%s8722_s1 + $0x428] sm:$0xff] }
 0x1a2   : > { %v625_v52 = vpop.f32.mrf.mxu1  ;;  %v979_v45 = vpop.f32.mrf.mxu3  ;;  %1853 = vmatpush.msra.mxu0 %v5323_v41 }
 0x1a3   : > { %v6453_v56 = vadd.f32 %v979_v45, %v820_v43  ;;  %v626_v11 = vadd.f32 %v625_v52, %v512_v48  ;;  %v6470_v45 = vld [vmem:[%s5884_s20 + $0xe2] sm:$0xff] }
 0x1a4   : > { %1127 = vmatmul.f32.gmra.mxu0 %v5251_v1 }
 0x1a5   : > { %8741 = vst [vmem:[#allocation12_spill] sm:$0xff] %v6453_v56  ;;  %1321 = vmatmul.f32.gmra.mxu1 %v6450_v53  ;;  %1516 = vmatmul.f32.gmra.mxu2 %v5205_v55  ;;  %v5164_v56 = vld [vmem:[%s5884_s20 + $0x122] sm:$0xff] }
 0x1a7   : > { %1710 = vmatmul.f32.gmra.mxu3 %v5253_v31 }
 0x1a8   : > { %v787_v13 = vpop.f32.mrf.mxu2 }
 0x1a9   : > { %v821_v15 = vadd.f32 %v787_v13, %v626_v11  ;;  %v1083_v16 = vpop.f32.mrf.mxu0  ;;  %v5207_v11 = vld [vmem:[%s5884_s20 + $0xf8] sm:$0xff] }
 0x1aa   : > { %v1277_v6 = vpop.f32.mrf.mxu1  ;;  %v982_v14 = vpop.f32.mrf.mxu3  ;;  %v1179_v28 = vadd.f32 %v1083_v16, %v6052_v10  ;;  %v5255_v16 = vld [vmem:[%s5884_s20 + $0xf9] sm:$0xff] }
 0x1ab   : > { %v6462_v24 = vadd.f32 %v982_v14, %v821_v15 }
 0x1ac   : > { %v1373_v1 = vadd.f32 %v1277_v6, %v1179_v28  ;;  %1130 = vmatmul.f32.gmra.mxu0 %v5252_v3 }
 0x1ad   : > { %8742 = vst [vmem:[#allocation13_spill] sm:$0xff] %v6462_v24  ;;  %1324 = vmatmul.f32.gmra.mxu1 %v6458_v62  ;;  %1519 = vmatmul.f32.gmra.mxu2 %v5206_v22 }
 0x1af   : > { %1713 = vmatmul.f32.gmra.mxu3 %v5254_v29 }
 0x1b0   : > { %v1472_v43 = vpop.f32.mrf.mxu2 }
 0x1b1   : > { %v1568_v48 = vadd.f32 %v1472_v43, %v1373_v1  ;;  %v1086_v10 = vpop.f32.mrf.mxu0  ;;  %v6479_v1 = vld [vmem:[%s5884_s20 + $0xf2] sm:$0xff]  ;;  %v5208_v43 = vld [vmem:[%s5884_s20 + $0x108] sm:$0xff] }
 0x1b2   : > { %v1280_v52 = vpop.f32.mrf.mxu1  ;;  %v1180_v3 = vadd.f32 %v1086_v10, %v6057_v39  ;;  %v1666_v55 = vpop.f32.mrf.mxu3  ;;  %8744 = vst [vmem:[#allocation15_spill] sm:$0xff] %v6479_v1  ;;  %v5256_v10 = vld [vmem:[%s5884_s20 + $0x109] sm:$0xff] }
 0x1b3   : > { %v6474_v13 = vadd.f32 %v1666_v55, %v1568_v48 }
 0x1b4   : > { %v1374_v15 = vadd.f32 %v1280_v52, %v1180_v3  ;;  %1133 = vmatmul.f32.gmra.mxu0 %v5253_v31  ;;  %v5322_v52 = vld [vmem:[%s8722_s1 + $0x420] sm:$0xff] }
 0x1b5   : > { %8743 = vst [vmem:[#allocation14_spill] sm:$0xff] %v6474_v13  ;;  %1327 = vmatmul.f32.gmra.mxu1 %v6470_v45  ;;  %1522 = vmatmul.f32.gmra.mxu2 %v5207_v11 }
 0x1b6   : > { %1854 = vmatpush.msra.mxu0 %v5322_v52 }
 0x1b7   : > { %1716 = vmatmul.f32.gmra.mxu3 %v5255_v16 }
 0x1b8   : > { %v1475_v6 = vpop.f32.mrf.mxu2 }
 0x1b9   : > { %v1569_v14 = vadd.f32 %v1475_v6, %v1374_v15  ;;  %v1089_v28 = vpop.f32.mrf.mxu0  ;;  %v6491_v15 = vld [vmem:[%s5884_s20 + $0xfa] sm:$0xff] }
 0x1ba   : > { %v1283_v22 = vpop.f32.mrf.mxu1  ;;  %v1181_v39 = vadd.f32 %v1089_v28, %v6065_v50  ;;  %v1669_v41 = vpop.f32.mrf.mxu3  ;;  %8746 = vst [vmem:[#allocation17_spill] sm:$0xff] %v6491_v15 }
 0x1bb   : > { %v6483_v48 = vadd.f32 %v1669_v41, %v1569_v14  ;;  %v5209_v14 = vld [vmem:[%s5884_s20 + $0x110] sm:$0xff] }
 0x1bc   : > { %v1375_v31 = vadd.f32 %v1283_v22, %v1181_v39  ;;  %1136 = vmatmul.f32.gmra.mxu0 %v5254_v29  ;;  %v5257_v39 = vld [vmem:[%s5884_s20 + $0x111] sm:$0xff] }
 0x1bd   : > { %8745 = vst [vmem:[#allocation16_spill] sm:$0xff] %v6483_v48  ;;  %1330 = vmatmul.f32.gmra.mxu1 %v6479_v1  ;;  %1525 = vmatmul.f32.gmra.mxu2 %v5208_v43  ;;  %v5221_v48 = vld [vmem:[%s5884_s20 + $0x1a0] sm:$0xff] }
 0x1bf   : > { %1719 = vmatmul.f32.gmra.mxu3 %v5256_v10 }
 0x1c0   : > { %v1478_v50 = vpop.f32.mrf.mxu2 }
 0x1c1   : > { %v1570_v3 = vadd.f32 %v1478_v50, %v1375_v31  ;;  %v1092_v55 = vpop.f32.mrf.mxu0  ;;  %v6500_v50 = vld [vmem:[%s5884_s20 + $0x10a] sm:$0xff] }
 0x1c2   : > { %v1286_v11 = vpop.f32.mrf.mxu1  ;;  %v1182_v29 = vadd.f32 %v1092_v55, %v6070_v60  ;;  %v1672_v6 = vpop.f32.mrf.mxu3  ;;  %8748 = vst [vmem:[#allocation19_spill] sm:$0xff] %v6500_v50 }
 0x1c3   : > { %v6495_v28 = vadd.f32 %v1672_v6, %v1570_v3  ;;  %v5210_v3 = vld [vmem:[%s5884_s20 + $0x120] sm:$0xff] }
 0x1c4   : > { %v1376_v22 = vadd.f32 %v1286_v11, %v1182_v29  ;;  %1139 = vmatmul.f32.gmra.mxu0 %v5255_v16  ;;  %v5258_v11 = vld [vmem:[%s5884_s20 + $0x121] sm:$0xff]  ;;  %v5321_v29 = vld [vmem:[%s8722_s1 + $0x418] sm:$0xff] }
 0x1c5   : > { %8747 = vst [vmem:[#allocation18_spill] sm:$0xff] %v6495_v28  ;;  %1333 = vmatmul.f32.gmra.mxu1 %v6491_v15  ;;  %1528 = vmatmul.f32.gmra.mxu2 %v5209_v14  ;;  %v5172_v28 = vld [vmem:[%s5884_s20 + $0x182] sm:$0xff] }
 0x1c6   : > { %1855 = vmatpush.msra.mxu0 %v5321_v29 }
 0x1c7   : > { %1722 = vmatmul.f32.gmra.mxu3 %v5257_v39 }
 0x1c8   : > { %v1481_v41 = vpop.f32.mrf.mxu2 }
 0x1c9   : > { %v1571_v43 = vadd.f32 %v1481_v41, %v1376_v22  ;;  %v1095_v31 = vpop.f32.mrf.mxu0 }
 0x1ca   : > { %v1289_v52 = vpop.f32.mrf.mxu1  ;;  %v1183_v60 = vadd.f32 %v1095_v31, %v6078_v7  ;;  %v1675_v55 = vpop.f32.mrf.mxu3 }
 0x1cb   : > { %v6504_v6 = vadd.f32 %v1675_v55, %v1571_v43  ;;  %v5163_v43 = vld [vmem:[%s5884_s20 + $0x112] sm:$0xff] }
 0x1cc   : > { %v1377_v16 = vadd.f32 %v1289_v52, %v1183_v60  ;;  %1142 = vmatmul.f32.gmra.mxu0 %v5256_v10  ;;  %v5211_v52 = vld [vmem:[%s5884_s20 + $0x128] sm:$0xff] }
 0x1cd   : > { %8749 = vst [vmem:[#allocation20_spill] sm:$0xff] %v6504_v6  ;;  %1336 = vmatmul.f32.gmra.mxu1 %v6500_v50  ;;  %1531 = vmatmul.f32.gmra.mxu2 %v5210_v3  ;;  %v5259_v3 = vld [vmem:[%s5884_s20 + $0x129] sm:$0xff]  ;;  %v5220_v50 = vld [vmem:[%s5884_s20 + $0x198] sm:$0xff] }
 0x1cf   : > { %1725 = vmatmul.f32.gmra.mxu3 %v5258_v11 }
 0x1d0   : > { %v1484_v7 = vpop.f32.mrf.mxu2 }
 0x1d1   : > { %v1572_v14 = vadd.f32 %v1484_v7, %v1377_v16  ;;  %v1098_v22 = vpop.f32.mrf.mxu0 }
 0x1d2   : > { %v1292_v41 = vpop.f32.mrf.mxu1  ;;  %v1184_v31 = vadd.f32 %v1098_v22, %v6083_v37  ;;  %v1678_v10 = vpop.f32.mrf.mxu3  ;;  %v5212_v22 = vld [vmem:[%s5884_s20 + $0x138] sm:$0xff] }
 0x1d3   : > { %v6514_v60 = vadd.f32 %v1678_v10, %v1572_v14 }
 0x1d4   : > { %v1378_v55 = vadd.f32 %v1292_v41, %v1184_v31  ;;  %1145 = vmatmul.f32.gmra.mxu0 %v5257_v39  ;;  %v5260_v39 = vld [vmem:[%s5884_s20 + $0x139] sm:$0xff]  ;;  %v5320_v41 = vld [vmem:[%s8722_s1 + $0x410] sm:$0xff] }
 0x1d5   : > { %8750 = vst [vmem:[#allocation21_spill] sm:$0xff] %v6514_v60  ;;  %1339 = vmatmul.f32.gmra.mxu1 %v5163_v43  ;;  %1534 = vmatmul.f32.gmra.mxu2 %v5211_v52  ;;  %v5165_v52 = vld [vmem:[%s5884_s20 + $0x12a] sm:$0xff] }
 0x1d6   : > { %1856 = vmatpush.msra.mxu0 %v5320_v41  ;;  %v5267_v60 = vld [vmem:[%s5884_s20 + $0x189] sm:$0xff] }
 0x1d7   : > { %1728 = vmatmul.f32.gmra.mxu3 %v5259_v3 }
 0x1d8   : > { %v1487_v29 = vpop.f32.mrf.mxu2 }
 0x1d9   : > { %v1573_v16 = vadd.f32 %v1487_v29, %v1378_v55  ;;  %v1101_v7 = vpop.f32.mrf.mxu0  ;;  %v5261_v29 = vld [vmem:[%s5884_s20 + $0x141] sm:$0xff] }
 0x1da   : > { %v1295_v24 = vpop.f32.mrf.mxu1  ;;  %v1185_v6 = vadd.f32 %v1101_v7, %v6091_v49  ;;  %v1681_v37 = vpop.f32.mrf.mxu3 }
 0x1db   : > { %v6520_v23 = vadd.f32 %v1681_v37, %v1573_v16 }
 0x1dc   : > { %v1379_v14 = vadd.f32 %v1295_v24, %v1185_v6  ;;  %1148 = vmatmul.f32.gmra.mxu0 %v5258_v11 }
 0x1dd   : > { %8751 = vst [vmem:[#allocation22_spill] sm:$0xff] %v6520_v23  ;;  %1342 = vmatmul.f32.gmra.mxu1 %v5164_v56  ;;  %1537 = vmatmul.f32.gmra.mxu2 %v5212_v22  ;;  %v5213_v56 = vld [vmem:[%s5884_s20 + $0x140] sm:$0xff] }
 0x1de   : > { %v5166_v22 = vld [vmem:[%s5884_s20 + $0x13a] sm:$0xff] }
 0x1df   : > { %1731 = vmatmul.f32.gmra.mxu3 %v5260_v39 }
 0x1e0   : > { %v1490_v43 = vpop.f32.mrf.mxu2 }
 0x1e1   : > { %v1574_v49 = vadd.f32 %v1490_v43, %v1379_v14  ;;  %v1104_v31 = vpop.f32.mrf.mxu0  ;;  %v5262_v43 = vld [vmem:[%s5884_s20 + $0x151] sm:$0xff] }
 0x1e2   : > { %v1298_v10 = vpop.f32.mrf.mxu1  ;;  %v1186_v24 = vadd.f32 %v1104_v31, %v6096_v61  ;;  %v1684_v6 = vpop.f32.mrf.mxu3  ;;  %v5214_v61 = vld [vmem:[%s5884_s20 + $0x150] sm:$0xff] }
 0x1e3   : > { %v6529_v11 = vadd.f32 %v1684_v6, %v1574_v49 }
 0x1e4   : > { %v1380_v55 = vadd.f32 %v1298_v10, %v1186_v24  ;;  %1151 = vmatmul.f32.gmra.mxu0 %v5259_v3  ;;  %v5319_v3 = vld [vmem:[%s8722_s1 + $0x408] sm:$0xff] }
 0x1e5   : > { %8752 = vst [vmem:[#allocation23_spill] sm:$0xff] %v6529_v11  ;;  %1345 = vmatmul.f32.gmra.mxu1 %v5165_v52  ;;  %1540 = vmatmul.f32.gmra.mxu2 %v5213_v56  ;;  %v5167_v10 = vld [vmem:[%s5884_s20 + $0x142] sm:$0xff]  ;;  %v5215_v52 = vld [vmem:[%s5884_s20 + $0x158] sm:$0xff] }
 0x1e6   : > { %1857 = vmatpush.msra.mxu0 %v5319_v3  ;;  %v5168_v56 = vld [vmem:[%s5884_s20 + $0x152] sm:$0xff]  ;;  %v5266_v11 = vld [vmem:[%s5884_s20 + $0x181] sm:$0xff] }
 0x1e7   : > { %1734 = vmatmul.f32.gmra.mxu3 %v5261_v29 }
 0x1e8   : > { %v1493_v16 = vpop.f32.mrf.mxu2 }
 0x1e9   : > { %v1575_v7 = vadd.f32 %v1493_v16, %v1380_v55  ;;  %v6532_v37 = vpop.f32.mrf.mxu0  ;;  %v5216_v16 = vld [vmem:[%s5884_s20 + $0x168] sm:$0xff] }
 0x1ea   : > { %v1687_v14 = vpop.f32.mrf.mxu3  ;;  %v6542_v49 = vpop.f32.mrf.mxu1 }
 0x1eb   : > { %v6536_v41 = vadd.f32 %v1687_v14, %v1575_v7  ;;  %v5264_v7 = vld [vmem:[%s5884_s20 + $0x169] sm:$0xff] }
 0x1ec   : > { %1154 = vmatmul.f32.gmra.mxu0 %v5260_v39  ;;  %v5263_v39 = vld [vmem:[%s5884_s20 + $0x159] sm:$0xff] }
 0x1ed   : > { %8753 = vst [vmem:[#allocation24_spill] sm:$0xff] %v6536_v41  ;;  %1348 = vmatmul.f32.gmra.mxu1 %v5166_v22  ;;  %1543 = vmatmul.f32.gmra.mxu2 %v5214_v61  ;;  %v5169_v61 = vld [vmem:[%s5884_s20 + $0x15a] sm:$0xff] }
 0x1ef   : > { %1737 = vmatmul.f32.gmra.mxu3 %v5262_v43 }
 0x1f0   : > { %v6548_v24 = vpop.f32.mrf.mxu2 }
 0x1f1   : > { %v6544_v31 = vpop.f32.mrf.mxu0 }
 0x1f2   : > { %v6554_v55 = vpop.f32.mrf.mxu1  ;;  %v6566_v3 = vpop.f32.mrf.mxu3 }
 0x1f4   : > { %1157 = vmatmul.f32.gmra.mxu0 %v5261_v29  ;;  %v5318_v29 = vld [vmem:[%s8722_s1 + $0x400] sm:$0xff] }
 0x1f5   : > { %1351 = vmatmul.f32.gmra.mxu1 %v5167_v10  ;;  %1546 = vmatmul.f32.gmra.mxu2 %v5215_v52 }
 0x1f6   : > { %1858 = vmatpush.msra.mxu0 %v5318_v29  ;;  %v5218_v29 = vld [vmem:[%s5884_s20 + $0x180] sm:$0xff] }
 0x1f7   : > { %1740 = vmatmul.f32.gmra.mxu3 %v5263_v39 }
 0x1f8   : > { %v6561_v22 = vpop.f32.mrf.mxu2 }
 0x1f9   : > { %v6551_v6 = vpop.f32.mrf.mxu0 }
 0x1fa   : > { %v6569_v10 = vpop.f32.mrf.mxu1  ;;  %v6578_v41 = vpop.f32.mrf.mxu3 }
 0x1fc   : > { %1160 = vmatmul.f32.gmra.mxu0 %v5262_v43  ;;  %v5217_v43 = vld [vmem:[%s5884_s20 + $0x170] sm:$0xff] }
 0x1fd   : > { %1354 = vmatmul.f32.gmra.mxu1 %v5168_v56  ;;  %1549 = vmatmul.f32.gmra.mxu2 %v5216_v16  ;;  %v5170_v16 = vld [vmem:[%s5884_s20 + $0x16a] sm:$0xff] }
 0x1ff   : > { %1743 = vmatmul.f32.gmra.mxu3 %v5264_v7 }
 0x200   : > { %v6572_v52 = vpop.f32.mrf.mxu2 }
 0x201   : > { %v6563_v14 = vpop.f32.mrf.mxu0 }
 0x204   : > { %1163 = vmatmul.f32.gmra.mxu0 %v5263_v39  ;;  %v6581_v39 = vpop.f32.mrf.mxu1 }
 0x205   : > { %1357 = vmatmul.f32.gmra.mxu1 %v5169_v61  ;;  %1552 = vmatmul.f32.gmra.mxu2 %v5217_v43  ;;  %v5171_v43 = vld [vmem:[%s5884_s20 + $0x172] sm:$0xff] }
 0x207   : > { %1746 = vmatmul.f32.gmra.mxu3 %v6302_v30  ;;  %v5123_v30 = vld [vmem:[%s5884_s20 + $0x171] sm:$0xff] }
 0x208   : > { %v6587_v23 = vpop.f32.mrf.mxu2 }
 0x209   : > { %v6574_v56 = vpop.f32.mrf.mxu0 }
 0x20c   : > { %1166 = vmatmul.f32.gmra.mxu0 %v5264_v7  ;;  %v6591_v7 = vpop.f32.mrf.mxu3 }
 0x20d   : > { %1360 = vmatmul.f32.gmra.mxu1 %v5170_v16  ;;  %1555 = vmatmul.f32.gmra.mxu2 %v5218_v29  ;;  %8754 = vst [vmem:[#allocation25_spill] sm:$0xff] %v6591_v7  ;;  %v6593_v16 = vpop.f32.mrf.mxu1 }
 0x20f   : > { %1749 = vmatmul.f32.gmra.mxu3 %v5266_v11 }
 0x210   : > { %v6599_v63 = vpop.f32.mrf.mxu2 }
 0x211   : > { %v6583_v61 = vpop.f32.mrf.mxu0 }
 0x214   : > { %1169 = vmatmul.f32.gmra.mxu0 %v5123_v30  ;;  %v5268_v30 = vld [vmem:[%s5884_s20 + $0x199] sm:$0xff] }
 0x215   : > { %1363 = vmatmul.f32.gmra.mxu1 %v5171_v43  ;;  %1558 = vmatmul.f32.gmra.mxu2 %v6309_v8  ;;  %v6602_v8 = vpop.f32.mrf.mxu3  ;;  %v6607_v15 = vpop.f32.mrf.mxu1 }
 0x216   : > { %8755 = vst [vmem:[#allocation26_spill] sm:$0xff] %v6602_v8 }
 0x217   : > { %1752 = vmatmul.f32.gmra.mxu3 %v5267_v60 }
 0x219   : > { %v6595_v29 = vpop.f32.mrf.mxu0 }
 0x21c   : > { %1172 = vmatmul.f32.gmra.mxu0 %v5266_v11  ;;  %v6611_v11 = vpop.f32.mrf.mxu2 }
 0x21d   : > { %1366 = vmatmul.f32.gmra.mxu1 %v5172_v28  ;;  %1561 = vmatmul.f32.gmra.mxu2 %v5220_v50  ;;  %v5286_v50 = vld [vmem:[%s5884_s20 + $0x32] sm:$0xff]  ;;  %v6618_v1 = vpop.f32.mrf.mxu1 }
 0x21f   : > { %1755 = vmatmul.f32.gmra.mxu3 %v5268_v30  ;;  %v6616_v30 = vpop.f32.mrf.mxu3 }
 0x220   : > { %8756 = vst [vmem:[#allocation27_spill] sm:$0xff] %v6616_v30 }
 0x221   : > { %v6604_v43 = vpop.f32.mrf.mxu0 }
 0x224   : > { %1175 = vmatmul.f32.gmra.mxu0 %v5267_v60  ;;  %v6620_v12 = vpop.f32.mrf.mxu2  ;;  %v5287_v60 = vld [vmem:[%s5884_s20 + $0x3a] sm:$0xff] }
 0x225   : > { %1369 = vmatmul.f32.gmra.mxu1 %v5173_v32  ;;  %1564 = vmatmul.f32.gmra.mxu2 %v5221_v48  ;;  %8757 = vst [vmem:[#allocation28_spill] sm:$0xff] %v6620_v12  ;;  %v6627_v48 = vpop.f32.mrf.mxu1 }
 0x227   : > { %1758 = vmatmul.f32.gmra.mxu3 %v5269_v19  ;;  %v6625_v32 = vpop.f32.mrf.mxu3  ;;  %v5288_v19 = vld [vmem:[%s5884_s20 + $0x4a] sm:$0xff] }
 0x228   : > { %8758 = vst [vmem:[#allocation29_spill] sm:$0xff] %v6625_v32 }
 0x229   : > { %v6613_v28 = vpop.f32.mrf.mxu0 }
 0x22c   : > { %1859 = vmatmul.f32.vlgmr.msra.gmra.mxu0 %v5286_v50  ;;  %v6632_v33 = vpop.f32.mrf.mxu2 }
 0x22d   : > { %8759 = vst [vmem:[#allocation30_spill] sm:$0xff] %v6632_v33  ;;  %v6636_v30 = vpop.f32.mrf.mxu1 }
 0x22f   : > { %v6634_v17 = vpop.f32.mrf.mxu3 }
 0x230   : > { %8760 = vst [vmem:[#allocation31_spill] sm:$0xff] %v6634_v17  ;;  %v5365_v17 = vld [vmem:[%s8724_s3 + $0x178] sm:$0xff] }
 0x231   : > { %v6622_v46 = vpop.f32.mrf.mxu0  ;;  %3541 = vmatpush.msra.mxu3 %v5365_v17 }
 0x234   : > { %1862 = vmatmul.f32.gmra.mxu0 %v5287_v60  ;;  %v6640_v8 = vpop.f32.mrf.mxu2 }
 0x235   : > { %8761 = vst [vmem:[#allocation32_spill] sm:$0xff] %v6640_v8  ;;  %v6647_v7 = vpop.f32.mrf.mxu1 }
 0x236   : > { %8763 = vst [vmem:[#allocation34_spill] sm:$0xff] %v6647_v7 }
 0x237   : > { %v6643_v32 = vpop.f32.mrf.mxu3 }
 0x238   : > { %8762 = vst [vmem:[#allocation33_spill] sm:$0xff] %v6643_v32  ;;  %v5349_v32 = vld [vmem:[%s8724_s3 + $0xf8] sm:$0xff] }
 0x239   : > { %v6629_v13 = vpop.f32.mrf.mxu0  ;;  %3434 = vmatpush.msra.mxu1 %v5349_v32  ;;  %v5364_v32 = vld [vmem:[%s8724_s3 + $0x170] sm:$0xff] }
 0x23a   : > { %3542 = vmatpush.msra.mxu3 %v5364_v32  ;;  %v3406_v32 = vld [vmem:[%s8724_s3 + $0x68] sm:$0xff] }
 0x23c   : > { %1865 = vmatmul.f32.gmra.mxu0 %v5288_v19  ;;  %v3408_v19 = vld [vmem:[%s8724_s3 + $0x78] sm:$0xff]  ;;  %v6656_v8 = vpop.f32.mrf.mxu2 }
 0x23d   : > { %3475 = vmatpush.msra.mxu2 %v3408_v19  ;;  %8764 = vst [vmem:[#allocation35_spill] sm:$0xff] %v6656_v8  ;;  %v3407_v19 = vld [vmem:[%s8724_s3 + $0x70] sm:$0xff] }
 0x23f   : > { %v6663_v7 = vpop.f32.mrf.mxu3  ;;  %3476 = vmatpush.msra.mxu2 %v3407_v19 }
 0x240   : > { %8765 = vst [vmem:[#allocation36_spill] sm:$0xff] %v6663_v7 }
 0x241   : > { %v6638_v50 = vpop.f32.mrf.mxu0  ;;  %3477 = vmatpush.msra.mxu2 %v3406_v32 }
 0x244   : > { %1868 = vmatmul.f32.gmra.mxu0 %v6353_v25  ;;  %v6668_v33 = vpop.f32.mrf.mxu2 }
 0x245   : > { %8766 = vst [vmem:[#allocation37_spill] sm:$0xff] %v6668_v33 }
 0x247   : > { %v6672_v17 = vpop.f32.mrf.mxu3 }
 0x248   : > { %8768 = vst [vmem:[#allocation39_spill] sm:$0xff] %v6672_v17  ;;  %v5348_v17 = vld [vmem:[%s8724_s3 + $0xf0] sm:$0xff] }
 0x249   : > { %v6645_v60 = vpop.f32.mrf.mxu0  ;;  %3435 = vmatpush.msra.mxu1 %v5348_v17  ;;  %v5363_v17 = vld [vmem:[%s8724_s3 + $0x168] sm:$0xff] }
 0x24a   : > { %3543 = vmatpush.msra.mxu3 %v5363_v17  ;;  %v3405_v17 = vld [vmem:[%s8724_s3 + $0x60] sm:$0xff] }
 0x24b   : > { %3478 = vmatpush.msra.mxu2 %v3405_v17 }
 0x24c   : > { %1871 = vmatmul.f32.gmra.mxu0 %v6362_v54  ;;  %v6665_v54 = vpop.f32.mrf.mxu1 }
 0x251   : > { %v6658_v25 = vpop.f32.mrf.mxu0 }
 0x254   : > { %1874 = vmatmul.f32.gmra.mxu0 %v6374_v47  ;;  %v6681_v7 = vpop.f32.mrf.mxu1 }
 0x259   : > { %v6670_v12 = vpop.f32.mrf.mxu0 }
 0x25a   : > { %8767 = vst [vmem:[#allocation38_spill] sm:$0xff] %v6670_v12  ;;  %v6688_v12 = vpop.f32.mrf.mxu2 }
 0x25b   : > { %8770 = vst [vmem:[#allocation41_spill] sm:$0xff] %v6688_v12 }
 0x25c   : > { %1877 = vmatmul.f32.gmra.mxu0 %v6382_v20  ;;  %v6691_v20 = vpop.f32.mrf.mxu3  ;;  %v6693_v33 = vpop.f32.mrf.mxu1 }
 0x25d   : > { %8771 = vst [vmem:[#allocation42_spill] sm:$0xff] %v6691_v20 }
 0x261   : > { %v6683_v47 = vpop.f32.mrf.mxu0 }
 0x262   : > { %8769 = vst [vmem:[#allocation40_spill] sm:$0xff] %v6683_v47  ;;  %v6697_v19 = vpop.f32.mrf.mxu2 }
 0x263   : > { %8773 = vst [vmem:[#allocation44_spill] sm:$0xff] %v6697_v19 }
 0x264   : > { %1880 = vmatmul.f32.gmra.mxu0 %v6393_v26  ;;  %v6706_v26 = vpop.f32.mrf.mxu3  ;;  %v6713_v19 = vpop.f32.mrf.mxu1 }
 0x265   : > { %8774 = vst [vmem:[#allocation45_spill] sm:$0xff] %v6706_v26 }
 0x269   : > { %v6695_v8 = vpop.f32.mrf.mxu0 }
 0x26a   : > { %8772 = vst [vmem:[#allocation43_spill] sm:$0xff] %v6695_v8  ;;  %v5347_v8 = vld [vmem:[%s8724_s3 + $0xe8] sm:$0xff] }
 0x26b   : > { %3436 = vmatpush.msra.mxu1 %v5347_v8  ;;  %v5362_v8 = vld [vmem:[%s8724_s3 + $0x160] sm:$0xff] }
 0x26c   : > { %1883 = vmatmul.f32.gmra.mxu0 %v6401_v36  ;;  %v6716_v36 = vpop.f32.mrf.mxu2  ;;  %v6720_v12 = vpop.f32.mrf.mxu3  ;;  %3544 = vmatpush.msra.mxu3 %v5362_v8 }
 0x26d   : > { %8777 = vst [vmem:[#allocation48_spill] sm:$0xff] %v6720_v12  ;;  %v6722_v32 = vpop.f32.mrf.mxu1  ;;  %v5346_v12 = vld [vmem:[%s8724_s3 + $0xe0] sm:$0xff] }
 0x26e   : > { %8778 = vst [vmem:[#allocation49_spill] sm:$0xff] %v6722_v32  ;;  %3437 = vmatpush.msra.mxu1 %v5346_v12 }
 0x271   : > { %v6708_v20 = vpop.f32.mrf.mxu0 }
 0x272   : > { %8775 = vst [vmem:[#allocation46_spill] sm:$0xff] %v6708_v20 }
 0x274   : > { %1886 = vmatmul.f32.gmra.mxu0 %v6412_v9  ;;  %v6731_v9 = vpop.f32.mrf.mxu2 }
 0x275   : > { %8779 = vst [vmem:[#allocation50_spill] sm:$0xff] %v6731_v9 }
 0x279   : > { %v6718_v47 = vpop.f32.mrf.mxu0 }
 0x27a   : > { %8776 = vst [vmem:[#allocation47_spill] sm:$0xff] %v6718_v47  ;;  %v6741_v47 = vpop.f32.mrf.mxu1 }
 0x27c   : > { %1889 = vmatmul.f32.gmra.mxu0 %v6420_v40  ;;  %v6738_v40 = vpop.f32.mrf.mxu3  ;;  %v6745_v20 = vpop.f32.mrf.mxu2 }
 0x27d   : > { %8782 = vst [vmem:[#allocation53_spill] sm:$0xff] %v6745_v20 }
 0x281   : > { %v6733_v26 = vpop.f32.mrf.mxu0 }
 0x282   : > { %8780 = vst [vmem:[#allocation51_spill] sm:$0xff] %v6733_v26  ;;  %v6750_v8 = vpop.f32.mrf.mxu1 }
 0x284   : > { %1892 = vmatmul.f32.gmra.mxu0 %v6431_v58  ;;  %v6748_v17 = vpop.f32.mrf.mxu3  ;;  %v6754_v9 = vpop.f32.mrf.mxu2  ;;  %v1187_v58 = vadd.f32 %v6532_v37, %v6128_v35  ;;  %v1192_v37 = vadd.f32 %v6583_v61, %v6295_v4  ;;  %v1195_v61 = vadd.f32 %v6613_v28, %v6321_v59  ;;  %v5344_v59 = vld [vmem:[%s8724_s3 + $0xd0] sm:$0xff]  ;;  %v8786_v28 = vld [vmem:[#allocation30_spill] sm:$0xff] }
 0x285   : > { %8783 = vst [vmem:[#allocation54_spill] sm:$0xff] %v6748_v17  ;;  %v1189_v17 = vadd.f32 %v6551_v6, %v6208_v44  ;;  %v5361_v44 = vld [vmem:[%s8724_s3 + $0x158] sm:$0xff] }
 0x286   : > { %v1381_v35 = vadd.f32 %v6542_v49, %v1187_v58  ;;  %3545 = vmatpush.msra.mxu3 %v5361_v44  ;;  %v1193_v49 = vadd.f32 %v6595_v29, %v6305_v38  ;;  %v1196_v38 = vadd.f32 %v6622_v46, %v6327_v2 }
 0x287   : > { %v1383_v6 = vadd.f32 %v6569_v10, %v1189_v17 }
 0x288   : > { %v1387_v2 = vadd.f32 %v6618_v1, %v1193_v49  ;;  %v8796_v49 = vld [vmem:[#allocation38_spill] sm:$0xff] }
 0x289   : > { %v6743_v32 = vpop.f32.mrf.mxu0 }
 0x28a   : > { %8781 = vst [vmem:[#allocation52_spill] sm:$0xff] %v6743_v32  ;;  %v6763_v20 = vpop.f32.mrf.mxu1 }
 0x28c   : > { %1895 = vmatmul.f32.gmra.mxu0 %v6439_v18  ;;  %v6757_v12 = vpop.f32.mrf.mxu3  ;;  %v1188_v18 = vadd.f32 %v6544_v31, %v6169_v0  ;;  %v3404_v0 = vld [vmem:[%s8724_s3 + $0x58] sm:$0xff]  ;;  %v1194_v31 = vadd.f32 %v6604_v43, %v6312_v51  ;;  %v1578_v51 = vadd.f32 %v6572_v52, %v1383_v6  ;;  %v6863_v6 = vld [vmem:[%s8723_s2] ss:$0 sm:$0xff] }
 0x28d   : > { %3479 = vmatpush.msra.mxu2 %v3404_v0  ;;  %v8794_v0 = vld [vmem:[#allocation37_spill] sm:$0xff] }
 0x28e   : > { %v1382_v4 = vadd.f32 %v6554_v55, %v1188_v18  ;;  %v1386_v55 = vadd.f32 %v6607_v15, %v1192_v37  ;;  %v1388_v46 = vadd.f32 %v6627_v48, %v1194_v31  ;;  %v8787_v48 = vld [vmem:[#allocation34_spill] sm:$0xff] }
 0x290   : > { %v1581_v15 = vadd.f32 %v6611_v11, %v1386_v55  ;;  %v8800_v55 = vld [vmem:[#allocation5_spill] sm:$0xff] }
 0x291   : > { %v6752_v26 = vpop.f32.mrf.mxu0 }
 0x292   : > { %8784 = vst [vmem:[#allocation55_spill] sm:$0xff] %v6752_v26  ;;  %v1190_v26 = vadd.f32 %v6563_v14, %v6244_v5  ;;  %v5345_v5 = vld [vmem:[%s8724_s3 + $0xd8] sm:$0xff]  ;;  %v6828_v52 = vpop.f32.mrf.mxu1 }
 0x293   : > { %3438 = vmatpush.msra.mxu1 %v5345_v5 }
 0x294   : > { %1898 = vmatmul.f32.gmra.mxu0 %v6450_v53  ;;  %v1191_v53 = vadd.f32 %v6574_v56, %v6280_v42  ;;  %v6786_v42 = vpop.f32.mrf.mxu2  ;;  %v1384_v14 = vadd.f32 %v6581_v39, %v1190_v26  ;;  %v6810_v43 = vpop.f32.mrf.mxu3 }
 0x295   : > { %3439 = vmatpush.msra.mxu1 %v5344_v59  ;;  %v8803_v59 = vld [vmem:[#allocation44_spill] sm:$0xff] }
 0x296   : > { %v1385_v56 = vadd.f32 %v6593_v16, %v1191_v53  ;;  %v1579_v10 = vadd.f32 %v6587_v23, %v1384_v14  ;;  %v1197_v16 = vadd.f32 %v6629_v13, %v6336_v21  ;;  %v1198_v23 = vadd.f32 %v6638_v50, %v6342_v34  ;;  %v8785_v34 = vld [vmem:[#allocation28_spill] sm:$0xff]  ;;  %v8793_v53 = vld [vmem:[#allocation35_spill] sm:$0xff] }
 0x297   : > { %v1389_v21 = vadd.f32 %v6636_v30, %v1195_v61  ;;  %v1199_v13 = vadd.f32 %v6645_v60, %v6355_v27  ;;  %v1582_v11 = vadd.f32 %v8785_v34, %v1387_v2  ;;  %v1390_v50 = vadd.f32 %v8787_v48, %v1196_v38  ;;  %v8788_v30 = vld [vmem:[#allocation25_spill] sm:$0xff]  ;;  %v8789_v27 = vld [vmem:[#allocation26_spill] sm:$0xff]  ;;  %v8797_v14 = vld [vmem:[#allocation31_spill] sm:$0xff] }
 0x298   : > { %v1580_v39 = vadd.f32 %v6599_v63, %v1385_v56  ;;  %v6838_v26 = vadd.f32 %v8788_v30, %v1578_v51  ;;  %v6841_v60 = vadd.f32 %v8789_v27, %v1579_v10  ;;  %v1391_v17 = vadd.f32 %v6665_v54, %v1197_v16  ;;  %v8801_v38 = vld [vmem:[#allocation40_spill] sm:$0xff]  ;;  %v8808_v48 = vld [vmem:[#allocation7_spill] sm:$0xff]  ;;  %v8810_v27 = vld [vmem:[#allocation42_spill] sm:$0xff] }
 0x299   : > { %v6761_v32 = vpop.f32.mrf.mxu0  ;;  %v1392_v37 = vadd.f32 %v6681_v7, %v1198_v23  ;;  %v1393_v5 = vadd.f32 %v6693_v33, %v1199_v13  ;;  %v5343_v7 = vld [vmem:[%s8724_s3 + $0xc8] sm:$0xff]  ;;  %v6869_v56 = vadd.f32 %v8797_v14, %v1582_v11  ;;  %v8798_v33 = vld [vmem:[#allocation33_spill] sm:$0xff]  ;;  %v1202_v51 = vadd.f32 %v8801_v38, %v8800_v55  ;;  %v5360_v13 = vld [vmem:[%s8724_s3 + $0x150] sm:$0xff] }
 0x29a   : > { %v1586_v44 = vadd.f32 %v8794_v0, %v1391_v17  ;;  %3440 = vmatpush.msra.mxu1 %v5343_v7  ;;  %v8806_v11 = vld [vmem:[#allocation6_spill] sm:$0xff]  ;;  %3546 = vmatpush.msra.mxu3 %v5360_v13 }
 0x29b   : > { %v8817_v14 = vld [vmem:[#allocation50_spill] sm:$0xff] }
 0x29c   : > { %1901 = vmatmul.f32.gmra.mxu0 %v6458_v62  ;;  %v1576_v62 = vadd.f32 %v6548_v24, %v1381_v35  ;;  %v1577_v24 = vadd.f32 %v6561_v22, %v1382_v4  ;;  %v1200_v22 = vadd.f32 %v6658_v25, %v6365_v57  ;;  %v8790_v57 = vld [vmem:[#allocation32_spill] sm:$0xff]  ;;  %v1585_v35 = vadd.f32 %v8793_v53, %v1390_v50  ;;  %v6858_v54 = vpop.f32.mrf.mxu2  ;;  %v8809_v50 = vld [vmem:[#allocation46_spill] sm:$0xff]  ;;  %v8812_v53 = vld [vmem:[#allocation15_spill] sm:$0xff] }
 0x29d   : > { %v1584_v25 = vadd.f32 %v8790_v57, %v1389_v21  ;;  %v8795_v4 = vld [vmem:[#allocation4_spill] sm:$0xff]  ;;  %v3403_v21 = vld [vmem:[%s8724_s3 + $0x50] sm:$0xff]  ;;  %v1204_v30 = vadd.f32 %v8809_v50, %v8808_v48  ;;  %v6900_v57 = vadd.f32 %v8810_v27, %v1586_v44  ;;  %v5358_v50 = vld [vmem:[%s8724_s3 + $0x140] sm:$0xff] }
 0x29e   : > { %v6821_v63 = vadd.f32 %v6566_v3, %v1576_v62  ;;  %v6832_v1 = vadd.f32 %v6578_v41, %v1577_v24  ;;  %v1583_v3 = vadd.f32 %v8786_v28, %v1388_v46  ;;  %v8792_v41 = vld [vmem:[#allocation29_spill] sm:$0xff]  ;;  %v1394_v62 = vadd.f32 %v6713_v19, %v1200_v22  ;;  %v8804_v46 = vld [vmem:[#allocation14_spill] sm:$0xff]  ;;  %v8805_v22 = vld [vmem:[#allocation39_spill] sm:$0xff]  ;;  %3480 = vmatpush.msra.mxu2 %v3403_v21 }
 0x29f   : > { %v6849_v18 = vadd.f32 %v8792_v41, %v1581_v15  ;;  %v1201_v31 = vadd.f32 %v8796_v49, %v8795_v4  ;;  %v8799_v19 = vld [vmem:[#allocation41_spill] sm:$0xff]  ;;  %v1588_v15 = vadd.f32 %v8803_v59, %v1393_v5  ;;  %v6890_v34 = vadd.f32 %v8805_v22, %v1585_v35  ;;  %v8807_v28 = vld [vmem:[#allocation43_spill] sm:$0xff]  ;;  %v5341_v35 = vld [vmem:[%s8724_s3 + $0xb8] sm:$0xff] }
 0x2a0   : > { %v6872_v61 = vadd.f32 %v8798_v33, %v1583_v3  ;;  %v1587_v24 = vadd.f32 %v8799_v19, %v1392_v37  ;;  %v1589_v2 = vadd.f32 %v6716_v36, %v1394_v62  ;;  %v1203_v3 = vadd.f32 %v8807_v28, %v8806_v11  ;;  %v5342_v36 = vld [vmem:[%s8724_s3 + $0xc0] sm:$0xff]  ;;  %v8814_v44 = vld [vmem:[#allocation8_spill] sm:$0xff]  ;;  %v8815_v62 = vld [vmem:[#allocation47_spill] sm:$0xff]  ;;  %v6923_v19 = vpop.f32.mrf.mxu1 }
 0x2a1   : > { %v6803_v29 = vpop.f32.mrf.mxu0  ;;  %3441 = vmatpush.msra.mxu1 %v5342_v36  ;;  %v8813_v37 = vld [vmem:[#allocation45_spill] sm:$0xff]  ;;  %v1396_v5 = vadd.f32 %v6741_v47, %v1202_v51  ;;  %v1205_v4 = vadd.f32 %v8815_v62, %v8814_v44  ;;  %v8816_v49 = vld [vmem:[#allocation48_spill] sm:$0xff]  ;;  %v5340_v47 = vld [vmem:[%s8724_s3 + $0xb0] sm:$0xff] }
 0x2a2   : > { %v6911_v0 = vadd.f32 %v8813_v37, %v1587_v24  ;;  %v6920_v7 = vadd.f32 %v6738_v40, %v1589_v2  ;;  %v8818_v24 = vld [vmem:[#allocation53_spill] sm:$0xff]  ;;  %v1397_v51 = vadd.f32 %v6750_v8, %v1203_v3  ;;  %v5642_v2 = vmov 0.0   ;;  %v5359_v22 = vld [vmem:[%s8724_s3 + $0x148] sm:$0xff]  ;;  %v5357_v44 = vld [vmem:[%s8724_s3 + $0x138] sm:$0xff] }
 0x2a3   : > { %3442 = vmatpush.msra.mxu1 %v5341_v35  ;;  %v1591_v38 = vadd.f32 %v8818_v24, %v1396_v5  ;;  %281 = vst [vmem:[#allocation2 + $0x10] sm:$0xff] %v5642_v2  ;;  %v1399_v8 = vadd.f32 %v6828_v52, %v1205_v4  ;;  %3547 = vmatpush.msra.mxu3 %v5359_v22  ;;  %v3401_v52 = vld [vmem:[%s8724_s3 + $0x40] sm:$0xff]  ;;  %v3400_v5 = vld [vmem:[%s8724_s3 + $0x38] sm:$0xff]  ;;  %v3399_v24 = vld [vmem:[%s8724_s3 + $0x30] sm:$0xff] }
 0x2a4   : > { %1904 = vmatmul.f32.gmra.mxu0 %v6470_v45  ;;  %v8791_v45 = vld [vmem:[#allocation27_spill] sm:$0xff]  ;;  %282 = vst [vmem:[#allocation2 + $0x18] sm:$0x3] %v5642_v2  ;;  %v6943_v11 = vpop.f32.mrf.mxu2  ;;  %v8821_v37 = vld [vmem:[#allocation17_spill] sm:$0xff] }
 0x2a5   : > { %v6846_v58 = vadd.f32 %v8791_v45, %v1580_v39  ;;  %v8802_v39 = vld [vmem:[#allocation36_spill] sm:$0xff]  ;;  %v6903_v45 = vpop.f32.mrf.mxu3  ;;  %3443 = vmatpush.msra.mxu1 %v5340_v47  ;;  %279 = vst [vmem:[#allocation2] sm:$0xff] %v5642_v2  ;;  %3548 = vmatpush.msra.mxu3 %v5358_v50 }
 0x2a6   : > { %v6878_v16 = vadd.f32 %v8802_v39, %v1584_v25  ;;  %v8811_v25 = vld [vmem:[#allocation49_spill] sm:$0xff]  ;;  %280 = vst [vmem:[#allocation2 + $0x8] sm:$0x3] %v5642_v2 }
 0x2a7   : > { %v1395_v17 = vadd.f32 %v8811_v25, %v1201_v31  ;;  %v6917_v31 = vadd.f32 %v8816_v49, %v1588_v15  ;;  %283 = vst [vmem:[#allocation2 + $0x20] sm:$0xff] %v5642_v2  ;;  %3549 = vmatpush.msra.mxu3 %v5357_v44 }
 0x2a8   : > { %284 = vst [vmem:[#allocation2 + $0x28] sm:$0x3] %v5642_v2 }
 0x2a9   : > { %v1860_v10 = vpop.f32.mrf.mxu0  ;;  %v1590_v33 = vadd.f32 %v8817_v14, %v1395_v17  ;;  %v8820_v17 = vld [vmem:[#allocation54_spill] sm:$0xff]  ;;  %285 = vst [vmem:[#allocation2 + $0x30] sm:$0xff] %v5642_v2 }
 0x2aa   : > { %v1956_v23 = vadd.f32 %v1860_v10, %v8804_v46  ;;  %v1398_v10 = vadd.f32 %v6763_v20, %v1204_v30  ;;  %v3402_v46 = vld [vmem:[%s8724_s3 + $0x48] sm:$0xff]  ;;  %286 = vst [vmem:[#allocation2 + $0x38] sm:$0x3] %v5642_v2 }
 0x2ab   : > { %3481 = vmatpush.msra.mxu2 %v3402_v46  ;;  %287 = vst [vmem:[#allocation2 + $0x40] sm:$0xff] %v5642_v2 }
 0x2ac   : > { %v1992_v41 = vadd.f32 %v6863_v6, %v1956_v23  ;;  %1907 = vmatmul.f32.gmra.mxu0 %v8812_v53  ;;  %v1592_v23 = vadd.f32 %v6754_v9, %v1397_v51  ;;  %v1593_v21 = vadd.f32 %v6786_v42, %v1398_v10  ;;  %v8819_v42 = vld [vmem:[#allocation16_spill] sm:$0xff]  ;;  %v1594_v53 = vadd.f32 %v6858_v54, %v1399_v8  ;;  %v8824_v10 = vld [vmem:[#allocation10_spill] sm:$0xff] }
 0x2ad   : > { %3482 = vmatpush.msra.mxu2 %v3401_v52  ;;  %v6972_v54 = vadd.f32 %v6757_v12, %v1591_v38  ;;  %v5356_v12 = vld [vmem:[%s8724_s3 + $0x130] sm:$0xff]  ;;  %v8822_v38 = vld [vmem:[#allocation9_spill] sm:$0xff]  ;;  %288 = vst [vmem:[#allocation2 + $0x48] sm:$0x3] %v5642_v2 }
 0x2ae   : > { %v2024_v55 = vmax.f32 %v1992_v41, 0.0  ;;  %v6958_v41 = vadd.f32 %v8820_v17, %v1590_v33  ;;  %v6975_v14 = vadd.f32 %v6810_v43, %v1592_v23  ;;  %v6978_v33 = vadd.f32 %v6903_v45, %v1593_v21  ;;  %v5339_v43 = vld [vmem:[%s8724_s3 + $0xa8] sm:$0xff]  ;;  %v8823_v45 = vld [vmem:[#allocation51_spill] sm:$0xff]  ;;  %3550 = vmatpush.msra.mxu3 %v5356_v12  ;;  %289 = vst [vmem:[#allocation2 + $0x50] sm:$0xff] %v5642_v2 }
 0x2af   : > { %3483 = vmatpush.msra.mxu2 %v3400_v5  ;;  %v1206_v51 = vadd.f32 %v8823_v45, %v8822_v38  ;;  %3444 = vmatpush.msra.mxu1 %v5339_v43  ;;  %290 = vst [vmem:[#allocation2 + $0x58] sm:$0x3] %v5642_v2  ;;  %v8827_v12 = vld [vmem:[#allocation18_spill] sm:$0xff] }
 0x2b0   : > { %v2088_v39 = vrot.slane %v2024_v55, 2  ;;  %v2089_v59 = vrot.slane %v2024_v55, 4  ;;  %v2090_v40 = vrot.slane %v2024_v55, 6  ;;  %v2281_v15 = vsel %vm2280_vm0, %v2024_v55, -inf  ;;  %v1744_v55 = vpop.f32.mrf.mxu3  ;;  %291 = vst [vmem:[#allocation2 + $0x60] sm:$0xff] %v5642_v2 }
 0x2b1   : > { %v2282_v20 = vrot.slane %v2281_v15, 4  ;;  %v1863_v13 = vpop.f32.mrf.mxu0  ;;  %3484 = vmatpush.msra.mxu2 %v3399_v24  ;;  %292 = vst [vmem:[#allocation2 + $0x68] sm:$0x3] %v5642_v2 }
 0x2b2   : > { %v2288_v28 = vsel %vm2280_vm0, %v2088_v39, -inf  ;;  %v2295_v3 = vsel %vm2280_vm0, %v2089_v59, -inf  ;;  %v2302_v9 = vsel %vm2280_vm0, %v2090_v40, -inf  ;;  %v1957_v48 = vadd.f32 %v1863_v13, %v8819_v42  ;;  %v8825_v39 = vld [vmem:[#allocation52_spill] sm:$0xff]  ;;  %293 = vst [vmem:[#allocation2 + $0x70] sm:$0xff] %v5642_v2 }
 0x2b3   : > { %v2283_v30 = vmax.f32 %v2281_v15, %v2282_v20  ;;  %v2289_v36 = vrot.slane %v2288_v28, 4  ;;  %v2296_v27 = vrot.slane %v2295_v3, 4  ;;  %v2303_v25 = vrot.slane %v2302_v9, 4  ;;  %v1361_v15 = vpop.f32.mrf.mxu1  ;;  %v5338_v20 = vld [vmem:[%s8724_s3 + $0xa0] sm:$0xff]  ;;  %294 = vst [vmem:[#allocation2 + $0x78] sm:$0x3] %v5642_v2 }
 0x2b4   : > { %v1993_v35 = vadd.f32 %v6863_v6, %v1957_v48  ;;  %1910 = vmatmul.f32.gmra.mxu0 %v8821_v37  ;;  %v1207_v59 = vadd.f32 %v8825_v39, %v8824_v10  ;;  %v7000_v13 = vadd.f32 %v1744_v55, %v1594_v53  ;;  %3445 = vmatpush.msra.mxu1 %v5338_v20  ;;  %v1556_v53 = vpop.f32.mrf.mxu2  ;;  %v8826_v55 = vld [vmem:[#allocation19_spill] sm:$0xff]  ;;  %v3398_v39 = vld [vmem:[%s8724_s3 + $0x28] sm:$0xff] }
 0x2b5   : > { %v2290_v62 = vmax.f32 %v2288_v28, %v2289_v36  ;;  %v2297_v4 = vmax.f32 %v2295_v3, %v2296_v27  ;;  %v2304_v49 = vmax.f32 %v2302_v9, %v2303_v25  ;;  %v2284_v40 = vrot.slane %v2283_v30, 2  ;;  %v5337_v36 = vld [vmem:[%s8724_s3 + $0x98] sm:$0xff]  ;;  %3485 = vmatpush.msra.mxu2 %v3398_v39  ;;  %295 = vst [vmem:[#allocation2 + $0x80] sm:$0xff] %v5642_v2  ;;  %v8828_v20 = vld [vmem:[#allocation11_spill] sm:$0xff] }
 0x2b6   : > { %v2025_v47 = vmax.f32 %v1993_v35, 0.0  ;;  %v1400_v27 = vadd.f32 %v6923_v19, %v1206_v51  ;;  %v1401_v25 = vadd.f32 %v1361_v15, %v1207_v59  ;;  %3446 = vmatpush.msra.mxu1 %v5337_v36  ;;  %296 = vst [vmem:[#allocation2 + $0x88] sm:$0x3] %v5642_v2 }
 0x2b7   : > { %v2291_v22 = vrot.slane %v2290_v62, 2  ;;  %v2298_v28 = vrot.slane %v2297_v4, 2  ;;  %v2305_v3 = vrot.slane %v2304_v49, 2  ;;  %v7011_v17 = vmax.f32 %v2283_v30, %v2284_v40  ;;  %297 = vst [vmem:[#allocation2 + $0x90] sm:$0xff] %v5642_v2 }
 0x2b8   : > { %v2091_v46 = vrot.slane %v2025_v47, 2  ;;  %v2092_v23 = vrot.slane %v2025_v47, 4  ;;  %v2093_v21 = vrot.slane %v2025_v47, 6  ;;  %v2309_v8 = vsel %vm2280_vm0, %v2025_v47, -inf  ;;  %v5336_v47 = vld [vmem:[%s8724_s3 + $0x90] sm:$0xff] }
 0x2b9   : > { %v1866_v9 = vpop.f32.mrf.mxu0  ;;  %v2310_v42 = vrot.slane %v2309_v8, 4  ;;  %v7019_v19 = vmax.f32 %v2290_v62, %v2291_v22  ;;  %v7021_v30 = vmax.f32 %v2297_v4, %v2298_v28  ;;  %v7023_v24 = vmax.f32 %v2304_v49, %v2305_v3  ;;  %v5355_v62 = vld [vmem:[%s8724_s3 + $0x128] sm:$0xff]  ;;  %3447 = vmatpush.msra.mxu1 %v5336_v47  ;;  %v8829_v22 = vld [vmem:[#allocation55_spill] sm:$0xff]  ;;  %298 = vst [vmem:[#allocation2 + $0x98] sm:$0x3] %v5642_v2 }
 0x2ba   : > { %v2316_v48 = vsel %vm2280_vm0, %v2091_v46, -inf  ;;  %v2323_v52 = vsel %vm2280_vm0, %v2092_v23, -inf  ;;  %v2330_v50 = vsel %vm2280_vm0, %v2093_v21, -inf  ;;  %v1958_v43 = vadd.f32 %v1866_v9, %v8827_v12  ;;  %v5335_v4 = vld [vmem:[%s8724_s3 + $0x88] sm:$0xff]  ;;  %3551 = vmatpush.msra.mxu3 %v5355_v62  ;;  %299 = vst [vmem:[#allocation3] sm:$0x3f] %v5642_v2 }
 0x2bb   : > { %v2311_v35 = vmax.f32 %v2309_v8, %v2310_v42  ;;  %v2317_v37 = vrot.slane %v2316_v48, 4  ;;  %v2324_v5 = vrot.slane %v2323_v52, 4  ;;  %v2331_v44 = vrot.slane %v2330_v50, 4  ;;  %v5354_v8 = vld [vmem:[%s8724_s3 + $0x120] sm:$0xff]  ;;  %3448 = vmatpush.msra.mxu1 %v5335_v4  ;;  %300 = vst [vmem:[#allocation3 + $0x8] sm:$0x3f] %v5642_v2 }
 0x2bc   : > { %1913 = vmatmul.f32.gmra.mxu0 %v8826_v55  ;;  %v7038_v49 = vadd.f32 %v6943_v11, %v1400_v27  ;;  %v7040_v59 = vadd.f32 %v1556_v53, %v1401_v25  ;;  %v1994_v40 = vadd.f32 %v6863_v6, %v1958_v43  ;;  %v3397_v11 = vld [vmem:[%s8724_s3 + $0x20] sm:$0xff]  ;;  %v7055_v28 = vadd.f32 %v8829_v22, %v8828_v20  ;;  %v3396_v53 = vld [vmem:[%s8724_s3 + $0x18] sm:$0xff] }
 0x2bd   : > { %v2312_v38 = vrot.slane %v2311_v35, 2  ;;  %v2318_v45 = vmax.f32 %v2316_v48, %v2317_v37  ;;  %v2325_v51 = vmax.f32 %v2323_v52, %v2324_v5  ;;  %v2332_v10 = vmax.f32 %v2330_v50, %v2331_v44  ;;  %v5305_v52 = vld [vmem:[%s5884_s20 + $0x112] sm:$0xff]  ;;  %3486 = vmatpush.msra.mxu2 %v3397_v11  ;;  %3552 = vmatpush.msra.mxu3 %v5354_v8  ;;  %v5334_v37 = vld [vmem:[%s8724_s3 + $0x80] sm:$0xff]  ;;  %v3394_v8 = vld [vmem:[%s8724_s3 + $0x8] sm:$0xff] }
 0x2be   : > { %v2286_v3 = vrot.slane %v7011_v17, 1  ;;  %v2293_v9 = vrot.slane %v7019_v19, 1  ;;  %v2026_v42 = vmax.f32 %v1994_v40, 0.0  ;;  %v2300_v50 = vrot.slane %v7021_v30, 1  ;;  %3449 = vmatpush.msra.mxu1 %v5334_v37  ;;  %301 = vst [vmem:[#allocation3 + $0x10] sm:$0x3f] %v5642_v2 }
 0x2bf   : > { %v7044_v15 = vmax.f32 %v2311_v35, %v2312_v38  ;;  %v2319_v46 = vrot.slane %v2318_v45, 2  ;;  %v2326_v23 = vrot.slane %v2325_v51, 2  ;;  %v2333_v21 = vrot.slane %v2332_v10, 2  ;;  %v5353_v35 = vld [vmem:[%s8724_s3 + $0x118] sm:$0xff]  ;;  %3487 = vmatpush.msra.mxu2 %v3396_v53  ;;  %v5352_v11 = vld [vmem:[%s8724_s3 + $0x110] sm:$0xff] }
 0x2c0   : > { %v2307_v36 = vrot.slane %v7023_v24, 1  ;;  %v2094_v5 = vrot.slane %v2026_v42, 2  ;;  %v2095_v44 = vrot.slane %v2026_v42, 4  ;;  %v2096_v55 = vrot.slane %v2026_v42, 6  ;;  %3553 = vmatpush.msra.mxu3 %v5353_v35  ;;  %302 = vst [vmem:[#allocation3 + $0x18] sm:$0x3f] %v5642_v2 }
 0x2c1   : > { %v1869_v48 = vpop.f32.mrf.mxu0  ;;  %v2320_v27 = vmax.f32 %v2318_v45, %v2319_v46  ;;  %v2327_v25 = vmax.f32 %v2325_v51, %v2326_v23  ;;  %v2337_v47 = vsel %vm2280_vm0, %v2026_v42, -inf  ;;  %v2314_v12 = vrot.slane %v7044_v15, 1  ;;  %v3395_v51 = vld [vmem:[%s8724_s3 + $0x10] sm:$0xff]  ;;  %303 = vst [vmem:[#allocation3 + $0x20] sm:$0x3f] %v5642_v2  ;;  %v5350_v35 = vld [vmem:[%s8724_s3 + $0x100] sm:$0xff] }
 0x2c2   : > { %v2334_v45 = vmax.f32 %v2332_v10, %v2333_v21  ;;  %v2338_v39 = vrot.slane %v2337_v47, 4  ;;  %v2344_v62 = vsel %vm2280_vm0, %v2094_v5, -inf  ;;  %v2351_v4 = vsel %vm2280_vm0, %v2095_v44, -inf  ;;  %3488 = vmatpush.msra.mxu2 %v3395_v51  ;;  %3554 = vmatpush.msra.mxu3 %v5352_v11  ;;  %304 = vst [vmem:[#allocation3 + $0x28] sm:$0x3f] %v5642_v2  ;;  %v5306_v44 = vld [vmem:[%s5884_s20 + $0x122] sm:$0xff] }
 0x2c3   : > { %v2321_v43 = vrot.slane %v2320_v27, 1  ;;  %v2328_v38 = vrot.slane %v2327_v25, 1  ;;  %v2358_v40 = vsel %vm2280_vm0, %v2096_v55, -inf  ;;  %v7085_v10 = vmax.f32 %v7011_v17, %v2286_v3  ;;  %v5351_v17 = vld [vmem:[%s8724_s3 + $0x108] sm:$0xff] }
 0x2c4   : > { %1916 = vmatmul.f32.gmra.mxu0 %v5305_v52  ;;  %v7088_v46 = vmax.f32 %v7019_v19, %v2293_v9  ;;  %v7091_v23 = vmax.f32 %v7021_v30, %v2300_v50  ;;  %v2345_v21 = vrot.slane %v2344_v62, 4  ;;  %v2339_v19 = vmax.f32 %v2337_v47, %v2338_v39  ;;  %v8830_v30 = vld [vmem:[#allocation20_spill] sm:$0xff]  ;;  %3489 = vmatpush.msra.mxu2 %v3394_v8  ;;  %v3409_v9 = vld [vmem:[#allocation2 + $0x1] sm:$0xff]  ;;  %v8831_v39 = vld [vmem:[#allocation21_spill] sm:$0xff] }
 0x2c5   : > { %v2352_v20 = vrot.slane %v2351_v4, 4  ;;  %v2359_v22 = vrot.slane %v2358_v40, 4  ;;  %v1959_v3 = vadd.f32 %v1869_v48, %v8830_v30  ;;  %v7106_v42 = vmax.f32 %v7023_v24, %v2307_v36  ;;  %v3393_v48 = vld [vmem:[%s8724_s3] sm:$0xff]  ;;  %3450 = vmatmul.f32.vlgmr.msra.gmra.mxu1 %v3409_v9  ;;  %3555 = vmatpush.msra.mxu3 %v5351_v17  ;;  %v3516_v55 = vld [vmem:[#allocation2 + $0x2] sm:$0xff] }
 0x2c6   : > { %v7109_v52 = vmax.f32 %v7044_v15, %v2314_v12  ;;  %v2335_v50 = vrot.slane %v2334_v45, 1  ;;  %v2346_v53 = vmax.f32 %v2344_v62, %v2345_v21  ;;  %v2340_v37 = vrot.slane %v2339_v19, 2  ;;  %3490 = vmatpush.msra.mxu2 %v3393_v48 }
 0x2c7   : > { %v2353_v5 = vmax.f32 %v2351_v4, %v2352_v20  ;;  %v2360_v24 = vmax.f32 %v2358_v40, %v2359_v22  ;;  %v1995_v15 = vadd.f32 %v6863_v6, %v1959_v3  ;;  %v7121_v47 = vmax.f32 %v2320_v27, %v2321_v43  ;;  %3556 = vmatpush.msra.mxu3 %v5350_v35 }
 0x2c8   : > { %v7123_v12 = vmax.f32 %v2327_v25, %v2328_v38  ;;  %v2347_v51 = vrot.slane %v2346_v53, 2  ;;  %v2341_v4 = vmax.f32 %v2339_v19, %v2340_v37  ;;  %3491 = vmatmul.f32.vlgmr.msra.gmra.mxu2 %v5642_v2  ;;  %v7127_v8 = vmax.f32 %v2334_v45, %v2335_v50  ;;  %3557 = vmatmul.f32.vlgmr.msra.gmra.mxu3 %v3516_v55  ;;  %v5307_v55 = vld [vmem:[%s5884_s20 + $0x12a] sm:$0xff] }
 0x2c9   : > { %v1872_v36 = vpop.f32.mrf.mxu0  ;;  %v2354_v40 = vrot.slane %v2353_v5, 2  ;;  %v2361_v21 = vrot.slane %v2360_v24, 2  ;;  %v2027_v11 = vmax.f32 %v1995_v15, 0.0 }
 0x2ca   : > { %v1960_v62 = vadd.f32 %v1872_v36, %v8831_v39  ;;  %v2348_v17 = vmax.f32 %v2346_v53, %v2347_v51  ;;  %v2342_v25 = vrot.slane %v2341_v4, 1 }
 0x2cb   : > { %v2355_v43 = vmax.f32 %v2353_v5, %v2354_v40  ;;  %v2362_v38 = vmax.f32 %v2360_v24, %v2361_v21  ;;  %v2097_v20 = vrot.slane %v2027_v11, 2  ;;  %v2098_v19 = vrot.slane %v2027_v11, 4 }
 0x2cc   : > { %v1996_v27 = vadd.f32 %v6863_v6, %v1960_v62  ;;  %1919 = vmatmul.f32.gmra.mxu0 %v5306_v44  ;;  %v2349_v22 = vrot.slane %v2348_v17, 1  ;;  %v2099_v30 = vrot.slane %v2027_v11, 6  ;;  %v2365_v3 = vsel %vm2280_vm0, %v2027_v11, -inf }
 0x2cd   : > { %v2343_v9 = vmax.f32 %v2341_v4, %v2342_v25  ;;  %v2356_v2 = vrot.slane %v2355_v43, 1  ;;  %v2363_v45 = vrot.slane %v2362_v38, 1  ;;  %v2366_v50 = vrot.slane %v2365_v3, 4 }
 0x2ce   : > { %v2350_v53 = vmax.f32 %v2348_v17, %v2349_v22  ;;  %v2372_v48 = vsel %vm2280_vm0, %v2097_v20, -inf  ;;  %v2379_v35 = vsel %vm2280_vm0, %v2098_v19, -inf  ;;  %v2386_v37 = vsel %vm2280_vm0, %v2099_v30, -inf  ;;  %v1747_v30 = vpop.f32.mrf.mxu3 }
 0x2cf   : > { %v2357_v5 = vmax.f32 %v2355_v43, %v2356_v2  ;;  %v2364_v24 = vmax.f32 %v2362_v38, %v2363_v45  ;;  %v3177_v15 = vmax.f32 %v7085_v10, %v2343_v9  ;;  %v2367_v36 = vmax.f32 %v2365_v3, %v2366_v50 }
 0x2d0   : > { %v3178_v51 = vmax.f32 %v7088_v46, %v2350_v53  ;;  %v2373_v39 = vrot.slane %v2372_v48, 4  ;;  %v2380_v62 = vrot.slane %v2379_v35, 4  ;;  %v2387_v4 = vrot.slane %v2386_v37, 4 }
 0x2d1   : > { %v7135_v44 = vpop.f32.mrf.mxu0  ;;  %v3179_v40 = vmax.f32 %v7091_v23, %v2357_v5  ;;  %v3180_v21 = vmax.f32 %v7106_v42, %v2364_v24  ;;  %v2368_v11 = vrot.slane %v2367_v36, 2  ;;  %v2028_v17 = vmax.f32 %v1996_v27, 0.0 }
 0x2d2   : > { %v3306_v25 = vsel %vm3305_vm1, %v3178_v51, %v3177_v15  ;;  %v2374_v43 = vmax.f32 %v2372_v48, %v2373_v39  ;;  %v2381_v10 = vmax.f32 %v2379_v35, %v2380_v62  ;;  %v2388_v38 = vmax.f32 %v2386_v37, %v2387_v4  ;;  %v5308_v51 = vld [vmem:[%s5884_s20 + $0x13a] sm:$0xff] }
 0x2d3   : > { %v3308_v20 = vsel %vm3307_vm2, %v3179_v40, %v3306_v25  ;;  %v2369_v22 = vmax.f32 %v2367_v36, %v2368_v11  ;;  %v2100_v46 = vrot.slane %v2028_v17, 2  ;;  %v2101_v19 = vrot.slane %v2028_v17, 4 }
 0x2d4   : > { %1922 = vmatmul.f32.gmra.mxu0 %v5307_v55  ;;  %v3310_v3 = vsel %vm3309_vm3, %v3180_v21, %v3308_v20  ;;  %v2375_v23 = vrot.slane %v2374_v43, 2  ;;  %v2382_v9 = vrot.slane %v2381_v10, 2  ;;  %v2389_v42 = vrot.slane %v2388_v38, 2 }
 0x2d5   : > { %v2370_v27 = vrot.slane %v2369_v22, 1  ;;  %v2102_v2 = vrot.slane %v2028_v17, 6  ;;  %v2393_v45 = vsel %vm2280_vm0, %v2028_v17, -inf  ;;  %v2400_v50 = vsel %vm2280_vm0, %v2100_v46, -inf }
 0x2d6   : > { %v2376_v53 = vmax.f32 %v2374_v43, %v2375_v23  ;;  %v2383_v48 = vmax.f32 %v2381_v10, %v2382_v9  ;;  %v2390_v35 = vmax.f32 %v2388_v38, %v2389_v42  ;;  %v2394_v37 = vrot.slane %v2393_v45, 4 }
 0x2d7   : > { %v2371_v5 = vmax.f32 %v2369_v22, %v2370_v27  ;;  %v2401_v24 = vrot.slane %v2400_v50, 4  ;;  %v2407_v15 = vsel %vm2280_vm0, %v2101_v19, -inf  ;;  %v2414_v36 = vsel %vm2280_vm0, %v2102_v2, -inf  ;;  %v1364_v22 = vpop.f32.mrf.mxu1 }
 0x2d8   : > { %v2377_v39 = vrot.slane %v2376_v53, 1  ;;  %v2384_v62 = vrot.slane %v2383_v48, 1  ;;  %v2391_v4 = vrot.slane %v2390_v35, 1  ;;  %v2395_v40 = vmax.f32 %v2393_v45, %v2394_v37  ;;  %v1750_v37 = vpop.f32.mrf.mxu3 }
 0x2d9   : > { %v1878_v55 = vpop.f32.mrf.mxu0  ;;  %v3181_v21 = vmax.f32 %v7109_v52, %v2371_v5  ;;  %v2402_v11 = vmax.f32 %v2400_v50, %v2401_v24  ;;  %v2408_v17 = vrot.slane %v2407_v15, 4  ;;  %v2415_v25 = vrot.slane %v2414_v36, 4  ;;  %v1559_v5 = vpop.f32.mrf.mxu2 }
 0x2da   : > { %v2378_v43 = vmax.f32 %v2376_v53, %v2377_v39  ;;  %v2385_v10 = vmax.f32 %v2383_v48, %v2384_v62  ;;  %v2392_v38 = vmax.f32 %v2390_v35, %v2391_v4  ;;  %v2396_v20 = vrot.slane %v2395_v40, 2  ;;  %v8832_v48 = vld [vmem:[#allocation22_spill] sm:$0xff] }
 0x2db   : > { %v3312_v46 = vsel %vm3311_vm4, %v3181_v21, %v3310_v3  ;;  %v2403_v19 = vrot.slane %v2402_v11, 2  ;;  %v2409_v23 = vmax.f32 %v2407_v15, %v2408_v17  ;;  %v2416_v9 = vmax.f32 %v2414_v36, %v2415_v25  ;;  %v5309_v4 = vld [vmem:[%s5884_s20 + $0x142] sm:$0xff]  ;;  %v8834_v25 = vld [vmem:[#allocation24_spill] sm:$0xff] }
 0x2dc   : > { %1925 = vmatmul.f32.gmra.mxu0 %v5308_v51  ;;  %v3182_v42 = vmax.f32 %v7121_v47, %v2378_v43  ;;  %v3183_v27 = vmax.f32 %v7123_v12, %v2385_v10  ;;  %v3184_v52 = vmax.f32 %v7127_v8, %v2392_v38  ;;  %v2397_v2 = vmax.f32 %v2395_v40, %v2396_v20  ;;  %v8833_v47 = vld [vmem:[#allocation23_spill] sm:$0xff]  ;;  %v8835_v10 = vld [vmem:[#allocation12_spill] sm:$0xff] }
 0x2dd   : > { %v2404_v45 = vmax.f32 %v2402_v11, %v2403_v19  ;;  %v2410_v50 = vrot.slane %v2409_v23, 2  ;;  %v2417_v53 = vrot.slane %v2416_v9, 2  ;;  %v1961_v35 = vadd.f32 %v7135_v44, %v8832_v48 }
 0x2de   : > { %v1402_v3 = vadd.f32 %v1364_v22, %v7055_v28  ;;  %v3314_v24 = vsel %vm3313_vm5, %v3182_v42, %v3312_v46  ;;  %v2398_v15 = vrot.slane %v2397_v2, 1  ;;  %v1962_v36 = vadd.f32 %v1878_v55, %v8833_v47  ;;  %v5310_v47 = vld [vmem:[%s5884_s20 + $0x152] sm:$0xff] }
 0x2df   : > { %v3316_v12 = vsel %vm3315_vm6, %v3183_v27, %v3314_v24  ;;  %v2405_v8 = vrot.slane %v2404_v45, 1  ;;  %v2411_v51 = vmax.f32 %v2409_v23, %v2410_v50  ;;  %v7160_v39 = vmax.f32 %v2416_v9, %v2417_v53 }
 0x2e0   : > { %v7164_v40 = vadd.f32 %v1747_v30, %v7038_v49  ;;  %v3318_v44 = vsel %vm3317_vm7, %v3184_v52, %v3316_v12  ;;  %v1997_v28 = vadd.f32 %v6863_v6, %v1961_v35  ;;  %v1998_v21 = vadd.f32 %v6863_v6, %v1962_v36 }
 0x2e1   : > { %v1881_v62 = vpop.f32.mrf.mxu0  ;;  %v7170_v11 = vadd.f32 %v1750_v37, %v7040_v59  ;;  %v7172_v55 = vadd.f32 %v1559_v5, %v1402_v3  ;;  %3377 = vst [vmem:[#allocation2 + $0x11] sm:$0xff] %v3318_v44  ;;  %v2412_v17 = vrot.slane %v2411_v51, 1  ;;  %3453 = vmatmul.f32.gmra.mxu1 %v3318_v44  ;;  %v7177_v49 = vadd.f32 %v6761_v32, %v8835_v10 }
 0x2e2   : > { %v1963_v43 = vadd.f32 %v1881_v62, %v8834_v25  ;;  %v7179_v30 = vmax.f32 %v2397_v2, %v2398_v15  ;;  %v2029_v38 = vmax.f32 %v1997_v28, 0.0  ;;  %v2030_v20 = vmax.f32 %v1998_v21, 0.0 }
 0x2e3   : > { %v7181_v22 = vmax.f32 %v2404_v45, %v2405_v8  ;;  %v7183_v59 = vmax.f32 %v2411_v51, %v2412_v17  ;;  %v2419_v46 = vrot.slane %v7160_v39, 1 }
 0x2e4   : > { %1928 = vmatmul.f32.gmra.mxu0 %v5309_v4  ;;  %v7187_v19 = vadd.f32 %v6863_v6, %v1963_v43  ;;  %v2103_v23 = vrot.slane %v2029_v38, 2  ;;  %v2104_v9 = vrot.slane %v2029_v38, 4  ;;  %v2105_v42 = vrot.slane %v2029_v38, 6 }
 0x2e5   : > { %v2421_v32 = vsel %vm2280_vm0, %v2029_v38, -inf  ;;  %v2106_v52 = vrot.slane %v2030_v20, 2  ;;  %v2107_v2 = vrot.slane %v2030_v20, 4  ;;  %v2108_v50 = vrot.slane %v2030_v20, 6 }
 0x2e6   : > { %v2422_v27 = vrot.slane %v2421_v32, 4  ;;  %v2428_v45 = vsel %vm2280_vm0, %v2103_v23, -inf  ;;  %v2435_v53 = vsel %vm2280_vm0, %v2104_v9, -inf  ;;  %v2442_v48 = vsel %vm2280_vm0, %v2105_v42, -inf }
 0x2e7   : > { %v2449_v35 = vsel %vm2280_vm0, %v2030_v20, -inf  ;;  %v2429_v3 = vrot.slane %v2428_v45, 4  ;;  %v2436_v5 = vrot.slane %v2435_v53, 4  ;;  %v2443_v24 = vrot.slane %v2442_v48, 4 }
 0x2e8   : > { %v2423_v37 = vmax.f32 %v2421_v32, %v2422_v27  ;;  %v2450_v36 = vrot.slane %v2449_v35, 4  ;;  %v2456_v12 = vsel %vm2280_vm0, %v2106_v52, -inf  ;;  %v2463_v8 = vsel %vm2280_vm0, %v2107_v2, -inf  ;;  %v3386_v62 = vld [vmem:[#allocation2 + $0x10] sm:$0xff] }
 0x2e9   : > { %v7194_v15 = vpop.f32.mrf.mxu0  ;;  %v2470_v51 = vsel %vm2280_vm0, %v2108_v50, -inf  ;;  %v3517_v4 = vld [vmem:[#allocation2 + $0x12] sm:$0xff]  ;;  %v2430_v28 = vmax.f32 %v2428_v45, %v2429_v3  ;;  %v2437_v21 = vmax.f32 %v2435_v53, %v2436_v5  ;;  %v2444_v17 = vmax.f32 %v2442_v48, %v2443_v24  ;;  %3494 = vmatmul.f32.gmra.mxu2 %v3386_v62 }
 0x2ea   : > { %v2424_v44 = vrot.slane %v2423_v37, 2  ;;  %3560 = vmatmul.f32.gmra.mxu3 %v3517_v4  ;;  %v2451_v25 = vmax.f32 %v2449_v35, %v2450_v36  ;;  %v2457_v43 = vrot.slane %v2456_v12, 4  ;;  %v2464_v10 = vrot.slane %v2463_v8, 4 }
 0x2eb   : > { %v2471_v38 = vrot.slane %v2470_v51, 4  ;;  %v2431_v23 = vrot.slane %v2430_v28, 2  ;;  %v2438_v9 = vrot.slane %v2437_v21, 2  ;;  %v2445_v42 = vrot.slane %v2444_v17, 2 }
 0x2ec   : > { %1931 = vmatmul.f32.gmra.mxu0 %v5310_v47  ;;  %v2425_v20 = vmax.f32 %v2423_v37, %v2424_v44  ;;  %v2452_v32 = vrot.slane %v2451_v25, 2  ;;  %v2458_v27 = vmax.f32 %v2456_v12, %v2457_v43  ;;  %v2465_v52 = vmax.f32 %v2463_v8, %v2464_v10  ;;  %v5311_v12 = vld [vmem:[%s5884_s20 + $0x15a] sm:$0xff] }
 0x2ed   : > { %v2472_v2 = vmax.f32 %v2470_v51, %v2471_v38  ;;  %v2432_v45 = vmax.f32 %v2430_v28, %v2431_v23  ;;  %v2439_v53 = vmax.f32 %v2437_v21, %v2438_v9  ;;  %v7200_v48 = vmax.f32 %v2444_v17, %v2445_v42 }
 0x2ee   : > { %v2426_v50 = vrot.slane %v2425_v20, 1  ;;  %v2453_v3 = vmax.f32 %v2451_v25, %v2452_v32  ;;  %v2459_v35 = vrot.slane %v2458_v27, 2  ;;  %v2466_v5 = vrot.slane %v2465_v52, 2 }
 0x2ef   : > { %v2473_v24 = vrot.slane %v2472_v2, 2  ;;  %v2420_v47 = vmax.f32 %v7160_v39, %v2419_v46  ;;  %v2433_v36 = vrot.slane %v2432_v45, 1  ;;  %v2440_v62 = vrot.slane %v2439_v53, 1 }
 0x2f0   : > { %v7203_v37 = vmax.f32 %v2425_v20, %v2426_v50  ;;  %v2454_v44 = vrot.slane %v2453_v3, 1  ;;  %v2460_v8 = vmax.f32 %v2458_v27, %v2459_v35  ;;  %v2467_v51 = vmax.f32 %v2465_v52, %v2466_v5 }
 0x2f1   : > { %v1887_v4 = vpop.f32.mrf.mxu0  ;;  %v2474_v43 = vmax.f32 %v2472_v2, %v2473_v24  ;;  %v7206_v28 = vmax.f32 %v2432_v45, %v2433_v36  ;;  %v7208_v21 = vmax.f32 %v2439_v53, %v2440_v62  ;;  %v2447_v17 = vrot.slane %v7200_v48, 1 }
 0x2f2   : > { %v2031_v25 = vmax.f32 %v7187_v19, 0.0  ;;  %v2455_v10 = vmax.f32 %v2453_v3, %v2454_v44  ;;  %v2461_v39 = vrot.slane %v2460_v8, 1  ;;  %v2468_v46 = vrot.slane %v2467_v51, 1 }
 0x2f3   : > { %v2475_v38 = vrot.slane %v2474_v43, 1  ;;  %v1964_v44 = vadd.f32 %v7194_v15, %v6821_v63 }
 0x2f4   : > { %1934 = vmatmul.f32.gmra.mxu0 %v5311_v12  ;;  %v2109_v20 = vrot.slane %v2031_v25, 2  ;;  %v2110_v23 = vrot.slane %v2031_v25, 4  ;;  %v2111_v9 = vrot.slane %v2031_v25, 6  ;;  %v2477_v42 = vsel %vm2280_vm0, %v2031_v25, -inf }
 0x2f5   : > { %v2462_v32 = vmax.f32 %v2460_v8, %v2461_v39  ;;  %v2469_v27 = vmax.f32 %v2467_v51, %v2468_v46  ;;  %v2476_v52 = vmax.f32 %v2474_v43, %v2475_v38  ;;  %v3185_v2 = vmax.f32 %v7179_v30, %v2455_v10  ;;  %v5312_v8 = vld [vmem:[%s5884_s20 + $0x16a] sm:$0xff] }
 0x2f6   : > { %v2478_v50 = vrot.slane %v2477_v42, 4  ;;  %v2484_v45 = vsel %vm2280_vm0, %v2109_v20, -inf  ;;  %v2491_v19 = vsel %vm2280_vm0, %v2110_v23, -inf  ;;  %v2498_v53 = vsel %vm2280_vm0, %v2111_v9, -inf }
 0x2f7   : > { %v3186_v3 = vmax.f32 %v7181_v22, %v2462_v32  ;;  %v3187_v35 = vmax.f32 %v7183_v59, %v2469_v27  ;;  %v3188_v5 = vmax.f32 %v2420_v47, %v2476_v52  ;;  %v2485_v24 = vrot.slane %v2484_v45, 4 }
 0x2f8   : > { %v2479_v36 = vmax.f32 %v2477_v42, %v2478_v50  ;;  %v2492_v62 = vrot.slane %v2491_v19, 4  ;;  %v2499_v12 = vrot.slane %v2498_v53, 4  ;;  %v1965_v25 = vadd.f32 %v1887_v4, %v6832_v1 }
 0x2f9   : > { %v1890_v30 = vpop.f32.mrf.mxu0  ;;  %v3319_v51 = vsel %vm3305_vm1, %v3186_v3, %v3185_v2  ;;  %v2486_v43 = vmax.f32 %v2484_v45, %v2485_v24  ;;  %v2000_v20 = vadd.f32 %v6863_v6, %v1964_v44 }
 0x2fa   : > { %v1966_v10 = vadd.f32 %v1890_v30, %v6838_v26  ;;  %v3320_v22 = vsel %vm3307_vm2, %v3187_v35, %v3319_v51  ;;  %v2480_v59 = vrot.slane %v2479_v36, 2  ;;  %v2493_v47 = vmax.f32 %v2491_v19, %v2492_v62 }
 0x2fb   : > { %v2500_v39 = vmax.f32 %v2498_v53, %v2499_v12  ;;  %v3321_v46 = vsel %vm3309_vm3, %v3188_v5, %v3320_v22  ;;  %v2487_v38 = vrot.slane %v2486_v43, 2  ;;  %v2001_v63 = vadd.f32 %v6863_v6, %v1965_v25 }
 0x2fc   : > { %1937 = vmatmul.f32.gmra.mxu0 %v5312_v8  ;;  %v2481_v15 = vmax.f32 %v2479_v36, %v2480_v59  ;;  %v2494_v23 = vrot.slane %v2493_v47, 2  ;;  %v2002_v1 = vadd.f32 %v6863_v6, %v1966_v10  ;;  %v2448_v26 = vmax.f32 %v7200_v48, %v2447_v17  ;;  %v5313_v48 = vld [vmem:[%s5884_s20 + $0x172] sm:$0xff] }
 0x2fd   : > { %v2501_v9 = vrot.slane %v2500_v39, 2  ;;  %v2488_v4 = vmax.f32 %v2486_v43, %v2487_v38  ;;  %v2032_v42 = vmax.f32 %v2000_v20, 0.0  ;;  %v2033_v32 = vmax.f32 %v2001_v63, 0.0 }
 0x2fe   : > { %v2482_v27 = vrot.slane %v2481_v15, 1  ;;  %v2495_v52 = vmax.f32 %v2493_v47, %v2494_v23  ;;  %v7231_v50 = vmax.f32 %v2002_v1, 0.0 }
 0x2ff   : > { %v2502_v2 = vmax.f32 %v2500_v39, %v2501_v9  ;;  %v2489_v45 = vrot.slane %v2488_v4, 1  ;;  %v2112_v19 = vrot.slane %v2032_v42, 2  ;;  %v2113_v53 = vrot.slane %v2032_v42, 4 }
 0x300   : > { %v2114_v3 = vrot.slane %v2032_v42, 6  ;;  %v2483_v35 = vmax.f32 %v2481_v15, %v2482_v27  ;;  %v2496_v5 = vrot.slane %v2495_v52, 1  ;;  %v2505_v6 = vsel %vm2280_vm0, %v2032_v42, -inf }
 0x301   : > { %v2503_v24 = vrot.slane %v2502_v2, 1  ;;  %v7234_v36 = vpop.f32.mrf.mxu0  ;;  %v2490_v17 = vmax.f32 %v2488_v4, %v2489_v45  ;;  %v2506_v62 = vrot.slane %v2505_v6, 4  ;;  %v2512_v12 = vsel %vm2280_vm0, %v2112_v19, -inf }
 0x302   : > { %v2519_v44 = vsel %vm2280_vm0, %v2113_v53, -inf  ;;  %v2497_v30 = vmax.f32 %v2495_v52, %v2496_v5  ;;  %v3189_v51 = vmax.f32 %v7203_v37, %v2483_v35  ;;  %v2513_v43 = vrot.slane %v2512_v12, 4 }
 0x303   : > { %v2504_v8 = vmax.f32 %v2502_v2, %v2503_v24  ;;  %v3190_v25 = vmax.f32 %v7206_v28, %v2490_v17  ;;  %v2507_v10 = vmax.f32 %v2505_v6, %v2506_v62  ;;  %v2520_v22 = vrot.slane %v2519_v44, 4 }
 0x304   : > { %v2526_v59 = vsel %vm2280_vm0, %v2114_v3, -inf  ;;  %1940 = vmatmul.f32.gmra.mxu0 %v5313_v48  ;;  %v3191_v47 = vmax.f32 %v7208_v21, %v2497_v30  ;;  %v3322_v38 = vsel %vm3311_vm4, %v3189_v51, %v3321_v46  ;;  %v2514_v20 = vmax.f32 %v2512_v12, %v2513_v43  ;;  %v5314_v3 = vld [vmem:[%s5884_s20 + $0x182] sm:$0xff] }
 0x305   : > { %v3192_v39 = vmax.f32 %v2448_v26, %v2504_v8  ;;  %v3323_v63 = vsel %vm3313_vm5, %v3190_v25, %v3322_v38  ;;  %v2508_v15 = vrot.slane %v2507_v10, 2  ;;  %v2521_v23 = vmax.f32 %v2519_v44, %v2520_v22  ;;  %v1367_v26 = vpop.f32.mrf.mxu1 }
 0x306   : > { %v2527_v9 = vrot.slane %v2526_v59, 4  ;;  %v3324_v37 = vsel %vm3315_vm6, %v3191_v47, %v3323_v63  ;;  %v2515_v28 = vrot.slane %v2514_v20, 2  ;;  %v2115_v1 = vrot.slane %v2033_v32, 2 }
 0x307   : > { %v2116_v4 = vrot.slane %v2033_v32, 4  ;;  %v3325_v42 = vsel %vm3317_vm7, %v3192_v39, %v3324_v37  ;;  %v2509_v27 = vmax.f32 %v2507_v10, %v2508_v15  ;;  %v2522_v52 = vrot.slane %v2521_v23, 2 }
 0x308   : > { %v2528_v21 = vmax.f32 %v2526_v59, %v2527_v9  ;;  %3378 = vst [vmem:[#allocation2 + $0x21] sm:$0xff] %v3325_v42  ;;  %v2516_v46 = vmax.f32 %v2514_v20, %v2515_v28  ;;  %v2117_v2 = vrot.slane %v2033_v32, 6  ;;  %v2533_v45 = vsel %vm2280_vm0, %v2033_v32, -inf  ;;  %3456 = vmatmul.f32.gmra.mxu1 %v3325_v42 }
 0x309   : > { %v2540_v19 = vsel %vm2280_vm0, %v2115_v1, -inf  ;;  %v7249_v53 = vpop.f32.mrf.mxu0  ;;  %v2510_v35 = vrot.slane %v2509_v27, 1  ;;  %v2523_v5 = vmax.f32 %v2521_v23, %v2522_v52  ;;  %v2534_v6 = vrot.slane %v2533_v45, 4 }
 0x30a   : > { %v2529_v24 = vrot.slane %v2528_v21, 2  ;;  %v2517_v48 = vrot.slane %v2516_v46, 1  ;;  %v2541_v17 = vrot.slane %v2540_v19, 4  ;;  %v2547_v62 = vsel %vm2280_vm0, %v2116_v4, -inf }
 0x30b   : > { %v2554_v12 = vsel %vm2280_vm0, %v2117_v2, -inf  ;;  %v7255_v44 = vadd.f32 %v1367_v26, %v7177_v49  ;;  %v2524_v32 = vrot.slane %v2523_v5, 1  ;;  %v2535_v8 = vmax.f32 %v2533_v45, %v2534_v6  ;;  %v5315_v26 = vld [vmem:[%s5884_s20 + $0x18a] sm:$0xff] }
 0x30c   : > { %v2530_v30 = vmax.f32 %v2528_v21, %v2529_v24  ;;  %1943 = vmatmul.f32.gmra.mxu0 %v5314_v3  ;;  %v7257_v51 = vmax.f32 %v2509_v27, %v2510_v35  ;;  %v2542_v43 = vmax.f32 %v2540_v19, %v2541_v17  ;;  %v2548_v25 = vrot.slane %v2547_v62, 4 }
 0x30d   : > { %v2555_v10 = vrot.slane %v2554_v12, 4  ;;  %v7259_v22 = vmax.f32 %v2516_v46, %v2517_v48  ;;  %v7261_v59 = vmax.f32 %v2523_v5, %v2524_v32  ;;  %v2536_v47 = vrot.slane %v2535_v8, 2 }
 0x30e   : > { %v2118_v39 = vrot.slane %v7231_v50, 2  ;;  %v2543_v38 = vrot.slane %v2542_v43, 2  ;;  %v2549_v20 = vmax.f32 %v2547_v62, %v2548_v25  ;;  %v2119_v63 = vrot.slane %v7231_v50, 4 }
 0x30f   : > { %v2556_v49 = vmax.f32 %v2554_v12, %v2555_v10  ;;  %v2531_v15 = vrot.slane %v2530_v30, 1  ;;  %v2537_v23 = vmax.f32 %v2535_v8, %v2536_v47  ;;  %v2120_v9 = vrot.slane %v7231_v50, 6  ;;  %v3387_v28 = vld [vmem:[#allocation2 + $0x20] sm:$0xff] }
 0x310   : > { %v2561_v37 = vsel %vm2280_vm0, %v7231_v50, -inf  ;;  %v3518_v1 = vld [vmem:[#allocation2 + $0x22] sm:$0xff]  ;;  %v2544_v4 = vmax.f32 %v2542_v43, %v2543_v38  ;;  %v2550_v42 = vrot.slane %v2549_v20, 2  ;;  %3497 = vmatmul.f32.gmra.mxu2 %v3387_v28  ;;  %v2568_v2 = vsel %vm2280_vm0, %v2118_v39, -inf }
 0x311   : > { %v2557_v27 = vrot.slane %v2556_v49, 2  ;;  %v2562_v52 = vrot.slane %v2561_v37, 4  ;;  %3563 = vmatmul.f32.gmra.mxu3 %v3518_v1  ;;  %v1899_v21 = vpop.f32.mrf.mxu0  ;;  %v2538_v46 = vrot.slane %v2537_v23, 1  ;;  %v2575_v45 = vsel %vm2280_vm0, %v2119_v63, -inf }
 0x312   : > { %v2582_v19 = vsel %vm2280_vm0, %v2120_v9, -inf  ;;  %v2545_v3 = vrot.slane %v2544_v4, 1  ;;  %v2551_v35 = vmax.f32 %v2549_v20, %v2550_v42  ;;  %v7272_v24 = vmax.f32 %v2530_v30, %v2531_v15 }
 0x313   : > { %v2558_v50 = vmax.f32 %v2556_v49, %v2557_v27  ;;  %v2563_v5 = vmax.f32 %v2561_v37, %v2562_v52  ;;  %v2569_v6 = vrot.slane %v2568_v2, 4  ;;  %v2576_v48 = vrot.slane %v2575_v45, 4 }
 0x314   : > { %v2583_v17 = vrot.slane %v2582_v19, 4  ;;  %1946 = vmatmul.f32.gmra.mxu0 %v5315_v26  ;;  %v7274_v62 = vmax.f32 %v2537_v23, %v2538_v46  ;;  %v2552_v12 = vrot.slane %v2551_v35, 1  ;;  %v1967_v47 = vadd.f32 %v7234_v36, %v6841_v60  ;;  %v7287_v23 = vld [vmem:[%s8723_s2] ss:$0 sm:$0xff] }
 0x315   : > { %v2559_v32 = vrot.slane %v2558_v50, 1  ;;  %v2564_v8 = vrot.slane %v2563_v5, 2  ;;  %v2570_v43 = vmax.f32 %v2568_v2, %v2569_v6  ;;  %v2577_v25 = vmax.f32 %v2575_v45, %v2576_v48 }
 0x316   : > { %v2584_v10 = vmax.f32 %v2582_v19, %v2583_v17  ;;  %v7278_v39 = vmax.f32 %v2544_v4, %v2545_v3  ;;  %v7280_v30 = vmax.f32 %v2551_v35, %v2552_v12  ;;  %v1968_v20 = vadd.f32 %v7249_v53, %v6846_v58  ;;  %v5316_v4 = vld [vmem:[%s5884_s20 + $0x19a] sm:$0xff] }
 0x317   : > { %v2565_v38 = vmax.f32 %v2563_v5, %v2564_v8  ;;  %v2571_v49 = vrot.slane %v2570_v43, 2  ;;  %v2578_v63 = vrot.slane %v2577_v25, 2  ;;  %v2003_v9 = vadd.f32 %v7287_v23, %v1967_v47 }
 0x318   : > { %v2585_v15 = vrot.slane %v2584_v10, 2  ;;  %v7290_v37 = vmax.f32 %v2558_v50, %v2559_v32  ;;  %v2004_v36 = vadd.f32 %v7287_v23, %v1968_v20  ;;  %v1969_v28 = vadd.f32 %v1899_v21, %v6849_v18 }
 0x319   : > { %v2566_v60 = vrot.slane %v2565_v38, 1  ;;  %v1902_v1 = vpop.f32.mrf.mxu0  ;;  %v2572_v58 = vmax.f32 %v2570_v43, %v2571_v49  ;;  %v2579_v53 = vmax.f32 %v2577_v25, %v2578_v63  ;;  %v2035_v27 = vmax.f32 %v2003_v9, 0.0  ;;  %v5317_v9 = vld [vmem:[%s5884_s20 + $0x1a2] sm:$0xff]  ;;  %s5592_s20 = sshll.u32 %s8838_s25, 4 }
 0x31a   : > { %v2586_v42 = vmax.f32 %v2584_v10, %v2585_v15  ;;  %v2036_v26 = vmax.f32 %v2004_v36, 0.0  ;;  %v7296_v46 = vadd.f32 %v7287_v23, %v1969_v28  ;;  %v7299_v2 = vadd.f32 %v1902_v1, %v6869_v56  ;;  %s278_s10 = scalar_lea.vmem %s8728_s7, %s5592_s20 }
 0x31b   : > { %v2567_v52 = vmax.f32 %v2565_v38, %v2566_v60  ;;  %v2573_v45 = vrot.slane %v2572_v58, 1  ;;  %v2580_v19 = vrot.slane %v2579_v53, 1  ;;  %v2121_v35 = vrot.slane %v2035_v27, 2 }
 0x31c   : > { %v2587_v3 = vrot.slane %v2586_v42, 1  ;;  %1949 = vmatmul.f32.gmra.mxu0 %v5316_v4  ;;  %v2122_v21 = vrot.slane %v2035_v27, 4  ;;  %v2123_v50 = vrot.slane %v2035_v27, 6  ;;  %v2589_v5 = vsel %vm2280_vm0, %v2035_v27, -inf }
 0x31d   : > { %v3193_v18 = vmax.f32 %v7257_v51, %v2567_v52  ;;  %v2574_v6 = vmax.f32 %v2572_v58, %v2573_v45  ;;  %v2581_v48 = vmax.f32 %v2579_v53, %v2580_v19  ;;  %v2590_v12 = vrot.slane %v2589_v5, 4 }
 0x31e   : > { %v2588_v17 = vmax.f32 %v2586_v42, %v2587_v3  ;;  %v2596_v32 = vsel %vm2280_vm0, %v2121_v35, -inf  ;;  %v2603_v56 = vsel %vm2280_vm0, %v2122_v21, -inf  ;;  %v2610_v8 = vsel %vm2280_vm0, %v2123_v50, -inf }
 0x31f   : > { %v2124_v43 = vrot.slane %v2036_v26, 2  ;;  %v3194_v25 = vmax.f32 %v7259_v22, %v2574_v6  ;;  %v3195_v51 = vmax.f32 %v7261_v59, %v2581_v48  ;;  %v2591_v47 = vmax.f32 %v2589_v5, %v2590_v12 }
 0x320   : > { %v3196_v10 = vmax.f32 %v7272_v24, %v2588_v17  ;;  %v2597_v38 = vrot.slane %v2596_v32, 4  ;;  %v2604_v20 = vrot.slane %v2603_v56, 4  ;;  %v2611_v49 = vrot.slane %v2610_v8, 4 }
 0x321   : > { %v2125_v63 = vrot.slane %v2036_v26, 4  ;;  %v1905_v15 = vpop.f32.mrf.mxu0  ;;  %v3326_v60 = vsel %vm3305_vm1, %v3194_v25, %v3193_v18  ;;  %v2592_v36 = vrot.slane %v2591_v47, 2  ;;  %v2126_v28 = vrot.slane %v2036_v26, 6 }
 0x322   : > { %v2617_v1 = vsel %vm2280_vm0, %v2036_v26, -inf  ;;  %v3327_v4 = vsel %vm3307_vm2, %v3195_v51, %v3326_v60  ;;  %v2598_v22 = vmax.f32 %v2596_v32, %v2597_v38  ;;  %v2605_v58 = vmax.f32 %v2603_v56, %v2604_v20 }
 0x323   : > { %v2612_v59 = vmax.f32 %v2610_v8, %v2611_v49  ;;  %v3328_v24 = vsel %vm3309_vm3, %v3196_v10, %v3327_v4  ;;  %v2593_v53 = vmax.f32 %v2591_v47, %v2592_v36  ;;  %v2618_v42 = vrot.slane %v2617_v1, 4 }
 0x324   : > { %v2624_v27 = vsel %vm2280_vm0, %v2124_v43, -inf  ;;  %1952 = vmatmul.f32.gmra.mxu0 %v5317_v9  ;;  %v2599_v52 = vrot.slane %v2598_v22, 2  ;;  %v2606_v45 = vrot.slane %v2605_v58, 2  ;;  %v2631_v26 = vsel %vm2280_vm0, %v2125_v63, -inf }
 0x325   : > { %v2613_v19 = vrot.slane %v2612_v59, 2  ;;  %v2625_v3 = vrot.slane %v2624_v27, 4  ;;  %v2594_v35 = vrot.slane %v2593_v53, 1  ;;  %v2619_v18 = vmax.f32 %v2617_v1, %v2618_v42 }
 0x326   : > { %v2638_v21 = vsel %vm2280_vm0, %v2126_v28, -inf  ;;  %v2600_v50 = vmax.f32 %v2598_v22, %v2599_v52  ;;  %v2607_v5 = vmax.f32 %v2605_v58, %v2606_v45  ;;  %v2632_v32 = vrot.slane %v2631_v26, 4 }
 0x327   : > { %v2614_v6 = vmax.f32 %v2612_v59, %v2613_v19  ;;  %v2626_v48 = vmax.f32 %v2624_v27, %v2625_v3  ;;  %v2595_v17 = vmax.f32 %v2593_v53, %v2594_v35  ;;  %v2620_v12 = vrot.slane %v2619_v18, 2 }
 0x328   : > { %v2639_v56 = vrot.slane %v2638_v21, 4  ;;  %v2601_v8 = vrot.slane %v2600_v50, 1  ;;  %v2608_v43 = vrot.slane %v2607_v5, 1  ;;  %v2633_v38 = vmax.f32 %v2631_v26, %v2632_v32 }
 0x329   : > { %v2615_v25 = vrot.slane %v2614_v6, 1  ;;  %v2627_v51 = vrot.slane %v2626_v48, 2  ;;  %v3197_v10 = vmax.f32 %v7274_v62, %v2595_v17  ;;  %v2621_v47 = vmax.f32 %v2619_v18, %v2620_v12  ;;  %v7318_v36 = vpop.f32.mrf.mxu0 }
 0x32a   : > { %v2640_v20 = vmax.f32 %v2638_v21, %v2639_v56  ;;  %v2602_v49 = vmax.f32 %v2600_v50, %v2601_v8  ;;  %v2609_v63 = vmax.f32 %v2607_v5, %v2608_v43  ;;  %v2634_v4 = vrot.slane %v2633_v38, 2 }
 0x32b   : > { %v2616_v9 = vmax.f32 %v2614_v6, %v2615_v25  ;;  %v2628_v60 = vmax.f32 %v2626_v48, %v2627_v51  ;;  %v3329_v28 = vsel %vm3311_vm4, %v3197_v10, %v3328_v24  ;;  %v2622_v1 = vrot.slane %v2621_v47, 1 }
 0x32c   : > { %v2641_v22 = vrot.slane %v2640_v20, 2  ;;  %v3198_v58 = vmax.f32 %v7278_v39, %v2602_v49  ;;  %v3199_v59 = vmax.f32 %v7280_v30, %v2609_v63  ;;  %v2635_v27 = vmax.f32 %v2633_v38, %v2634_v4 }
 0x32d   : > { %v3200_v62 = vmax.f32 %v7290_v37, %v2616_v9  ;;  %v2629_v53 = vrot.slane %v2628_v60, 1  ;;  %v7324_v42 = vmax.f32 %v2621_v47, %v2622_v1  ;;  %v2037_v45 = vmax.f32 %v7296_v46, 0.0 }
 0x32e   : > { %v2642_v52 = vmax.f32 %v2640_v20, %v2641_v22  ;;  %v3330_v19 = vsel %vm3313_vm5, %v3198_v58, %v3329_v28  ;;  %v2006_v24 = vadd.f32 %v7287_v23, %v7299_v2  ;;  %v1971_v39 = vadd.f32 %v1905_v15, %v6872_v61 }
 0x32f   : > { %v7328_v3 = vmax.f32 %v2628_v60, %v2629_v53  ;;  %v3331_v30 = vsel %vm3315_vm6, %v3199_v59, %v3330_v19  ;;  %v2636_v35 = vrot.slane %v2635_v27, 1  ;;  %v2127_v18 = vrot.slane %v2037_v45, 2 }
 0x330   : > { %v2643_v37 = vrot.slane %v2642_v52, 1  ;;  %v3332_v26 = vsel %vm3317_vm7, %v3200_v62, %v3331_v30  ;;  %v2128_v21 = vrot.slane %v2037_v45, 4  ;;  %v2129_v50 = vrot.slane %v2037_v45, 6 }
 0x331   : > { %v2645_v46 = vsel %vm2280_vm0, %v2037_v45, -inf  ;;  %3379 = vst [vmem:[#allocation2 + $0x31] sm:$0xff] %v3332_v26  ;;  %v7336_v5 = vmax.f32 %v2635_v27, %v2636_v35  ;;  %v2652_v2 = vsel %vm2280_vm0, %v2127_v18, -inf  ;;  %3459 = vmatmul.f32.gmra.mxu1 %v3332_v26  ;;  %v2038_v12 = vmax.f32 %v2006_v24, 0.0  ;;  %v7344_v38 = vpop.f32.mrf.mxu0 }
 0x332   : > { %v7338_v6 = vmax.f32 %v2642_v52, %v2643_v37  ;;  %v2646_v48 = vrot.slane %v2645_v46, 4  ;;  %v2653_v61 = vrot.slane %v2652_v2, 4  ;;  %v2659_v15 = vsel %vm2280_vm0, %v2128_v21, -inf }
 0x333   : > { %v2666_v17 = vsel %vm2280_vm0, %v2129_v50, -inf  ;;  %v2660_v56 = vrot.slane %v2659_v15, 4  ;;  %v2007_v43 = vadd.f32 %v7287_v23, %v1971_v39  ;;  %v2130_v51 = vrot.slane %v2038_v12, 2 }
 0x334   : > { %v2647_v32 = vmax.f32 %v2645_v46, %v2646_v48  ;;  %v2667_v8 = vrot.slane %v2666_v17, 4  ;;  %v2654_v25 = vmax.f32 %v2652_v2, %v2653_v61  ;;  %v2131_v10 = vrot.slane %v2038_v12, 4 }
 0x335   : > { %v2132_v47 = vrot.slane %v2038_v12, 6  ;;  %v2661_v49 = vmax.f32 %v2659_v15, %v2660_v56  ;;  %v2673_v9 = vsel %vm2280_vm0, %v2038_v12, -inf  ;;  %v2680_v1 = vsel %vm2280_vm0, %v2130_v51, -inf }
 0x336   : > { %v2648_v20 = vrot.slane %v2647_v32, 2  ;;  %v2668_v63 = vmax.f32 %v2666_v17, %v2667_v8  ;;  %v2655_v60 = vrot.slane %v2654_v25, 2  ;;  %v2674_v28 = vrot.slane %v2673_v9, 4 }
 0x337   : > { %v2687_v4 = vsel %vm2280_vm0, %v2131_v10, -inf  ;;  %v2662_v58 = vrot.slane %v2661_v49, 2  ;;  %v2681_v62 = vrot.slane %v2680_v1, 4  ;;  %v2694_v45 = vsel %vm2280_vm0, %v2132_v47, -inf }
 0x338   : > { %v2649_v22 = vmax.f32 %v2647_v32, %v2648_v20  ;;  %v2669_v59 = vrot.slane %v2668_v63, 2  ;;  %v2656_v53 = vmax.f32 %v2654_v25, %v2655_v60  ;;  %v2675_v27 = vmax.f32 %v2673_v9, %v2674_v28  ;;  %v3388_v19 = vld [vmem:[#allocation2 + $0x30] sm:$0xff] }
 0x339   : > { %v2688_v52 = vrot.slane %v2687_v4, 4  ;;  %v3519_v24 = vld [vmem:[#allocation2 + $0x32] sm:$0xff]  ;;  %v2663_v30 = vmax.f32 %v2661_v49, %v2662_v58  ;;  %v2682_v37 = vmax.f32 %v2680_v1, %v2681_v62  ;;  %3500 = vmatmul.f32.gmra.mxu2 %v3388_v19  ;;  %v2695_v50 = vrot.slane %v2694_v45, 4 }
 0x33a   : > { %v2650_v39 = vrot.slane %v2649_v22, 1  ;;  %v2670_v35 = vmax.f32 %v2668_v63, %v2669_v59  ;;  %3566 = vmatmul.f32.gmra.mxu3 %v3519_v24  ;;  %v2657_v18 = vrot.slane %v2656_v53, 1  ;;  %v2676_v26 = vrot.slane %v2675_v27, 2  ;;  %v1914_v63 = vpop.f32.mrf.mxu0 }
 0x33b   : > { %v2689_v21 = vmax.f32 %v2687_v4, %v2688_v52  ;;  %v2664_v48 = vrot.slane %v2663_v30, 1  ;;  %v2683_v61 = vrot.slane %v2682_v37, 2  ;;  %v2696_v32 = vmax.f32 %v2694_v45, %v2695_v50 }
 0x33c   : > { %v7350_v46 = vmax.f32 %v2649_v22, %v2650_v39  ;;  %v2671_v2 = vrot.slane %v2670_v35, 1  ;;  %v7352_v15 = vmax.f32 %v2656_v53, %v2657_v18  ;;  %v2677_v17 = vmax.f32 %v2675_v27, %v2676_v26 }
 0x33d   : > { %v2690_v12 = vrot.slane %v2689_v21, 2  ;;  %v7354_v56 = vmax.f32 %v2663_v30, %v2664_v48  ;;  %v2684_v25 = vmax.f32 %v2682_v37, %v2683_v61  ;;  %v2039_v51 = vmax.f32 %v2007_v43, 0.0 }
 0x33e   : > { %v7356_v8 = vmax.f32 %v2670_v35, %v2671_v2  ;;  %v2678_v10 = vrot.slane %v2677_v17, 1  ;;  %v2697_v20 = vrot.slane %v2696_v32, 2  ;;  %v1972_v49 = vadd.f32 %v7318_v36, %v6878_v16 }
 0x33f   : > { %v2691_v47 = vmax.f32 %v2689_v21, %v2690_v12  ;;  %v2685_v9 = vrot.slane %v2684_v25, 1  ;;  %v2133_v60 = vrot.slane %v2039_v51, 2  ;;  %v2134_v28 = vrot.slane %v2039_v51, 4 }
 0x340   : > { %v2135_v1 = vrot.slane %v2039_v51, 6  ;;  %v2679_v4 = vmax.f32 %v2677_v17, %v2678_v10  ;;  %v2698_v58 = vmax.f32 %v2696_v32, %v2697_v20  ;;  %v2701_v59 = vsel %vm2280_vm0, %v2039_v51, -inf }
 0x341   : > { %v2692_v22 = vrot.slane %v2691_v47, 1  ;;  %v2686_v62 = vmax.f32 %v2684_v25, %v2685_v9  ;;  %v2702_v53 = vrot.slane %v2701_v59, 4  ;;  %v2708_v43 = vsel %vm2280_vm0, %v2133_v60, -inf }
 0x342   : > { %v2715_v27 = vsel %vm2280_vm0, %v2134_v28, -inf  ;;  %v2699_v45 = vrot.slane %v2698_v58, 1  ;;  %v3201_v16 = vmax.f32 %v7324_v42, %v2679_v4  ;;  %v2709_v36 = vrot.slane %v2708_v43, 4  ;;  %v1917_v9 = vpop.f32.mrf.mxu0 }
 0x343   : > { %v2693_v52 = vmax.f32 %v2691_v47, %v2692_v22  ;;  %v3202_v19 = vmax.f32 %v7328_v3, %v2686_v62  ;;  %v2703_v24 = vmax.f32 %v2701_v59, %v2702_v53  ;;  %v2716_v39 = vrot.slane %v2715_v27, 4 }
 0x344   : > { %v2722_v30 = vsel %vm2280_vm0, %v2135_v1, -inf  ;;  %v2700_v35 = vmax.f32 %v2698_v58, %v2699_v45  ;;  %v2710_v18 = vmax.f32 %v2708_v43, %v2709_v36  ;;  %v2008_v2 = vadd.f32 %v7287_v23, %v1972_v49 }
 0x345   : > { %v3203_v37 = vmax.f32 %v7336_v5, %v2693_v52  ;;  %v2723_v26 = vrot.slane %v2722_v30, 4  ;;  %v3333_v21 = vsel %vm3305_vm1, %v3202_v19, %v3201_v16  ;;  %v2704_v50 = vrot.slane %v2703_v24, 2 }
 0x346   : > { %v2717_v48 = vmax.f32 %v2715_v27, %v2716_v39  ;;  %v3204_v42 = vmax.f32 %v7338_v6, %v2700_v35  ;;  %v2711_v3 = vrot.slane %v2710_v18, 2  ;;  %v2040_v25 = vmax.f32 %v2008_v2, 0.0 }
 0x347   : > { %v3334_v61 = vsel %vm3307_vm2, %v3203_v37, %v3333_v21  ;;  %v2724_v17 = vmax.f32 %v2722_v30, %v2723_v26  ;;  %v2705_v12 = vmax.f32 %v2703_v24, %v2704_v50  ;;  %v1973_v5 = vadd.f32 %v7344_v38, %v6890_v34  ;;  %v1562_v26 = vpop.f32.mrf.mxu2 }
 0x348   : > { %v2718_v32 = vrot.slane %v2717_v48, 2  ;;  %v3335_v51 = vsel %vm3309_vm3, %v3204_v42, %v3334_v61  ;;  %v2712_v10 = vmax.f32 %v2710_v18, %v2711_v3  ;;  %v1974_v20 = vadd.f32 %v1914_v63, %v6900_v57 }
 0x349   : > { %v2725_v47 = vrot.slane %v2724_v17, 2  ;;  %v2706_v49 = vrot.slane %v2705_v12, 1  ;;  %v2136_v6 = vrot.slane %v2040_v25, 2  ;;  %v2137_v28 = vrot.slane %v2040_v25, 4 }
 0x34a   : > { %v2719_v60 = vmax.f32 %v2717_v48, %v2718_v32  ;;  %v2713_v1 = vrot.slane %v2712_v10, 1  ;;  %v2138_v22 = vrot.slane %v2040_v25, 6  ;;  %v2729_v58 = vsel %vm2280_vm0, %v2040_v25, -inf  ;;  %v1920_v32 = vpop.f32.mrf.mxu0 }
 0x34b   : > { %v2726_v4 = vmax.f32 %v2724_v17, %v2725_v47  ;;  %v2707_v59 = vmax.f32 %v2705_v12, %v2706_v49  ;;  %v2730_v53 = vrot.slane %v2729_v58, 4  ;;  %v2736_v34 = vsel %vm2280_vm0, %v2136_v6, -inf  ;;  %v8836_v47 = vld [vmem:[#allocation13_spill] sm:$0xff] }
 0x34c   : > { %v2720_v62 = vrot.slane %v2719_v60, 1  ;;  %v2714_v38 = vmax.f32 %v2712_v10, %v2713_v1  ;;  %v2737_v27 = vrot.slane %v2736_v34, 4  ;;  %v2743_v57 = vsel %vm2280_vm0, %v2137_v28, -inf }
 0x34d   : > { %v2727_v43 = vrot.slane %v2726_v4, 1  ;;  %v3205_v52 = vmax.f32 %v7350_v46, %v2707_v59  ;;  %v2731_v45 = vmax.f32 %v2729_v58, %v2730_v53  ;;  %v2744_v16 = vrot.slane %v2743_v57, 4 }
 0x34e   : > { %v2721_v63 = vmax.f32 %v2719_v60, %v2720_v62  ;;  %v3206_v19 = vmax.f32 %v7352_v15, %v2714_v38  ;;  %v2738_v24 = vmax.f32 %v2736_v34, %v2737_v27  ;;  %v2750_v39 = vsel %vm2280_vm0, %v2138_v22, -inf }
 0x34f   : > { %v2728_v36 = vmax.f32 %v2726_v4, %v2727_v43  ;;  %v3336_v35 = vsel %vm3311_vm4, %v3205_v52, %v3335_v51  ;;  %v2732_v37 = vrot.slane %v2731_v45, 2  ;;  %v2745_v18 = vmax.f32 %v2743_v57, %v2744_v16 }
 0x350   : > { %v3207_v30 = vmax.f32 %v7354_v56, %v2721_v63  ;;  %v3337_v50 = vsel %vm3313_vm5, %v3206_v19, %v3336_v35  ;;  %v2739_v46 = vrot.slane %v2738_v24, 2  ;;  %v2751_v48 = vrot.slane %v2750_v39, 4 }
 0x351   : > { %v3208_v21 = vmax.f32 %v7356_v8, %v2728_v36  ;;  %v2733_v42 = vmax.f32 %v2731_v45, %v2732_v37  ;;  %v2746_v15 = vrot.slane %v2745_v18, 2  ;;  %v2009_v61 = vadd.f32 %v7287_v23, %v1973_v5 }
 0x352   : > { %v3338_v2 = vsel %vm3315_vm6, %v3207_v30, %v3337_v50  ;;  %v2740_v56 = vmax.f32 %v2738_v24, %v2739_v46  ;;  %v2752_v17 = vmax.f32 %v2750_v39, %v2751_v48  ;;  %v2010_v12 = vadd.f32 %v7287_v23, %v1974_v20 }
 0x353   : > { %v3339_v3 = vsel %vm3317_vm7, %v3208_v21, %v3338_v2  ;;  %v7390_v25 = vadd.f32 %v1562_v26, %v7255_v44  ;;  %v2734_v8 = vrot.slane %v2733_v42, 1  ;;  %v2747_v51 = vmax.f32 %v2745_v18, %v2746_v15  ;;  %v1923_v15 = vpop.f32.mrf.mxu0 }
 0x354   : > { %3380 = vst [vmem:[#allocation2 + $0x41] sm:$0xff] %v3339_v3  ;;  %v2041_v10 = vmax.f32 %v2009_v61, 0.0  ;;  %3462 = vmatmul.f32.gmra.mxu1 %v3339_v3  ;;  %v7394_v49 = vadd.f32 %v6803_v29, %v8836_v47  ;;  %v2741_v5 = vrot.slane %v2740_v56, 1  ;;  %v2753_v60 = vrot.slane %v2752_v17, 2 }
 0x355   : > { %v7397_v6 = vadd.f32 %v1917_v9, %v6911_v0  ;;  %v2042_v1 = vmax.f32 %v2010_v12, 0.0  ;;  %v7400_v44 = vadd.f32 %v1920_v32, %v6917_v31  ;;  %v7402_v4 = vmax.f32 %v2733_v42, %v2734_v8 }
 0x356   : > { %v2139_v28 = vrot.slane %v2041_v10, 2  ;;  %v2140_v20 = vrot.slane %v2041_v10, 4  ;;  %v2754_v22 = vmax.f32 %v2752_v17, %v2753_v60  ;;  %v2141_v58 = vrot.slane %v2041_v10, 6 }
 0x357   : > { %v2757_v59 = vsel %vm2280_vm0, %v2041_v10, -inf  ;;  %v2748_v62 = vrot.slane %v2747_v51, 1  ;;  %v7407_v0 = vmax.f32 %v2740_v56, %v2741_v5  ;;  %v2142_v57 = vrot.slane %v2042_v1, 2 }
 0x358   : > { %v2758_v29 = vrot.slane %v2757_v59, 4  ;;  %v2764_v53 = vsel %vm2280_vm0, %v2139_v28, -inf  ;;  %v2771_v34 = vsel %vm2280_vm0, %v2140_v20, -inf  ;;  %v2778_v43 = vsel %vm2280_vm0, %v2141_v58, -inf }
 0x359   : > { %v2765_v9 = vrot.slane %v2764_v53, 4  ;;  %v2772_v38 = vrot.slane %v2771_v34, 4  ;;  %v2779_v27 = vrot.slane %v2778_v43, 4  ;;  %v2143_v63 = vrot.slane %v2042_v1, 4 }
 0x35a   : > { %v2759_v31 = vmax.f32 %v2757_v59, %v2758_v29  ;;  %v2755_v52 = vrot.slane %v2754_v22, 1  ;;  %v2144_v36 = vrot.slane %v2042_v1, 6  ;;  %v2785_v35 = vsel %vm2280_vm0, %v2042_v1, -inf }
 0x35b   : > { %v2766_v45 = vmax.f32 %v2764_v53, %v2765_v9  ;;  %v2773_v16 = vmax.f32 %v2771_v34, %v2772_v38  ;;  %v3389_v19 = vld [vmem:[#allocation2 + $0x40] sm:$0xff]  ;;  %v2780_v30 = vmax.f32 %v2778_v43, %v2779_v27  ;;  %v2792_v37 = vsel %vm2280_vm0, %v2142_v57, -inf }
 0x35c   : > { %v3520_v24 = vld [vmem:[#allocation2 + $0x42] sm:$0xff]  ;;  %v2760_v39 = vrot.slane %v2759_v31, 2  ;;  %3503 = vmatmul.f32.gmra.mxu2 %v3389_v19  ;;  %v2786_v21 = vrot.slane %v2785_v35, 4  ;;  %v2793_v50 = vrot.slane %v2792_v37, 4  ;;  %v2799_v2 = vsel %vm2280_vm0, %v2143_v63, -inf }
 0x35d   : > { %3569 = vmatmul.f32.gmra.mxu3 %v3520_v24  ;;  %v2767_v18 = vrot.slane %v2766_v45, 2  ;;  %v2774_v26 = vrot.slane %v2773_v16, 2  ;;  %v2781_v48 = vrot.slane %v2780_v30, 2  ;;  %v2806_v42 = vsel %vm2280_vm0, %v2144_v36, -inf }
 0x35e   : > { %v2761_v46 = vmax.f32 %v2759_v31, %v2760_v39  ;;  %v2787_v56 = vmax.f32 %v2785_v35, %v2786_v21  ;;  %v2794_v17 = vmax.f32 %v2792_v37, %v2793_v50  ;;  %v2800_v8 = vrot.slane %v2799_v2, 4 }
 0x35f   : > { %v2768_v61 = vmax.f32 %v2766_v45, %v2767_v18  ;;  %v2775_v3 = vmax.f32 %v2773_v16, %v2774_v26  ;;  %v2782_v32 = vmax.f32 %v2780_v30, %v2781_v48  ;;  %v2807_v10 = vrot.slane %v2806_v42, 4  ;;  %v7429_v18 = vpop.f32.mrf.mxu0 }
 0x360   : > { %v2762_v12 = vrot.slane %v2761_v46, 1  ;;  %v2788_v60 = vrot.slane %v2787_v56, 2  ;;  %v2795_v28 = vrot.slane %v2794_v17, 2  ;;  %v2749_v20 = vmax.f32 %v2747_v51, %v2748_v62 }
 0x361   : > { %v2769_v47 = vrot.slane %v2768_v61, 1  ;;  %v2776_v5 = vrot.slane %v2775_v3, 1  ;;  %v2783_v1 = vrot.slane %v2782_v32, 1  ;;  %v2801_v58 = vmax.f32 %v2799_v2, %v2800_v8 }
 0x362   : > { %v2808_v59 = vmax.f32 %v2806_v42, %v2807_v10  ;;  %v2756_v29 = vmax.f32 %v2754_v22, %v2755_v52  ;;  %v7414_v53 = vmax.f32 %v2761_v46, %v2762_v12  ;;  %v2789_v34 = vmax.f32 %v2787_v56, %v2788_v60 }
 0x363   : > { %v2796_v9 = vmax.f32 %v2794_v17, %v2795_v28  ;;  %v7416_v38 = vmax.f32 %v2768_v61, %v2769_v47  ;;  %v2802_v43 = vrot.slane %v2801_v58, 2  ;;  %v2011_v27 = vadd.f32 %v7287_v23, %v7397_v6 }
 0x364   : > { %v2809_v31 = vrot.slane %v2808_v59, 2  ;;  %v7420_v57 = vmax.f32 %v2775_v3, %v2776_v5  ;;  %v2790_v63 = vrot.slane %v2789_v34, 1  ;;  %v2012_v51 = vadd.f32 %v7287_v23, %v7400_v44 }
 0x365   : > { %v2797_v45 = vrot.slane %v2796_v9, 1  ;;  %v7424_v62 = vmax.f32 %v2782_v32, %v2783_v1  ;;  %v2803_v22 = vmax.f32 %v2801_v58, %v2802_v43  ;;  %v2043_v16 = vmax.f32 %v2011_v27, 0.0 }
 0x366   : > { %v2810_v52 = vmax.f32 %v2808_v59, %v2809_v31  ;;  %v2791_v36 = vmax.f32 %v2789_v34, %v2790_v63  ;;  %v2044_v24 = vmax.f32 %v2012_v51, 0.0  ;;  %v7427_v39 = vadd.f32 %v1923_v15, %v6920_v7 }
 0x367   : > { %v2798_v19 = vmax.f32 %v2796_v9, %v2797_v45  ;;  %v2804_v30 = vrot.slane %v2803_v22, 1  ;;  %v2145_v35 = vrot.slane %v2043_v16, 2  ;;  %v2146_v37 = vrot.slane %v2043_v16, 4 }
 0x368   : > { %v2811_v6 = vrot.slane %v2810_v52, 1  ;;  %v3209_v26 = vmax.f32 %v7402_v4, %v2791_v36  ;;  %v2147_v21 = vrot.slane %v2043_v16, 6  ;;  %v2813_v50 = vsel %vm2280_vm0, %v2043_v16, -inf }
 0x369   : > { %v3210_v44 = vmax.f32 %v7407_v0, %v2798_v19  ;;  %v2805_v46 = vmax.f32 %v2803_v22, %v2804_v30  ;;  %v2814_v2 = vrot.slane %v2813_v50, 4  ;;  %v2820_v42 = vsel %vm2280_vm0, %v2145_v35, -inf  ;;  %v1753_v0 = vpop.f32.mrf.mxu3  ;;  %v7443_v19 = vpop.f32.mrf.mxu0 }
 0x36a   : > { %v2812_v48 = vmax.f32 %v2810_v52, %v2811_v6  ;;  %v2821_v15 = vrot.slane %v2820_v42, 4  ;;  %v2827_v61 = vsel %vm2280_vm0, %v2146_v37, -inf  ;;  %v2834_v3 = vsel %vm2280_vm0, %v2147_v21, -inf }
 0x36b   : > { %v3340_v7 = vsel %vm3305_vm1, %v3210_v44, %v3209_v26  ;;  %v3211_v56 = vmax.f32 %v2749_v20, %v2805_v46  ;;  %v2815_v4 = vmax.f32 %v2813_v50, %v2814_v2  ;;  %v2828_v12 = vrot.slane %v2827_v61, 4  ;;  %v1370_v50 = vpop.f32.mrf.mxu1 }
 0x36c   : > { %v3212_v17 = vmax.f32 %v2756_v29, %v2812_v48  ;;  %v2822_v32 = vmax.f32 %v2820_v42, %v2821_v15  ;;  %v2835_v8 = vrot.slane %v2834_v3, 4  ;;  %v2148_v10 = vrot.slane %v2044_v24, 2 }
 0x36d   : > { %v2149_v47 = vrot.slane %v2044_v24, 4  ;;  %v3341_v5 = vsel %vm3307_vm2, %v3211_v56, %v3340_v7  ;;  %v2816_v60 = vrot.slane %v2815_v4, 2  ;;  %v2829_v28 = vmax.f32 %v2827_v61, %v2828_v12 }
 0x36e   : > { %v2150_v1 = vrot.slane %v2044_v24, 6  ;;  %v3342_v58 = vsel %vm3309_vm3, %v3212_v17, %v3341_v5  ;;  %v2823_v59 = vrot.slane %v2822_v32, 2  ;;  %v2836_v34 = vmax.f32 %v2834_v3, %v2835_v8 }
 0x36f   : > { %v2841_v9 = vsel %vm2280_vm0, %v2044_v24, -inf  ;;  %v2817_v20 = vmax.f32 %v2815_v4, %v2816_v60  ;;  %v2830_v29 = vrot.slane %v2829_v28, 2  ;;  %v2848_v31 = vsel %vm2280_vm0, %v2148_v10, -inf  ;;  %v1565_v10 = vpop.f32.mrf.mxu2 }
 0x370   : > { %v2842_v43 = vrot.slane %v2841_v9, 4  ;;  %v2824_v27 = vmax.f32 %v2822_v32, %v2823_v59  ;;  %v2837_v63 = vrot.slane %v2836_v34, 2  ;;  %v2849_v45 = vrot.slane %v2848_v31, 4 }
 0x371   : > { %v2855_v51 = vsel %vm2280_vm0, %v2149_v47, -inf  ;;  %v2818_v22 = vrot.slane %v2817_v20, 1  ;;  %v2831_v52 = vmax.f32 %v2829_v28, %v2830_v29  ;;  %v2862_v24 = vsel %vm2280_vm0, %v2150_v1, -inf  ;;  %v1756_v56 = vpop.f32.mrf.mxu3 }
 0x372   : > { %v2843_v16 = vmax.f32 %v2841_v9, %v2842_v43  ;;  %v2856_v36 = vrot.slane %v2855_v51, 4  ;;  %v2825_v30 = vrot.slane %v2824_v27, 1  ;;  %v2838_v6 = vmax.f32 %v2836_v34, %v2837_v63 }
 0x373   : > { %v2850_v35 = vmax.f32 %v2848_v31, %v2849_v45  ;;  %v2819_v37 = vmax.f32 %v2817_v20, %v2818_v22  ;;  %v2832_v26 = vrot.slane %v2831_v52, 1  ;;  %v2863_v42 = vrot.slane %v2862_v24, 4 }
 0x374   : > { %v2844_v44 = vrot.slane %v2843_v16, 2  ;;  %v2857_v21 = vmax.f32 %v2855_v51, %v2856_v36  ;;  %v2826_v46 = vmax.f32 %v2824_v27, %v2825_v30  ;;  %v2839_v48 = vrot.slane %v2838_v6, 1 }
 0x375   : > { %v2851_v2 = vrot.slane %v2850_v35, 2  ;;  %v2833_v7 = vmax.f32 %v2831_v52, %v2832_v26  ;;  %v3213_v15 = vmax.f32 %v7414_v53, %v2819_v37  ;;  %v2013_v3 = vadd.f32 %v7287_v23, %v7427_v39 }
 0x376   : > { %v2858_v61 = vrot.slane %v2857_v21, 2  ;;  %v2840_v17 = vmax.f32 %v2838_v6, %v2839_v48  ;;  %v3214_v4 = vmax.f32 %v7416_v38, %v2826_v46  ;;  %v2864_v12 = vmax.f32 %v2862_v24, %v2863_v42 }
 0x377   : > { %v1978_v32 = vadd.f32 %v7429_v18, %v6958_v41  ;;  %v1404_v8 = vadd.f32 %v1370_v50, %v7394_v49  ;;  %v3215_v47 = vmax.f32 %v7420_v57, %v2833_v7  ;;  %v3343_v5 = vsel %vm3311_vm4, %v3213_v15, %v3342_v58 }
 0x378   : > { %v7455_v53 = vmax.f32 %v2843_v16, %v2844_v44  ;;  %v3216_v60 = vmax.f32 %v7424_v62, %v2840_v17  ;;  %v3344_v39 = vsel %vm3313_vm5, %v3214_v4, %v3343_v5  ;;  %v7459_v28 = vmax.f32 %v2850_v35, %v2851_v2  ;;  %v5397_v5 = vld [vmem:[%s8724_s3 + $0x278] sm:$0xff] }
 0x379   : > { %v7461_v38 = vmax.f32 %v2857_v21, %v2858_v61  ;;  %v7464_v1 = vadd.f32 %v1753_v0, %v7172_v55  ;;  %v7467_v41 = vadd.f32 %v1756_v56, %v7390_v25  ;;  %v3345_v49 = vsel %vm3315_vm6, %v3215_v47, %v3344_v39  ;;  %v7475_v0 = vpop.f32.mrf.mxu0  ;;  %v5381_v39 = vld [vmem:[%s8724_s3 + $0x1f8] sm:$0xff]  ;;  %3689 = vmatpush.msrb.mxu2 %v5397_v5  ;;  %v5411_v5 = vld [vmem:[%s8724_s3 + $0x2e8] sm:$0xff] }
 0x37a   : > { %v2045_v57 = vmax.f32 %v2013_v3, 0.0  ;;  %v7470_v18 = vadd.f32 %v1565_v10, %v1404_v8  ;;  %v3346_v58 = vsel %vm3317_vm7, %v3216_v60, %v3345_v49  ;;  %v2865_v62 = vrot.slane %v2864_v12, 2  ;;  %v5413_v60 = vld [vmem:[%s8724_s3 + $0x2f8] sm:$0xff]  ;;  %3615 = vmatpush.msrb.mxu1 %v5381_v39  ;;  %v5394_v39 = vld [vmem:[%s8724_s3 + $0x260] sm:$0xff] }
 0x37b   : > { %v2014_v59 = vadd.f32 %v7287_v23, %v1978_v32  ;;  %3381 = vst [vmem:[#allocation2 + $0x51] sm:$0xff] %v3346_v58  ;;  %v2846_v34 = vrot.slane %v7455_v53, 1  ;;  %3465 = vmatmul.f32.gmra.mxu1 %v3346_v58  ;;  %v2853_v25 = vrot.slane %v7459_v28, 1  ;;  %v2860_v29 = vrot.slane %v7461_v38, 1  ;;  %3763 = vmatpush.msrb.mxu3 %v5413_v60  ;;  %v5379_v60 = vld [vmem:[%s8724_s3 + $0x1e8] sm:$0xff] }
 0x37c   : > { %v2151_v9 = vrot.slane %v2045_v57, 2  ;;  %v2152_v20 = vrot.slane %v2045_v57, 4  ;;  %v2153_v55 = vrot.slane %v2045_v57, 6  ;;  %v2869_v43 = vsel %vm2280_vm0, %v2045_v57, -inf }
 0x37d   : > { %v2046_v31 = vmax.f32 %v2014_v59, 0.0  ;;  %v2870_v27 = vrot.slane %v2869_v43, 4  ;;  %v2866_v51 = vmax.f32 %v2864_v12, %v2865_v62  ;;  %v5396_v59 = vld [vmem:[%s8724_s3 + $0x270] sm:$0xff] }
 0x37e   : > { %v2876_v63 = vsel %vm2280_vm0, %v2151_v9, -inf  ;;  %v2883_v23 = vsel %vm2280_vm0, %v2152_v20, -inf  ;;  %v2890_v45 = vsel %vm2280_vm0, %v2153_v55, -inf  ;;  %v2847_v20 = vmax.f32 %v7455_v53, %v2846_v34  ;;  %3690 = vmatpush.msrb.mxu2 %v5396_v59 }
 0x37f   : > { %v2877_v22 = vrot.slane %v2876_v63, 4  ;;  %v2884_v52 = vrot.slane %v2883_v23, 4  ;;  %v2891_v16 = vrot.slane %v2890_v45, 4  ;;  %v2871_v36 = vmax.f32 %v2869_v43, %v2870_v27 }
 0x380   : > { %v2154_v30 = vrot.slane %v2046_v31, 2  ;;  %v2155_v6 = vrot.slane %v2046_v31, 4  ;;  %v2156_v35 = vrot.slane %v2046_v31, 6  ;;  %v2897_v44 = vsel %vm2280_vm0, %v2046_v31, -inf }
 0x381   : > { %v2878_v24 = vmax.f32 %v2876_v63, %v2877_v22  ;;  %v2885_v37 = vmax.f32 %v2883_v23, %v2884_v52  ;;  %v2892_v26 = vmax.f32 %v2890_v45, %v2891_v16  ;;  %v2872_v21 = vrot.slane %v2871_v36, 2  ;;  %v1935_v9 = vpop.f32.mrf.mxu0 }
 0x382   : > { %v2898_v50 = vrot.slane %v2897_v44, 4  ;;  %v2904_v46 = vsel %vm2280_vm0, %v2154_v30, -inf  ;;  %v2911_v48 = vsel %vm2280_vm0, %v2155_v6, -inf  ;;  %v3390_v61 = vld [vmem:[#allocation2 + $0x50] sm:$0xff]  ;;  %v2918_v12 = vsel %vm2280_vm0, %v2156_v35, -inf }
 0x383   : > { %v2879_v2 = vrot.slane %v2878_v24, 2  ;;  %v2886_v42 = vrot.slane %v2885_v37, 2  ;;  %v2893_v7 = vrot.slane %v2892_v26, 2  ;;  %v2905_v15 = vrot.slane %v2904_v46, 4  ;;  %v3521_v3 = vld [vmem:[#allocation2 + $0x52] sm:$0xff]  ;;  %3506 = vmatmul.f32.gmra.mxu2 %v3390_v61 }
 0x384   : > { %v2873_v56 = vmax.f32 %v2871_v36, %v2872_v21  ;;  %v2899_v17 = vmax.f32 %v2897_v44, %v2898_v50  ;;  %v2912_v4 = vrot.slane %v2911_v48, 4  ;;  %3572 = vmatmul.f32.gmra.mxu3 %v3521_v3  ;;  %v2867_v32 = vrot.slane %v2866_v51, 1  ;;  %v7514_v21 = vld [vmem:[%s8723_s2] ss:$0 sm:$0xff] }
 0x385   : > { %v2880_v8 = vmax.f32 %v2878_v24, %v2879_v2  ;;  %v2887_v10 = vmax.f32 %v2885_v37, %v2886_v42  ;;  %v2906_v47 = vmax.f32 %v2904_v46, %v2905_v15  ;;  %v2894_v49 = vmax.f32 %v2892_v26, %v2893_v7 }
 0x386   : > { %v2900_v57 = vrot.slane %v2899_v17, 2  ;;  %v2913_v58 = vmax.f32 %v2911_v48, %v2912_v4  ;;  %v2919_v62 = vrot.slane %v2918_v12, 4  ;;  %v2854_v55 = vmax.f32 %v7459_v28, %v2853_v25  ;;  %v5395_v4 = vld [vmem:[%s8724_s3 + $0x268] sm:$0xff] }
 0x387   : > { %v2874_v43 = vrot.slane %v2873_v56, 1  ;;  %v2907_v31 = vrot.slane %v2906_v47, 2  ;;  %v2861_v27 = vmax.f32 %v7461_v38, %v2860_v29  ;;  %v2868_v22 = vmax.f32 %v2866_v51, %v2867_v32  ;;  %3691 = vmatpush.msrb.mxu2 %v5395_v4  ;;  %v5376_v4 = vld [vmem:[%s8724_s3 + $0x1d0] sm:$0xff] }
 0x388   : > { %v2901_v63 = vmax.f32 %v2899_v17, %v2900_v57  ;;  %v2914_v23 = vrot.slane %v2913_v58, 2  ;;  %v2920_v45 = vmax.f32 %v2918_v12, %v2919_v62  ;;  %v2881_v52 = vrot.slane %v2880_v8, 1  ;;  %v5380_v17 = vld [vmem:[%s8724_s3 + $0x1f0] sm:$0xff] }
 0x389   : > { %v2888_v16 = vrot.slane %v2887_v10, 1  ;;  %v2908_v36 = vmax.f32 %v2906_v47, %v2907_v31  ;;  %v2895_v30 = vrot.slane %v2894_v49, 1  ;;  %v7502_v53 = vmax.f32 %v2873_v56, %v2874_v43  ;;  %v5412_v56 = vld [vmem:[%s8724_s3 + $0x2f0] sm:$0xff]  ;;  %v7534_v12 = vpop.f32.mrf.mxu0  ;;  %3616 = vmatpush.msrb.mxu1 %v5380_v17  ;;  %3692 = vmatpush.msrb.mxu2 %v5394_v39 }
 0x38a   : > { %v2902_v6 = vrot.slane %v2901_v63, 1  ;;  %v2915_v35 = vmax.f32 %v2913_v58, %v2914_v23  ;;  %v2921_v24 = vrot.slane %v2920_v45, 2  ;;  %v1979_v34 = vadd.f32 %v7443_v19, %v6972_v54  ;;  %3764 = vmatpush.msrb.mxu3 %v5412_v56 }
 0x38b   : > { %v2909_v28 = vrot.slane %v2908_v36, 1  ;;  %v1980_v38 = vadd.f32 %v7475_v0, %v6975_v14  ;;  %v1981_v51 = vadd.f32 %v1935_v9, %v6978_v33  ;;  %v7509_v26 = vmax.f32 %v2880_v8, %v2881_v52  ;;  %3617 = vmatpush.msrb.mxu1 %v5379_v60 }
 0x38c   : > { %v2903_v25 = vmax.f32 %v2901_v63, %v2902_v6  ;;  %v2916_v29 = vrot.slane %v2915_v35, 1  ;;  %v2922_v37 = vmax.f32 %v2920_v45, %v2921_v24  ;;  %v2015_v50 = vadd.f32 %v7514_v21, %v1979_v34  ;;  %3765 = vmatpush.msrb.mxu3 %v5411_v5 }
 0x38d   : > { %v2910_v44 = vmax.f32 %v2908_v36, %v2909_v28  ;;  %v2016_v54 = vadd.f32 %v7514_v21, %v1980_v38  ;;  %v2017_v0 = vadd.f32 %v7514_v21, %v1981_v51  ;;  %v7519_v48 = vmax.f32 %v2887_v10, %v2888_v16  ;;  %v5378_v38 = vld [vmem:[%s8724_s3 + $0x1e0] sm:$0xff] }
 0x38e   : > { %v2917_v19 = vmax.f32 %v2915_v35, %v2916_v29  ;;  %v2923_v46 = vrot.slane %v2922_v37, 1  ;;  %v3217_v14 = vmax.f32 %v2847_v20, %v2903_v25  ;;  %v2047_v2 = vmax.f32 %v2015_v50, 0.0  ;;  %3618 = vmatpush.msrb.mxu1 %v5378_v38  ;;  %v5408_v38 = vld [vmem:[%s8724_s3 + $0x2d0] sm:$0xff] }
 0x38f   : > { %v3218_v33 = vmax.f32 %v2854_v55, %v2910_v44  ;;  %v2048_v42 = vmax.f32 %v2016_v54, 0.0  ;;  %v7521_v7 = vmax.f32 %v2894_v49, %v2895_v30  ;;  %v7523_v3 = vmax.f32 %v2017_v0, 0.0 }
 0x390   : > { %v2924_v15 = vmax.f32 %v2922_v37, %v2923_v46  ;;  %v3219_v61 = vmax.f32 %v2861_v27, %v2917_v19  ;;  %v2157_v8 = vrot.slane %v2047_v2, 2  ;;  %v2158_v10 = vrot.slane %v2047_v2, 4  ;;  %v5377_v46 = vld [vmem:[%s8724_s3 + $0x1d8] sm:$0xff] }
 0x391   : > { %v3347_v32 = vsel %vm3305_vm1, %v3218_v33, %v3217_v14  ;;  %v2159_v47 = vrot.slane %v2047_v2, 6  ;;  %v2925_v58 = vsel %vm2280_vm0, %v2047_v2, -inf  ;;  %v2160_v62 = vrot.slane %v2048_v42, 2  ;;  %3619 = vmatpush.msrb.mxu1 %v5377_v46 }
 0x392   : > { %v3220_v49 = vmax.f32 %v2868_v22, %v2924_v15  ;;  %v3348_v57 = vsel %vm3307_vm2, %v3219_v61, %v3347_v32  ;;  %v2926_v59 = vrot.slane %v2925_v58, 4  ;;  %v2932_v9 = vsel %vm2280_vm0, %v2157_v8, -inf }
 0x393   : > { %v2939_v20 = vsel %vm2280_vm0, %v2158_v10, -inf  ;;  %v2946_v55 = vsel %vm2280_vm0, %v2159_v47, -inf  ;;  %v2933_v31 = vrot.slane %v2932_v9, 4  ;;  %v2161_v45 = vrot.slane %v2048_v42, 4  ;;  %3620 = vmatpush.msrb.mxu1 %v5376_v4 }
 0x394   : > { %v7552_v43 = vsel %vm3309_vm3, %v3220_v49, %v3348_v57  ;;  %v2940_v27 = vrot.slane %v2939_v20, 4  ;;  %v2947_v63 = vrot.slane %v2946_v55, 4  ;;  %v2927_v23 = vmax.f32 %v2925_v58, %v2926_v59  ;;  %v5375_v57 = vld [vmem:[%s8724_s3 + $0x1c8] sm:$0xff] }
 0x395   : > { %v2162_v22 = vrot.slane %v2048_v42, 6  ;;  %v2953_v52 = vsel %vm2280_vm0, %v2048_v42, -inf  ;;  %v2934_v16 = vmax.f32 %v2932_v9, %v2933_v31  ;;  %v2960_v24 = vsel %vm2280_vm0, %v2160_v62, -inf  ;;  %v1941_v42 = vpop.f32.mrf.mxu0  ;;  %v5409_v31 = vld [vmem:[%s8724_s3 + $0x2d8] sm:$0xff]  ;;  %3621 = vmatpush.msrb.mxu1 %v5375_v57 }
 0x396   : > { %v2941_v36 = vmax.f32 %v2939_v20, %v2940_v27  ;;  %v2948_v30 = vmax.f32 %v2946_v55, %v2947_v63  ;;  %v2954_v6 = vrot.slane %v2953_v52, 4  ;;  %v2928_v35 = vrot.slane %v2927_v23, 2  ;;  %v5410_v20 = vld [vmem:[%s8724_s3 + $0x2e0] sm:$0xff]  ;;  %v5393_v55 = vld [vmem:[%s8724_s3 + $0x258] sm:$0xff] }
 0x397   : > { %v2967_v28 = vsel %vm2280_vm0, %v2161_v45, -inf  ;;  %v2974_v34 = vsel %vm2280_vm0, %v2162_v22, -inf  ;;  %v2935_v25 = vrot.slane %v2934_v16, 2  ;;  %v2961_v50 = vrot.slane %v2960_v24, 4  ;;  %3766 = vmatpush.msrb.mxu3 %v5410_v20  ;;  %v5392_v22 = vld [vmem:[%s8724_s3 + $0x250] sm:$0xff]  ;;  %3693 = vmatpush.msrb.mxu2 %v5393_v55  ;;  %v5371_v55 = vld [vmem:[%s8724_s3 + $0x1a8] sm:$0xff] }
 0x398   : > { %v2942_v29 = vrot.slane %v2941_v36, 2  ;;  %v2949_v37 = vrot.slane %v2948_v30, 2  ;;  %v2955_v51 = vmax.f32 %v2953_v52, %v2954_v6  ;;  %v2929_v44 = vmax.f32 %v2927_v23, %v2928_v35 }
 0x399   : > { %v2968_v54 = vrot.slane %v2967_v28, 4  ;;  %v2975_v19 = vrot.slane %v2974_v34, 4  ;;  %v2936_v14 = vmax.f32 %v2934_v16, %v2935_v25  ;;  %v2962_v61 = vmax.f32 %v2960_v24, %v2961_v50  ;;  %3767 = vmatpush.msrb.mxu3 %v5409_v31  ;;  %3694 = vmatpush.msrb.mxu2 %v5392_v22  ;;  %v5373_v25 = vld [vmem:[%s8724_s3 + $0x1b8] sm:$0xff] }
 0x39a   : > { %v2943_v0 = vmax.f32 %v2941_v36, %v2942_v29  ;;  %v2950_v33 = vmax.f32 %v2948_v30, %v2949_v37  ;;  %v2956_v2 = vrot.slane %v2955_v51, 2  ;;  %v2930_v15 = vrot.slane %v2929_v44, 1  ;;  %v5405_v22 = vld [vmem:[%s8724_s3 + $0x2b8] sm:$0xff] }
 0x39b   : > { %v2969_v56 = vmax.f32 %v2967_v28, %v2968_v54  ;;  %v2976_v17 = vmax.f32 %v2974_v34, %v2975_v19  ;;  %v2937_v32 = vrot.slane %v2936_v14, 1  ;;  %v2963_v60 = vrot.slane %v2962_v61, 2  ;;  %3768 = vmatpush.msrb.mxu3 %v5408_v38 }
 0x39c   : > { %v2944_v8 = vrot.slane %v2943_v0, 1  ;;  %v2951_v10 = vrot.slane %v2950_v33, 1  ;;  %v2957_v47 = vmax.f32 %v2955_v51, %v2956_v2  ;;  %v2931_v5 = vmax.f32 %v2929_v44, %v2930_v15  ;;  %v5407_v15 = vld [vmem:[%s8724_s3 + $0x2c8] sm:$0xff] }
 0x39d   : > { %v2970_v39 = vrot.slane %v2969_v56, 2  ;;  %v2977_v49 = vrot.slane %v2976_v17, 2  ;;  %v2938_v58 = vmax.f32 %v2936_v14, %v2937_v32  ;;  %v2964_v63 = vmax.f32 %v2962_v61, %v2963_v60  ;;  %v1944_v50 = vpop.f32.mrf.mxu0  ;;  %v5390_v61 = vld [vmem:[%s8724_s3 + $0x240] sm:$0xff]  ;;  %3769 = vmatpush.msrb.mxu3 %v5407_v15  ;;  %v5372_v60 = vld [vmem:[%s8724_s3 + $0x1b0] sm:$0xff] }
 0x39e   : > { %v2945_v62 = vmax.f32 %v2943_v0, %v2944_v8  ;;  %v2952_v59 = vmax.f32 %v2950_v33, %v2951_v10  ;;  %v2958_v9 = vrot.slane %v2957_v47, 1  ;;  %v3221_v27 = vmax.f32 %v7502_v53, %v2931_v5  ;;  %v5391_v0 = vld [vmem:[%s8724_s3 + $0x248] sm:$0xff] }
 0x39f   : > { %v2971_v23 = vmax.f32 %v2969_v56, %v2970_v39  ;;  %v2978_v45 = vmax.f32 %v2976_v17, %v2977_v49  ;;  %v3222_v52 = vmax.f32 %v7509_v26, %v2938_v58  ;;  %v1982_v30 = vadd.f32 %v7534_v12, %v7000_v13  ;;  %v5374_v26 = vld [vmem:[%s8724_s3 + $0x1c0] sm:$0xff]  ;;  %3695 = vmatpush.msrb.mxu2 %v5391_v0 }
 0x3a0   : > { %v3223_v16 = vmax.f32 %v7519_v48, %v2945_v62  ;;  %v3224_v36 = vmax.f32 %v7521_v7, %v2952_v59  ;;  %v3350_v53 = vsel %vm3311_vm4, %v3221_v27, %v7552_v43  ;;  %v2965_v6 = vrot.slane %v2964_v63, 1  ;;  %3622 = vmatpush.msrb.mxu1 %v5374_v26 }
 0x3a1   : > { %v2972_v35 = vrot.slane %v2971_v23, 1  ;;  %v1983_v24 = vadd.f32 %v1941_v42, %v7164_v40  ;;  %v3351_v48 = vsel %vm3313_vm5, %v3222_v52, %v3350_v53  ;;  %v2163_v7 = vrot.slane %v7523_v3, 2  ;;  %3696 = vmatpush.msrb.mxu2 %v5390_v61 }
 0x3a2   : > { %v2164_v28 = vrot.slane %v7523_v3, 4  ;;  %v2165_v13 = vrot.slane %v7523_v3, 6  ;;  %v3352_v12 = vsel %vm3315_vm6, %v3223_v16, %v3351_v48  ;;  %v7599_v43 = vmax.f32 %v2957_v47, %v2958_v9  ;;  %3623 = vmatpush.msrb.mxu1 %v5373_v25  ;;  %v5369_v25 = vld [vmem:[%s8724_s3 + $0x198] sm:$0xff] }
 0x3a3   : > { %v7601_v34 = vmax.f32 %v2964_v63, %v2965_v6  ;;  %v2979_v40 = vrot.slane %v2978_v45, 1  ;;  %v3353_v29 = vsel %vm3317_vm7, %v3224_v36, %v3352_v12  ;;  %v2981_v37 = vsel %vm2280_vm0, %v7523_v3, -inf }
 0x3a4   : > { %v2988_v51 = vsel %vm2280_vm0, %v2163_v7, -inf  ;;  %v2995_v44 = vsel %vm2280_vm0, %v2164_v28, -inf  ;;  %3382 = vst [vmem:[#allocation2 + $0x61] sm:$0xff] %v3353_v29  ;;  %v2982_v54 = vrot.slane %v2981_v37, 4  ;;  %v3002_v14 = vsel %vm2280_vm0, %v2165_v13, -inf  ;;  %3468 = vmatmul.f32.gmra.mxu1 %v3353_v29  ;;  %v5370_v28 = vld [vmem:[%s8724_s3 + $0x1a0] sm:$0xff] }
 0x3a5   : > { %v2989_v19 = vrot.slane %v2988_v51, 4  ;;  %v2996_v46 = vrot.slane %v2995_v44, 4  ;;  %v7618_v33 = vmax.f32 %v2971_v23, %v2972_v35  ;;  %v3003_v3 = vrot.slane %v3002_v14, 4  ;;  %3624 = vmatpush.msrb.mxu1 %v5372_v60  ;;  %v5388_v35 = vld [vmem:[%s8724_s3 + $0x230] sm:$0xff] }
 0x3a6   : > { %v2018_v2 = vadd.f32 %v7514_v21, %v1982_v30  ;;  %v2019_v42 = vadd.f32 %v7514_v21, %v1983_v24  ;;  %v2983_v56 = vmax.f32 %v2981_v37, %v2982_v54  ;;  %v1984_v32 = vadd.f32 %v1944_v50, %v7170_v11  ;;  %v5406_v11 = vld [vmem:[%s8724_s3 + $0x2c0] sm:$0xff] }
 0x3a7   : > { %v2990_v17 = vmax.f32 %v2988_v51, %v2989_v19  ;;  %v2997_v4 = vmax.f32 %v2995_v44, %v2996_v46  ;;  %v7629_v8 = vmax.f32 %v2978_v45, %v2979_v40  ;;  %v3004_v10 = vmax.f32 %v3002_v14, %v3003_v3  ;;  %3770 = vmatpush.msrb.mxu3 %v5406_v11  ;;  %v5389_v45 = vld [vmem:[%s8724_s3 + $0x238] sm:$0xff]  ;;  %v5404_v14 = vld [vmem:[%s8724_s3 + $0x2b0] sm:$0xff] }
 0x3a8   : > { %v2050_v47 = vmax.f32 %v2018_v2, 0.0  ;;  %v7631_v5 = vmax.f32 %v2019_v42, 0.0  ;;  %v2984_v39 = vrot.slane %v2983_v56, 2  ;;  %v7637_v58 = vadd.f32 %v7514_v21, %v1984_v32  ;;  %3625 = vmatpush.msrb.mxu1 %v5371_v55  ;;  %3697 = vmatpush.msrb.mxu2 %v5389_v45  ;;  %v5403_v32 = vld [vmem:[%s8724_s3 + $0x2a8] sm:$0xff] }
 0x3a9   : > { %v2991_v49 = vrot.slane %v2990_v17, 2  ;;  %v2998_v57 = vrot.slane %v2997_v4, 2  ;;  %v3005_v62 = vrot.slane %v3004_v10, 2  ;;  %3771 = vmatpush.msrb.mxu3 %v5405_v22  ;;  %v5367_v55 = vld [vmem:[%s8724_s3 + $0x188] sm:$0xff] }
 0x3aa   : > { %v2166_v59 = vrot.slane %v2050_v47, 2  ;;  %v2167_v9 = vrot.slane %v2050_v47, 4  ;;  %v2168_v20 = vrot.slane %v2050_v47, 6  ;;  %v2985_v31 = vmax.f32 %v2983_v56, %v2984_v39  ;;  %3698 = vmatpush.msrb.mxu2 %v5388_v35  ;;  %3626 = vmatpush.msrb.mxu1 %v5370_v28  ;;  %v5366_v35 = vld [vmem:[%s8724_s3 + $0x180] sm:$0xff] }
 0x3ab   : > { %v2992_v27 = vmax.f32 %v2990_v17, %v2991_v49  ;;  %v2999_v63 = vmax.f32 %v2997_v4, %v2998_v57  ;;  %v3009_v23 = vsel %vm2280_vm0, %v2050_v47, -inf  ;;  %v3006_v52 = vmax.f32 %v3004_v10, %v3005_v62  ;;  %v7654_v53 = vld [vmem:[#allocation2 + $0x60] sm:$0xff]  ;;  %3772 = vmatpush.msrb.mxu3 %v5404_v14  ;;  %v5368_v10 = vld [vmem:[%s8724_s3 + $0x190] sm:$0xff]  ;;  %v7697_v57 = vpop.f32.mrf.mxu0 }
 0x3ac   : > { %v3010_v16 = vrot.slane %v3009_v23, 4  ;;  %v3016_v36 = vsel %vm2280_vm0, %v2166_v59, -inf  ;;  %v3023_v30 = vsel %vm2280_vm0, %v2167_v9, -inf  ;;  %v7656_v6 = vld [vmem:[#allocation2 + $0x62] sm:$0xff]  ;;  %v2986_v24 = vrot.slane %v2985_v31, 1  ;;  %3509 = vmatmul.f32.gmra.mxu2 %v7654_v53  ;;  %3627 = vmatpush.msrb.mxu1 %v5369_v25  ;;  %v5386_v9 = vld [vmem:[%s8724_s3 + $0x220] sm:$0xff] }
 0x3ad   : > { %v2993_v26 = vrot.slane %v2992_v27, 1  ;;  %v3000_v48 = vrot.slane %v2999_v63, 1  ;;  %v3017_v7 = vrot.slane %v3016_v36, 4  ;;  %3575 = vmatmul.f32.gmra.mxu3 %v7656_v6  ;;  %v3007_v13 = vrot.slane %v3006_v52, 1  ;;  %v5387_v4 = vld [vmem:[%s8724_s3 + $0x228] sm:$0xff] }
 0x3ae   : > { %v3011_v12 = vmax.f32 %v3009_v23, %v3010_v16  ;;  %v3024_v40 = vrot.slane %v3023_v30, 4  ;;  %v3030_v38 = vsel %vm2280_vm0, %v2168_v20, -inf  ;;  %v7670_v29 = vmax.f32 %v2985_v31, %v2986_v24  ;;  %3699 = vmatpush.msrb.mxu2 %v5387_v4  ;;  %3773 = vmatpush.msrb.mxu3 %v5403_v32  ;;  %v5402_v20 = vld [vmem:[%s8724_s3 + $0x2a0] sm:$0xff] }
 0x3af   : > { %v7672_v37 = vmax.f32 %v2992_v27, %v2993_v26  ;;  %v7674_v51 = vmax.f32 %v2999_v63, %v3000_v48  ;;  %v3018_v44 = vmax.f32 %v3016_v36, %v3017_v7  ;;  %v7676_v50 = vmax.f32 %v3006_v52, %v3007_v13  ;;  %3628 = vmatpush.msrb.mxu1 %v5368_v10  ;;  %v5385_v36 = vld [vmem:[%s8724_s3 + $0x218] sm:$0xff] }
 0x3b0   : > { %v3012_v54 = vrot.slane %v3011_v12, 2  ;;  %v3025_v19 = vmax.f32 %v3023_v30, %v3024_v40  ;;  %v3031_v46 = vrot.slane %v3030_v38, 4  ;;  %v2169_v3 = vrot.slane %v7631_v5, 2  ;;  %3700 = vmatpush.msrb.mxu2 %v5386_v9  ;;  %3774 = vmatpush.msrb.mxu3 %v5402_v20  ;;  %v5401_v30 = vld [vmem:[%s8724_s3 + $0x298] sm:$0xff] }
 0x3b1   : > { %v3019_v0 = vrot.slane %v3018_v44, 2  ;;  %v2170_v2 = vrot.slane %v7631_v5, 4  ;;  %v2171_v42 = vrot.slane %v7631_v5, 6  ;;  %v3037_v17 = vsel %vm2280_vm0, %v7631_v5, -inf  ;;  %3629 = vmatpush.msrb.mxu1 %v5367_v55 }
 0x3b2   : > { %v3013_v15 = vmax.f32 %v3011_v12, %v3012_v54  ;;  %v3026_v61 = vrot.slane %v3025_v19, 2  ;;  %v3032_v56 = vmax.f32 %v3030_v38, %v3031_v46  ;;  %v3038_v60 = vrot.slane %v3037_v17, 4  ;;  %3701 = vmatpush.msrb.mxu2 %v5385_v36  ;;  %3775 = vmatpush.msrb.mxu3 %v5401_v30  ;;  %v5384_v38 = vld [vmem:[%s8724_s3 + $0x210] sm:$0xff] }
 0x3b3   : > { %v3020_v47 = vmax.f32 %v3018_v44, %v3019_v0  ;;  %v3044_v39 = vsel %vm2280_vm0, %v2169_v3, -inf  ;;  %v3051_v49 = vsel %vm2280_vm0, %v2170_v2, -inf  ;;  %v3058_v23 = vsel %vm2280_vm0, %v2171_v42, -inf  ;;  %3630 = vmatpush.msrb.mxu1 %v5366_v35 }
 0x3b4   : > { %v3014_v5 = vrot.slane %v3013_v15, 1  ;;  %v3027_v11 = vmax.f32 %v3025_v19, %v3026_v61  ;;  %v3033_v62 = vrot.slane %v3032_v56, 2  ;;  %v3045_v59 = vrot.slane %v3044_v39, 4  ;;  %3702 = vmatpush.msrb.mxu2 %v5384_v38 }
 0x3b5   : > { %v3021_v31 = vrot.slane %v3020_v47, 1  ;;  %v3039_v27 = vmax.f32 %v3037_v17, %v3038_v60  ;;  %v3052_v63 = vrot.slane %v3051_v49, 4  ;;  %v3059_v7 = vrot.slane %v3058_v23, 4 }
 0x3b6   : > { %v3015_v45 = vmax.f32 %v3013_v15, %v3014_v5  ;;  %v3028_v22 = vrot.slane %v3027_v11, 1  ;;  %v3034_v52 = vmax.f32 %v3032_v56, %v3033_v62  ;;  %v3046_v16 = vmax.f32 %v3044_v39, %v3045_v59  ;;  %v1950_v39 = vpop.f32.mrf.mxu0  ;;  %v5382_v62 = vld [vmem:[%s8724_s3 + $0x200] sm:$0xff] }
 0x3b7   : > { %v3022_v24 = vmax.f32 %v3020_v47, %v3021_v31  ;;  %v3040_v26 = vrot.slane %v3039_v27, 2  ;;  %v3053_v48 = vmax.f32 %v3051_v49, %v3052_v63  ;;  %v3060_v19 = vmax.f32 %v3058_v23, %v3059_v7  ;;  %v5398_v59 = vld [vmem:[%s8724_s3 + $0x280] sm:$0xff] }
 0x3b8   : > { %v3029_v28 = vmax.f32 %v3027_v11, %v3028_v22  ;;  %v3035_v13 = vrot.slane %v3034_v52, 1  ;;  %v3225_v12 = vmax.f32 %v7599_v43, %v3015_v45  ;;  %v3047_v40 = vrot.slane %v3046_v16, 2  ;;  %v5400_v43 = vld [vmem:[%s8724_s3 + $0x290] sm:$0xff] }
 0x3b9   : > { %v3226_v25 = vmax.f32 %v7601_v34, %v3022_v24  ;;  %v3041_v44 = vmax.f32 %v3039_v27, %v3040_v26  ;;  %v3054_v54 = vrot.slane %v3053_v48, 2  ;;  %v2052_v3 = vmax.f32 %v7637_v58, 0.0  ;;  %3776 = vmatpush.msrb.mxu3 %v5400_v43  ;;  %v5399_v58 = vld [vmem:[%s8724_s3 + $0x288] sm:$0xff] }
 0x3ba   : > { %v3036_v46 = vmax.f32 %v3034_v52, %v3035_v13  ;;  %v3227_v14 = vmax.f32 %v7618_v33, %v3029_v28  ;;  %v3048_v0 = vmax.f32 %v3046_v16, %v3047_v40  ;;  %v3061_v61 = vrot.slane %v3060_v19, 2  ;;  %v5383_v33 = vld [vmem:[%s8724_s3 + $0x208] sm:$0xff]  ;;  %v1759_v28 = vpop.f32.mrf.mxu3 }
 0x3bb   : > { %v3354_v2 = vsel %vm3305_vm1, %v3226_v25, %v3225_v12  ;;  %v3042_v42 = vrot.slane %v3041_v44, 1  ;;  %v3055_v15 = vmax.f32 %v3053_v48, %v3054_v54  ;;  %v2172_v4 = vrot.slane %v2052_v3, 2  ;;  %3703 = vmatpush.msrb.mxu2 %v5383_v33  ;;  %3777 = vmatpush.msrb.mxu3 %v5399_v58 }
 0x3bc   : > { %v3228_v34 = vmax.f32 %v7629_v8, %v3036_v46  ;;  %v3355_v56 = vsel %vm3307_vm2, %v3227_v14, %v3354_v2  ;;  %v3049_v17 = vrot.slane %v3048_v0, 1  ;;  %v3062_v47 = vmax.f32 %v3060_v19, %v3061_v61 }
 0x3bd   : > { %v3043_v32 = vmax.f32 %v3041_v44, %v3042_v42  ;;  %v3056_v10 = vrot.slane %v3055_v15, 1  ;;  %v2173_v60 = vrot.slane %v2052_v3, 4  ;;  %v2174_v5 = vrot.slane %v2052_v3, 6  ;;  %3704 = vmatpush.msrb.mxu2 %v5382_v62  ;;  %3778 = vmatpush.msrb.mxu3 %v5398_v59  ;;  %v5461_v62 = vld [vmem:[%s8724_s3 + $0x478] sm:$0xff] }
 0x3be   : > { %v3356_v8 = vsel %vm3309_vm3, %v3228_v34, %v3355_v56  ;;  %v3050_v49 = vmax.f32 %v3048_v0, %v3049_v17  ;;  %v3065_v11 = vsel %vm2280_vm0, %v2052_v3, -inf  ;;  %v3063_v20 = vrot.slane %v3062_v47, 1  ;;  %v5429_v59 = vld [vmem:[%s8724_s3 + $0x378] sm:$0xff] }
 0x3bf   : > { %v3057_v9 = vmax.f32 %v3055_v15, %v3056_v10  ;;  %v3229_v55 = vmax.f32 %v7670_v29, %v3043_v32  ;;  %v3066_v31 = vrot.slane %v3065_v11, 4  ;;  %v3072_v63 = vsel %vm2280_vm0, %v2172_v4, -inf  ;;  %3986 = vmatpush.msra.mxu3 %v5461_v62  ;;  %3838 = vmatpush.msra.mxu1 %v5429_v59 }
 0x3c0   : > { %v3230_v27 = vmax.f32 %v7672_v37, %v3050_v49  ;;  %v3079_v23 = vsel %vm2280_vm0, %v2173_v60, -inf  ;;  %v3086_v45 = vsel %vm2280_vm0, %v2174_v5, -inf  ;;  %v3064_v22 = vmax.f32 %v3062_v47, %v3063_v20  ;;  %v3590_v60 = vld [vmem:[#allocation2 + $0x10] sm:$0xff] }
 0x3c1   : > { %v3231_v52 = vmax.f32 %v7674_v51, %v3057_v9  ;;  %v3357_v16 = vsel %vm3311_vm4, %v3229_v55, %v3356_v8  ;;  %v3067_v36 = vmax.f32 %v3065_v11, %v3066_v31  ;;  %v3073_v29 = vrot.slane %v3072_v63, 4  ;;  %v5445_v11 = vld [vmem:[%s8724_s3 + $0x3f8] sm:$0xff]  ;;  %v5444_v31 = vld [vmem:[%s8724_s3 + $0x3f0] sm:$0xff] }
 0x3c2   : > { %v3358_v30 = vsel %vm3313_vm5, %v3230_v27, %v3357_v16  ;;  %v3080_v35 = vrot.slane %v3079_v23, 4  ;;  %v3087_v24 = vrot.slane %v3086_v45, 4  ;;  %v3232_v26 = vmax.f32 %v7676_v50, %v3064_v22  ;;  %3912 = vmatpush.msra.mxu2 %v5445_v11  ;;  %v5460_v27 = vld [vmem:[%s8724_s3 + $0x470] sm:$0xff]  ;;  %v5443_v16 = vld [vmem:[%s8724_s3 + $0x3e8] sm:$0xff] }
 0x3c3   : > { %v3359_v37 = vsel %vm3315_vm6, %v3231_v52, %v3358_v30  ;;  %v3068_v48 = vrot.slane %v3067_v36, 2  ;;  %v1985_v7 = vadd.f32 %v7697_v57, %v7464_v1  ;;  %v3074_v13 = vmax.f32 %v3072_v63, %v3073_v29  ;;  %v1953_v57 = vpop.f32.mrf.mxu0  ;;  %v5428_v63 = vld [vmem:[%s8724_s3 + $0x370] sm:$0xff]  ;;  %3987 = vmatpush.msra.mxu3 %v5460_v27 }
 0x3c4   : > { %v3081_v12 = vmax.f32 %v3079_v23, %v3080_v35  ;;  %v3088_v51 = vmax.f32 %v3086_v45, %v3087_v24  ;;  %v1986_v40 = vadd.f32 %v1950_v39, %v7467_v41  ;;  %v7759_v38 = vsel %vm3317_vm7, %v3232_v26, %v3359_v37  ;;  %3913 = vmatpush.msra.mxu2 %v5444_v31  ;;  %v5459_v24 = vld [vmem:[%s8724_s3 + $0x468] sm:$0xff] }
 0x3c5   : > { %v2021_v25 = vadd.f32 %v7514_v21, %v1985_v7  ;;  %3383 = vst [vmem:[#allocation2 + $0x71] sm:$0xff] %v7759_v38  ;;  %3471 = vmatmul.f32.gmra.mxu1 %v7759_v38  ;;  %v1793_v44 = vadd.f32 %v1759_v28, %v7470_v18  ;;  %v3069_v54 = vmax.f32 %v3067_v36, %v3068_v48  ;;  %v3075_v19 = vrot.slane %v3074_v13, 2  ;;  %v5427_v26 = vld [vmem:[%s8724_s3 + $0x368] sm:$0xff] }
 0x3c6   : > { %v2022_v50 = vadd.f32 %v7514_v21, %v1986_v40  ;;  %v3082_v46 = vrot.slane %v3081_v12, 2  ;;  %v3089_v14 = vrot.slane %v3088_v51, 2  ;;  %3839 = vmatpush.msra.mxu1 %v5428_v63  ;;  %3914 = vmatpush.msra.mxu2 %v5443_v16  ;;  %v5439_v63 = vld [vmem:[%s8724_s3 + $0x3c8] sm:$0xff] }
 0x3c7   : > { %v2053_v1 = vmax.f32 %v2021_v25, 0.0  ;;  %v1987_v42 = vadd.f32 %v1953_v57, %v1793_v44  ;;  %v3070_v34 = vrot.slane %v3069_v54, 1  ;;  %v3076_v56 = vmax.f32 %v3074_v13, %v3075_v19  ;;  %v5442_v13 = vld [vmem:[%s8724_s3 + $0x3e0] sm:$0xff]  ;;  %3988 = vmatpush.msra.mxu3 %v5459_v24 }
 0x3c8   : > { %v2054_v43 = vmax.f32 %v2022_v50, 0.0  ;;  %v3083_v4 = vmax.f32 %v3081_v12, %v3082_v46  ;;  %v3090_v33 = vmax.f32 %v3088_v51, %v3089_v14  ;;  %v3664_v57 = vld [vmem:[#allocation2 + $0x11] sm:$0xff]  ;;  %3840 = vmatpush.msra.mxu1 %v5427_v26  ;;  %3915 = vmatpush.msra.mxu2 %v5442_v13  ;;  %v5423_v13 = vld [vmem:[%s8724_s3 + $0x348] sm:$0xff] }
 0x3c9   : > { %v2175_v41 = vrot.slane %v2053_v1, 2  ;;  %v2176_v0 = vrot.slane %v2053_v1, 4  ;;  %v2177_v3 = vrot.slane %v2053_v1, 6  ;;  %v3093_v2 = vsel %vm2280_vm0, %v2053_v1, -inf }
 0x3ca   : > { %v3094_v15 = vrot.slane %v3093_v2, 4  ;;  %v2178_v32 = vrot.slane %v2054_v43, 2  ;;  %v2179_v39 = vrot.slane %v2054_v43, 4  ;;  %v2180_v8 = vrot.slane %v2054_v43, 6 }
 0x3cb   : > { %v3100_v61 = vsel %vm2280_vm0, %v2175_v41, -inf  ;;  %v3107_v18 = vsel %vm2280_vm0, %v2176_v0, -inf  ;;  %v3114_v17 = vsel %vm2280_vm0, %v2177_v3, -inf  ;;  %v3121_v49 = vsel %vm2280_vm0, %v2054_v43, -inf  ;;  %v3738_v0 = vld [vmem:[#allocation2 + $0x12] sm:$0xff]  ;;  %v7830_v3 = vld [vmem:[#allocation2 + $0x20] sm:$0xff] }
 0x3cc   : > { %v3101_v58 = vrot.slane %v3100_v61, 4  ;;  %v7770_v10 = vld [vmem:[#allocation2 + $0x70] sm:$0xff]  ;;  %v7776_v5 = vadd.f32 %v7514_v21, %v1987_v42  ;;  %v3095_v9 = vmax.f32 %v3093_v2, %v3094_v15  ;;  %v3108_v20 = vrot.slane %v3107_v18, 4  ;;  %v5426_v43 = vld [vmem:[%s8724_s3 + $0x360] sm:$0xff] }
 0x3cd   : > { %v7772_v47 = vld [vmem:[#allocation2 + $0x72] sm:$0xff]  ;;  %3512 = vmatmul.f32.gmra.mxu2 %v7770_v10  ;;  %v3115_v21 = vrot.slane %v3114_v17, 4  ;;  %v3122_v55 = vrot.slane %v3121_v49, 4  ;;  %3631 = vmatmul.f32.vlgmr.msrb.gmra.mxu1 %v3590_v60  ;;  %v7798_v23 = vmax.f32 %v3069_v54, %v3070_v34  ;;  %v3128_v45 = vsel %vm2280_vm0, %v2178_v32, -inf }
 0x3ce   : > { %3578 = vmatmul.f32.gmra.mxu3 %v7772_v47  ;;  %v3135_v22 = vsel %vm2280_vm0, %v2179_v39, -inf  ;;  %v3142_v52 = vsel %vm2280_vm0, %v2180_v8, -inf  ;;  %v3077_v36 = vrot.slane %v3076_v56, 1  ;;  %v3084_v30 = vrot.slane %v3083_v4, 1  ;;  %v5458_v54 = vld [vmem:[%s8724_s3 + $0x460] sm:$0xff]  ;;  %v5441_v34 = vld [vmem:[%s8724_s3 + $0x3d8] sm:$0xff]  ;;  %3841 = vmatpush.msra.mxu1 %v5426_v43 }
 0x3cf   : > { %v3091_v29 = vrot.slane %v3090_v33, 1  ;;  %v3123_v35 = vmax.f32 %v3121_v49, %v3122_v55  ;;  %v7812_v37 = vmax.f32 %v3100_v61, %v3101_v58  ;;  %v3129_v48 = vrot.slane %v3128_v45, 4  ;;  %3989 = vmatpush.msra.mxu3 %v5458_v54  ;;  %v5425_v58 = vld [vmem:[%s8724_s3 + $0x358] sm:$0xff]  ;;  %v5440_v49 = vld [vmem:[%s8724_s3 + $0x3d0] sm:$0xff]  ;;  %3916 = vmatpush.msra.mxu2 %v5441_v34  ;;  %v5454_v54 = vld [vmem:[%s8724_s3 + $0x440] sm:$0xff] }
 0x3d0   : > { %v3136_v7 = vrot.slane %v3135_v22, 4  ;;  %v3143_v28 = vrot.slane %v3142_v52, 4  ;;  %v3096_v12 = vrot.slane %v3095_v9, 2  ;;  %v7817_v51 = vmax.f32 %v3107_v18, %v3108_v20  ;;  %v5424_v20 = vld [vmem:[%s8724_s3 + $0x350] sm:$0xff]  ;;  %3842 = vmatpush.msra.mxu1 %v5425_v58 }
 0x3d1   : > { %v7819_v40 = vmax.f32 %v3114_v17, %v3115_v21  ;;  %v3124_v25 = vrot.slane %v3123_v35, 2  ;;  %v3130_v50 = vmax.f32 %v3128_v45, %v3129_v48  ;;  %v7824_v19 = vmax.f32 %v3076_v56, %v3077_v36  ;;  %v5457_v56 = vld [vmem:[%s8724_s3 + $0x458] sm:$0xff]  ;;  %v5455_v45 = vld [vmem:[%s8724_s3 + $0x448] sm:$0xff]  ;;  %3917 = vmatpush.msra.mxu2 %v5440_v49 }
 0x3d2   : > { %v3137_v44 = vmax.f32 %v3135_v22, %v3136_v7  ;;  %v3144_v1 = vmax.f32 %v3142_v52, %v3143_v28  ;;  %v7826_v46 = vmax.f32 %v3083_v4, %v3084_v30  ;;  %v7828_v14 = vmax.f32 %v3090_v33, %v3091_v29  ;;  %3990 = vmatpush.msra.mxu3 %v5457_v56 }
 0x3d3   : > { %v3125_v41 = vmax.f32 %v3123_v35, %v3124_v25  ;;  %v3103_v2 = vrot.slane %v7812_v37, 2  ;;  %v3131_v42 = vrot.slane %v3130_v50, 2  ;;  %v7842_v18 = vmax.f32 %v3095_v9, %v3096_v12  ;;  %3843 = vmatpush.msra.mxu1 %v5424_v20  ;;  %3918 = vmatpush.msra.mxu2 %v5439_v63  ;;  %v5438_v12 = vld [vmem:[%s8724_s3 + $0x3c0] sm:$0xff]  ;;  %v5435_v63 = vld [vmem:[%s8724_s3 + $0x3a8] sm:$0xff] }
 0x3d4   : > { %v3138_v15 = vrot.slane %v3137_v44, 2  ;;  %v3145_v61 = vrot.slane %v3144_v1, 2  ;;  %v3110_v17 = vrot.slane %v7817_v51, 2  ;;  %v2055_v33 = vmax.f32 %v7776_v5, 0.0  ;;  %v5456_v5 = vld [vmem:[%s8724_s3 + $0x450] sm:$0xff] }
 0x3d5   : > { %3705 = vmatmul.f32.vlgmr.msrb.gmra.mxu2 %v3664_v57  ;;  %v3126_v4 = vrot.slane %v3125_v41, 1  ;;  %3634 = vmatmul.f32.gmra.mxu1 %v7830_v3  ;;  %v3117_v32 = vrot.slane %v7819_v40, 2  ;;  %v3132_v60 = vmax.f32 %v3130_v50, %v3131_v42  ;;  %v7871_v26 = vmax.f32 %v7812_v37, %v3103_v2  ;;  %v7888_v57 = vld [vmem:[#allocation2 + $0x30] sm:$0xff] }
 0x3d6   : > { %3779 = vmatmul.f32.vlgmr.msrb.gmra.mxu3 %v3738_v0  ;;  %v3139_v39 = vmax.f32 %v3137_v44, %v3138_v15  ;;  %v3146_v8 = vmax.f32 %v3144_v1, %v3145_v61  ;;  %v2181_v62 = vrot.slane %v2055_v33, 2  ;;  %v2182_v59 = vrot.slane %v2055_v33, 4  ;;  %v7886_v1 = vld [vmem:[#allocation2 + $0x22] sm:$0xff]  ;;  %3844 = vmatpush.msra.mxu1 %v5423_v13  ;;  %v5453_v61 = vld [vmem:[%s8724_s3 + $0x438] sm:$0xff] }
 0x3d7   : > { %v3127_v11 = vmax.f32 %v3125_v41, %v3126_v4  ;;  %v2183_v9 = vrot.slane %v2055_v33, 6  ;;  %v3133_v21 = vrot.slane %v3132_v60, 1  ;;  %v3149_v27 = vsel %vm2280_vm0, %v2055_v33, -inf  ;;  %3991 = vmatpush.msra.mxu3 %v5456_v5  ;;  %3919 = vmatpush.msra.mxu2 %v5438_v12  ;;  %v5421_v33 = vld [vmem:[%s8724_s3 + $0x338] sm:$0xff] }
 0x3d8   : > { %v3140_v55 = vrot.slane %v3139_v39, 1  ;;  %v3147_v31 = vrot.slane %v3146_v8, 1  ;;  %v3150_v52 = vrot.slane %v3149_v27, 4  ;;  %v3156_v16 = vsel %vm2280_vm0, %v2181_v62, -inf  ;;  %v5420_v62 = vld [vmem:[%s8724_s3 + $0x330] sm:$0xff] }
 0x3d9   : > { %v3233_v22 = vmax.f32 %v7798_v23, %v3127_v11  ;;  %v3163_v36 = vsel %vm2280_vm0, %v2182_v59, -inf  ;;  %v3134_v30 = vmax.f32 %v3132_v60, %v3133_v21  ;;  %v3157_v24 = vrot.slane %v3156_v16, 4  ;;  %v7874_v23 = vld [vmem:[#allocation2 + $0x21] sm:$0xff]  ;;  %3992 = vmatpush.msra.mxu3 %v5455_v45 }
 0x3da   : > { %v3141_v29 = vmax.f32 %v3139_v39, %v3140_v55  ;;  %v3148_v35 = vmax.f32 %v3146_v8, %v3147_v31  ;;  %v3151_v48 = vmax.f32 %v3149_v27, %v3150_v52  ;;  %v3164_v7 = vrot.slane %v3163_v36, 4  ;;  %v5452_v39 = vld [vmem:[%s8724_s3 + $0x430] sm:$0xff]  ;;  %v7924_v27 = vld [vmem:[#allocation2 + $0x31] sm:$0xff]  ;;  %v5451_v45 = vld [vmem:[%s8724_s3 + $0x428] sm:$0xff] }
 0x3db   : > { %v3170_v28 = vsel %vm2280_vm0, %v2183_v9, -inf  ;;  %v3234_v25 = vmax.f32 %v7824_v19, %v3134_v30  ;;  %v3158_v44 = vmax.f32 %v3156_v16, %v3157_v24  ;;  %v3111_v41 = vmax.f32 %v7817_v51, %v3110_v17  ;;  %3993 = vmatpush.msra.mxu3 %v5454_v54  ;;  %v7934_v52 = vld [vmem:[#allocation2 + $0x32] sm:$0xff]  ;;  %v7936_v16 = vld [vmem:[#allocation2 + $0x40] sm:$0xff] }
 0x3dc   : > { %v3235_v37 = vmax.f32 %v7826_v46, %v3141_v29  ;;  %v3236_v50 = vmax.f32 %v7828_v14, %v3148_v35  ;;  %v3152_v0 = vrot.slane %v3151_v48, 2  ;;  %v3165_v43 = vmax.f32 %v3163_v36, %v3164_v7  ;;  %v5422_v46 = vld [vmem:[%s8724_s3 + $0x340] sm:$0xff]  ;;  %v5437_v14 = vld [vmem:[%s8724_s3 + $0x3b8] sm:$0xff]  ;;  %v5419_v36 = vld [vmem:[%s8724_s3 + $0x328] sm:$0xff] }
 0x3dd   : > { %3708 = vmatmul.f32.gmra.mxu2 %v7874_v23  ;;  %v3171_v19 = vrot.slane %v3170_v28, 4  ;;  %3637 = vmatmul.f32.gmra.mxu1 %v7888_v57  ;;  %v3098_v2 = vrot.slane %v7842_v18, 1  ;;  %v3118_v42 = vmax.f32 %v7819_v40, %v3117_v32  ;;  %v3361_v51 = vsel %vm3305_vm1, %v3234_v25, %v3233_v22  ;;  %v5436_v40 = vld [vmem:[%s8724_s3 + $0x3b0] sm:$0xff] }
 0x3de   : > { %3782 = vmatmul.f32.gmra.mxu3 %v7886_v1  ;;  %v3159_v15 = vrot.slane %v3158_v44, 2  ;;  %v3362_v34 = vsel %vm3307_vm2, %v3235_v37, %v3361_v51  ;;  %v3153_v56 = vmax.f32 %v3151_v48, %v3152_v0  ;;  %v3166_v17 = vrot.slane %v3165_v43, 2  ;;  %3845 = vmatpush.msra.mxu1 %v5422_v46  ;;  %v5450_v48 = vld [vmem:[%s8724_s3 + $0x420] sm:$0xff]  ;;  %v3594_v51 = vld [vmem:[#allocation2 + $0x50] sm:$0xff] }
 0x3df   : > { %v3172_v4 = vmax.f32 %v3170_v28, %v3171_v19  ;;  %v3105_v58 = vrot.slane %v7871_v26, 1  ;;  %v3363_v32 = vsel %vm3309_vm3, %v3236_v50, %v3362_v34  ;;  %3920 = vmatpush.msra.mxu2 %v5437_v14  ;;  %v3112_v8 = vrot.slane %v3111_v41, 1  ;;  %3994 = vmatpush.msra.mxu3 %v5453_v61  ;;  %v5418_v28 = vld [vmem:[%s8724_s3 + $0x320] sm:$0xff]  ;;  %v5433_v50 = vld [vmem:[%s8724_s3 + $0x398] sm:$0xff]  ;;  %v5448_v19 = vld [vmem:[%s8724_s3 + $0x410] sm:$0xff] }
 0x3e0   : > { %v3160_v60 = vmax.f32 %v3158_v44, %v3159_v15  ;;  %v3154_v49 = vrot.slane %v3153_v56, 1  ;;  %v3167_v5 = vmax.f32 %v3165_v43, %v3166_v17  ;;  %v3099_v59 = vmax.f32 %v7842_v18, %v3098_v2  ;;  %3846 = vmatpush.msra.mxu1 %v5421_v33  ;;  %v5449_v44 = vld [vmem:[%s8724_s3 + $0x418] sm:$0xff]  ;;  %v7970_v14 = vld [vmem:[#allocation2 + $0x41] sm:$0xff]  ;;  %v5446_v17 = vld [vmem:[%s8724_s3 + $0x400] sm:$0xff] }
 0x3e1   : > { %v3173_v11 = vrot.slane %v3172_v4, 2  ;;  %3921 = vmatpush.msra.mxu2 %v5436_v40  ;;  %v3119_v20 = vrot.slane %v3118_v42, 1  ;;  %3995 = vmatpush.msra.mxu3 %v5452_v39  ;;  %v3106_v18 = vmax.f32 %v7871_v26, %v3105_v58  ;;  %v3113_v30 = vmax.f32 %v3111_v41, %v3112_v8  ;;  %v5434_v26 = vld [vmem:[%s8724_s3 + $0x3a0] sm:$0xff]  ;;  %v5417_v41 = vld [vmem:[%s8724_s3 + $0x318] sm:$0xff]  ;;  %v5432_v2 = vld [vmem:[%s8724_s3 + $0x390] sm:$0xff]  ;;  %v8001_v39 = vpop.f32.mrf.mxu2  ;;  %v8005_v8 = vpop.f32.mrf.mxu3 }
 0x3e2   : > { %v3161_v9 = vrot.slane %v3160_v60, 1  ;;  %v3155_v21 = vmax.f32 %v3153_v56, %v3154_v49  ;;  %v3168_v55 = vrot.slane %v3167_v5, 1  ;;  %3847 = vmatpush.msra.mxu1 %v5420_v62  ;;  %v5416_v15 = vld [vmem:[%s8724_s3 + $0x310] sm:$0xff]  ;;  %v5431_v61 = vld [vmem:[%s8724_s3 + $0x388] sm:$0xff]  ;;  %v5414_v33 = vld [vmem:[%s8724_s3 + $0x300] sm:$0xff] }
 0x3e3   : > { %v3174_v31 = vmax.f32 %v3172_v4, %v3173_v11  ;;  %3922 = vmatpush.msra.mxu2 %v5435_v63  ;;  %3996 = vmatpush.msra.mxu3 %v5451_v45  ;;  %v3120_v13 = vmax.f32 %v3118_v42, %v3119_v20  ;;  %v3741_v42 = vld [vmem:[#allocation2 + $0x42] sm:$0xff]  ;;  %v5430_v4 = vld [vmem:[%s8724_s3 + $0x380] sm:$0xff] }
 0x3e4   : > { %v3162_v22 = vmax.f32 %v3160_v60, %v3161_v9  ;;  %v3169_v29 = vmax.f32 %v3167_v5, %v3168_v55  ;;  %v3237_v24 = vmax.f32 %v3099_v59, %v3155_v21  ;;  %3848 = vmatpush.msra.mxu1 %v5419_v36  ;;  %v5447_v34 = vld [vmem:[%s8724_s3 + $0x408] sm:$0xff]  ;;  %v3668_v40 = vld [vmem:[#allocation2 + $0x51] sm:$0xff]  ;;  %v7999_v60 = vpop.f32.mrf.mxu1 }
 0x3e5   : > { %3711 = vmatmul.f32.gmra.mxu2 %v7924_v27  ;;  %v3175_v35 = vrot.slane %v3174_v31, 1  ;;  %3640 = vmatmul.f32.gmra.mxu1 %v7936_v16  ;;  %v5415_v56 = vld [vmem:[%s8724_s3 + $0x308] sm:$0xff]  ;;  %v3742_v58 = vld [vmem:[#allocation2 + $0x52] sm:$0xff] }
 0x3e6   : > { %3785 = vmatmul.f32.gmra.mxu3 %v7934_v52  ;;  %v3238_v7 = vmax.f32 %v3106_v18, %v3162_v22  ;;  %v3239_v25 = vmax.f32 %v3113_v30, %v3169_v29  ;;  %v3364_v37 = vsel %vm3311_vm4, %v3237_v24, %v3363_v32  ;;  %3923 = vmatpush.msra.mxu2 %v5434_v26  ;;  %v3669_v32 = vld [vmem:[#allocation2 + $0x61] sm:$0xff]  ;;  %v5557_v9 = vld [vmem:[%s8726_s5 + $0x378] sm:$0xff] }
 0x3e7   : > { %v3176_v12 = vmax.f32 %v3174_v31, %v3175_v35  ;;  %3997 = vmatpush.msra.mxu3 %v5450_v48  ;;  %3849 = vmatpush.msra.mxu1 %v5418_v28  ;;  %v5624_v26 = vld [vmem:[#allocation2] sm:$0xff]  ;;  %v3894_v48 = vld [vmem:[#allocation2 + $0x91] sm:$0xff] }
 0x3e8   : > { %v3365_v54 = vsel %vm3313_vm5, %v3238_v7, %v3364_v37  ;;  %3924 = vmatpush.msra.mxu2 %v5433_v50  ;;  %4786 = vmatpush.msrb.mxu0 %v5557_v9 }
 0x3e9   : > { %v3240_v0 = vmax.f32 %v3120_v13, %v3176_v12  ;;  %v3366_v43 = vsel %vm3315_vm6, %v3239_v25, %v3365_v54  ;;  %3998 = vmatpush.msra.mxu3 %v5449_v44  ;;  %3850 = vmatpush.msra.mxu1 %v5417_v41  ;;  %v8011_v11 = vpop.f32.mrf.mxu2  ;;  %v8013_v62 = vpop.f32.mrf.mxu3 }
 0x3ea   : > { %3925 = vmatpush.msra.mxu2 %v5432_v2 }
 0x3eb   : > { %v7968_v46 = vsel %vm3317_vm7, %v3240_v0, %v3366_v43  ;;  %3999 = vmatpush.msra.mxu3 %v5448_v19  ;;  %3851 = vmatpush.msra.mxu1 %v5416_v15  ;;  %v5552_v19 = vld [vmem:[%s8726_s5 + $0x350] sm:$0xff] }
 0x3ec   : > { %3384 = vst [vmem:[#allocation2 + $0x81] sm:$0xff] %v7968_v46  ;;  %3926 = vmatpush.msra.mxu2 %v5431_v61  ;;  %v8009_v5 = vpop.f32.mrf.mxu1 }
 0x3ed   : > { %3714 = vmatmul.f32.gmra.mxu2 %v7970_v14  ;;  %3643 = vmatmul.f32.gmra.mxu1 %v3594_v51 }
 0x3ee   : > { %3788 = vmatmul.f32.gmra.mxu3 %v3741_v42  ;;  %3852 = vmatpush.msra.mxu1 %v5415_v56 }
 0x3ef   : > { %4000 = vmatpush.msra.mxu3 %v5447_v34  ;;  %3927 = vmatpush.msra.mxu2 %v5430_v4 }
 0x3f0   : > { %3853 = vmatpush.msra.mxu1 %v5414_v33 }
 0x3f1   : > { %4001 = vmatpush.msra.mxu3 %v5446_v17  ;;  %v8022_v21 = vpop.f32.mrf.mxu2  ;;  %v8024_v55 = vpop.f32.mrf.mxu3 }
 0x3f3   : > { %v3597_v49 = vld [vmem:[#allocation2 + $0x80] sm:$0xff] }
 0x3f4   : > { %v3745_v59 = vld [vmem:[#allocation2 + $0x82] sm:$0xff]  ;;  %v8020_v20 = vpop.f32.mrf.mxu1 }
 0x3f5   : > { %3717 = vmatmul.f32.gmra.mxu2 %v3668_v40  ;;  %3646 = vmatmul.f32.gmra.mxu1 %v7654_v53 }
 0x3f6   : > { %3791 = vmatmul.f32.gmra.mxu3 %v3742_v58 }
 0x3f9   : > { %v8033_v63 = vpop.f32.mrf.mxu3 }
 0x3fc   : > { %v8029_v31 = vpop.f32.mrf.mxu1 }
 0x3fd   : > { %3720 = vmatmul.f32.gmra.mxu2 %v3669_v32  ;;  %3649 = vmatmul.f32.gmra.mxu1 %v7770_v10 }
 0x3fe   : > { %3794 = vmatmul.f32.gmra.mxu3 %v7656_v6 }
 0x404   : > { %v8041_v45 = vpop.f32.mrf.mxu1 }
 0x405   : > { %3723 = vmatmul.f32.gmra.mxu2 %v7759_v38  ;;  %3652 = vmatmul.f32.gmra.mxu1 %v3597_v49 }
 0x406   : > { %3797 = vmatmul.f32.gmra.mxu3 %v7772_v47 }
 0x40d   : > { %3726 = vmatmul.f32.gmra.mxu2 %v7968_v46  ;;  %3854 = vmatmul.f32.vlgmr.msra.gmra.mxu1 %v7830_v3  ;;  %v8031_v3 = vpop.f32.mrf.mxu2 }
 0x40e   : > { %3800 = vmatmul.f32.gmra.mxu3 %v3745_v59  ;;  %v3502_v34 = vadd.f32 %v8031_v3, %v8029_v31 }
 0x415   : > { %3928 = vmatmul.f32.vlgmr.msra.gmra.mxu2 %v7874_v23  ;;  %3857 = vmatmul.f32.gmra.mxu1 %v7888_v57  ;;  %v5556_v23 = vld [vmem:[%s8726_s5 + $0x370] sm:$0xff]  ;;  %v8045_v57 = vpop.f32.mrf.mxu3 }
 0x416   : > { %4002 = vmatmul.f32.vlgmr.msra.gmra.mxu3 %v7886_v1  ;;  %v8043_v1 = vpop.f32.mrf.mxu2  ;;  %4787 = vmatpush.msrb.mxu0 %v5556_v23 }
 0x41d   : > { %3931 = vmatmul.f32.gmra.mxu2 %v7924_v27  ;;  %3860 = vmatmul.f32.gmra.mxu1 %v7936_v16  ;;  %v8048_v27 = vpop.f32.mrf.mxu1  ;;  %v8050_v22 = vpop.f32.mrf.mxu3 }
 0x41e   : > { %4005 = vmatmul.f32.gmra.mxu3 %v7934_v52  ;;  %v3507_v18 = vpop.f32.mrf.mxu2  ;;  %v5555_v52 = vld [vmem:[%s8726_s5 + $0x368] sm:$0xff] }
 0x41f   : > { %4788 = vmatpush.msrb.mxu0 %v5555_v52 }
 0x425   : > { %3934 = vmatmul.f32.gmra.mxu2 %v7970_v14  ;;  %3863 = vmatmul.f32.gmra.mxu1 %v3594_v51  ;;  %v3469_v16 = vpop.f32.mrf.mxu1  ;;  %v3499_v14 = vadd.f32 %v8022_v21, %v8020_v20 }
 0x426   : > { %4008 = vmatmul.f32.gmra.mxu3 %v3741_v42 }
 0x427   : > { %v3584_v51 = vadd.f32 %v8024_v55, %v3499_v14  ;;  %v5474_v14 = vld [vmem:[%s8726_s5 + $0xe0] sm:$0xff] }
 0x42d   : > { %3937 = vmatmul.f32.gmra.mxu2 %v3668_v40  ;;  %3866 = vmatmul.f32.gmra.mxu1 %v7654_v53  ;;  %v5554_v53 = vld [vmem:[%s8726_s5 + $0x360] sm:$0xff]  ;;  %v5551_v40 = vld [vmem:[%s8726_s5 + $0x348] sm:$0xff] }
 0x42e   : > { %4011 = vmatmul.f32.gmra.mxu3 %v3742_v58  ;;  %4789 = vmatpush.msrb.mxu0 %v5554_v53  ;;  %v3585_v58 = vadd.f32 %v8033_v63, %v3502_v34 }
 0x42f   : > { %v3510_v36 = vpop.f32.mrf.mxu2 }
 0x430   : > { %v3511_v30 = vadd.f32 %v3510_v36, %v3469_v16  ;;  %v3576_v29 = vpop.f32.mrf.mxu3 }
 0x432   : > { %v8056_v35 = vadd.f32 %v3576_v29, %v3511_v30 }
 0x435   : > { %3940 = vmatmul.f32.gmra.mxu2 %v3669_v32  ;;  %3869 = vmatmul.f32.gmra.mxu1 %v7770_v10  ;;  %v5553_v10 = vld [vmem:[%s8726_s5 + $0x358] sm:$0xff]  ;;  %v3508_v32 = vadd.f32 %v3507_v18, %v8048_v27 }
 0x436   : > { %4014 = vmatmul.f32.gmra.mxu3 %v7656_v6  ;;  %v3968_v6 = vld [vmem:[#allocation2 + $0x92] sm:$0xff]  ;;  %4790 = vmatpush.msrb.mxu0 %v5553_v10 }
 0x437   : > { %v3587_v9 = vadd.f32 %v8050_v22, %v3508_v32 }
 0x438   : > { %4791 = vmatpush.msrb.mxu0 %v5552_v19 }
 0x43a   : > { %4792 = vmatpush.msrb.mxu0 %v5551_v40 }
 0x43d   : > { %3943 = vmatmul.f32.gmra.mxu2 %v7759_v38  ;;  %3872 = vmatmul.f32.gmra.mxu1 %v3597_v49 }
 0x43e   : > { %4017 = vmatmul.f32.gmra.mxu3 %v7772_v47  ;;  %v3493_v47 = vadd.f32 %v8001_v39, %v7999_v60 }
 0x440   : > { %v3582_v37 = vadd.f32 %v8005_v8, %v3493_v47  ;;  %v3505_v8 = vadd.f32 %v8043_v1, %v8041_v45 }
 0x442   : > { %v3472_v24 = vpop.f32.mrf.mxu1  ;;  %v3586_v31 = vadd.f32 %v8045_v57, %v3505_v8 }
 0x445   : > { %3946 = vmatmul.f32.gmra.mxu2 %v7968_v46  ;;  %3875 = vmatmul.f32.gmra.mxu1 %v5624_v26 }
 0x446   : > { %4020 = vmatmul.f32.gmra.mxu3 %v3745_v59 }
 0x44a   : > { %v3632_v7 = vpop.f32.mrf.mxu1 }
 0x44b   : > { %v3656_v50 = vadd.f32 %v3632_v7, %v3582_v37  ;;  %v5477_v37 = vld [vmem:[%s8726_s5 + $0xf8] sm:$0xff] }
 0x44c   : > { %4444 = vmatpush.msrb.mxu1 %v5477_v37  ;;  %v5493_v37 = vld [vmem:[%s8726_s5 + $0x178] sm:$0xff] }
 0x44d   : > { %3949 = vmatmul.f32.gmra.mxu2 %v3894_v48  ;;  %4541 = vmatpush.msrb.mxu3 %v5493_v37 }
 0x44e   : > { %4023 = vmatmul.f32.gmra.mxu3 %v3968_v6  ;;  %v5550_v6 = vld [vmem:[%s8726_s5 + $0x340] sm:$0xff] }
 0x44f   : > { %4793 = vmatpush.msrb.mxu0 %v5550_v6  ;;  %v5470_v6 = vld [vmem:[%s8726_s5 + $0xc0] sm:$0xff] }
 0x450   : > { %v3513_v38 = vpop.f32.mrf.mxu2 }
 0x451   : > { %v3579_v28 = vpop.f32.mrf.mxu3  ;;  %v3514_v13 = vadd.f32 %v3513_v38, %v3472_v24  ;;  %v3496_v38 = vadd.f32 %v8011_v11, %v8009_v5  ;;  %v8119_v5 = vld [vmem:[%s8725_s4] ss:$0 sm:$0xff]  ;;  %v5476_v11 = vld [vmem:[%s8726_s5 + $0xf0] sm:$0xff] }
 0x452   : > { %v8071_v25 = vpop.f32.mrf.mxu1  ;;  %4445 = vmatpush.msrb.mxu1 %v5476_v11 }
 0x453   : > { %v3589_v12 = vadd.f32 %v3579_v28, %v3514_v13  ;;  %v3583_v13 = vadd.f32 %v8013_v62, %v3496_v38 }
 0x458   : > { %v3706_v44 = vpop.f32.mrf.mxu2 }
 0x459   : > { %v3780_v54 = vpop.f32.mrf.mxu3  ;;  %v3730_v41 = vadd.f32 %v3706_v44, %v3656_v50  ;;  %v3657_v50 = vadd.f32 %v8071_v25, %v3583_v13  ;;  %v5475_v25 = vld [vmem:[%s8726_s5 + $0xe8] sm:$0xff] }
 0x45a   : > { %v3638_v43 = vpop.f32.mrf.mxu1  ;;  %4446 = vmatpush.msrb.mxu1 %v5475_v25 }
 0x45b   : > { %v3804_v0 = vadd.f32 %v3780_v54, %v3730_v41  ;;  %v3658_v15 = vadd.f32 %v3638_v43, %v3584_v51 }
 0x45c   : > { %4447 = vmatpush.msrb.mxu1 %v5474_v14  ;;  %v5468_v14 = vld [vmem:[%s8726_s5 + $0xb0] sm:$0xff] }
 0x460   : > { %v3709_v46 = vpop.f32.mrf.mxu2 }
 0x461   : > { %v8079_v2 = vpop.f32.mrf.mxu3  ;;  %v3731_v62 = vadd.f32 %v3709_v46, %v3657_v50  ;;  %v5473_v46 = vld [vmem:[%s8726_s5 + $0xd8] sm:$0xff] }
 0x462   : > { %v3641_v42 = vpop.f32.mrf.mxu1  ;;  %4448 = vmatpush.msrb.mxu1 %v5473_v46 }
 0x463   : > { %v3659_v60 = vadd.f32 %v3641_v42, %v3585_v58  ;;  %v3805_v42 = vadd.f32 %v8079_v2, %v3731_v62 }
 0x468   : > { %v3712_v61 = vpop.f32.mrf.mxu2 }
 0x469   : > { %v3732_v56 = vadd.f32 %v3712_v61, %v3658_v15  ;;  %v3786_v17 = vpop.f32.mrf.mxu3  ;;  %v4407_v15 = vld [vmem:[%s8726_s5 + $0x78] sm:$0xff] }
 0x46a   : > { %v3644_v33 = vpop.f32.mrf.mxu1  ;;  %4482 = vmatpush.msrb.mxu2 %v4407_v15 }
 0x46b   : > { %v8084_v4 = vadd.f32 %v3786_v17, %v3732_v56  ;;  %v3660_v3 = vadd.f32 %v3644_v33, %v3586_v31  ;;  %v4406_v31 = vld [vmem:[%s8726_s5 + $0x70] sm:$0xff] }
 0x46c   : > { %4483 = vmatpush.msrb.mxu2 %v4406_v31 }
 0x470   : > { %v3715_v39 = vpop.f32.mrf.mxu2 }
 0x471   : > { %v3733_v49 = vadd.f32 %v3715_v39, %v3659_v60  ;;  %v3789_v59 = vpop.f32.mrf.mxu3 }
 0x472   : > { %v3647_v21 = vpop.f32.mrf.mxu1 }
 0x473   : > { %v8094_v20 = vadd.f32 %v3789_v59, %v3733_v49  ;;  %v3661_v55 = vadd.f32 %v3647_v21, %v3587_v9 }
 0x478   : > { %v3718_v23 = vpop.f32.mrf.mxu2 }
 0x479   : > { %v3734_v63 = vadd.f32 %v3718_v23, %v3660_v3  ;;  %v3792_v52 = vpop.f32.mrf.mxu3 }
 0x47a   : > { %v3650_v18 = vpop.f32.mrf.mxu1 }
 0x47b   : > { %v8097_v27 = vadd.f32 %v3792_v52, %v3734_v63  ;;  %v3662_v16 = vadd.f32 %v3650_v18, %v8056_v35 }
 0x480   : > { %v3721_v45 = vpop.f32.mrf.mxu2 }
 0x481   : > { %v3735_v1 = vadd.f32 %v3721_v45, %v3661_v55  ;;  %v3795_v36 = vpop.f32.mrf.mxu3  ;;  %v5472_v55 = vld [vmem:[%s8726_s5 + $0xd0] sm:$0xff] }
 0x482   : > { %v3653_v22 = vpop.f32.mrf.mxu1  ;;  %4449 = vmatpush.msrb.mxu1 %v5472_v55 }
 0x483   : > { %v8100_v30 = vadd.f32 %v3795_v36, %v3735_v1  ;;  %v3663_v29 = vadd.f32 %v3653_v22, %v3589_v12  ;;  %v5471_v1 = vld [vmem:[%s8726_s5 + $0xc8] sm:$0xff] }
 0x484   : > { %v4405_v36 = vld [vmem:[%s8726_s5 + $0x68] sm:$0xff]  ;;  %4450 = vmatpush.msrb.mxu1 %v5471_v1 }
 0x485   : > { %4484 = vmatpush.msrb.mxu2 %v4405_v36 }
 0x486   : > { %4451 = vmatpush.msrb.mxu1 %v5470_v6 }
 0x488   : > { %v3724_v53 = vpop.f32.mrf.mxu2 }
 0x489   : > { %v3736_v24 = vadd.f32 %v3724_v53, %v3662_v16  ;;  %v3798_v26 = vpop.f32.mrf.mxu3  ;;  %v4408_v16 = vld [vmem:[#allocation3 + $0x1] sm:$0xf] }
 0x48a   : > { %v3855_v48 = vpop.f32.mrf.mxu1  ;;  %4433 = vst [vmem:[#allocation1] ss:$2 sm:$0xff] %v4408_v16 }
 0x48b   : > { %v8102_v57 = vadd.f32 %v3798_v26, %v3736_v24  ;;  %v3879_v12 = vadd.f32 %v3855_v48, %v3804_v0 }
 0x490   : > { %v3727_v7 = vpop.f32.mrf.mxu2 }
 0x491   : > { %v3737_v35 = vadd.f32 %v3727_v7, %v3663_v29  ;;  %v3801_v10 = vpop.f32.mrf.mxu3  ;;  %v4404_v7 = vld [vmem:[%s8726_s5 + $0x60] sm:$0xff] }
 0x492   : > { %v3858_v47 = vpop.f32.mrf.mxu1  ;;  %4485 = vmatpush.msrb.mxu2 %v4404_v7 }
 0x493   : > { %v8109_v28 = vadd.f32 %v3801_v10, %v3737_v35  ;;  %v3880_v61 = vadd.f32 %v3858_v47, %v3805_v42  ;;  %v4402_v42 = vld [vmem:[%s8726_s5 + $0x50] sm:$0xff] }
 0x498   : > { %v3929_v44 = vpop.f32.mrf.mxu2 }
 0x499   : > { %v3953_v54 = vadd.f32 %v3929_v44, %v3879_v12  ;;  %v4003_v41 = vpop.f32.mrf.mxu3  ;;  %v4403_v12 = vld [vmem:[%s8726_s5 + $0x58] sm:$0xff] }
 0x49a   : > { %v3861_v43 = vpop.f32.mrf.mxu1  ;;  %4486 = vmatpush.msrb.mxu2 %v4403_v12 }
 0x49b   : > { %v4027_v0 = vadd.f32 %v4003_v41, %v3953_v54  ;;  %v3881_v26 = vadd.f32 %v3861_v43, %v8084_v4  ;;  %v5469_v4 = vld [vmem:[%s8726_s5 + $0xb8] sm:$0xff] }
 0x49c   : > { %4452 = vmatpush.msrb.mxu1 %v5469_v4  ;;  %4487 = vmatpush.msrb.mxu2 %v4402_v42 }
 0x49d   : > { %v4039_v19 = vadd.f32 %v8119_v5, %v4027_v0 }
 0x49e   : > { %4453 = vmatpush.msrb.mxu1 %v5468_v14 }
 0x49f   : > { %v4047_v51 = vmax.f32 %v4039_v19, 0.0 }
 0x4a0   : > { %v3932_v34 = vpop.f32.mrf.mxu2 }
 0x4a1   : > { %v4063_v56 = vrot.slane %v4047_v51, 2  ;;  %v4064_v17 = vrot.slane %v4047_v51, 4  ;;  %v4065_v33 = vrot.slane %v4047_v51, 6  ;;  %v4111_v40 = vsel %vm2280_vm0, %v4047_v51, -inf  ;;  %v4006_v2 = vpop.f32.mrf.mxu3 }
 0x4a2   : > { %v4112_v58 = vrot.slane %v4111_v40, 4  ;;  %v3954_v32 = vadd.f32 %v3932_v34, %v3880_v61  ;;  %v3864_v45 = vpop.f32.mrf.mxu1  ;;  %v5492_v61 = vld [vmem:[%s8726_s5 + $0x170] sm:$0xff] }
 0x4a3   : > { %v4118_v60 = vsel %vm2280_vm0, %v4063_v56, -inf  ;;  %v4125_v39 = vsel %vm2280_vm0, %v4064_v17, -inf  ;;  %v4132_v8 = vsel %vm2280_vm0, %v4065_v33, -inf  ;;  %4542 = vmatpush.msrb.mxu3 %v5492_v61  ;;  %v4397_v61 = vld [vmem:[%s8726_s5 + $0x28] sm:$0xff] }
 0x4a4   : > { %v4113_v49 = vmax.f32 %v4111_v40, %v4112_v58  ;;  %v4119_v59 = vrot.slane %v4118_v60, 4  ;;  %v4126_v9 = vrot.slane %v4125_v39, 4  ;;  %v4133_v21 = vrot.slane %v4132_v8, 4  ;;  %v5549_v40 = vld [vmem:[%s8726_s5 + $0x338] sm:$0xff]  ;;  %v4401_v58 = vld [vmem:[%s8726_s5 + $0x48] sm:$0xff] }
 0x4a5   : > { %v4028_v3 = vadd.f32 %v4006_v2, %v3954_v32  ;;  %v5467_v2 = vld [vmem:[%s8726_s5 + $0xa8] sm:$0xff]  ;;  %4794 = vmatpush.msrb.mxu0 %v5549_v40  ;;  %4488 = vmatpush.msrb.mxu2 %v4401_v58 }
 0x4a6   : > { %v4114_v23 = vrot.slane %v4113_v49, 2  ;;  %v4120_v63 = vmax.f32 %v4118_v60, %v4119_v59  ;;  %v4127_v52 = vmax.f32 %v4125_v39, %v4126_v9  ;;  %v4134_v18 = vmax.f32 %v4132_v8, %v4133_v21  ;;  %4454 = vmatpush.msrb.mxu1 %v5467_v2  ;;  %v5491_v9 = vld [vmem:[%s8726_s5 + $0x168] sm:$0xff] }
 0x4a7   : > { %v4040_v22 = vadd.f32 %v8119_v5, %v4028_v3  ;;  %v3882_v8 = vadd.f32 %v3864_v45, %v8094_v20  ;;  %4543 = vmatpush.msrb.mxu3 %v5491_v9  ;;  %v5466_v20 = vld [vmem:[%s8726_s5 + $0xa0] sm:$0xff] }
 0x4a8   : > { %v4121_v29 = vrot.slane %v4120_v63, 2  ;;  %v4128_v53 = vrot.slane %v4127_v52, 2  ;;  %v4135_v24 = vrot.slane %v4134_v18, 2  ;;  %v3935_v48 = vpop.f32.mrf.mxu2  ;;  %v4115_v38 = vmax.f32 %v4113_v49, %v4114_v23  ;;  %v4400_v23 = vld [vmem:[%s8726_s5 + $0x40] sm:$0xff]  ;;  %4455 = vmatpush.msrb.mxu1 %v5466_v20 }
 0x4a9   : > { %v4048_v35 = vmax.f32 %v4040_v22, 0.0  ;;  %v4009_v10 = vpop.f32.mrf.mxu3  ;;  %v3955_v13 = vadd.f32 %v3935_v48, %v3881_v26  ;;  %4489 = vmatpush.msrb.mxu2 %v4400_v23  ;;  %v4399_v26 = vld [vmem:[%s8726_s5 + $0x38] sm:$0xff]  ;;  %v5486_v9 = vld [vmem:[%s8726_s5 + $0x140] sm:$0xff] }
 0x4aa   : > { %v4122_v47 = vmax.f32 %v4120_v63, %v4121_v29  ;;  %v4129_v11 = vmax.f32 %v4127_v52, %v4128_v53  ;;  %v4136_v62 = vmax.f32 %v4134_v18, %v4135_v24  ;;  %v4116_v51 = vrot.slane %v4115_v38, 1  ;;  %v8194_v59 = vpop.f32.mrf.mxu1  ;;  %v5490_v63 = vld [vmem:[%s8726_s5 + $0x160] sm:$0xff]  ;;  %v5465_v24 = vld [vmem:[%s8726_s5 + $0x98] sm:$0xff] }
 0x4ab   : > { %v4066_v50 = vrot.slane %v4048_v35, 2  ;;  %v4067_v44 = vrot.slane %v4048_v35, 4  ;;  %v4068_v54 = vrot.slane %v4048_v35, 6  ;;  %v4139_v41 = vsel %vm2280_vm0, %v4048_v35, -inf  ;;  %4544 = vmatpush.msrb.mxu3 %v5490_v63  ;;  %v5489_v48 = vld [vmem:[%s8726_s5 + $0x158] sm:$0xff]  ;;  %4456 = vmatpush.msrb.mxu1 %v5465_v24 }
 0x4ac   : > { %v4140_v0 = vrot.slane %v4139_v41, 4  ;;  %v4123_v46 = vrot.slane %v4122_v47, 1  ;;  %v4029_v33 = vadd.f32 %v4009_v10, %v3955_v13  ;;  %v4130_v32 = vrot.slane %v4129_v11, 1  ;;  %4490 = vmatpush.msrb.mxu2 %v4399_v26  ;;  %v5509_v24 = vld [vmem:[%s8726_s5 + $0x1f8] sm:$0xff] }
 0x4ad   : > { %v4146_v25 = vsel %vm2280_vm0, %v4066_v50, -inf  ;;  %v4153_v43 = vsel %vm2280_vm0, %v4067_v44, -inf  ;;  %v4160_v19 = vsel %vm2280_vm0, %v4068_v54, -inf  ;;  %v4137_v60 = vrot.slane %v4136_v62, 1  ;;  %4545 = vmatpush.msrb.mxu3 %v5489_v48  ;;  %v5464_v54 = vld [vmem:[%s8726_s5 + $0x90] sm:$0xff] }
 0x4ae   : > { %v4147_v15 = vrot.slane %v4146_v25, 4  ;;  %v4141_v34 = vmax.f32 %v4139_v41, %v4140_v0  ;;  %v4154_v56 = vrot.slane %v4153_v43, 4  ;;  %v4161_v17 = vrot.slane %v4160_v19, 4  ;;  %v4398_v41 = vld [vmem:[%s8726_s5 + $0x30] sm:$0xff]  ;;  %4457 = vmatpush.msrb.mxu1 %v5464_v54 }
 0x4af   : > { %v4041_v3 = vadd.f32 %v8119_v5, %v4029_v33  ;;  %v8209_v52 = vmax.f32 %v4115_v38, %v4116_v51  ;;  %v8211_v18 = vmax.f32 %v4122_v47, %v4123_v46  ;;  %v4131_v6 = vmax.f32 %v4129_v11, %v4130_v32  ;;  %4491 = vmatpush.msrb.mxu2 %v4398_v41 }
 0x4b0   : > { %v4148_v39 = vmax.f32 %v4146_v25, %v4147_v15  ;;  %v3938_v49 = vpop.f32.mrf.mxu2  ;;  %v4142_v21 = vrot.slane %v4141_v34, 2  ;;  %v4155_v55 = vmax.f32 %v4153_v43, %v4154_v56  ;;  %v4162_v31 = vmax.f32 %v4160_v19, %v4161_v17  ;;  %v5488_v43 = vld [vmem:[%s8726_s5 + $0x150] sm:$0xff]  ;;  %v5463_v15 = vld [vmem:[%s8726_s5 + $0x88] sm:$0xff] }
 0x4b1   : > { %v3956_v45 = vadd.f32 %v3938_v49, %v3882_v8  ;;  %v4049_v29 = vmax.f32 %v4041_v3, 0.0  ;;  %v4012_v53 = vpop.f32.mrf.mxu3  ;;  %v8222_v7 = vmax.f32 %v4136_v62, %v4137_v60  ;;  %4546 = vmatpush.msrb.mxu3 %v5488_v43  ;;  %4458 = vmatpush.msrb.mxu1 %v5463_v15  ;;  %v5462_v8 = vld [vmem:[%s8726_s5 + $0x80] sm:$0xff] }
 0x4b2   : > { %v4149_v16 = vrot.slane %v4148_v39, 2  ;;  %v4143_v1 = vmax.f32 %v4141_v34, %v4142_v21  ;;  %v4156_v36 = vrot.slane %v4155_v55, 2  ;;  %v4163_v22 = vrot.slane %v4162_v31, 2  ;;  %v5487_v34 = vld [vmem:[%s8726_s5 + $0x148] sm:$0xff]  ;;  %4492 = vmatpush.msrb.mxu2 %v4397_v61  ;;  %v4396_v49 = vld [vmem:[%s8726_s5 + $0x20] sm:$0xff] }
 0x4b3   : > { %v4030_v10 = vadd.f32 %v4012_v53, %v3956_v45  ;;  %v4069_v4 = vrot.slane %v4049_v29, 2  ;;  %v4070_v37 = vrot.slane %v4049_v29, 4  ;;  %v4071_v50 = vrot.slane %v4049_v29, 6  ;;  %4547 = vmatpush.msrb.mxu3 %v5487_v34  ;;  %4459 = vmatpush.msrb.mxu1 %v5462_v8  ;;  %v8274_v53 = vld [vmem:[%s8726_s5 + $0x330] sm:$0xff] }
 0x4b4   : > { %v4150_v35 = vmax.f32 %v4148_v39, %v4149_v16  ;;  %v4144_v38 = vrot.slane %v4143_v1, 1  ;;  %v4157_v47 = vmax.f32 %v4155_v55, %v4156_v36  ;;  %v4164_v13 = vmax.f32 %v4162_v31, %v4163_v22  ;;  %v8248_v39 = vpop.f32.mrf.mxu1  ;;  %4493 = vmatpush.msrb.mxu2 %v4396_v49  ;;  %v5485_v16 = vld [vmem:[%s8726_s5 + $0x138] sm:$0xff]  ;;  %4795 = vmatpush.msrb.mxu0 %v8274_v53 }
 0x4b5   : > { %v4167_v44 = vsel %vm2280_vm0, %v4049_v29, -inf  ;;  %v4174_v14 = vsel %vm2280_vm0, %v4069_v4, -inf  ;;  %v4181_v42 = vsel %vm2280_vm0, %v4070_v37, -inf  ;;  %v4188_v51 = vsel %vm2280_vm0, %v4071_v50, -inf  ;;  %4548 = vmatpush.msrb.mxu3 %v5486_v9  ;;  %4602 = vmatpush.msra.mxu1 %v5509_v24  ;;  %v5505_v24 = vld [vmem:[%s8726_s5 + $0x1d8] sm:$0xff] }
 0x4b6   : > { %v4151_v12 = vrot.slane %v4150_v35, 1  ;;  %v4145_v11 = vmax.f32 %v4143_v1, %v4144_v38  ;;  %v4158_v62 = vrot.slane %v4157_v47, 1  ;;  %v4165_v0 = vrot.slane %v4164_v13, 1 }
 0x4b7   : > { %v4168_v25 = vrot.slane %v4167_v44, 4  ;;  %v4175_v58 = vrot.slane %v4174_v14, 4  ;;  %v4182_v32 = vrot.slane %v4181_v42, 4  ;;  %v4189_v60 = vrot.slane %v4188_v51, 4  ;;  %4549 = vmatpush.msrb.mxu3 %v5485_v16  ;;  %v5482_v16 = vld [vmem:[%s8726_s5 + $0x120] sm:$0xff] }
 0x4b8   : > { %v4152_v19 = vmax.f32 %v4150_v35, %v4151_v12  ;;  %v3941_v46 = vpop.f32.mrf.mxu2  ;;  %v4159_v56 = vmax.f32 %v4157_v47, %v4158_v62  ;;  %v4166_v17 = vmax.f32 %v4164_v13, %v4165_v0  ;;  %v4335_v33 = vmax.f32 %v8209_v52, %v4145_v11 }
 0x4b9   : > { %v4169_v40 = vmax.f32 %v4167_v44, %v4168_v25  ;;  %v4042_v3 = vadd.f32 %v8119_v5, %v4030_v10  ;;  %v4176_v23 = vmax.f32 %v4174_v14, %v4175_v58  ;;  %v4183_v63 = vmax.f32 %v4181_v42, %v4182_v32  ;;  %v4015_v29 = vpop.f32.mrf.mxu3  ;;  %v5508_v44 = vld [vmem:[%s8726_s5 + $0x1f0] sm:$0xff] }
 0x4ba   : > { %v4336_v2 = vmax.f32 %v8211_v18, %v4152_v19  ;;  %v4337_v21 = vmax.f32 %v4131_v6, %v4159_v56  ;;  %v4338_v55 = vmax.f32 %v8222_v7, %v4166_v17  ;;  %v4190_v52 = vmax.f32 %v4188_v51, %v4189_v60  ;;  %v4395_v18 = vld [vmem:[%s8726_s5 + $0x18] sm:$0xff]  ;;  %4603 = vmatpush.msra.mxu1 %v5508_v44  ;;  %v4393_v56 = vld [vmem:[%s8726_s5 + $0x8] sm:$0xff] }
 0x4bb   : > { %v4170_v31 = vrot.slane %v4169_v40, 2  ;;  %v4050_v36 = vmax.f32 %v4042_v3, 0.0  ;;  %v3883_v22 = vadd.f32 %v8194_v59, %v8097_v27  ;;  %v4177_v48 = vrot.slane %v4176_v23, 2  ;;  %4494 = vmatpush.msrb.mxu2 %v4395_v18  ;;  %v4394_v27 = vld [vmem:[%s8726_s5 + $0x10] sm:$0xff]  ;;  %v5483_v17 = vld [vmem:[%s8726_s5 + $0x128] sm:$0xff]  ;;  %v4392_v18 = vld [vmem:[%s8726_s5] sm:$0xff] }
 0x4bc   : > { %v4367_v20 = vsel %vm3305_vm1, %v4336_v2, %v4335_v33  ;;  %v4184_v6 = vrot.slane %v4183_v63, 2  ;;  %v4191_v7 = vrot.slane %v4190_v52, 2  ;;  %v5484_v59 = vld [vmem:[%s8726_s5 + $0x130] sm:$0xff]  ;;  %v3884_v61 = vadd.f32 %v8248_v39, %v8100_v30  ;;  %v3873_v34 = vpop.f32.mrf.mxu1  ;;  %v5507_v30 = vld [vmem:[%s8726_s5 + $0x1e8] sm:$0xff] }
 0x4bd   : > { %v4368_v45 = vsel %vm3307_vm2, %v4337_v21, %v4367_v20  ;;  %v4171_v1 = vmax.f32 %v4169_v40, %v4170_v31  ;;  %v4072_v35 = vrot.slane %v4050_v36, 2  ;;  %v4073_v10 = vrot.slane %v4050_v36, 4  ;;  %4495 = vmatpush.msrb.mxu2 %v4394_v27  ;;  %4550 = vmatpush.msrb.mxu3 %v5484_v59  ;;  %v5480_v59 = vld [vmem:[%s8726_s5 + $0x110] sm:$0xff] }
 0x4be   : > { %v4369_v26 = vsel %vm3309_vm3, %v4338_v55, %v4368_v45  ;;  %v4074_v38 = vrot.slane %v4050_v36, 6  ;;  %v3957_v47 = vadd.f32 %v3941_v46, %v3883_v22  ;;  %v4178_v13 = vmax.f32 %v4176_v23, %v4177_v48  ;;  %4604 = vmatpush.msra.mxu1 %v5507_v30  ;;  %v5506_v45 = vld [vmem:[%s8726_s5 + $0x1e0] sm:$0xff] }
 0x4bf   : > { %4384 = vst [vmem:[#allocation3 + $0x9] sm:$0xf] %v4369_v26  ;;  %v4185_v4 = vmax.f32 %v4183_v63, %v4184_v6  ;;  %v4192_v12 = vmax.f32 %v4190_v52, %v4191_v7  ;;  %v4195_v37 = vsel %vm2280_vm0, %v4050_v36, -inf  ;;  %v4202_v41 = vsel %vm2280_vm0, %v4072_v35, -inf  ;;  %4496 = vmatpush.msrb.mxu2 %v4393_v56  ;;  %4551 = vmatpush.msrb.mxu3 %v5483_v17  ;;  %v5525_v26 = vld [vmem:[%s8726_s5 + $0x278] sm:$0xff] }
 0x4c0   : > { %v3944_v50 = vpop.f32.mrf.mxu2  ;;  %v4196_v54 = vrot.slane %v4195_v37, 4  ;;  %v4209_v11 = vsel %vm2280_vm0, %v4073_v10, -inf  ;;  %v4172_v62 = vrot.slane %v4171_v1, 1  ;;  %v4179_v0 = vrot.slane %v4178_v13, 1  ;;  %4605 = vmatpush.msra.mxu1 %v5506_v45 }
 0x4c1   : > { %v4186_v25 = vrot.slane %v4185_v4, 1  ;;  %v4203_v43 = vrot.slane %v4202_v41, 4  ;;  %v4210_v14 = vrot.slane %v4209_v11, 4  ;;  %v4216_v42 = vsel %vm2280_vm0, %v4074_v38, -inf  ;;  %v4018_v55 = vpop.f32.mrf.mxu3  ;;  %4497 = vmatpush.msrb.mxu2 %v4392_v18  ;;  %4552 = vmatpush.msrb.mxu3 %v5482_v16  ;;  %v5501_v18 = vld [vmem:[%s8726_s5 + $0x1b8] sm:$0xff] }
 0x4c2   : > { %v4197_v19 = vmax.f32 %v4195_v37, %v4196_v54  ;;  %v4031_v51 = vadd.f32 %v4015_v29, %v3957_v47  ;;  %v4193_v46 = vrot.slane %v4192_v12, 1  ;;  %v4217_v2 = vrot.slane %v4216_v42, 4  ;;  %v5481_v29 = vld [vmem:[%s8726_s5 + $0x118] sm:$0xff]  ;;  %4606 = vmatpush.msra.mxu1 %v5505_v24 }
 0x4c3   : > { %v4204_v15 = vmax.f32 %v4202_v41, %v4203_v43  ;;  %v4211_v40 = vmax.f32 %v4209_v11, %v4210_v14  ;;  %v8306_v60 = vmax.f32 %v4171_v1, %v4172_v62  ;;  %v8308_v39 = vmax.f32 %v4178_v13, %v4179_v0  ;;  %4663 = vmatpush.msra.mxu2 %v5525_v26  ;;  %v4388_v13 = vld [vmem:[#allocation3] sm:$0xf] }
 0x4c4   : > { %v4198_v33 = vrot.slane %v4197_v19, 2  ;;  %v4043_v58 = vadd.f32 %v8119_v5, %v4031_v51  ;;  %v3958_v8 = vadd.f32 %v3944_v50, %v3884_v61  ;;  %v8310_v49 = vmax.f32 %v4185_v4, %v4186_v25  ;;  %4553 = vmatpush.msrb.mxu3 %v5481_v29  ;;  %v5504_v4 = vld [vmem:[%s8726_s5 + $0x1d0] sm:$0xff]  ;;  %v5479_v43 = vld [vmem:[%s8726_s5 + $0x108] sm:$0xff] }
 0x4c5   : > { %v4218_v21 = vmax.f32 %v4216_v42, %v4217_v2  ;;  %v3885_v31 = vadd.f32 %v3873_v34, %v8102_v57  ;;  %v8313_v3 = vmax.f32 %v4192_v12, %v4193_v46  ;;  %v4205_v20 = vrot.slane %v4204_v15, 2  ;;  %v5524_v12 = vld [vmem:[%s8726_s5 + $0x270] sm:$0xff]  ;;  %4607 = vmatpush.msra.mxu1 %v5504_v4  ;;  %v5503_v61 = vld [vmem:[%s8726_s5 + $0x1c8] sm:$0xff]  ;;  %v5522_v2 = vld [vmem:[%s8726_s5 + $0x260] sm:$0xff] }
 0x4c6   : > { %v4409_v32 = vld [vmem:[#allocation3 + $0x9] sm:$0xf]  ;;  %v4199_v9 = vmax.f32 %v4197_v19, %v4198_v33  ;;  %v4212_v23 = vrot.slane %v4211_v40, 2  ;;  %v4051_v63 = vmax.f32 %v4043_v58, 0.0  ;;  %v4032_v36 = vadd.f32 %v4018_v55, %v3958_v8  ;;  %4664 = vmatpush.msra.mxu2 %v5524_v12  ;;  %4554 = vmatpush.msrb.mxu3 %v5480_v59  ;;  %v5523_v19 = vld [vmem:[%s8726_s5 + $0x268] sm:$0xff]  ;;  %v5502_v8 = vld [vmem:[%s8726_s5 + $0x1c0] sm:$0xff] }
 0x4c7   : > { %4435 = vst [vmem:[#allocation1 + $0x1] ss:$2 sm:$0xff] %v4409_v32  ;;  %v4219_v57 = vrot.slane %v4218_v21, 2  ;;  %v4206_v48 = vmax.f32 %v4204_v15, %v4205_v20  ;;  %v4389_v37 = vld [vmem:[#allocation3 + $0x8] sm:$0xf]  ;;  %4608 = vmatpush.msra.mxu1 %v5503_v61 }
 0x4c8   : > { %v3947_v52 = vpop.f32.mrf.mxu2  ;;  %v4200_v1 = vrot.slane %v4199_v9, 1  ;;  %v4213_v6 = vmax.f32 %v4211_v40, %v4212_v23  ;;  %v4075_v7 = vrot.slane %v4051_v63, 2  ;;  %v4076_v27 = vrot.slane %v4051_v63, 4  ;;  %4665 = vmatpush.msra.mxu2 %v5523_v19  ;;  %v5478_v40 = vld [vmem:[%s8726_s5 + $0x100] sm:$0xff]  ;;  %4555 = vmatpush.msrb.mxu3 %v5479_v43 }
 0x4c9   : > { %v8324_v22 = vadd.f32 %v3947_v52, %v3885_v31  ;;  %v4220_v10 = vmax.f32 %v4218_v21, %v4219_v57  ;;  %v4077_v38 = vrot.slane %v4051_v63, 6  ;;  %v4223_v47 = vsel %vm2280_vm0, %v4051_v63, -inf  ;;  %v4021_v20 = vpop.f32.mrf.mxu3  ;;  %4609 = vmatpush.msra.mxu1 %v5502_v8 }
 0x4ca   : > { %v4201_v35 = vmax.f32 %v4199_v9, %v4200_v1  ;;  %v4207_v50 = vrot.slane %v4206_v48, 1  ;;  %v4214_v44 = vrot.slane %v4213_v6, 1  ;;  %v4224_v54 = vrot.slane %v4223_v47, 4  ;;  %4666 = vmatpush.msra.mxu2 %v5522_v2  ;;  %4556 = vmatpush.msrb.mxu3 %v5478_v40 }
 0x4cb   : > { %v4230_v41 = vsel %vm2280_vm0, %v4075_v7, -inf  ;;  %v4221_v11 = vrot.slane %v4220_v10, 1  ;;  %v4237_v25 = vsel %vm2280_vm0, %v4076_v27, -inf  ;;  %v4244_v17 = vsel %vm2280_vm0, %v4077_v38, -inf  ;;  %v5500_v7 = vld [vmem:[%s8726_s5 + $0x1b0] sm:$0xff]  ;;  %4610 = vmatpush.msra.mxu1 %v5501_v18 }
 0x4cc   : > { %v4339_v62 = vmax.f32 %v8306_v60, %v4201_v35  ;;  %v4231_v0 = vrot.slane %v4230_v41, 4  ;;  %v4208_v42 = vmax.f32 %v4206_v48, %v4207_v50  ;;  %v4215_v51 = vmax.f32 %v4213_v6, %v4214_v44  ;;  %v4505_v6 = vld [vmem:[#allocation3 + $0x2] sm:$0xf]  ;;  %v4506_v27 = vld [vmem:[#allocation3 + $0xa] sm:$0xf] }
 0x4cd   : > { %v4225_v46 = vmax.f32 %v4223_v47, %v4224_v54  ;;  %v4238_v15 = vrot.slane %v4237_v25, 4  ;;  %v4222_v34 = vmax.f32 %v4220_v10, %v4221_v11  ;;  %v4044_v33 = vadd.f32 %v8119_v5, %v4032_v36  ;;  %v5520_v36 = vld [vmem:[%s8726_s5 + $0x250] sm:$0xff]  ;;  %v3876_v47 = vpop.f32.mrf.mxu1  ;;  %v5519_v50 = vld [vmem:[%s8726_s5 + $0x248] sm:$0xff]  ;;  %4611 = vmatpush.msra.mxu1 %v5500_v7 }
 0x4ce   : > { %v4440_v14 = vld.sshfl [vmem:[#allocation1] sm:$0xff pattern:$0x75316420]  ;;  %v4232_v56 = vmax.f32 %v4230_v41, %v4231_v0  ;;  %v4340_v58 = vmax.f32 %v8308_v39, %v4208_v42  ;;  %v4341_v30 = vmax.f32 %v8310_v49, %v4215_v51  ;;  %v4245_v55 = vrot.slane %v4244_v17, 4  ;;  %v5521_v39 = vld [vmem:[%s8726_s5 + $0x258] sm:$0xff]  ;;  %v5539_v44 = vld [vmem:[%s8726_s5 + $0x2e8] sm:$0xff] }
 0x4cf   : > { %4473 = vst [vmem:[#allocation1 + $0x1] ss:$2 sm:$0xff] %v4389_v37  ;;  %4460 = vmatmul.f32.vlgmr.msrb.gmra.mxu1 %v4440_v14  ;;  %v4226_v32 = vrot.slane %v4225_v46, 2  ;;  %v4239_v60 = vmax.f32 %v4237_v25, %v4238_v15  ;;  %v4342_v9 = vmax.f32 %v8313_v3, %v4222_v34  ;;  %v4052_v31 = vmax.f32 %v4044_v33, 0.0  ;;  %v5541_v49 = vld [vmem:[%s8726_s5 + $0x2f8] sm:$0xff]  ;;  %4667 = vmatpush.msra.mxu2 %v5521_v39  ;;  %v5499_v37 = vld [vmem:[%s8726_s5 + $0x1a8] sm:$0xff] }
 0x4d0   : > { %4471 = vst [vmem:[#allocation1] ss:$2 sm:$0xff] %v4388_v13  ;;  %v4233_v21 = vrot.slane %v4232_v56, 2  ;;  %v4370_v23 = vsel %vm3305_vm1, %v4340_v58, %v4339_v62  ;;  %v4033_v3 = vadd.f32 %v4021_v20, %v8324_v22  ;;  %v4246_v1 = vmax.f32 %v4244_v17, %v4245_v55  ;;  %v5540_v22 = vld [vmem:[%s8726_s5 + $0x2f0] sm:$0xff]  ;;  %4724 = vmatpush.msra.mxu3 %v5541_v49  ;;  %v3950_v62 = vpop.f32.mrf.mxu2  ;;  %v5498_v25 = vld [vmem:[%s8726_s5 + $0x1a0] sm:$0xff]  ;;  %v5497_v58 = vld [vmem:[%s8726_s5 + $0x198] sm:$0xff] }
 0x4d1   : > { %v8378_v63 = vmax.f32 %v4225_v46, %v4226_v32  ;;  %v4240_v52 = vrot.slane %v4239_v60, 2  ;;  %v4371_v16 = vsel %vm3307_vm2, %v4341_v30, %v4370_v23  ;;  %v4078_v57 = vrot.slane %v4052_v31, 2  ;;  %4668 = vmatpush.msra.mxu2 %v5520_v36  ;;  %v5518_v51 = vld [vmem:[%s8726_s5 + $0x240] sm:$0xff]  ;;  %4612 = vmatpush.msra.mxu1 %v5499_v37  ;;  %v4024_v2 = vpop.f32.mrf.mxu3  ;;  %v5537_v30 = vld [vmem:[%s8726_s5 + $0x2d8] sm:$0xff]  ;;  %v5516_v55 = vld [vmem:[%s8726_s5 + $0x230] sm:$0xff] }
 0x4d2   : > { %v8385_v45 = vmax.f32 %v4232_v56, %v4233_v21  ;;  %v4372_v29 = vsel %vm3309_vm3, %v4342_v9, %v4371_v16  ;;  %v4079_v48 = vrot.slane %v4052_v31, 4  ;;  %v4247_v35 = vrot.slane %v4246_v1, 2  ;;  %4725 = vmatpush.msra.mxu3 %v5540_v22  ;;  %v5538_v46 = vld [vmem:[%s8726_s5 + $0x2e0] sm:$0xff]  ;;  %v8441_v21 = vld [vmem:[%s8726_s5 + $0x328] sm:$0xff]  ;;  %v5496_v23 = vld [vmem:[%s8726_s5 + $0x190] sm:$0xff] }
 0x4d3   : > { %v4228_v24 = vrot.slane %v8378_v63, 1  ;;  %v8395_v26 = vmax.f32 %v4239_v60, %v4240_v52  ;;  %4385 = vst [vmem:[#allocation3 + $0x11] sm:$0xf] %v4372_v29  ;;  %v4080_v10 = vrot.slane %v4052_v31, 6  ;;  %v4251_v38 = vsel %vm2280_vm0, %v4052_v31, -inf  ;;  %4669 = vmatpush.msra.mxu2 %v5519_v50  ;;  %4613 = vmatpush.msra.mxu1 %v5498_v25  ;;  %v5536_v36 = vld [vmem:[%s8726_s5 + $0x2d0] sm:$0xff] }
 0x4d4   : > { %v4235_v59 = vrot.slane %v8385_v45, 1  ;;  %v4252_v4 = vrot.slane %v4251_v38, 4  ;;  %v4258_v12 = vsel %vm2280_vm0, %v4078_v57, -inf  ;;  %v4248_v54 = vmax.f32 %v4246_v1, %v4247_v35  ;;  %4726 = vmatpush.msra.mxu3 %v5539_v44  ;;  %4796 = vmatpush.msrb.mxu0 %v8441_v21  ;;  %v4566_v18 = vld [vmem:[#allocation3 + $0x8] sm:$0xf]  ;;  %v5495_v22 = vld [vmem:[%s8726_s5 + $0x188] sm:$0xff] }
 0x4d5   : > { %v4242_v13 = vrot.slane %v8395_v26, 1  ;;  %v4259_v41 = vrot.slane %v4258_v12, 4  ;;  %v4265_v11 = vsel %vm2280_vm0, %v4079_v48, -inf  ;;  %v4272_v14 = vsel %vm2280_vm0, %v4080_v10, -inf  ;;  %4670 = vmatpush.msra.mxu2 %v5518_v51  ;;  %4614 = vmatpush.msra.mxu1 %v5497_v58  ;;  %v5515_v7 = vld [vmem:[%s8726_s5 + $0x228] sm:$0xff]  ;;  %v5573_v25 = vld [vmem:[%s8726_s5 + $0x3f8] sm:$0xff] }
 0x4d6   : > { %v4253_v43 = vmax.f32 %v4251_v38, %v4252_v4  ;;  %v4266_v19 = vrot.slane %v4265_v11, 4  ;;  %v3886_v42 = vadd.f32 %v3876_v47, %v8109_v28  ;;  %v4249_v15 = vrot.slane %v4248_v54, 1  ;;  %v5517_v28 = vld [vmem:[%s8726_s5 + $0x238] sm:$0xff]  ;;  %4727 = vmatpush.msra.mxu3 %v5538_v46  ;;  %v5514_v4 = vld [vmem:[%s8726_s5 + $0x220] sm:$0xff]  ;;  %v5532_v58 = vld [vmem:[%s8726_s5 + $0x2b0] sm:$0xff] }
 0x4d7   : > { %v4478_v0 = vld.sshfl [vmem:[#allocation1] sm:$0xff pattern:$0x75316420]  ;;  %v4260_v61 = vmax.f32 %v4258_v12, %v4259_v41  ;;  %v4273_v34 = vrot.slane %v4272_v14, 4  ;;  %v4045_v56 = vadd.f32 %v8119_v5, %v4033_v3  ;;  %v8436_v32 = vmax.f32 %v8378_v63, %v4228_v24  ;;  %4671 = vmatpush.msra.mxu2 %v5517_v28  ;;  %4615 = vmatpush.msra.mxu1 %v5496_v23  ;;  %v5533_v46 = vld [vmem:[%s8726_s5 + $0x2b8] sm:$0xff]  ;;  %v5512_v28 = vld [vmem:[%s8726_s5 + $0x210] sm:$0xff] }
 0x4d8   : > { %4498 = vmatmul.f32.vlgmr.msrb.gmra.mxu2 %v4478_v0  ;;  %4532 = vst [vmem:[#allocation1 + $0x1] ss:$2 sm:$0xff] %v4506_v27  ;;  %v4254_v17 = vrot.slane %v4253_v43, 2  ;;  %v4267_v33 = vmax.f32 %v4265_v11, %v4266_v19  ;;  %v3960_v40 = vadd.f32 %v3950_v62, %v3886_v42  ;;  %v8447_v20 = vmax.f32 %v8385_v45, %v4235_v59  ;;  %v5535_v27 = vld [vmem:[%s8726_s5 + $0x2c8] sm:$0xff] }
 0x4d9   : > { %4530 = vst [vmem:[#allocation1] ss:$2 sm:$0xff] %v4505_v6  ;;  %v4261_v60 = vrot.slane %v4260_v61, 2  ;;  %v4274_v8 = vmax.f32 %v4272_v14, %v4273_v34  ;;  %v4053_v9 = vmax.f32 %v4045_v56, 0.0  ;;  %v8450_v39 = vmax.f32 %v8395_v26, %v4242_v13  ;;  %4728 = vmatpush.msra.mxu3 %v5537_v30  ;;  %4672 = vmatpush.msra.mxu2 %v5516_v55  ;;  %v5494_v13 = vld [vmem:[%s8726_s5 + $0x180] sm:$0xff] }
 0x4da   : > { %v4410_v31 = vld [vmem:[#allocation3 + $0x11] sm:$0xf]  ;;  %v4255_v49 = vmax.f32 %v4253_v43, %v4254_v17  ;;  %v8456_v63 = vmax.f32 %v4248_v54, %v4249_v15  ;;  %v4034_v3 = vadd.f32 %v4024_v2, %v3960_v40  ;;  %v4268_v45 = vrot.slane %v4267_v33, 2  ;;  %4616 = vmatpush.msra.mxu1 %v5495_v22  ;;  %v5534_v54 = vld [vmem:[%s8726_s5 + $0x2c0] sm:$0xff]  ;;  %v5572_v15 = vld [vmem:[%s8726_s5 + $0x3f0] sm:$0xff] }
 0x4db   : > { %4437 = vst [vmem:[#allocation1 + $0x10] ss:$2 sm:$0xff] %v4410_v31  ;;  %v4262_v52 = vmax.f32 %v4260_v61, %v4261_v60  ;;  %v4275_v1 = vrot.slane %v4274_v8, 2  ;;  %v4081_v57 = vrot.slane %v4053_v9, 2  ;;  %v4567_v29 = vld [vmem:[#allocation3 + $0x10] sm:$0xf]  ;;  %4729 = vmatpush.msra.mxu3 %v5536_v36  ;;  %4673 = vmatpush.msra.mxu2 %v5515_v7 }
 0x4dc   : > { %v4256_v16 = vrot.slane %v4255_v49, 1  ;;  %v4082_v26 = vrot.slane %v4053_v9, 4  ;;  %v4083_v48 = vrot.slane %v4053_v9, 6  ;;  %v4279_v6 = vsel %vm2280_vm0, %v4053_v9, -inf  ;;  %v5513_v43 = vld [vmem:[%s8726_s5 + $0x218] sm:$0xff]  ;;  %4617 = vmatpush.msra.mxu1 %v5494_v13  ;;  %v5510_v22 = vld [vmem:[%s8726_s5 + $0x200] sm:$0xff] }
 0x4dd   : > { %v4263_v24 = vrot.slane %v4262_v52, 1  ;;  %v4269_v35 = vmax.f32 %v4267_v33, %v4268_v45  ;;  %v4276_v10 = vmax.f32 %v4274_v8, %v4275_v1  ;;  %v4280_v38 = vrot.slane %v4279_v6, 4  ;;  %4730 = vmatpush.msra.mxu3 %v5535_v27  ;;  %4674 = vmatpush.msra.mxu2 %v5514_v4  ;;  %v8517_v8 = vld [vmem:[%s8726_s5 + $0x320] sm:$0xff]  ;;  %v8522_v9 = vld [vmem:[%s8726_s5 + $0x318] sm:$0xff]  ;;  %v8572_v4 = vld [vmem:[%s8726_s5 + $0x308] sm:$0xff] }
 0x4de   : > { %v4257_v59 = vmax.f32 %v4255_v49, %v4256_v16  ;;  %v4286_v37 = vsel %vm2280_vm0, %v4081_v57, -inf  ;;  %v4293_v50 = vsel %vm2280_vm0, %v4082_v26, -inf  ;;  %v4300_v44 = vsel %vm2280_vm0, %v4083_v48, -inf  ;;  %4847 = vmatpush.msrb.mxu1 %v5573_v25  ;;  %4797 = vmatpush.msrb.mxu0 %v8517_v8  ;;  %v4627_v49 = vld [vmem:[#allocation3 + $0x9] sm:$0xf] }
 0x4df   : > { %v4264_v12 = vmax.f32 %v4262_v52, %v4263_v24  ;;  %v4270_v41 = vrot.slane %v4269_v35, 1  ;;  %v4277_v11 = vrot.slane %v4276_v10, 1  ;;  %v4281_v0 = vmax.f32 %v4279_v6, %v4280_v38  ;;  %4731 = vmatpush.msra.mxu3 %v5534_v54  ;;  %4675 = vmatpush.msra.mxu2 %v5513_v43  ;;  %v8539_v16 = vld [vmem:[%s8726_s5 + $0x310] sm:$0xff]  ;;  %v4628_v45 = vld [vmem:[#allocation3 + $0x11] sm:$0xf] }
 0x4e0   : > { %v4537_v47 = vld.sshfl [vmem:[#allocation1] sm:$0xff pattern:$0x75316420]  ;;  %v4343_v62 = vmax.f32 %v8436_v32, %v4257_v59  ;;  %v4287_v14 = vrot.slane %v4286_v37, 4  ;;  %v4294_v42 = vrot.slane %v4293_v50, 4  ;;  %v4301_v51 = vrot.slane %v4300_v44, 4  ;;  %4848 = vmatpush.msrb.mxu1 %v5572_v15  ;;  %4798 = vmatpush.msrb.mxu0 %v8522_v9 }
 0x4e1   : > { %4557 = vmatmul.f32.vlgmr.msrb.gmra.mxu3 %v4537_v47  ;;  %4591 = vst [vmem:[#allocation1] ss:$2 sm:$0xff] %v4566_v18  ;;  %v4344_v19 = vmax.f32 %v8447_v20, %v4264_v12  ;;  %v4271_v61 = vmax.f32 %v4269_v35, %v4270_v41  ;;  %v4278_v34 = vmax.f32 %v4276_v10, %v4277_v11  ;;  %v4282_v55 = vrot.slane %v4281_v0, 2  ;;  %v5511_v20 = vld [vmem:[%s8726_s5 + $0x208] sm:$0xff]  ;;  %v5570_v18 = vld [vmem:[%s8726_s5 + $0x3e0] sm:$0xff]  ;;  %v5569_v6 = vld [vmem:[%s8726_s5 + $0x3d8] sm:$0xff] }
 0x4e2   : > { %4593 = vst [vmem:[#allocation1 + $0x1] ss:$2 sm:$0xff] %v4567_v29  ;;  %v4046_v56 = vadd.f32 %v8119_v5, %v4034_v3  ;;  %v4288_v33 = vmax.f32 %v4286_v37, %v4287_v14  ;;  %v8502_v40 = vmax.f32 %v4293_v50, %v4294_v42  ;;  %v8504_v2 = vmax.f32 %v4300_v44, %v4301_v51  ;;  %v5571_v5 = vld [vmem:[%s8726_s5 + $0x3e8] sm:$0xff]  ;;  %v5530_v29 = vld [vmem:[%s8726_s5 + $0x2a0] sm:$0xff]  ;;  %v5589_v59 = vld [vmem:[%s8726_s5 + $0x478] sm:$0xff] }
 0x4e3   : > { %v4373_v17 = vsel %vm3305_vm1, %v4344_v19, %v4343_v62  ;;  %v4345_v30 = vmax.f32 %v8450_v39, %v4271_v61  ;;  %v4346_v32 = vmax.f32 %v8456_v63, %v4278_v34  ;;  %4732 = vmatpush.msra.mxu3 %v5533_v46  ;;  %4676 = vmatpush.msra.mxu2 %v5512_v28  ;;  %v5531_v39 = vld [vmem:[%s8726_s5 + $0x2a8] sm:$0xff]  ;;  %v5529_v35 = vld [vmem:[%s8726_s5 + $0x298] sm:$0xff]  ;;  %v5568_v10 = vld [vmem:[%s8726_s5 + $0x3d0] sm:$0xff] }
 0x4e4   : > { %v4054_v60 = vmax.f32 %v4046_v56, 0.0  ;;  %v4289_v31 = vrot.slane %v4288_v33, 2  ;;  %v4296_v63 = vrot.slane %v8502_v40, 2  ;;  %4849 = vmatpush.msrb.mxu1 %v5571_v5  ;;  %v4303_v57 = vrot.slane %v8504_v2, 2  ;;  %4799 = vmatpush.msrb.mxu0 %v8539_v16  ;;  %v5588_v37 = vld [vmem:[%s8726_s5 + $0x470] sm:$0xff]  ;;  %v5567_v62 = vld [vmem:[%s8726_s5 + $0x3c8] sm:$0xff] }
 0x4e5   : > { %v4374_v23 = vsel %vm3307_vm2, %v4345_v30, %v4373_v17  ;;  %4733 = vmatpush.msra.mxu3 %v5532_v58  ;;  %4677 = vmatpush.msra.mxu2 %v5511_v20  ;;  %v4283_v7 = vmax.f32 %v4281_v0, %v4282_v55  ;;  %v5528_v50 = vld [vmem:[%s8726_s5 + $0x290] sm:$0xff]  ;;  %v8586_v0 = vld [vmem:[%s8726_s5 + $0x300] sm:$0xff]  ;;  %v5587_v14 = vld [vmem:[%s8726_s5 + $0x468] sm:$0xff] }
 0x4e6   : > { %v4084_v52 = vrot.slane %v4054_v60, 2  ;;  %v4085_v3 = vrot.slane %v4054_v60, 4  ;;  %v4375_v1 = vsel %vm3309_vm3, %v4346_v32, %v4374_v23  ;;  %v4086_v24 = vrot.slane %v4054_v60, 6  ;;  %4850 = vmatpush.msrb.mxu1 %v5570_v18  ;;  %4800 = vmatpush.msrb.mxu0 %v8572_v4  ;;  %v5527_v42 = vld [vmem:[%s8726_s5 + $0x288] sm:$0xff]  ;;  %v5566_v34 = vld [vmem:[%s8726_s5 + $0x3c0] sm:$0xff]  ;;  %v5565_v30 = vld [vmem:[%s8726_s5 + $0x3b8] sm:$0xff] }
 0x4e7   : > { %4386 = vst [vmem:[#allocation3 + $0x19] sm:$0xf] %v4375_v1  ;;  %v4307_v26 = vsel %vm2280_vm0, %v4054_v60, -inf  ;;  %4734 = vmatpush.msra.mxu3 %v5531_v39  ;;  %4678 = vmatpush.msra.mxu2 %v5510_v22  ;;  %v4290_v44 = vmax.f32 %v4288_v33, %v4289_v31  ;;  %v4284_v25 = vrot.slane %v4283_v7, 1  ;;  %v4297_v43 = vmax.f32 %v8502_v40, %v4296_v63  ;;  %v5586_v17 = vld [vmem:[%s8726_s5 + $0x460] sm:$0xff]  ;;  %v5585_v32 = vld [vmem:[%s8726_s5 + $0x458] sm:$0xff] }
 0x4e8   : > { %v4314_v48 = vsel %vm2280_vm0, %v4084_v52, -inf  ;;  %v4308_v27 = vrot.slane %v4307_v26, 4  ;;  %v4321_v47 = vsel %vm2280_vm0, %v4085_v3, -inf  ;;  %v4328_v13 = vsel %vm2280_vm0, %v4086_v24, -inf  ;;  %4851 = vmatpush.msrb.mxu1 %v5569_v6  ;;  %4801 = vmatpush.msrb.mxu0 %v8586_v0  ;;  %v4688_v33 = vld [vmem:[#allocation3 + $0xa] sm:$0xf] }
 0x4e9   : > { %v8544_v36 = vld.sshfl [vmem:[#allocation1] sm:$0xff pattern:$0x75316420]  ;;  %v4315_v38 = vrot.slane %v4314_v48, 4  ;;  %4735 = vmatpush.msra.mxu3 %v5530_v29  ;;  %v4322_v41 = vrot.slane %v4321_v47, 4  ;;  %v4329_v11 = vrot.slane %v4328_v13, 4  ;;  %4908 = vmatpush.msrb.mxu2 %v5589_v59  ;;  %v4304_v51 = vmax.f32 %v8504_v2, %v4303_v57 }
 0x4ea   : > { %4652 = vst [vmem:[#allocation1] ss:$2 sm:$0xff] %v4627_v49  ;;  %v4309_v12 = vmax.f32 %v4307_v26, %v4308_v27  ;;  %4852 = vmatpush.msrb.mxu1 %v5568_v10  ;;  %v5526_v40 = vld [vmem:[%s8726_s5 + $0x280] sm:$0xff]  ;;  %v4291_v2 = vrot.slane %v4290_v44, 1  ;;  %v4689_v5 = vld [vmem:[#allocation3 + $0x12] sm:$0xf]  ;;  %v4285_v39 = vmax.f32 %v4283_v7, %v4284_v25 }
 0x4eb   : > { %4654 = vst [vmem:[#allocation1 + $0x1] ss:$2 sm:$0xff] %v4628_v45  ;;  %v4316_v54 = vmax.f32 %v4314_v48, %v4315_v38  ;;  %4736 = vmatpush.msra.mxu3 %v5529_v35  ;;  %v4323_v15 = vmax.f32 %v4321_v47, %v4322_v41  ;;  %v4330_v61 = vmax.f32 %v4328_v13, %v4329_v11  ;;  %v4298_v49 = vrot.slane %v4297_v43, 1  ;;  %v5564_v52 = vld [vmem:[%s8726_s5 + $0x3b0] sm:$0xff]  ;;  %v5625_v1 = vld [vmem:[%s8726_s5 + $0x378] sm:$0xff]  ;;  %v5563_v24 = vld [vmem:[%s8726_s5 + $0x3a8] sm:$0xff] }
 0x4ec   : > { %v4310_v19 = vrot.slane %v4309_v12, 2  ;;  %4909 = vmatpush.msrb.mxu2 %v5588_v37  ;;  %4853 = vmatpush.msrb.mxu1 %v5567_v62  ;;  %v4305_v23 = vrot.slane %v4304_v51, 1  ;;  %v5584_v57 = vld [vmem:[%s8726_s5 + $0x450] sm:$0xff]  ;;  %v4292_v22 = vmax.f32 %v4290_v44, %v4291_v2  ;;  %v5583_v27 = vld [vmem:[%s8726_s5 + $0x448] sm:$0xff]  ;;  %v5562_v10 = vld [vmem:[%s8726_s5 + $0x3a0] sm:$0xff] }
 0x4ed   : > { %v4317_v46 = vrot.slane %v4316_v54, 2  ;;  %4737 = vmatpush.msra.mxu3 %v5528_v50  ;;  %v4324_v55 = vrot.slane %v4323_v15, 2  ;;  %v4331_v31 = vrot.slane %v4330_v61, 2  ;;  %v5626_v7 = vld [vmem:[%s8726_s5 + $0x370] sm:$0xff]  ;;  %v4299_v59 = vmax.f32 %v4297_v43, %v4298_v49  ;;  %v5627_v50 = vld [vmem:[%s8726_s5 + $0x368] sm:$0xff]  ;;  %v5582_v44 = vld [vmem:[%s8726_s5 + $0x440] sm:$0xff] }
 0x4ee   : > { %v4411_v56 = vld [vmem:[#allocation3 + $0x19] sm:$0xf]  ;;  %v4311_v28 = vmax.f32 %v4309_v12, %v4310_v19  ;;  %4910 = vmatpush.msrb.mxu2 %v5587_v14  ;;  %4854 = vmatpush.msrb.mxu1 %v5566_v34  ;;  %v4306_v13 = vmax.f32 %v4304_v51, %v4305_v23  ;;  %v5561_v11 = vld [vmem:[%s8726_s5 + $0x398] sm:$0xff]  ;;  %v5560_v51 = vld [vmem:[%s8726_s5 + $0x390] sm:$0xff] }
 0x4ef   : > { %4439 = vst [vmem:[#allocation1 + $0x11] ss:$2 sm:$0xff] %v4411_v56  ;;  %v4318_v58 = vmax.f32 %v4316_v54, %v4317_v46  ;;  %4738 = vmatpush.msra.mxu3 %v5527_v42  ;;  %v4325_v18 = vmax.f32 %v4323_v15, %v4324_v55  ;;  %v4332_v45 = vmax.f32 %v4330_v61, %v4331_v31  ;;  %v4391_v38 = vld [vmem:[#allocation3 + $0x18] sm:$0xf]  ;;  %v4390_v54 = vld [vmem:[#allocation3 + $0x10] sm:$0xf] }
 0x4f0   : > { %v4312_v60 = vrot.slane %v4311_v28, 1  ;;  %4911 = vmatpush.msrb.mxu2 %v5586_v17  ;;  %4855 = vmatpush.msrb.mxu1 %v5565_v30  ;;  %v5628_v43 = vld [vmem:[%s8726_s5 + $0x360] sm:$0xff]  ;;  %v5581_v19 = vld [vmem:[%s8726_s5 + $0x438] sm:$0xff]  ;;  %v5580_v34 = vld [vmem:[%s8726_s5 + $0x430] sm:$0xff] }
 0x4f1   : > { %v4319_v63 = vrot.slane %v4318_v58, 1  ;;  %4739 = vmatpush.msra.mxu3 %v5526_v40  ;;  %v4326_v26 = vrot.slane %v4325_v18, 1  ;;  %v4333_v48 = vrot.slane %v4332_v45, 1  ;;  %v4750_v42 = vld [vmem:[#allocation3 + $0x10] sm:$0xf]  ;;  %v5630_v17 = vld [vmem:[%s8726_s5 + $0x350] sm:$0xff] }
 0x4f2   : > { %v8613_v20 = vld.sshfl [vmem:[#allocation1] sm:$0xff pattern:$0x75316420]  ;;  %v4313_v3 = vmax.f32 %v4311_v28, %v4312_v60  ;;  %4912 = vmatpush.msrb.mxu2 %v5585_v32  ;;  %4856 = vmatpush.msrb.mxu1 %v5564_v52  ;;  %v5629_v61 = vld [vmem:[%s8726_s5 + $0x358] sm:$0xff]  ;;  %v5559_v28 = vld [vmem:[%s8726_s5 + $0x388] sm:$0xff] }
 0x4f3   : > { %4713 = vst [vmem:[#allocation1] ss:$2 sm:$0xff] %v4688_v33  ;;  %5593 = vmatpush.msrb.mxu3 %v5625_v1  ;;  %v4320_v29 = vmax.f32 %v4318_v58, %v4319_v63  ;;  %v4327_v12 = vmax.f32 %v4325_v18, %v4326_v26  ;;  %v4334_v37 = vmax.f32 %v4332_v45, %v4333_v48  ;;  %v4751_v15 = vld [vmem:[#allocation3 + $0x18] sm:$0xf]  ;;  %v5579_v33 = vld [vmem:[%s8726_s5 + $0x428] sm:$0xff]  ;;  %v5577_v55 = vld [vmem:[%s8726_s5 + $0x418] sm:$0xff] }
 0x4f4   : > { %4715 = vst [vmem:[#allocation1 + $0x1] ss:$2 sm:$0xff] %v4689_v5  ;;  %v4347_v6 = vmax.f32 %v4285_v39, %v4313_v3  ;;  %4913 = vmatpush.msrb.mxu2 %v5584_v57  ;;  %4857 = vmatpush.msrb.mxu1 %v5563_v24  ;;  %v5631_v40 = vld [vmem:[%s8726_s5 + $0x348] sm:$0xff]  ;;  %v5558_v2 = vld [vmem:[%s8726_s5 + $0x380] sm:$0xff]  ;;  %v4507_v5 = vld [vmem:[#allocation3 + $0x12] sm:$0xf] }
 0x4f5   : > { %5594 = vmatpush.msrb.mxu3 %v5626_v7  ;;  %v4348_v35 = vmax.f32 %v4292_v22, %v4320_v29  ;;  %v4349_v62 = vmax.f32 %v4299_v59, %v4327_v12  ;;  %v4350_v25 = vmax.f32 %v4306_v13, %v4334_v37  ;;  %v5578_v58 = vld [vmem:[%s8726_s5 + $0x420] sm:$0xff]  ;;  %v4811_v39 = vld [vmem:[#allocation3 + $0x11] sm:$0xf]  ;;  %v5576_v49 = vld [vmem:[%s8726_s5 + $0x410] sm:$0xff] }
 0x4f6   : > { %v4441_v47 = vld.sshfl [vmem:[#allocation1 + $0x10] sm:$0xff pattern:$0x75316420]  ;;  %4914 = vmatpush.msrb.mxu2 %v5583_v27  ;;  %4858 = vmatpush.msrb.mxu1 %v5562_v10  ;;  %v4508_v32 = vld [vmem:[#allocation3 + $0x1a] sm:$0xf]  ;;  %v5575_v63 = vld [vmem:[%s8726_s5 + $0x408] sm:$0xff] }
 0x4f7   : > { %5595 = vmatpush.msrb.mxu3 %v5627_v50  ;;  %4477 = vst [vmem:[#allocation1 + $0x11] ss:$2 sm:$0xff] %v4391_v38  ;;  %v4376_v41 = vsel %vm3305_vm1, %v4348_v35, %v4347_v6  ;;  %4463 = vmatmul.f32.gmra.mxu1 %v4441_v47  ;;  %v5632_v60 = vld [vmem:[%s8726_s5 + $0x340] sm:$0xff]  ;;  %v4875_v7 = vld [vmem:[#allocation3 + $0x2a] sm:$0xf] }
 0x4f8   : > { %4475 = vst [vmem:[#allocation1 + $0x10] ss:$2 sm:$0xff] %v4390_v54  ;;  %4915 = vmatpush.msrb.mxu2 %v5582_v44  ;;  %v4377_v46 = vsel %vm3307_vm2, %v4349_v62, %v4376_v41  ;;  %4859 = vmatpush.msrb.mxu1 %v5561_v11  ;;  %v4812_v23 = vld [vmem:[#allocation3 + $0x19] sm:$0xf] }
 0x4f9   : > { %5596 = vmatpush.msrb.mxu3 %v5628_v43  ;;  %v4378_v56 = vsel %vm3309_vm3, %v4350_v25, %v4377_v46  ;;  %v5574_v52 = vld [vmem:[%s8726_s5 + $0x400] sm:$0xff] }
 0x4fa   : > { %4916 = vmatpush.msrb.mxu2 %v5581_v19  ;;  %4387 = vst [vmem:[#allocation3 + $0x21] sm:$0xf] %v4378_v56  ;;  %4860 = vmatpush.msrb.mxu1 %v5560_v51  ;;  %v4568_v3 = vld [vmem:[#allocation3 + $0x18] sm:$0xf] }
 0x4fb   : > { %v8652_v14 = vld.sshfl [vmem:[#allocation1] sm:$0xff pattern:$0x75316420]  ;;  %5597 = vmatpush.msrb.mxu3 %v5629_v61 }
 0x4fc   : > { %4775 = vst [vmem:[#allocation1] ss:$2 sm:$0xff] %v4750_v42  ;;  %4917 = vmatpush.msrb.mxu2 %v5580_v34  ;;  %4861 = vmatpush.msrb.mxu1 %v5559_v28  ;;  %v4873_v1 = vld [vmem:[#allocation3 + $0x1a] sm:$0xf]  ;;  %v5621_v61 = vld [vmem:[%s8727_s6] ss:$0 sm:$0xff] }
 0x4fd   : > { %4777 = vst [vmem:[#allocation1 + $0x1] ss:$2 sm:$0xff] %v4751_v15  ;;  %5598 = vmatpush.msrb.mxu3 %v5630_v17  ;;  %v4690_v22 = vld [vmem:[#allocation3 + $0x1a] sm:$0xf] }
 0x4fe   : > { %4918 = vmatpush.msrb.mxu2 %v5579_v33  ;;  %4862 = vmatpush.msrb.mxu1 %v5558_v2 }
 0x4ff   : > { %5599 = vmatpush.msrb.mxu3 %v5631_v40  ;;  %v4479_v30 = vld.sshfl [vmem:[#allocation1 + $0x10] sm:$0xff pattern:$0x75316420]  ;;  %4618 = vmatmul.f32.vlgmr.msra.gmra.mxu1 %v8544_v36  ;;  %v5633_v36 = vld [vmem:[%s8726_s5 + $0x338] sm:$0xff] }
 0x500   : > { %4501 = vmatmul.f32.gmra.mxu2 %v4479_v30  ;;  %4534 = vst [vmem:[#allocation1 + $0x10] ss:$2 sm:$0xff] %v4507_v5 }
 0x501   : > { %5600 = vmatpush.msrb.mxu3 %v5632_v60  ;;  %4536 = vst [vmem:[#allocation1 + $0x11] ss:$2 sm:$0xff] %v4508_v32  ;;  %4919 = vmatpush.msrb.mxu2 %v5578_v58  ;;  %v4569_v45 = vld [vmem:[#allocation3 + $0x20] sm:$0xf] }
 0x502   : > { %v4630_v57 = vld [vmem:[#allocation3 + $0x21] sm:$0xf] }
 0x503   : > { %5601 = vmatpush.msrb.mxu3 %v5633_v36  ;;  %4920 = vmatpush.msrb.mxu2 %v5577_v55  ;;  %v4691_v29 = vld [vmem:[#allocation3 + $0x22] sm:$0xf] }
 0x504   : > { %v4782_v31 = vld.sshfl [vmem:[#allocation1] sm:$0xff pattern:$0x75316420]  ;;  %v4752_v26 = vld [vmem:[#allocation3 + $0x20] sm:$0xf] }
 0x505   : > { %4802 = vmatmul.f32.vlgmr.msrb.gmra.mxu0 %v4782_v31  ;;  %4836 = vst [vmem:[#allocation1] ss:$2 sm:$0xff] %v4811_v39  ;;  %5602 = vmatpush.msrb.mxu3 %v8274_v53  ;;  %v4813_v6 = vld [vmem:[#allocation3 + $0x21] sm:$0xf] }
 0x506   : > { %4838 = vst [vmem:[#allocation1 + $0x1] ss:$2 sm:$0xff] %v4812_v23  ;;  %4921 = vmatpush.msrb.mxu2 %v5576_v49  ;;  %v4874_v59 = vld [vmem:[#allocation3 + $0x22] sm:$0xf] }
 0x507   : > { %5603 = vmatpush.msrb.mxu3 %v8441_v21  ;;  %v4872_v21 = vld [vmem:[#allocation3 + $0x12] sm:$0xf] }
 0x508   : > { %4922 = vmatpush.msrb.mxu2 %v5575_v63  ;;  %v4538_v18 = vld.sshfl [vmem:[#allocation1 + $0x10] sm:$0xff pattern:$0x75316420] }
 0x509   : > { %4679 = vmatmul.f32.vlgmr.msra.gmra.mxu2 %v8613_v20  ;;  %5604 = vmatpush.msrb.mxu3 %v8517_v8  ;;  %4595 = vst [vmem:[#allocation1 + $0x10] ss:$2 sm:$0xff] %v4568_v3  ;;  %v4629_v20 = vld [vmem:[#allocation3 + $0x19] sm:$0xf] }
 0x50a   : > { %4560 = vmatmul.f32.gmra.mxu3 %v4538_v18  ;;  %4923 = vmatpush.msrb.mxu2 %v5574_v52  ;;  %4597 = vst [vmem:[#allocation1 + $0x11] ss:$2 sm:$0xff] %v4569_v45 }
 0x50b   : > { %5605 = vmatpush.msrb.mxu3 %v8522_v9 }
 0x50d   : > { %v4843_v53 = vld.sshfl [vmem:[#allocation1] sm:$0xff pattern:$0x75316420]  ;;  %5606 = vmatpush.msrb.mxu3 %v8539_v16  ;;  %v4753_v16 = vld [vmem:[#allocation3 + $0x28] sm:$0xf] }
 0x50e   : > { %4897 = vst [vmem:[#allocation1] ss:$2 sm:$0xff] %v4872_v21 }
 0x50f   : > { %4899 = vst [vmem:[#allocation1 + $0x1] ss:$2 sm:$0xff] %v4873_v1  ;;  %5607 = vmatpush.msrb.mxu3 %v8572_v4 }
 0x511   : > { %5608 = vmatpush.msrb.mxu3 %v8586_v0  ;;  %v4599_v8 = vld.sshfl [vmem:[#allocation1 + $0x10] sm:$0xff pattern:$0x75316420] }
 0x512   : > { %4740 = vmatmul.f32.vlgmr.msra.gmra.mxu3 %v8652_v14  ;;  %4621 = vmatmul.f32.gmra.mxu1 %v4599_v8  ;;  %4656 = vst [vmem:[#allocation1 + $0x10] ss:$2 sm:$0xff] %v4629_v20  ;;  %v4814_v0 = vld [vmem:[#allocation3 + $0x29] sm:$0xf] }
 0x513   : > { %4658 = vst [vmem:[#allocation1 + $0x11] ss:$2 sm:$0xff] %v4630_v57 }
 0x516   : > { %v4904_v24 = vld.sshfl [vmem:[#allocation1] sm:$0xff pattern:$0x75316420] }
 0x51a   : > { %v4660_v9 = vld.sshfl [vmem:[#allocation1 + $0x10] sm:$0xff pattern:$0x75316420]  ;;  %4863 = vmatmul.f32.vlgmr.msrb.gmra.mxu1 %v4843_v53 }
 0x51b   : > { %4682 = vmatmul.f32.gmra.mxu2 %v4660_v9  ;;  %4717 = vst [vmem:[#allocation1 + $0x10] ss:$2 sm:$0xff] %v4690_v22 }
 0x51c   : > { %4719 = vst [vmem:[#allocation1 + $0x11] ss:$2 sm:$0xff] %v4691_v29 }
 0x523   : > { %v4721_v4 = vld.sshfl [vmem:[#allocation1 + $0x10] sm:$0xff pattern:$0x75316420]  ;;  %4924 = vmatmul.f32.vlgmr.msrb.gmra.mxu2 %v4904_v24 }
 0x524   : > { %4743 = vmatmul.f32.gmra.mxu3 %v4721_v4  ;;  %4779 = vst [vmem:[#allocation1 + $0x10] ss:$2 sm:$0xff] %v4752_v26 }
 0x525   : > { %4781 = vst [vmem:[#allocation1 + $0x11] ss:$2 sm:$0xff] %v4753_v16 }
 0x52c   : > { %v4783_v48 = vld.sshfl [vmem:[#allocation1 + $0x10] sm:$0xff pattern:$0x75316420] }
 0x52d   : > { %4805 = vmatmul.f32.vlgmr.msrb.gmra.mxu3 %v4783_v48  ;;  %4840 = vst [vmem:[#allocation1 + $0x10] ss:$2 sm:$0xff] %v4813_v6 }
 0x52e   : > { %4842 = vst [vmem:[#allocation1 + $0x11] ss:$2 sm:$0xff] %v4814_v0 }
 0x535   : > { %v4844_v27 = vld.sshfl [vmem:[#allocation1 + $0x10] sm:$0xff pattern:$0x75316420] }
 0x536   : > { %4866 = vmatmul.f32.gmra.mxu1 %v4844_v27  ;;  %4901 = vst [vmem:[#allocation1 + $0x10] ss:$2 sm:$0xff] %v4874_v59 }
 0x537   : > { %4903 = vst [vmem:[#allocation1 + $0x11] ss:$2 sm:$0xff] %v4875_v7 }
 0x53e   : > { %v4905_v35 = vld.sshfl [vmem:[#allocation1 + $0x10] sm:$0xff pattern:$0x75316420] }
 0x53f   : > { %4927 = vmatmul.f32.gmra.mxu2 %v4905_v35 }
 0x54c   : > { %v4461_v10 = vpop.f32.mrf.mxu1 }
 0x55b   : > { %v4499_v38 = vpop.f32.mrf.mxu2 }
 0x55c   : > { %v4500_v44 = vadd.f32 %v4499_v38, %v4461_v10 }
 0x564   : > { %v4558_v47 = vpop.f32.mrf.mxu3 }
 0x565   : > { %v4564_v41 = vadd.f32 %v4558_v47, %v4500_v44 }
 0x574   : > { %v4464_v13 = vpop.f32.mrf.mxu1 }
 0x57c   : > { %v4619_v50 = vpop.f32.mrf.mxu1 }
 0x57d   : > { %v4625_v11 = vadd.f32 %v4619_v50, %v4564_v41 }
 0x582   : > { %v4803_v42 = vpop.f32.mrf.mxu0 }
 0x583   : > { %v4502_v12 = vpop.f32.mrf.mxu2 }
 0x584   : > { %v4503_v2 = vadd.f32 %v4502_v12, %v4464_v13 }
 0x58c   : > { %v4680_v54 = vpop.f32.mrf.mxu2 }
 0x58d   : > { %v4561_v37 = vpop.f32.mrf.mxu3  ;;  %v4686_v43 = vadd.f32 %v4680_v54, %v4625_v11 }
 0x58e   : > { %v4565_v58 = vadd.f32 %v4561_v37, %v4503_v2 }
 0x58f   : > { %v4622_v62 = vpop.f32.mrf.mxu1 }
 0x590   : > { %v4626_v5 = vadd.f32 %v4622_v62, %v4565_v58 }
 0x595   : > { %v4741_v25 = vpop.f32.mrf.mxu3 }
 0x596   : > { %v4747_v19 = vadd.f32 %v4741_v25, %v4686_v43 }
 0x597   : > { %v4864_v46 = vpop.f32.mrf.mxu1 }
 0x598   : > { %v4809_v51 = vadd.f32 %v4803_v42, %v4747_v19 }
 0x59a   : > { %v4870_v15 = vadd.f32 %v4864_v46, %v4809_v51 }
 0x59e   : > { %v4683_v14 = vpop.f32.mrf.mxu2 }
 0x59f   : > { %v4687_v30 = vadd.f32 %v4683_v14, %v4626_v5 }
 0x5a6   : > { %v4925_v34 = vpop.f32.mrf.mxu2 }
 0x5a7   : > { %v4931_v56 = vadd.f32 %v4925_v34, %v4870_v15  ;;  %v4744_v40 = vpop.f32.mrf.mxu3 }
 0x5a8   : > { %v4748_v60 = vadd.f32 %v4744_v40, %v4687_v30 }
 0x5a9   : > { %v4937_v28 = vadd.f32 %v5621_v61, %v4931_v56 }
 0x5ab   : > { %v4939_v17 = vmax.f32 %v4937_v28, 0.0 }
 0x5ad   : > { %v4943_v33 = vrot.slane %v4939_v17, 4  ;;  %4947 = vst [vmem:[%s278_s10] sm:$0xf] %v4939_v17 }
 0x5af   : > { %4948 = vst [vmem:[%s278_s10 + $0x4] sm:$0xf] %v4943_v33 }
 0x5b0   : > { %v4806_v32 = vpop.f32.mrf.mxu3 }
 0x5b1   : > { %v4810_v55 = vadd.f32 %v4806_v32, %v4748_v60 }
 0x5b3   : > { %v4867_v31 = vpop.f32.mrf.mxu1 }
 0x5b4   : > { %v4871_v39 = vadd.f32 %v4867_v31, %v4810_v55 }
 0x5c2   : > { %v4928_v36 = vpop.f32.mrf.mxu2 }
 0x5c3   : > { %v4932_v49 = vadd.f32 %v4928_v36, %v4871_v39 }
 0x5c5   : > { %v4938_v23 = vadd.f32 %v5621_v61, %v4932_v49 }
 0x5c7   : > { %v4940_v63 = vmax.f32 %v4938_v23, 0.0 }
 0x5c9   : > { %v4944_v52 = vrot.slane %v4940_v63, 4  ;;  %4949 = vst [vmem:[%s278_s10 + $0x8] sm:$0xf] %v4940_v63 }
 0x5cb   : > { %4950 = vst [vmem:[%s278_s10 + $0xc] sm:$0xf] %v4944_v52 }
 0x5cc PF: > { %s17_s24 = sadd.s32 1, %s5640_s24  }
 0x5cd   : > { %p14_p4 = scmp.ge.s32.totalorder %s17_s24, 4  }
 0x5cf   :  { %16 = sbr.rel (!%p14_p4) target bundleno = 1 (0x1), region = 135 }

</bundles_post_ra>
